<compile_context>
chip_gen: v5e
topology: v5e:2x2
jax: 0.10.0
libtpu: 0.0.40
codegen_flags: <defaults>
</compile_context>

<pallas_src>
import functools

import jax
import jax.numpy as jnp
from jax import lax
from jax.experimental import pallas as pl
from jax.experimental.pallas import tpu as pltpu

_EPS = 1e-5                     # nn.BatchNorm2d default eps
_LANES = 128
_COMPUTE_DTYPE = jnp.bfloat16   # MXU-operand / intermediate dtype (f32 = strict parity)
_TL_TARGET = 1024               # inner row-tile target (bounds f32 accumulator)


def _round_up(x, m):
    return (x + m - 1) // m * m


def _valid_mask(ts, tl, Wp, W, L):
    """(tl, 1) mask: real pixels only (drop the 2 wide columns and rows >= L)."""
    idx = ts + lax.broadcasted_iota(jnp.int32, (tl, 1), 0)
    return (idx % Wp < W) & (idx < L)


def _conv9(read_window, w_ref, ts, tl, C):
    """3x3 conv tile as 9 accumulating window matmuls (f32 accumulation)."""
    acc = None
    for k in range(9):
        dy, dx = divmod(k, 3)
        part = jnp.dot(read_window(dy, dx, ts, tl),
                       w_ref[k * C:(k + 1) * C, :],
                       preferred_element_type=jnp.float32)
        acc = part if acc is None else acc + part
    return acc


# --------------------------------------------------------------------------- #
# pass 1: conv1 (9 window matmuls) + per-image BN1 partial stats
# --------------------------------------------------------------------------- #
def _conv1_kernel(x_ref, w_ref, y_ref, st_ref, *, T, Wp, W, L, TL, Ci):
    # x_ref: (1, Re, Ci) zero-padded image slab (row p, col q at T + p*Wp + q)
    # w_ref: (9*Ci, Cm)  3x3 taps stacked along the contraction axis
    # y_ref: (1, L_pad, Cm) conv1 output in "shifted" layout (row oy*Wp + ox)
    # st_ref:(1, 2, Cm)  per-image [sum, sum_sq] over real pixels
    _, L_pad, Cm = y_ref.shape

    def read(dy, dx, ts, tl):
        s = T + dy * Wp + dx + ts
        return x_ref[0, s:s + tl, :]

    ssum = jnp.zeros((1, Cm), jnp.float32)
    ssq = jnp.zeros((1, Cm), jnp.float32)
    for ts in range(0, L_pad, TL):
        y = _conv9(read, w_ref, ts, TL, Ci)
        y = jnp.where(_valid_mask(ts, TL, Wp, W, L), y, 0.0)
        y_ref[0, ts:ts + TL, :] = y.astype(y_ref.dtype)
        ssum = ssum + jnp.sum(y, axis=0, keepdims=True)
        ssq = ssq + jnp.sum(y * y, axis=0, keepdims=True)
    st_ref[0, 0:1, :] = ssum
    st_ref[0, 1:2, :] = ssq


# --------------------------------------------------------------------------- #
# pass 2: bn1+ReLU into a zero-halo frame, conv2 (9 window matmuls), BN2 stats
# --------------------------------------------------------------------------- #
def _conv2_kernel(y1_ref, sc_ref, sh_ref, w_ref, y2_ref, st_ref, frame_ref,
                  *, FT, Wp, W, L, TL, Cm):
    _, L_pad, Co = y2_ref.shape
    Rf = frame_ref.shape[0]
    off = FT + Wp + 1                              # multiple of 8 by choice of FT

    # zero only the two halo row-strips; column halos are masked below
    frame_ref[0:off, :] = jnp.zeros((off, Cm), frame_ref.dtype)
    frame_ref[off + L_pad:Rf, :] = jnp.zeros((Rf - off - L_pad, Cm), frame_ref.dtype)

    # bn1 (folded scale/shift) + ReLU applied once per element, stored to frame
    for ts in range(0, L_pad, TL):
        a = y1_ref[0, ts:ts + TL, :].astype(jnp.float32) * sc_ref[...] + sh_ref[...]
        a = jnp.where(_valid_mask(ts, TL, Wp, W, L), jnp.maximum(a, 0.0), 0.0)
        frame_ref[off + ts:off + ts + TL, :] = a.astype(frame_ref.dtype)

    def read(dy, dx, ts, tl):
        s = FT + dy * Wp + dx + ts
        return frame_ref[s:s + tl, :]

    ssum = jnp.zeros((1, Co), jnp.float32)
    ssq = jnp.zeros((1, Co), jnp.float32)
    for ts in range(0, L_pad, TL):
        y = _conv9(read, w_ref, ts, TL, Cm)        # b2 dropped: cancelled by bn2
        y = jnp.where(_valid_mask(ts, TL, Wp, W, L), y, 0.0)
        y2_ref[0, ts:ts + TL, :] = y.astype(y2_ref.dtype)
        ssum = ssum + jnp.sum(y, axis=0, keepdims=True)
        ssq = ssq + jnp.sum(y * y, axis=0, keepdims=True)
    st_ref[0, 0:1, :] = ssum
    st_ref[0, 1:2, :] = ssq


# --------------------------------------------------------------------------- #
# wrapper
# --------------------------------------------------------------------------- #
def _fold_bn(stats, g, be, m):
    tot = jnp.sum(stats, axis=0)                   # (2, C) tiny cross-image reduce
    mean = tot[0] / m
    var = jnp.maximum(tot[1] / m - mean * mean, 0.0)
    scale = g * lax.rsqrt(var + _EPS)
    shift = be - mean * scale
    return scale.astype(jnp.float32), shift.astype(jnp.float32)


def _compiler_params(block_bytes, scratch_bytes=0):
    try:
        cap = int(pltpu.get_tpu_info().vmem_capacity_bytes)
    except Exception:                              # pragma: no cover
        cap = 64 * 1024 * 1024                     # v7x physical VMEM (smallest gen)
    need = 2 * block_bytes + scratch_bytes + (4 << 20)   # double-buffered blocks + slack
    limit = min(max(need, 32 << 20), int(cap * 0.85))
    return pltpu.CompilerParams(dimension_semantics=("parallel",),
                                vmem_limit_bytes=limit)


def conv_block_nested(x_nchw, params, *, compute_dtype=_COMPUTE_DTYPE):
    """Forward pass. x_nchw: (N, in_ch, H, W) float32 -> (N, out_ch, H, W) float32."""
    w1, b1, g1, be1, w2, b2, g2, be2 = params
    del b2                     # cancelled exactly by bn2's batch-statistics mean
    N, in_ch, H, W = x_nchw.shape
    mid = w1.shape[-1]
    out_ch = w2.shape[-1]
    assert mid == out_ch, "residual add requires mid_ch == out_ch"

    f32 = jnp.float32
    Wp = W + 2
    L = H * Wp                                     # flattened "shifted" output rows
    NTL = -(-L // _TL_TARGET)                      # number of inner row tiles
    TL = _round_up(-(-L // NTL), 8)                # tile rows (multiple of 8)
    L_pad = NTL * TL
    T = (-(Wp + 1)) % 8                            # makes frame interior store 8-aligned
    Re = _round_up(T + L_pad + 2 * Wp + 2, 8)      # slab / frame row extent
    Ci = _round_up(in_ch, _LANES)
    Cm = _round_up(mid, _LANES)
    Co = _round_up(out_ch, _LANES)                 # == Cm
    csize = jnp.dtype(compute_dtype).itemsize

    # ---- layout glue: NCHW -> lane-padded NHWC -> zero-padded, row-flattened slab
    x = jnp.transpose(x_nchw, (0, 2, 3, 1)).astype(f32)
    xp = jnp.pad(x, ((0, 0), (1, 1), (1, 1), (0, Ci - in_ch)))
    slab = jnp.pad(xp.reshape(N, (H + 2) * Wp, Ci),
                   ((0, 0), (T, Re - T - (H + 2) * Wp), (0, 0))).astype(compute_dtype)

    def pad_w(w, ci, cin, co, cout):               # (9,cin,cout) -> (9*ci, co)
        wpad = jnp.zeros((9, ci, co), f32).at[:, :cin, :cout].set(w)
        return wpad.reshape(9 * ci, co).astype(compute_dtype)

    def pad_c(v, c, n):                            # (1,n) -> (1,c), zero padded
        return jnp.zeros((1, c), f32).at[:, :n].set(v.reshape(1, -1))

    w1cat = pad_w(w1, Ci, in_ch, Cm, mid)
    w2cat = pad_w(w2, Cm, mid, Co, out_ch)
    b1p = pad_c(b1, Cm, mid)
    g1p, be1p = pad_c(g1, Cm, mid), pad_c(be1, Cm, mid)
    g2p, be2p = pad_c(g2, Co, out_ch), pad_c(be2, Co, out_ch)

    # ---- pass 1: conv1 + BN1 partial stats -----------------------------------
    p1_blocks = (Re * Ci + 9 * Ci * Cm + L_pad * Cm) * csize + 2 * Cm * 4
    y1, st1 = pl.pallas_call(
        functools.partial(_conv1_kernel, T=T, Wp=Wp, W=W, L=L, TL=TL, Ci=Ci),
        grid=(N,),
        in_specs=[pl.BlockSpec((1, Re, Ci), lambda n: (n, 0, 0)),
                  pl.BlockSpec((9 * Ci, Cm), lambda n: (0, 0))],
        out_specs=(pl.BlockSpec((1, L_pad, Cm), lambda n: (n, 0, 0)),
                   pl.BlockSpec((1, 2, Cm), lambda n: (n, 0, 0))),
        out_shape=(jax.ShapeDtypeStruct((N, L_pad, Cm), compute_dtype),
                   jax.ShapeDtypeStruct((N, 2, Cm), f32)),
        compiler_params=_compiler_params(p1_blocks),
    )(slab, w1cat)

    M = N * H * W
    # TODO(synk): single-pass E[x^2]-E[x]^2 in f32; switch to a shifted/two-pass
    # reduction if |mean| >> std or N*H*W grows very large.
    sc1, sh1 = _fold_bn(st1, g1p, be1p, M)

    # ---- pass 2: bn1+ReLU -> frame -> conv2 + BN2 partial stats --------------
    p2_blocks = (L_pad * Cm + 9 * Cm * Co + L_pad * Co) * csize + 2 * (Co + Cm) * 4
    p2_scratch = Re * Cm * csize
    y2, st2 = pl.pallas_call(
        functools.partial(_conv2_kernel, FT=T, Wp=Wp, W=W, L=L, TL=TL, Cm=Cm),
        grid=(N,),
        in_specs=[pl.BlockSpec((1, L_pad, Cm), lambda n: (n, 0, 0)),
                  pl.BlockSpec((1, Cm), lambda n: (0, 0)),
                  pl.BlockSpec((1, Cm), lambda n: (0, 0)),
                  pl.BlockSpec((9 * Cm, Co), lambda n: (0, 0))],
        out_specs=(pl.BlockSpec((1, L_pad, Co), lambda n: (n, 0, 0)),
                   pl.BlockSpec((1, 2, Co), lambda n: (n, 0, 0))),
        out_shape=(jax.ShapeDtypeStruct((N, L_pad, Co), compute_dtype),
                   jax.ShapeDtypeStruct((N, 2, Co), f32)),
        scratch_shapes=[pltpu.VMEM((Re, Cm), compute_dtype)],
        compiler_params=_compiler_params(p2_blocks, p2_scratch),
    )(y1, sc1, sh1, w2cat)

    sc2, sh2 = _fold_bn(st2, g2p, be2p, M)

    # ---- bn2 + residual (identity = conv1 + b1) + ReLU, fused by XLA with the
    # reshape / slice / transpose epilogue (no extra HBM round trip) ------------
    out = jnp.maximum(
        y2[:, :L, :].astype(f32) * sc2.reshape(1, 1, Co) + sh2.reshape(1, 1, Co)
        + y1[:, :L, :].astype(f32) + b1p.reshape(1, 1, Cm), 0.0)
    out = out.reshape(N, H, Wp, Co)[:, :, :W, :out_ch]
    return jnp.transpose(out, (0, 3, 1, 2))


# --------------------------------------------------------------------------- #
# pure-JAX reference (matches the PyTorch forward, train-mode BN)
# --------------------------------------------------------------------------- #
def _reference(x_nchw, params):
    w1, b1, g1, be1, w2, b2, g2, be2 = params
    x = jnp.transpose(x_nchw, (0, 2, 3, 1)).astype(jnp.float32)

    def conv(inp, w, b):
        w_hwio = w.reshape(3, 3, w.shape[1], w.shape[2])
        y = jax.lax.conv_general_dilated(
            inp, w_hwio, (1, 1), "SAME",
            dimension_numbers=("NHWC", "HWIO", "NHWC"))
        return y + b.reshape(1, 1, 1, -1)

    def bn(y, g, be):
        mu = jnp.mean(y, axis=(0, 1, 2), keepdims=True)
        var = jnp.var(y, axis=(0, 1, 2), keepdims=True)   # biased, like PyTorch BN
        return (y - mu) * jax.lax.rsqrt(var + _EPS) * g.reshape(1, 1, 1, -1) \
            + be.reshape(1, 1, 1, -1)

    y1 = conv(x, w1, b1)
    a1 = jnp.maximum(bn(y1, g1, be1), 0.0)
    y2 = conv(a1, w2, b2)
    out = jnp.maximum(bn(y2, g2, be2) + y1, 0.0)
    return jnp.transpose(out, (0, 3, 1, 2))


if __name__ == "__main__":
    key = jax.random.PRNGKey(0)
    ks = jax.random.split(key, 9)

    N, in_ch, mid_ch, out_ch, H, W = 2, 4, 8, 8, 16, 16
    x = jax.random.normal(ks[0], (N, in_ch, H, W), jnp.float32)

    # synthetic parameters: 3x3 kernels stored as (9, Cin, Cout), tap k = 3*dy + dx
    w1 = 0.1 * jax.random.normal(ks[1], (9, in_ch, mid_ch), jnp.float32)
    b1 = 0.1 * jax.random.normal(ks[2], (1, mid_ch), jnp.float32)
    g1 = 1.0 + 0.1 * jax.random.normal(ks[3], (1, mid_ch), jnp.float32)
    be1 = 0.1 * jax.random.normal(ks[4], (1, mid_ch), jnp.float32)
    w2 = 0.1 * jax.random.normal(ks[5], (9, mid_ch, out_ch), jnp.float32)
    b2 = 0.1 * jax.random.normal(ks[6], (1, out_ch), jnp.float32)
    g2 = 1.0 + 0.1 * jax.random.normal(ks[7], (1, out_ch), jnp.float32)
    be2 = 0.1 * jax.random.normal(ks[8], (1, out_ch), jnp.float32)
    params = (w1, b1, g1, be1, w2, b2, g2, be2)

    ref = jax.block_until_ready(_reference(x, params))

    # strict PyTorch parity with f32 MXU operands / intermediates
    fwd_f32 = jax.jit(functools.partial(conv_block_nested, compute_dtype=jnp.float32))
    out_f32 = jax.block_until_ready(fwd_f32(x, params))
    assert out_f32.shape == (N, out_ch, H, W)
    assert bool(jnp.allclose(out_f32, ref, atol=2e-4, rtol=2e-4)), "f32 kernel != reference"

    # default path (bf16 MXU operands / intermediates): looser tolerance
    fwd = jax.jit(conv_block_nested)
    out = jax.block_until_ready(fwd(x, params))
    assert out.shape == (N, out_ch, H, W)
    assert bool(jnp.allclose(out, ref, atol=1e-1, rtol=5e-2)), "bf16 kernel != reference"

    print("KERNEL_OK")
</pallas_src>

<mosaic_0001>
module attributes {stable_mosaic.version = 11 : i64} {
  func.func @_conv1_kernel(%arg0: i32, %arg1: memref<1x336x128xf32, #tpu.memory_space<vmem>>, %arg2: memref<1152x128xf32, #tpu.memory_space<vmem>>, %arg3: memref<1x288x128xf32, #tpu.memory_space<vmem>>, %arg4: memref<1x2x128xf32, #tpu.memory_space<vmem>>) attributes {dimension_semantics = [#tpu.dimension_semantics<parallel>], iteration_bounds = array<i64: 2>, scalar_prefetch = 0 : i64, scratch_operands = 0 : i64, tpu.core_type = #tpu.core_type<tc>, window_params = [{transform_indices = @transform_0, window_bounds = array<i64: 1, 336, 128>}, {pipeline_mode = #tpu.pipeline_mode<synchronous>, transform_indices = @transform_1, window_bounds = array<i64: 1152, 128>}, {transform_indices = @transform_2, window_bounds = array<i64: 1, 288, 128>}, {transform_indices = @transform_3, window_bounds = array<i64: 1, 2, 128>}]} {
    %cst = arith.constant 0.000000e+00 : f32
    %0 = vector.broadcast %cst : f32 to vector<1x128xf32>
    %cst_0 = arith.constant 0.000000e+00 : f32
    %1 = vector.broadcast %cst_0 : f32 to vector<1x128xf32>
    %c0 = arith.constant 0 : index
    %c5 = arith.constant 5 : index
    %c0_1 = arith.constant 0 : index
    %2 = vector.load %arg1[%c0, %c5, %c0_1] : memref<1x336x128xf32, #tpu.memory_space<vmem>>, vector<1x288x128xf32>
    %3 = vector.shape_cast %2 : vector<1x288x128xf32> to vector<288x128xf32>
    %c0_2 = arith.constant 0 : index
    %c0_3 = arith.constant 0 : index
    %4 = vector.load %arg2[%c0_2, %c0_3] : memref<1152x128xf32, #tpu.memory_space<vmem>>, vector<128x128xf32>
    %cst_4 = arith.constant dense<0.000000e+00> : vector<288x128xf32>
    %5 = tpu.matmul %3, %4, %cst_4 {dimension_numbers = #tpu.dot_dimension_numbers<[1], [0], [0], [1], [0, 0, 1, 1], [], []>} : vector<288x128xf32>, vector<128x128xf32>, vector<288x128xf32> -> vector<288x128xf32>
    %c0_5 = arith.constant 0 : index
    %c6 = arith.constant 6 : index
    %c0_6 = arith.constant 0 : index
    %6 = vector.load %arg1[%c0_5, %c6, %c0_6] : memref<1x336x128xf32, #tpu.memory_space<vmem>>, vector<1x288x128xf32>
    %7 = vector.shape_cast %6 : vector<1x288x128xf32> to vector<288x128xf32>
    %c128 = arith.constant 128 : index
    %c0_7 = arith.constant 0 : index
    %8 = vector.load %arg2[%c128, %c0_7] : memref<1152x128xf32, #tpu.memory_space<vmem>>, vector<128x128xf32>
    %cst_8 = arith.constant dense<0.000000e+00> : vector<288x128xf32>
    %9 = tpu.matmul %7, %8, %cst_8 {dimension_numbers = #tpu.dot_dimension_numbers<[1], [0], [0], [1], [0, 0, 1, 1], [], []>} : vector<288x128xf32>, vector<128x128xf32>, vector<288x128xf32> -> vector<288x128xf32>
    %10 = arith.addf %5, %9 : vector<288x128xf32>
    %c0_9 = arith.constant 0 : index
    %c7 = arith.constant 7 : index
    %c0_10 = arith.constant 0 : index
    %11 = vector.load %arg1[%c0_9, %c7, %c0_10] : memref<1x336x128xf32, #tpu.memory_space<vmem>>, vector<1x288x128xf32>
    %12 = vector.shape_cast %11 : vector<1x288x128xf32> to vector<288x128xf32>
    %c256 = arith.constant 256 : index
    %c0_11 = arith.constant 0 : index
    %13 = vector.load %arg2[%c256, %c0_11] : memref<1152x128xf32, #tpu.memory_space<vmem>>, vector<128x128xf32>
    %cst_12 = arith.constant dense<0.000000e+00> : vector<288x128xf32>
    %14 = tpu.matmul %12, %13, %cst_12 {dimension_numbers = #tpu.dot_dimension_numbers<[1], [0], [0], [1], [0, 0, 1, 1], [], []>} : vector<288x128xf32>, vector<128x128xf32>, vector<288x128xf32> -> vector<288x128xf32>
    %15 = arith.addf %10, %14 : vector<288x128xf32>
    %c0_13 = arith.constant 0 : index
    %c23 = arith.constant 23 : index
    %c0_14 = arith.constant 0 : index
    %16 = vector.load %arg1[%c0_13, %c23, %c0_14] : memref<1x336x128xf32, #tpu.memory_space<vmem>>, vector<1x288x128xf32>
    %17 = vector.shape_cast %16 : vector<1x288x128xf32> to vector<288x128xf32>
    %c384 = arith.constant 384 : index
    %c0_15 = arith.constant 0 : index
    %18 = vector.load %arg2[%c384, %c0_15] : memref<1152x128xf32, #tpu.memory_space<vmem>>, vector<128x128xf32>
    %cst_16 = arith.constant dense<0.000000e+00> : vector<288x128xf32>
    %19 = tpu.matmul %17, %18, %cst_16 {dimension_numbers = #tpu.dot_dimension_numbers<[1], [0], [0], [1], [0, 0, 1, 1], [], []>} : vector<288x128xf32>, vector<128x128xf32>, vector<288x128xf32> -> vector<288x128xf32>
    %20 = arith.addf %15, %19 : vector<288x128xf32>
    %c0_17 = arith.constant 0 : index
    %c24 = arith.constant 24 : index
    %c0_18 = arith.constant 0 : index
    %21 = vector.load %arg1[%c0_17, %c24, %c0_18] : memref<1x336x128xf32, #tpu.memory_space<vmem>>, vector<1x288x128xf32>
    %22 = vector.shape_cast %21 : vector<1x288x128xf32> to vector<288x128xf32>
    %c512 = arith.constant 512 : index
    %c0_19 = arith.constant 0 : index
    %23 = vector.load %arg2[%c512, %c0_19] : memref<1152x128xf32, #tpu.memory_space<vmem>>, vector<128x128xf32>
    %cst_20 = arith.constant dense<0.000000e+00> : vector<288x128xf32>
    %24 = tpu.matmul %22, %23, %cst_20 {dimension_numbers = #tpu.dot_dimension_numbers<[1], [0], [0], [1], [0, 0, 1, 1], [], []>} : vector<288x128xf32>, vector<128x128xf32>, vector<288x128xf32> -> vector<288x128xf32>
    %25 = arith.addf %20, %24 : vector<288x128xf32>
    %c0_21 = arith.constant 0 : index
    %c25 = arith.constant 25 : index
    %c0_22 = arith.constant 0 : index
    %26 = vector.load %arg1[%c0_21, %c25, %c0_22] : memref<1x336x128xf32, #tpu.memory_space<vmem>>, vector<1x288x128xf32>
    %27 = vector.shape_cast %26 : vector<1x288x128xf32> to vector<288x128xf32>
    %c640 = arith.constant 640 : index
    %c0_23 = arith.constant 0 : index
    %28 = vector.load %arg2[%c640, %c0_23] : memref<1152x128xf32, #tpu.memory_space<vmem>>, vector<128x128xf32>
    %cst_24 = arith.constant dense<0.000000e+00> : vector<288x128xf32>
    %29 = tpu.matmul %27, %28, %cst_24 {dimension_numbers = #tpu.dot_dimension_numbers<[1], [0], [0], [1], [0, 0, 1, 1], [], []>} : vector<288x128xf32>, vector<128x128xf32>, vector<288x128xf32> -> vector<288x128xf32>
    %30 = arith.addf %25, %29 : vector<288x128xf32>
    %c0_25 = arith.constant 0 : index
    %c41 = arith.constant 41 : index
    %c0_26 = arith.constant 0 : index
    %31 = vector.load %arg1[%c0_25, %c41, %c0_26] : memref<1x336x128xf32, #tpu.memory_space<vmem>>, vector<1x288x128xf32>
    %32 = vector.shape_cast %31 : vector<1x288x128xf32> to vector<288x128xf32>
    %c768 = arith.constant 768 : index
    %c0_27 = arith.constant 0 : index
    %33 = vector.load %arg2[%c768, %c0_27] : memref<1152x128xf32, #tpu.memory_space<vmem>>, vector<128x128xf32>
    %cst_28 = arith.constant dense<0.000000e+00> : vector<288x128xf32>
    %34 = tpu.matmul %32, %33, %cst_28 {dimension_numbers = #tpu.dot_dimension_numbers<[1], [0], [0], [1], [0, 0, 1, 1], [], []>} : vector<288x128xf32>, vector<128x128xf32>, vector<288x128xf32> -> vector<288x128xf32>
    %35 = arith.addf %30, %34 : vector<288x128xf32>
    %c0_29 = arith.constant 0 : index
    %c42 = arith.constant 42 : index
    %c0_30 = arith.constant 0 : index
    %36 = vector.load %arg1[%c0_29, %c42, %c0_30] : memref<1x336x128xf32, #tpu.memory_space<vmem>>, vector<1x288x128xf32>
    %37 = vector.shape_cast %36 : vector<1x288x128xf32> to vector<288x128xf32>
    %c896 = arith.constant 896 : index
    %c0_31 = arith.constant 0 : index
    %38 = vector.load %arg2[%c896, %c0_31] : memref<1152x128xf32, #tpu.memory_space<vmem>>, vector<128x128xf32>
    %cst_32 = arith.constant dense<0.000000e+00> : vector<288x128xf32>
    %39 = tpu.matmul %37, %38, %cst_32 {dimension_numbers = #tpu.dot_dimension_numbers<[1], [0], [0], [1], [0, 0, 1, 1], [], []>} : vector<288x128xf32>, vector<128x128xf32>, vector<288x128xf32> -> vector<288x128xf32>
    %40 = arith.addf %35, %39 : vector<288x128xf32>
    %c0_33 = arith.constant 0 : index
    %c43 = arith.constant 43 : index
    %c0_34 = arith.constant 0 : index
    %41 = vector.load %arg1[%c0_33, %c43, %c0_34] : memref<1x336x128xf32, #tpu.memory_space<vmem>>, vector<1x288x128xf32>
    %42 = vector.shape_cast %41 : vector<1x288x128xf32> to vector<288x128xf32>
    %c1024 = arith.constant 1024 : index
    %c0_35 = arith.constant 0 : index
    %43 = vector.load %arg2[%c1024, %c0_35] : memref<1152x128xf32, #tpu.memory_space<vmem>>, vector<128x128xf32>
    %cst_36 = arith.constant dense<0.000000e+00> : vector<288x128xf32>
    %44 = tpu.matmul %42, %43, %cst_36 {dimension_numbers = #tpu.dot_dimension_numbers<[1], [0], [0], [1], [0, 0, 1, 1], [], []>} : vector<288x128xf32>, vector<128x128xf32>, vector<288x128xf32> -> vector<288x128xf32>
    %45 = arith.addf %40, %44 : vector<288x128xf32>
    %46 = tpu.iota {dimensions = array<i32: 0>} : vector<288x1xi32>
    %c0_i32 = arith.constant 0 : i32
    %47 = vector.broadcast %c0_i32 : i32 to vector<288x1xi32>
    %48 = arith.addi %47, %46 : vector<288x1xi32>
    %c18_i32 = arith.constant 18 : i32
    %c0_i32_37 = arith.constant 0 : i32
    %49 = arith.cmpi eq, %c18_i32, %c0_i32_37 : i32
    %c1_i32 = arith.constant 1 : i32
    %50 = arith.select %49, %c1_i32, %c18_i32 : i32
    %51 = vector.broadcast %50 : i32 to vector<288x1xi32>
    %52 = arith.remsi %48, %51 : vector<288x1xi32>
    %c0_i32_38 = arith.constant 0 : i32
    %53 = vector.broadcast %c0_i32_38 : i32 to vector<288x1xi32>
    %54 = arith.cmpi ne, %52, %53 : vector<288x1xi32>
    %c0_i32_39 = arith.constant 0 : i32
    %55 = vector.broadcast %c0_i32_39 : i32 to vector<288x1xi32>
    %56 = arith.cmpi slt, %52, %55 : vector<288x1xi32>
    %c0_i32_40 = arith.constant 0 : i32
    %57 = arith.cmpi slt, %50, %c0_i32_40 : i32
    %58 = vector.broadcast %57 : i1 to vector<288x1xi1>
    %59 = vector.broadcast %58 : vector<288x1xi1> to vector<288x1xi1>
    %60 = arith.xori %56, %59 : vector<288x1xi1>
    %61 = arith.andi %60, %54 : vector<288x1xi1>
    %62 = vector.broadcast %50 : i32 to vector<288x1xi32>
    %63 = arith.addi %52, %62 : vector<288x1xi32>
    %64 = arith.select %61, %63, %52 : vector<288x1xi1>, vector<288x1xi32>
    %c16_i32 = arith.constant 16 : i32
    %65 = vector.broadcast %c16_i32 : i32 to vector<288x1xi32>
    %66 = arith.cmpi slt, %64, %65 : vector<288x1xi32>
    %c288_i32 = arith.constant 288 : i32
    %67 = vector.broadcast %c288_i32 : i32 to vector<288x1xi32>
    %68 = arith.cmpi slt, %48, %67 : vector<288x1xi32>
    %69 = arith.andi %66, %68 : vector<288x1xi1>
    %cst_41 = arith.constant 0.000000e+00 : f32
    %70 = vector.shape_cast %69 : vector<288x1xi1> to vector<288x1xi1>
    %71 = vector.broadcast %70 : vector<288x1xi1> to vector<288x128xi1>
    %72 = vector.broadcast %cst_41 : f32 to vector<288x128xf32>
    %73 = arith.select %71, %45, %72 : vector<288x128xi1>, vector<288x128xf32>
    %c0_42 = arith.constant 0 : index
    %c0_43 = arith.constant 0 : index
    %c0_44 = arith.constant 0 : index
    %74 = vector.load %arg3[%c0_42, %c0_43, %c0_44] : memref<1x288x128xf32, #tpu.memory_space<vmem>>, vector<1x288x128xf32>
    %75 = vector.shape_cast %74 : vector<1x288x128xf32> to vector<288x128xf32>
    %76 = vector.shape_cast %73 : vector<288x128xf32> to vector<1x288x128xf32>
    tpu.vector_store %arg3[%c0_42, %c0_43, %c0_44], %76 {strides = array<i32>} : memref<1x288x128xf32, #tpu.memory_space<vmem>>, vector<1x288x128xf32>,
    %cst_45 = arith.constant dense<0.000000e+00> : vector<128xf32>
    %77 = vector.multi_reduction <add>, %73, %cst_45 [0] : vector<288x128xf32> to vector<128xf32>
    %78 = vector.shape_cast %77 : vector<128xf32> to vector<1x128xf32>
    %79 = arith.addf %0, %78 : vector<1x128xf32>
    %80 = arith.mulf %73, %73 : vector<288x128xf32>
    %cst_46 = arith.constant dense<0.000000e+00> : vector<128xf32>
    %81 = vector.multi_reduction <add>, %80, %cst_46 [0] : vector<288x128xf32> to vector<128xf32>
    %82 = vector.shape_cast %81 : vector<128xf32> to vector<1x128xf32>
    %83 = arith.addf %1, %82 : vector<1x128xf32>
    %c0_47 = arith.constant 0 : index
    %c0_48 = arith.constant 0 : index
    %c0_49 = arith.constant 0 : index
    %84 = vector.load %arg4[%c0_47, %c0_48, %c0_49] : memref<1x2x128xf32, #tpu.memory_space<vmem>>, vector<1x1x128xf32>
    %85 = vector.shape_cast %84 : vector<1x1x128xf32> to vector<1x128xf32>
    %86 = vector.shape_cast %79 : vector<1x128xf32> to vector<1x1x128xf32>
    tpu.vector_store %arg4[%c0_47, %c0_48, %c0_49], %86 {strides = array<i32>} : memref<1x2x128xf32, #tpu.memory_space<vmem>>, vector<1x1x128xf32>,
    %c0_50 = arith.constant 0 : index
    %c1 = arith.constant 1 : index
    %c0_51 = arith.constant 0 : index
    %87 = vector.load %arg4[%c0_50, %c1, %c0_51] : memref<1x2x128xf32, #tpu.memory_space<vmem>>, vector<1x1x128xf32>
    %88 = vector.shape_cast %87 : vector<1x1x128xf32> to vector<1x128xf32>
    %89 = vector.shape_cast %83 : vector<1x128xf32> to vector<1x1x128xf32>
    tpu.vector_store %arg4[%c0_50, %c1, %c0_51], %89 {strides = array<i32>} : memref<1x2x128xf32, #tpu.memory_space<vmem>>, vector<1x1x128xf32>,
    return
  }
  func.func @transform_0(%arg0: i32) -> (i32, i32, i32) {
    %c0_i32 = arith.constant 0 : i32
    %c0_i32_0 = arith.constant 0 : i32
    %c0_i32_1 = arith.constant 0 : i32
    return %arg0, %c0_i32, %c0_i32_0 : i32, i32, i32
  }
  func.func @transform_1(%arg0: i32) -> (i32, i32) {
    %c0_i32 = arith.constant 0 : i32
    %c0_i32_0 = arith.constant 0 : i32
    %c0_i32_1 = arith.constant 0 : i32
    return %c0_i32, %c0_i32_0 : i32, i32
  }
  func.func @transform_2(%arg0: i32) -> (i32, i32, i32) {
    %c0_i32 = arith.constant 0 : i32
    %c0_i32_0 = arith.constant 0 : i32
    %c0_i32_1 = arith.constant 0 : i32
    return %arg0, %c0_i32, %c0_i32_0 : i32, i32, i32
  }
  func.func @transform_3(%arg0: i32) -> (i32, i32, i32) {
    %c0_i32 = arith.constant 0 : i32
    %c0_i32_0 = arith.constant 0 : i32
    %c0_i32_1 = arith.constant 0 : i32
    return %arg0, %c0_i32, %c0_i32_0 : i32, i32, i32
  }
}

module attributes {stable_mosaic.version = 11 : i64} {
  func.func @_conv2_kernel(%arg0: i32, %arg1: memref<1x288x128xf32, #tpu.memory_space<vmem>>, %arg2: memref<1x128xf32, #tpu.memory_space<vmem>>, %arg3: memref<1x128xf32, #tpu.memory_space<vmem>>, %arg4: memref<1152x128xf32, #tpu.memory_space<vmem>>, %arg5: memref<1x288x128xf32, #tpu.memory_space<vmem>>, %arg6: memref<1x2x128xf32, #tpu.memory_space<vmem>>, %arg7: memref<336x128xf32, #tpu.memory_space<vmem>>) attributes {dimension_semantics = [#tpu.dimension_semantics<parallel>], iteration_bounds = array<i64: 2>, scalar_prefetch = 0 : i64, scratch_operands = 1 : i64, tpu.core_type = #tpu.core_type<tc>, window_params = [{transform_indices = @transform_0, window_bounds = array<i64: 1, 288, 128>}, {pipeline_mode = #tpu.pipeline_mode<synchronous>, transform_indices = @transform_1, window_bounds = array<i64: 1, 128>}, {pipeline_mode = #tpu.pipeline_mode<synchronous>, transform_indices = @transform_2, window_bounds = array<i64: 1, 128>}, {pipeline_mode = #tpu.pipeline_mode<synchronous>, transform_indices = @transform_3, window_bounds = array<i64: 1152, 128>}, {transform_indices = @transform_4, window_bounds = array<i64: 1, 288, 128>}, {transform_indices = @transform_5, window_bounds = array<i64: 1, 2, 128>}]} {
    %cst = arith.constant 0.000000e+00 : f32
    %0 = vector.broadcast %cst : f32 to vector<24x128xf32>
    %c0 = arith.constant 0 : index
    %c0_0 = arith.constant 0 : index
    %1 = vector.load %arg7[%c0, %c0_0] : memref<336x128xf32, #tpu.memory_space<vmem>>, vector<24x128xf32>
    tpu.vector_store %arg7[%c0, %c0_0], %0 {strides = array<i32>} : memref<336x128xf32, #tpu.memory_space<vmem>>, vector<24x128xf32>,
    %cst_1 = arith.constant 0.000000e+00 : f32
    %2 = vector.broadcast %cst_1 : f32 to vector<24x128xf32>
    %c312 = arith.constant 312 : index
    %c0_2 = arith.constant 0 : index
    %3 = vector.load %arg7[%c312, %c0_2] : memref<336x128xf32, #tpu.memory_space<vmem>>, vector<24x128xf32>
    tpu.vector_store %arg7[%c312, %c0_2], %2 {strides = array<i32>} : memref<336x128xf32, #tpu.memory_space<vmem>>, vector<24x128xf32>,
    %c0_3 = arith.constant 0 : index
    %c0_4 = arith.constant 0 : index
    %c0_5 = arith.constant 0 : index
    %4 = vector.load %arg1[%c0_3, %c0_4, %c0_5] : memref<1x288x128xf32, #tpu.memory_space<vmem>>, vector<1x288x128xf32>
    %5 = vector.shape_cast %4 : vector<1x288x128xf32> to vector<288x128xf32>
    %c0_6 = arith.constant 0 : index
    %c0_7 = arith.constant 0 : index
    %6 = vector.load %arg2[%c0_6, %c0_7] : memref<1x128xf32, #tpu.memory_space<vmem>>, vector<1x128xf32>
    %7 = vector.broadcast %6 : vector<1x128xf32> to vector<288x128xf32>
    %8 = arith.mulf %5, %7 : vector<288x128xf32>
    %c0_8 = arith.constant 0 : index
    %c0_9 = arith.constant 0 : index
    %9 = vector.load %arg3[%c0_8, %c0_9] : memref<1x128xf32, #tpu.memory_space<vmem>>, vector<1x128xf32>
    %10 = vector.broadcast %9 : vector<1x128xf32> to vector<288x128xf32>
    %11 = arith.addf %8, %10 : vector<288x128xf32>
    %12 = tpu.iota {dimensions = array<i32: 0>} : vector<288x1xi32>
    %c0_i32 = arith.constant 0 : i32
    %13 = vector.broadcast %c0_i32 : i32 to vector<288x1xi32>
    %14 = arith.addi %13, %12 : vector<288x1xi32>
    %c18_i32 = arith.constant 18 : i32
    %c0_i32_10 = arith.constant 0 : i32
    %15 = arith.cmpi eq, %c18_i32, %c0_i32_10 : i32
    %c1_i32 = arith.constant 1 : i32
    %16 = arith.select %15, %c1_i32, %c18_i32 : i32
    %17 = vector.broadcast %16 : i32 to vector<288x1xi32>
    %18 = arith.remsi %14, %17 : vector<288x1xi32>
    %c0_i32_11 = arith.constant 0 : i32
    %19 = vector.broadcast %c0_i32_11 : i32 to vector<288x1xi32>
    %20 = arith.cmpi ne, %18, %19 : vector<288x1xi32>
    %c0_i32_12 = arith.constant 0 : i32
    %21 = vector.broadcast %c0_i32_12 : i32 to vector<288x1xi32>
    %22 = arith.cmpi slt, %18, %21 : vector<288x1xi32>
    %c0_i32_13 = arith.constant 0 : i32
    %23 = arith.cmpi slt, %16, %c0_i32_13 : i32
    %24 = vector.broadcast %23 : i1 to vector<288x1xi1>
    %25 = vector.broadcast %24 : vector<288x1xi1> to vector<288x1xi1>
    %26 = arith.xori %22, %25 : vector<288x1xi1>
    %27 = arith.andi %26, %20 : vector<288x1xi1>
    %28 = vector.broadcast %16 : i32 to vector<288x1xi32>
    %29 = arith.addi %18, %28 : vector<288x1xi32>
    %30 = arith.select %27, %29, %18 : vector<288x1xi1>, vector<288x1xi32>
    %c16_i32 = arith.constant 16 : i32
    %31 = vector.broadcast %c16_i32 : i32 to vector<288x1xi32>
    %32 = arith.cmpi slt, %30, %31 : vector<288x1xi32>
    %c288_i32 = arith.constant 288 : i32
    %33 = vector.broadcast %c288_i32 : i32 to vector<288x1xi32>
    %34 = arith.cmpi slt, %14, %33 : vector<288x1xi32>
    %35 = arith.andi %32, %34 : vector<288x1xi1>
    %cst_14 = arith.constant 0.000000e+00 : f32
    %36 = vector.broadcast %cst_14 : f32 to vector<288x128xf32>
    %37 = arith.maximumf %11, %36 : vector<288x128xf32>
    %cst_15 = arith.constant 0.000000e+00 : f32
    %38 = vector.shape_cast %35 : vector<288x1xi1> to vector<288x1xi1>
    %39 = vector.broadcast %38 : vector<288x1xi1> to vector<288x128xi1>
    %40 = vector.broadcast %cst_15 : f32 to vector<288x128xf32>
    %41 = arith.select %39, %37, %40 : vector<288x128xi1>, vector<288x128xf32>
    %c24 = arith.constant 24 : index
    %c0_16 = arith.constant 0 : index
    %42 = vector.load %arg7[%c24, %c0_16] : memref<336x128xf32, #tpu.memory_space<vmem>>, vector<288x128xf32>
    tpu.vector_store %arg7[%c24, %c0_16], %41 {strides = array<i32>} : memref<336x128xf32, #tpu.memory_space<vmem>>, vector<288x128xf32>,
    %cst_17 = arith.constant 0.000000e+00 : f32
    %43 = vector.broadcast %cst_17 : f32 to vector<1x128xf32>
    %cst_18 = arith.constant 0.000000e+00 : f32
    %44 = vector.broadcast %cst_18 : f32 to vector<1x128xf32>
    %c5 = arith.constant 5 : index
    %c0_19 = arith.constant 0 : index
    %45 = vector.load %arg7[%c5, %c0_19] : memref<336x128xf32, #tpu.memory_space<vmem>>, vector<288x128xf32>
    %c0_20 = arith.constant 0 : index
    %c0_21 = arith.constant 0 : index
    %46 = vector.load %arg4[%c0_20, %c0_21] : memref<1152x128xf32, #tpu.memory_space<vmem>>, vector<128x128xf32>
    %cst_22 = arith.constant dense<0.000000e+00> : vector<288x128xf32>
    %47 = tpu.matmul %45, %46, %cst_22 {dimension_numbers = #tpu.dot_dimension_numbers<[1], [0], [0], [1], [0, 0, 1, 1], [], []>} : vector<288x128xf32>, vector<128x128xf32>, vector<288x128xf32> -> vector<288x128xf32>
    %c6 = arith.constant 6 : index
    %c0_23 = arith.constant 0 : index
    %48 = vector.load %arg7[%c6, %c0_23] : memref<336x128xf32, #tpu.memory_space<vmem>>, vector<288x128xf32>
    %c128 = arith.constant 128 : index
    %c0_24 = arith.constant 0 : index
    %49 = vector.load %arg4[%c128, %c0_24] : memref<1152x128xf32, #tpu.memory_space<vmem>>, vector<128x128xf32>
    %cst_25 = arith.constant dense<0.000000e+00> : vector<288x128xf32>
    %50 = tpu.matmul %48, %49, %cst_25 {dimension_numbers = #tpu.dot_dimension_numbers<[1], [0], [0], [1], [0, 0, 1, 1], [], []>} : vector<288x128xf32>, vector<128x128xf32>, vector<288x128xf32> -> vector<288x128xf32>
    %51 = arith.addf %47, %50 : vector<288x128xf32>
    %c7 = arith.constant 7 : index
    %c0_26 = arith.constant 0 : index
    %52 = vector.load %arg7[%c7, %c0_26] : memref<336x128xf32, #tpu.memory_space<vmem>>, vector<288x128xf32>
    %c256 = arith.constant 256 : index
    %c0_27 = arith.constant 0 : index
    %53 = vector.load %arg4[%c256, %c0_27] : memref<1152x128xf32, #tpu.memory_space<vmem>>, vector<128x128xf32>
    %cst_28 = arith.constant dense<0.000000e+00> : vector<288x128xf32>
    %54 = tpu.matmul %52, %53, %cst_28 {dimension_numbers = #tpu.dot_dimension_numbers<[1], [0], [0], [1], [0, 0, 1, 1], [], []>} : vector<288x128xf32>, vector<128x128xf32>, vector<288x128xf32> -> vector<288x128xf32>
    %55 = arith.addf %51, %54 : vector<288x128xf32>
    %c23 = arith.constant 23 : index
    %c0_29 = arith.constant 0 : index
    %56 = vector.load %arg7[%c23, %c0_29] : memref<336x128xf32, #tpu.memory_space<vmem>>, vector<288x128xf32>
    %c384 = arith.constant 384 : index
    %c0_30 = arith.constant 0 : index
    %57 = vector.load %arg4[%c384, %c0_30] : memref<1152x128xf32, #tpu.memory_space<vmem>>, vector<128x128xf32>
    %cst_31 = arith.constant dense<0.000000e+00> : vector<288x128xf32>
    %58 = tpu.matmul %56, %57, %cst_31 {dimension_numbers = #tpu.dot_dimension_numbers<[1], [0], [0], [1], [0, 0, 1, 1], [], []>} : vector<288x128xf32>, vector<128x128xf32>, vector<288x128xf32> -> vector<288x128xf32>
    %59 = arith.addf %55, %58 : vector<288x128xf32>
    %c24_32 = arith.constant 24 : index
    %c0_33 = arith.constant 0 : index
    %60 = vector.load %arg7[%c24_32, %c0_33] : memref<336x128xf32, #tpu.memory_space<vmem>>, vector<288x128xf32>
    %c512 = arith.constant 512 : index
    %c0_34 = arith.constant 0 : index
    %61 = vector.load %arg4[%c512, %c0_34] : memref<1152x128xf32, #tpu.memory_space<vmem>>, vector<128x128xf32>
    %cst_35 = arith.constant dense<0.000000e+00> : vector<288x128xf32>
    %62 = tpu.matmul %60, %61, %cst_35 {dimension_numbers = #tpu.dot_dimension_numbers<[1], [0], [0], [1], [0, 0, 1, 1], [], []>} : vector<288x128xf32>, vector<128x128xf32>, vector<288x128xf32> -> vector<288x128xf32>
    %63 = arith.addf %59, %62 : vector<288x128xf32>
    %c25 = arith.constant 25 : index
    %c0_36 = arith.constant 0 : index
    %64 = vector.load %arg7[%c25, %c0_36] : memref<336x128xf32, #tpu.memory_space<vmem>>, vector<288x128xf32>
    %c640 = arith.constant 640 : index
    %c0_37 = arith.constant 0 : index
    %65 = vector.load %arg4[%c640, %c0_37] : memref<1152x128xf32, #tpu.memory_space<vmem>>, vector<128x128xf32>
    %cst_38 = arith.constant dense<0.000000e+00> : vector<288x128xf32>
    %66 = tpu.matmul %64, %65, %cst_38 {dimension_numbers = #tpu.dot_dimension_numbers<[1], [0], [0], [1], [0, 0, 1, 1], [], []>} : vector<288x128xf32>, vector<128x128xf32>, vector<288x128xf32> -> vector<288x128xf32>
    %67 = arith.addf %63, %66 : vector<288x128xf32>
    %c41 = arith.constant 41 : index
    %c0_39 = arith.constant 0 : index
    %68 = vector.load %arg7[%c41, %c0_39] : memref<336x128xf32, #tpu.memory_space<vmem>>, vector<288x128xf32>
    %c768 = arith.constant 768 : index
    %c0_40 = arith.constant 0 : index
    %69 = vector.load %arg4[%c768, %c0_40] : memref<1152x128xf32, #tpu.memory_space<vmem>>, vector<128x128xf32>
    %cst_41 = arith.constant dense<0.000000e+00> : vector<288x128xf32>
    %70 = tpu.matmul %68, %69, %cst_41 {dimension_numbers = #tpu.dot_dimension_numbers<[1], [0], [0], [1], [0, 0, 1, 1], [], []>} : vector<288x128xf32>, vector<128x128xf32>, vector<288x128xf32> -> vector<288x128xf32>
    %71 = arith.addf %67, %70 : vector<288x128xf32>
    %c42 = arith.constant 42 : index
    %c0_42 = arith.constant 0 : index
    %72 = vector.load %arg7[%c42, %c0_42] : memref<336x128xf32, #tpu.memory_space<vmem>>, vector<288x128xf32>
    %c896 = arith.constant 896 : index
    %c0_43 = arith.constant 0 : index
    %73 = vector.load %arg4[%c896, %c0_43] : memref<1152x128xf32, #tpu.memory_space<vmem>>, vector<128x128xf32>
    %cst_44 = arith.constant dense<0.000000e+00> : vector<288x128xf32>
    %74 = tpu.matmul %72, %73, %cst_44 {dimension_numbers = #tpu.dot_dimension_numbers<[1], [0], [0], [1], [0, 0, 1, 1], [], []>} : vector<288x128xf32>, vector<128x128xf32>, vector<288x128xf32> -> vector<288x128xf32>
    %75 = arith.addf %71, %74 : vector<288x128xf32>
    %c43 = arith.constant 43 : index
    %c0_45 = arith.constant 0 : index
    %76 = vector.load %arg7[%c43, %c0_45] : memref<336x128xf32, #tpu.memory_space<vmem>>, vector<288x128xf32>
    %c1024 = arith.constant 1024 : index
    %c0_46 = arith.constant 0 : index
    %77 = vector.load %arg4[%c1024, %c0_46] : memref<1152x128xf32, #tpu.memory_space<vmem>>, vector<128x128xf32>
    %cst_47 = arith.constant dense<0.000000e+00> : vector<288x128xf32>
    %78 = tpu.matmul %76, %77, %cst_47 {dimension_numbers = #tpu.dot_dimension_numbers<[1], [0], [0], [1], [0, 0, 1, 1], [], []>} : vector<288x128xf32>, vector<128x128xf32>, vector<288x128xf32> -> vector<288x128xf32>
    %79 = arith.addf %75, %78 : vector<288x128xf32>
    %80 = tpu.iota {dimensions = array<i32: 0>} : vector<288x1xi32>
    %c0_i32_48 = arith.constant 0 : i32
    %81 = vector.broadcast %c0_i32_48 : i32 to vector<288x1xi32>
    %82 = arith.addi %81, %80 : vector<288x1xi32>
    %c18_i32_49 = arith.constant 18 : i32
    %c0_i32_50 = arith.constant 0 : i32
    %83 = arith.cmpi eq, %c18_i32_49, %c0_i32_50 : i32
    %c1_i32_51 = arith.constant 1 : i32
    %84 = arith.select %83, %c1_i32_51, %c18_i32_49 : i32
    %85 = vector.broadcast %84 : i32 to vector<288x1xi32>
    %86 = arith.remsi %82, %85 : vector<288x1xi32>
    %c0_i32_52 = arith.constant 0 : i32
    %87 = vector.broadcast %c0_i32_52 : i32 to vector<288x1xi32>
    %88 = arith.cmpi ne, %86, %87 : vector<288x1xi32>
    %c0_i32_53 = arith.constant 0 : i32
    %89 = vector.broadcast %c0_i32_53 : i32 to vector<288x1xi32>
    %90 = arith.cmpi slt, %86, %89 : vector<288x1xi32>
    %c0_i32_54 = arith.constant 0 : i32
    %91 = arith.cmpi slt, %84, %c0_i32_54 : i32
    %92 = vector.broadcast %91 : i1 to vector<288x1xi1>
    %93 = vector.broadcast %92 : vector<288x1xi1> to vector<288x1xi1>
    %94 = arith.xori %90, %93 : vector<288x1xi1>
    %95 = arith.andi %94, %88 : vector<288x1xi1>
    %96 = vector.broadcast %84 : i32 to vector<288x1xi32>
    %97 = arith.addi %86, %96 : vector<288x1xi32>
    %98 = arith.select %95, %97, %86 : vector<288x1xi1>, vector<288x1xi32>
    %c16_i32_55 = arith.constant 16 : i32
    %99 = vector.broadcast %c16_i32_55 : i32 to vector<288x1xi32>
    %100 = arith.cmpi slt, %98, %99 : vector<288x1xi32>
    %c288_i32_56 = arith.constant 288 : i32
    %101 = vector.broadcast %c288_i32_56 : i32 to vector<288x1xi32>
    %102 = arith.cmpi slt, %82, %101 : vector<288x1xi32>
    %103 = arith.andi %100, %102 : vector<288x1xi1>
    %cst_57 = arith.constant 0.000000e+00 : f32
    %104 = vector.shape_cast %103 : vector<288x1xi1> to vector<288x1xi1>
    %105 = vector.broadcast %104 : vector<288x1xi1> to vector<288x128xi1>
    %106 = vector.broadcast %cst_57 : f32 to vector<288x128xf32>
    %107 = arith.select %105, %79, %106 : vector<288x128xi1>, vector<288x128xf32>
    %c0_58 = arith.constant 0 : index
    %c0_59 = arith.constant 0 : index
    %c0_60 = arith.constant 0 : index
    %108 = vector.load %arg5[%c0_58, %c0_59, %c0_60] : memref<1x288x128xf32, #tpu.memory_space<vmem>>, vector<1x288x128xf32>
    %109 = vector.shape_cast %108 : vector<1x288x128xf32> to vector<288x128xf32>
    %110 = vector.shape_cast %107 : vector<288x128xf32> to vector<1x288x128xf32>
    tpu.vector_store %arg5[%c0_58, %c0_59, %c0_60], %110 {strides = array<i32>} : memref<1x288x128xf32, #tpu.memory_space<vmem>>, vector<1x288x128xf32>,
    %cst_61 = arith.constant dense<0.000000e+00> : vector<128xf32>
    %111 = vector.multi_reduction <add>, %107, %cst_61 [0] : vector<288x128xf32> to vector<128xf32>
    %112 = vector.shape_cast %111 : vector<128xf32> to vector<1x128xf32>
    %113 = arith.addf %43, %112 : vector<1x128xf32>
    %114 = arith.mulf %107, %107 : vector<288x128xf32>
    %cst_62 = arith.constant dense<0.000000e+00> : vector<128xf32>
    %115 = vector.multi_reduction <add>, %114, %cst_62 [0] : vector<288x128xf32> to vector<128xf32>
    %116 = vector.shape_cast %115 : vector<128xf32> to vector<1x128xf32>
    %117 = arith.addf %44, %116 : vector<1x128xf32>
    %c0_63 = arith.constant 0 : index
    %c0_64 = arith.constant 0 : index
    %c0_65 = arith.constant 0 : index
    %118 = vector.load %arg6[%c0_63, %c0_64, %c0_65] : memref<1x2x128xf32, #tpu.memory_space<vmem>>, vector<1x1x128xf32>
    %119 = vector.shape_cast %118 : vector<1x1x128xf32> to vector<1x128xf32>
    %120 = vector.shape_cast %113 : vector<1x128xf32> to vector<1x1x128xf32>
    tpu.vector_store %arg6[%c0_63, %c0_64, %c0_65], %120 {strides = array<i32>} : memref<1x2x128xf32, #tpu.memory_space<vmem>>, vector<1x1x128xf32>,
    %c0_66 = arith.constant 0 : index
    %c1 = arith.constant 1 : index
    %c0_67 = arith.constant 0 : index
    %121 = vector.load %arg6[%c0_66, %c1, %c0_67] : memref<1x2x128xf32, #tpu.memory_space<vmem>>, vector<1x1x128xf32>
    %122 = vector.shape_cast %121 : vector<1x1x128xf32> to vector<1x128xf32>
    %123 = vector.shape_cast %117 : vector<1x128xf32> to vector<1x1x128xf32>
    tpu.vector_store %arg6[%c0_66, %c1, %c0_67], %123 {strides = array<i32>} : memref<1x2x128xf32, #tpu.memory_space<vmem>>, vector<1x1x128xf32>,
    return
  }
  func.func @transform_0(%arg0: i32) -> (i32, i32, i32) {
    %c0_i32 = arith.constant 0 : i32
    %c0_i32_0 = arith.constant 0 : i32
    %c0_i32_1 = arith.constant 0 : i32
    return %arg0, %c0_i32, %c0_i32_0 : i32, i32, i32
  }
  func.func @transform_1(%arg0: i32) -> (i32, i32) {
    %c0_i32 = arith.constant 0 : i32
    %c0_i32_0 = arith.constant 0 : i32
    %c0_i32_1 = arith.constant 0 : i32
    return %c0_i32, %c0_i32_0 : i32, i32
  }
  func.func @transform_2(%arg0: i32) -> (i32, i32) {
    %c0_i32 = arith.constant 0 : i32
    %c0_i32_0 = arith.constant 0 : i32
    %c0_i32_1 = arith.constant 0 : i32
    return %c0_i32, %c0_i32_0 : i32, i32
  }
  func.func @transform_3(%arg0: i32) -> (i32, i32) {
    %c0_i32 = arith.constant 0 : i32
    %c0_i32_0 = arith.constant 0 : i32
    %c0_i32_1 = arith.constant 0 : i32
    return %c0_i32, %c0_i32_0 : i32, i32
  }
  func.func @transform_4(%arg0: i32) -> (i32, i32, i32) {
    %c0_i32 = arith.constant 0 : i32
    %c0_i32_0 = arith.constant 0 : i32
    %c0_i32_1 = arith.constant 0 : i32
    return %arg0, %c0_i32, %c0_i32_0 : i32, i32, i32
  }
  func.func @transform_5(%arg0: i32) -> (i32, i32, i32) {
    %c0_i32 = arith.constant 0 : i32
    %c0_i32_0 = arith.constant 0 : i32
    %c0_i32_1 = arith.constant 0 : i32
    return %arg0, %c0_i32, %c0_i32_0 : i32, i32, i32
  }
}

</mosaic_0001>

<bundles_post_ra>
// kernel: conv_block_nested.2
= control target key start
LH: loop header
LB: loop body
LE: loop exit
PB: predicated region body
PF: predicated region fallthrough
CT: control target
= control target key end

     0   :  { %s3846_s12 = smov 0   ;;  %s5803_s0 = inlined_call_operand.vmem [shape: f32[2,336,128], index: 0, kind: input, shape index: {}]   ;;  %s5804_s1 = inlined_call_operand.vmem [shape: f32[1152,128], index: 1, kind: input, shape index: {}]   ;;  %s5805_s2 = inlined_call_operand.vmem [shape: f32[2,288,128], index: 2, kind: output, shape index: {0}]   ;;  %s5806_s3 = inlined_call_operand.vmem [shape: f32[2,2,128], index: 3, kind: output, shape index: {1}]  }
   0x1 LB: > { %s3748_s13 = sadd.s32 4294967295, %s3823_s12   ;;  %p3752_p0 = scmp.ge.s32.totalorder %s3823_s12, 1  ;;  %s3823_s12 = sphi %s3846_s12, %s14_s12  }
   0x2   : > { %p140_p1 = scmp.lt.s32.totalorder %s3823_s12, 3 }
   0x4   : > { %p141_p2 = pnand %p3752_p0, %p140_p1 }
   0x6   : > { %144 = sbr.rel (%p141_p2) target bundleno = 846 (0x34e), region = 28 }
   0xb   : > { %v285_v0 = vld [vmem:[%s5804_s1 + $0xf8] sm:$0xff]  ;;  %v284_v1 = vld [vmem:[%s5804_s1 + $0xf0] sm:$0xff]  ;;  %v283_v2 = vld [vmem:[%s5804_s1 + $0xe8] sm:$0xff]  ;;  %p168_p3 = scmp.lt.s32.totalorder %s3748_s13, 1 }
   0xc   : > { %3758 = vmatpush.msra.mxu1 %v285_v0  ;;  %3759 = vmatpush.msra.mxu2 %v285_v0  ;;  %v282_v3 = vld [vmem:[%s5804_s1 + $0xe0] sm:$0xff]  ;;  %v281_v4 = vld [vmem:[%s5804_s1 + $0xd8] sm:$0xff]  ;;  %v280_v5 = vld [vmem:[%s5804_s1 + $0xd0] sm:$0xff] }
   0xd   : > { %3760 = vmatpush.msra.mxu3 %v285_v0  ;;  %286 = vmatpush.msra.mxu0 %v285_v0  ;;  %v279_v6 = vld [vmem:[%s5804_s1 + $0xc8] sm:$0xff]  ;;  %v278_v7 = vld [vmem:[%s5804_s1 + $0xc0] sm:$0xff]  ;;  %v277_v8 = vld [vmem:[%s5804_s1 + $0xb8] sm:$0xff]  ;;  %s5921_s13 = smov (!%p168_p3, %s3748_s13), 1 }
   0xe   : > { %3761 = vmatpush.msra.mxu1 %v284_v1  ;;  %3762 = vmatpush.msra.mxu2 %v284_v1  ;;  %v276_v9 = vld [vmem:[%s5804_s1 + $0xb0] sm:$0xff]  ;;  %v275_v10 = vld [vmem:[%s5804_s1 + $0xa8] sm:$0xff]  ;;  %v274_v11 = vld [vmem:[%s5804_s1 + $0xa0] sm:$0xff]  ;;  %s3806_s15 = smul.u32 336, %s5921_s13 }
   0xf   : > { %3763 = vmatpush.msra.mxu3 %v284_v1  ;;  %287 = vmatpush.msra.mxu0 %v284_v1  ;;  %v273_v12 = vld [vmem:[%s5804_s1 + $0x98] sm:$0xff]  ;;  %v272_v13 = vld [vmem:[%s5804_s1 + $0x90] sm:$0xff]  ;;  %v271_v14 = vld [vmem:[%s5804_s1 + $0x88] sm:$0xff]  ;;  %s3807_s16 = smul.u32 288, %s5921_s13 }
  0x10   : > { %3764 = vmatpush.msra.mxu1 %v283_v2  ;;  %3765 = vmatpush.msra.mxu2 %v283_v2  ;;  %s3909_s22 = scalar_lea.vmem %s5803_s0, %s3806_s15  ;;  %v270_v15 = vld [vmem:[%s5804_s1 + $0x80] sm:$0xff]  ;;  %v587_v18 = vld [vmem:[%s5804_s1 + $0x178] sm:$0xff]  ;;  %v586_v22 = vld [vmem:[%s5804_s1 + $0x170] sm:$0xff] }
  0x11   : > { %3766 = vmatpush.msra.mxu3 %v283_v2  ;;  %288 = vmatpush.msra.mxu0 %v283_v2  ;;  %v243_v16 = vld [vmem:[%s3909_s22 + $0x4e] sm:$0xff]  ;;  %v252_v17 = vld [vmem:[%s3909_s22 + $0x96] sm:$0xff]  ;;  %v261_v19 = vld [vmem:[%s3909_s22 + $0xde] sm:$0xff]  ;;  %s4823_s19 = scalar_lea.vmem %s5805_s2, %s3807_s16 }
  0x12   : > { %3767 = vmatpush.msra.mxu1 %v282_v3  ;;  %3768 = vmatpush.msra.mxu2 %v282_v3  ;;  %v233_v20 = vld [vmem:[%s5804_s1 + $0x78] sm:$0xff]  ;;  %v232_v23 = vld [vmem:[%s5804_s1 + $0x70] sm:$0xff]  ;;  %v585_v25 = vld [vmem:[%s5804_s1 + $0x168] sm:$0xff] }
  0x13   : > { %3769 = vmatpush.msra.mxu3 %v282_v3  ;;  %289 = vmatpush.msra.mxu0 %v282_v3  ;;  %v800_v21 = vld [vmem:[%s5804_s1 + $0x1f8] sm:$0xff]  ;;  %v799_v24 = vld [vmem:[%s5804_s1 + $0x1f0] sm:$0xff]  ;;  %v234_v26 = vld [vmem:[%s3909_s22 + $0x6] sm:$0xff] }
  0x14   : > { %3770 = vmatpush.msra.mxu1 %v281_v4  ;;  %3771 = vmatpush.msra.mxu2 %v281_v4  ;;  %v231_v27 = vld [vmem:[%s5804_s1 + $0x68] sm:$0xff]  ;;  %v1013_v28 = vld [vmem:[%s5804_s1 + $0x278] sm:$0xff]  ;;  %v584_v32 = vld [vmem:[%s5804_s1 + $0x160] sm:$0xff] }
  0x15   : > { %3772 = vmatpush.msra.mxu3 %v281_v4  ;;  %290 = vmatpush.msra.mxu0 %v281_v4  ;;  %v798_v29 = vld [vmem:[%s5804_s1 + $0x1e8] sm:$0xff]  ;;  %v244_v30 = vld [vmem:[%s3909_s22 + $0x56] sm:$0xff]  ;;  %v253_v31 = vld [vmem:[%s3909_s22 + $0x9e] sm:$0xff] }
  0x16   : > { %3773 = vmatpush.msra.mxu1 %v280_v5  ;;  %3774 = vmatpush.msra.mxu2 %v280_v5  ;;  %v1012_v33 = vld [vmem:[%s5804_s1 + $0x270] sm:$0xff]  ;;  %v262_v34 = vld [vmem:[%s3909_s22 + $0xe6] sm:$0xff]  ;;  %v583_v37 = vld [vmem:[%s5804_s1 + $0x158] sm:$0xff] }
  0x17   : > { %3775 = vmatpush.msra.mxu3 %v280_v5  ;;  %291 = vmatpush.msra.mxu0 %v280_v5  ;;  %v230_v35 = vld [vmem:[%s5804_s1 + $0x60] sm:$0xff]  ;;  %v1011_v38 = vld [vmem:[%s5804_s1 + $0x268] sm:$0xff]  ;;  %v229_v39 = vld [vmem:[%s5804_s1 + $0x58] sm:$0xff] }
  0x18   : > { %3776 = vmatpush.msra.mxu1 %v279_v6  ;;  %3777 = vmatpush.msra.mxu2 %v279_v6  ;;  %v797_v36 = vld [vmem:[%s5804_s1 + $0x1e0] sm:$0xff]  ;;  %v796_v40 = vld [vmem:[%s5804_s1 + $0x1d8] sm:$0xff]  ;;  %v582_v41 = vld [vmem:[%s5804_s1 + $0x150] sm:$0xff] }
  0x19   : > { %3778 = vmatpush.msra.mxu3 %v279_v6  ;;  %292 = vmatpush.msra.mxu0 %v279_v6  ;;  %v235_v42 = vld [vmem:[%s3909_s22 + $0xe] sm:$0xff]  ;;  %v1010_v44 = vld [vmem:[%s5804_s1 + $0x260] sm:$0xff]  ;;  %v1009_v49 = vld [vmem:[%s5804_s1 + $0x258] sm:$0xff] }
  0x1a   : > { %3779 = vmatpush.msra.mxu1 %v278_v7  ;;  %3780 = vmatpush.msra.mxu2 %v278_v7  ;;  %v228_v43 = vld [vmem:[%s5804_s1 + $0x50] sm:$0xff]  ;;  %v245_v46 = vld [vmem:[%s3909_s22 + $0x5e] sm:$0xff]  ;;  %v254_v47 = vld [vmem:[%s3909_s22 + $0xa6] sm:$0xff] }
  0x1b   : > { %3781 = vmatpush.msra.mxu3 %v278_v7  ;;  %293 = vmatpush.msra.mxu0 %v278_v7  ;;  %v795_v45 = vld [vmem:[%s5804_s1 + $0x1d0] sm:$0xff]  ;;  %v581_v48 = vld [vmem:[%s5804_s1 + $0x148] sm:$0xff]  ;;  %v580_v53 = vld [vmem:[%s5804_s1 + $0x140] sm:$0xff] }
  0x1c   : > { %3782 = vmatpush.msra.mxu1 %v277_v8  ;;  %3783 = vmatpush.msra.mxu2 %v277_v8  ;;  %v263_v50 = vld [vmem:[%s3909_s22 + $0xee] sm:$0xff]  ;;  %v226_v55 = vld [vmem:[%s5804_s1 + $0x40] sm:$0xff]  ;;  %v579_v57 = vld [vmem:[%s5804_s1 + $0x138] sm:$0xff] }
  0x1d   : > { %3784 = vmatpush.msra.mxu3 %v277_v8  ;;  %294 = vmatpush.msra.mxu0 %v277_v8  ;;  %v227_v51 = vld [vmem:[%s5804_s1 + $0x48] sm:$0xff]  ;;  %v1008_v54 = vld [vmem:[%s5804_s1 + $0x250] sm:$0xff]  ;;  %v793_v56 = vld [vmem:[%s5804_s1 + $0x1c0] sm:$0xff] }
  0x1e   : > { %3785 = vmatpush.msra.mxu1 %v276_v9  ;;  %3786 = vmatpush.msra.mxu2 %v276_v9  ;;  %v794_v52 = vld [vmem:[%s5804_s1 + $0x1c8] sm:$0xff]  ;;  %v236_v58 = vld [vmem:[%s3909_s22 + $0x16] sm:$0xff]  ;;  %v1006_v1 = vld [vmem:[%s5804_s1 + $0x240] sm:$0xff] }
  0x1f   : > { %3787 = vmatpush.msra.mxu3 %v276_v9  ;;  %295 = vmatpush.msra.mxu0 %v276_v9  ;;  %v225_v59 = vld [vmem:[%s5804_s1 + $0x38] sm:$0xff]  ;;  %v1007_v60 = vld [vmem:[%s5804_s1 + $0x248] sm:$0xff]  ;;  %v578_v0 = vld [vmem:[%s5804_s1 + $0x130] sm:$0xff] }
  0x20   : > { %3788 = vmatpush.msra.mxu1 %v275_v10  ;;  %3789 = vmatpush.msra.mxu2 %v275_v10  ;;  %v792_v61 = vld [vmem:[%s5804_s1 + $0x1b8] sm:$0xff]  ;;  %v246_v62 = vld [vmem:[%s3909_s22 + $0x66] sm:$0xff]  ;;  %v255_v63 = vld [vmem:[%s3909_s22 + $0xae] sm:$0xff] }
  0x21   : > { %3790 = vmatpush.msra.mxu3 %v275_v10  ;;  %296 = vmatpush.msra.mxu0 %v275_v10  ;;  %v264_v2 = vld [vmem:[%s3909_s22 + $0xf6] sm:$0xff]  ;;  %v577_v5 = vld [vmem:[%s5804_s1 + $0x128] sm:$0xff]  ;;  %v576_v9 = vld [vmem:[%s5804_s1 + $0x120] sm:$0xff] }
  0x22   : > { %3791 = vmatpush.msra.mxu1 %v274_v11  ;;  %3792 = vmatpush.msra.mxu2 %v274_v11  ;;  %v224_v3 = vld [vmem:[%s5804_s1 + $0x30] sm:$0xff]  ;;  %v1005_v6 = vld [vmem:[%s5804_s1 + $0x238] sm:$0xff]  ;;  %v223_v7 = vld [vmem:[%s5804_s1 + $0x28] sm:$0xff] }
  0x23   : > { %3793 = vmatpush.msra.mxu3 %v274_v11  ;;  %297 = vmatpush.msra.mxu0 %v274_v11  ;;  %v791_v4 = vld [vmem:[%s5804_s1 + $0x1b0] sm:$0xff]  ;;  %v790_v8 = vld [vmem:[%s5804_s1 + $0x1a8] sm:$0xff]  ;;  %v237_v10 = vld [vmem:[%s3909_s22 + $0x1e] sm:$0xff] }
  0x24   : > { %3794 = vmatpush.msra.mxu1 %v273_v12  ;;  %3795 = vmatpush.msra.mxu2 %v273_v12  ;;  %v222_v11 = vld [vmem:[%s5804_s1 + $0x20] sm:$0xff] }
  0x25   : > { %3796 = vmatpush.msra.mxu3 %v273_v12  ;;  %298 = vmatpush.msra.mxu0 %v273_v12  ;;  %v1004_v12 = vld [vmem:[%s5804_s1 + $0x230] sm:$0xff] }
  0x26   : > { %3797 = vmatpush.msra.mxu1 %v272_v13  ;;  %3798 = vmatpush.msra.mxu2 %v272_v13 }
  0x27   : > { %3799 = vmatpush.msra.mxu3 %v272_v13  ;;  %299 = vmatpush.msra.mxu0 %v272_v13  ;;  %v789_v13 = vld [vmem:[%s5804_s1 + $0x1a0] sm:$0xff] }
  0x28   : > { %3800 = vmatpush.msra.mxu1 %v271_v14  ;;  %3801 = vmatpush.msra.mxu2 %v271_v14 }
  0x29   : > { %3802 = vmatpush.msra.mxu3 %v271_v14  ;;  %300 = vmatpush.msra.mxu0 %v271_v14  ;;  %v247_v14 = vld [vmem:[%s3909_s22 + $0x6e] sm:$0xff] }
  0x2a   : > { %3803 = vmatpush.msra.mxu1 %v270_v15  ;;  %3804 = vmatpush.msra.mxu2 %v270_v15 }
  0x2b   : > { %329 = vmatmul.f32.vlgmr.msra.gmra.mxu1 %v243_v16  ;;  %356 = vmatmul.f32.vlgmr.msra.gmra.mxu2 %v252_v17  ;;  %v575_v16 = vld [vmem:[%s5804_s1 + $0x118] sm:$0xff]  ;;  %v1003_v17 = vld [vmem:[%s5804_s1 + $0x228] sm:$0xff] }
  0x2c   : > { %588 = vmatpush.msrb.mxu2 %v587_v18  ;;  %3805 = vmatpush.msra.mxu3 %v270_v15  ;;  %v265_v18 = vld [vmem:[%s3909_s22 + $0xfe] sm:$0xff] }
  0x2d   : > { %383 = vmatmul.f32.vlgmr.msra.gmra.mxu3 %v261_v19  ;;  %411 = vmatpush.msrb.mxu1 %v233_v20  ;;  %v221_v19 = vld [vmem:[%s5804_s1 + $0x18] sm:$0xff] }
  0x2e   : > { %801 = vmatpush.msrb.mxu3 %v800_v21  ;;  %589 = vmatpush.msrb.mxu2 %v586_v22  ;;  %v788_v20 = vld [vmem:[%s5804_s1 + $0x198] sm:$0xff]  ;;  %v574_v21 = vld [vmem:[%s5804_s1 + $0x110] sm:$0xff]  ;;  %v1002_v22 = vld [vmem:[%s5804_s1 + $0x220] sm:$0xff] }
  0x2f   : > { %301 = vmatpush.msra.mxu0 %v270_v15  ;;  %412 = vmatpush.msrb.mxu1 %v232_v23  ;;  %v256_v15 = vld [vmem:[%s3909_s22 + $0xb6] sm:$0xff] }
  0x30   : > { %802 = vmatpush.msrb.mxu3 %v799_v24  ;;  %590 = vmatpush.msrb.mxu2 %v585_v25  ;;  %v220_v23 = vld [vmem:[%s5804_s1 + $0x10] sm:$0xff]  ;;  %v573_v25 = vld [vmem:[%s5804_s1 + $0x108] sm:$0xff] }
  0x31   : > { %302 = vmatmul.f32.vlgmr.msra.gmra.mxu0 %v234_v26  ;;  %413 = vmatpush.msrb.mxu1 %v231_v27  ;;  %v787_v24 = vld [vmem:[%s5804_s1 + $0x190] sm:$0xff]  ;;  %v238_v26 = vld [vmem:[%s3909_s22 + $0x26] sm:$0xff] }
  0x32   : > { %1014 = vmatpush.msrb.mxu0 %v1013_v28  ;;  %803 = vmatpush.msrb.mxu3 %v798_v29  ;;  %v219_v27 = vld [vmem:[%s5804_s1 + $0x8] sm:$0xff]  ;;  %v1001_v28 = vld [vmem:[%s5804_s1 + $0x218] sm:$0xff] }
  0x33   : > { %332 = vmatmul.f32.gmra.mxu1 %v244_v30  ;;  %359 = vmatmul.f32.gmra.mxu2 %v253_v31  ;;  %v786_v29 = vld [vmem:[%s5804_s1 + $0x188] sm:$0xff]  ;;  %v248_v30 = vld [vmem:[%s3909_s22 + $0x76] sm:$0xff]  ;;  %v257_v31 = vld [vmem:[%s3909_s22 + $0xbe] sm:$0xff] }
  0x34   : > { %591 = vmatpush.msrb.mxu2 %v584_v32  ;;  %1015 = vmatpush.msrb.mxu0 %v1012_v33  ;;  %v572_v32 = vld [vmem:[%s5804_s1 + $0x100] sm:$0xff]  ;;  %v1000_v33 = vld [vmem:[%s5804_s1 + $0x210] sm:$0xff] }
  0x35   : > { %386 = vmatmul.f32.gmra.mxu3 %v262_v34  ;;  %414 = vmatpush.msrb.mxu1 %v230_v35  ;;  %v266_v34 = vld [vmem:[%s3909_s22 + $0x106] sm:$0xff] }
  0x36   : > { %804 = vmatpush.msrb.mxu3 %v797_v36  ;;  %592 = vmatpush.msrb.mxu2 %v583_v37  ;;  %v218_v35 = vld [vmem:[%s5804_s1] sm:$0xff]  ;;  %v1439_v37 = vld [vmem:[%s5804_s1 + $0x378] sm:$0xff] }
  0x37   : > { %1016 = vmatpush.msrb.mxu0 %v1011_v38  ;;  %415 = vmatpush.msrb.mxu1 %v229_v39  ;;  %v785_v36 = vld [vmem:[%s5804_s1 + $0x180] sm:$0xff]  ;;  %v999_v38 = vld [vmem:[%s5804_s1 + $0x208] sm:$0xff]  ;;  %v1652_v39 = vld [vmem:[%s5804_s1 + $0x3f8] sm:$0xff] }
  0x38   : > { %805 = vmatpush.msrb.mxu3 %v796_v40  ;;  %593 = vmatpush.msrb.mxu2 %v582_v41  ;;  %v1226_v40 = vld [vmem:[%s5804_s1 + $0x2f8] sm:$0xff]  ;;  %v239_v41 = vld [vmem:[%s3909_s22 + $0x2e] sm:$0xff] }
  0x39   : > { %305 = vmatmul.f32.gmra.mxu0 %v235_v42  ;;  %416 = vmatpush.msrb.mxu1 %v228_v43  ;;  %v998_v42 = vld [vmem:[%s5804_s1 + $0x200] sm:$0xff] }
  0x3a   : > { %1017 = vmatpush.msrb.mxu0 %v1010_v44  ;;  %806 = vmatpush.msrb.mxu3 %v795_v45  ;;  %v249_v43 = vld [vmem:[%s3909_s22 + $0x7e] sm:$0xff]  ;;  %v258_v44 = vld [vmem:[%s3909_s22 + $0xc6] sm:$0xff]  ;;  %v267_v45 = vld [vmem:[%s3909_s22 + $0x10e] sm:$0xff] }
  0x3b   : > { %335 = vmatmul.f32.gmra.mxu1 %v245_v46  ;;  %362 = vmatmul.f32.gmra.mxu2 %v254_v47  ;;  %v1865_v46 = vld [vmem:[%s5804_s1 + $0x478] sm:$0xff] }
  0x3c   : > { %594 = vmatpush.msrb.mxu2 %v581_v48  ;;  %1018 = vmatpush.msrb.mxu0 %v1009_v49  ;;  %v240_v47 = vld [vmem:[%s3909_s22 + $0x36] sm:$0xff]  ;;  %v250_v48 = vld [vmem:[%s3909_s22 + $0x86] sm:$0xff]  ;;  %v259_v49 = vld [vmem:[%s3909_s22 + $0xce] sm:$0xff] }
  0x3d   : > { %389 = vmatmul.f32.gmra.mxu3 %v263_v50  ;;  %417 = vmatpush.msrb.mxu1 %v227_v51  ;;  %v268_v50 = vld [vmem:[%s3909_s22 + $0x116] sm:$0xff] }
  0x3e   : > { %807 = vmatpush.msrb.mxu3 %v794_v52  ;;  %595 = vmatpush.msrb.mxu2 %v580_v53  ;;  %v1438_v51 = vld [vmem:[%s5804_s1 + $0x370] sm:$0xff] }
  0x3f   : > { %1019 = vmatpush.msrb.mxu0 %v1008_v54  ;;  %418 = vmatpush.msrb.mxu1 %v226_v55  ;;  %v1651_v52 = vld [vmem:[%s5804_s1 + $0x3f0] sm:$0xff]  ;;  %v241_v54 = vld [vmem:[%s3909_s22 + $0x3e] sm:$0xff] }
  0x40   : > { %808 = vmatpush.msrb.mxu3 %v793_v56  ;;  %596 = vmatpush.msrb.mxu2 %v579_v57  ;;  %v1225_v53 = vld [vmem:[%s5804_s1 + $0x2f0] sm:$0xff]  ;;  %v269_v57 = vld [vmem:[%s3909_s22 + $0x11e] sm:$0xff] }
  0x41   : > { %308 = vmatmul.f32.gmra.mxu0 %v236_v58  ;;  %419 = vmatpush.msrb.mxu1 %v225_v59  ;;  %v251_v55 = vld [vmem:[%s3909_s22 + $0x8e] sm:$0xff]  ;;  %v260_v56 = vld [vmem:[%s3909_s22 + $0xd6] sm:$0xff]  ;;  %v242_v59 = vld [vmem:[%s3909_s22 + $0x46] sm:$0xff] }
  0x42   : > { %1020 = vmatpush.msrb.mxu0 %v1007_v60  ;;  %809 = vmatpush.msrb.mxu3 %v792_v61  ;;  %v1864_v58 = vld [vmem:[%s5804_s1 + $0x470] sm:$0xff]  ;;  %v182_v60 = vld [vmem:[%s3909_s22 + $0x5] sm:$0xff] }
  0x43   : > { %338 = vmatmul.f32.gmra.mxu1 %v246_v62  ;;  %365 = vmatmul.f32.gmra.mxu2 %v255_v63  ;;  %v536_v61 = vld [vmem:[%s3909_s22 + $0x7] sm:$0xff]  ;;  %v749_v62 = vld [vmem:[%s3909_s22 + $0x17] sm:$0xff] }
  0x44   : > { %597 = vmatpush.msrb.mxu2 %v578_v0  ;;  %1021 = vmatpush.msrb.mxu0 %v1006_v1  ;;  %v1437_v63 = vld [vmem:[%s5804_s1 + $0x368] sm:$0xff]  ;;  %v962_v1 = vld [vmem:[%s3909_s22 + $0x18] sm:$0xff] }
  0x45   : > { %392 = vmatmul.f32.gmra.mxu3 %v264_v2  ;;  %420 = vmatpush.msrb.mxu1 %v224_v3  ;;  %v1650_v0 = vld [vmem:[%s5804_s1 + $0x3e8] sm:$0xff] }
  0x46   : > { %810 = vmatpush.msrb.mxu3 %v791_v4  ;;  %598 = vmatpush.msrb.mxu2 %v577_v5  ;;  %v183_v2 = vld [vmem:[%s3909_s22 + $0xd] sm:$0xff]  ;;  %v750_v4 = vld [vmem:[%s3909_s22 + $0x1f] sm:$0xff] }
  0x47   : > { %1022 = vmatpush.msrb.mxu0 %v1005_v6  ;;  %421 = vmatpush.msrb.mxu1 %v223_v7  ;;  %v537_v3 = vld [vmem:[%s3909_s22 + $0xf] sm:$0xff]  ;;  %v963_v7 = vld [vmem:[%s3909_s22 + $0x20] sm:$0xff] }
  0x48   : > { %811 = vmatpush.msrb.mxu3 %v790_v8  ;;  %599 = vmatpush.msrb.mxu2 %v576_v9  ;;  %v1224_v5 = vld [vmem:[%s5804_s1 + $0x2e8] sm:$0xff]  ;;  %v184_v8 = vld [vmem:[%s3909_s22 + $0x15] sm:$0xff] }
  0x49   : > { %311 = vmatmul.f32.gmra.mxu0 %v237_v10  ;;  %422 = vmatpush.msrb.mxu1 %v222_v11  ;;  %v1863_v6 = vld [vmem:[%s5804_s1 + $0x468] sm:$0xff]  ;;  %v185_v11 = vld [vmem:[%s3909_s22 + $0x1d] sm:$0xff] }
  0x4a   : > { %1023 = vmatpush.msrb.mxu0 %v1004_v12  ;;  %812 = vmatpush.msrb.mxu3 %v789_v13  ;;  %v751_v9 = vld [vmem:[%s3909_s22 + $0x27] sm:$0xff]  ;;  %v752_v13 = vld [vmem:[%s3909_s22 + $0x2f] sm:$0xff] }
  0x4b   : > { %341 = vmatmul.f32.gmra.mxu1 %v247_v14  ;;  %368 = vmatmul.f32.gmra.mxu2 %v256_v15  ;;  %v964_v10 = vld [vmem:[%s3909_s22 + $0x28] sm:$0xff]  ;;  %v1436_v12 = vld [vmem:[%s5804_s1 + $0x360] sm:$0xff] }
  0x4c   : > { %600 = vmatpush.msrb.mxu2 %v575_v16  ;;  %1024 = vmatpush.msrb.mxu0 %v1003_v17  ;;  %v1649_v14 = vld [vmem:[%s5804_s1 + $0x3e0] sm:$0xff]  ;;  %v965_v16 = vld [vmem:[%s3909_s22 + $0x30] sm:$0xff] }
  0x4d   : > { %395 = vmatmul.f32.gmra.mxu3 %v265_v18  ;;  %423 = vmatpush.msrb.mxu1 %v221_v19  ;;  %v1223_v15 = vld [vmem:[%s5804_s1 + $0x2e0] sm:$0xff]  ;;  %v753_v18 = vld [vmem:[%s3909_s22 + $0x37] sm:$0xff] }
  0x4e   : > { %813 = vmatpush.msrb.mxu3 %v788_v20  ;;  %601 = vmatpush.msrb.mxu2 %v574_v21  ;;  %v186_v17 = vld [vmem:[%s3909_s22 + $0x25] sm:$0xff]  ;;  %v966_v20 = vld [vmem:[%s3909_s22 + $0x38] sm:$0xff]  ;;  %v187_v21 = vld [vmem:[%s3909_s22 + $0x2d] sm:$0xff] }
  0x4f   : > { %1025 = vmatpush.msrb.mxu0 %v1002_v22  ;;  %424 = vmatpush.msrb.mxu1 %v220_v23  ;;  %v1862_v19 = vld [vmem:[%s5804_s1 + $0x460] sm:$0xff]  ;;  %v1435_v23 = vld [vmem:[%s5804_s1 + $0x358] sm:$0xff] }
  0x50   : > { %814 = vmatpush.msrb.mxu3 %v787_v24  ;;  %602 = vmatpush.msrb.mxu2 %v573_v25  ;;  %v754_v22 = vld [vmem:[%s3909_s22 + $0x3f] sm:$0xff] }
  0x51   : > { %314 = vmatmul.f32.gmra.mxu0 %v238_v26  ;;  %425 = vmatpush.msrb.mxu1 %v219_v27  ;;  %v1648_v24 = vld [vmem:[%s5804_s1 + $0x3d8] sm:$0xff]  ;;  %v967_v25 = vld [vmem:[%s3909_s22 + $0x40] sm:$0xff] }
  0x52   : > { %1026 = vmatpush.msrb.mxu0 %v1001_v28  ;;  %815 = vmatpush.msrb.mxu3 %v786_v29  ;;  %v1222_v26 = vld [vmem:[%s5804_s1 + $0x2d8] sm:$0xff]  ;;  %v755_v28 = vld [vmem:[%s3909_s22 + $0x47] sm:$0xff] }
  0x53   : > { %344 = vmatmul.f32.gmra.mxu1 %v248_v30  ;;  %371 = vmatmul.f32.gmra.mxu2 %v257_v31  ;;  %v188_v27 = vld [vmem:[%s3909_s22 + $0x35] sm:$0xff]  ;;  %v968_v30 = vld [vmem:[%s3909_s22 + $0x48] sm:$0xff] }
  0x54   : > { %603 = vmatpush.msrb.mxu2 %v572_v32  ;;  %1027 = vmatpush.msrb.mxu0 %v1000_v33  ;;  %v1861_v29 = vld [vmem:[%s5804_s1 + $0x458] sm:$0xff]  ;;  %v756_v33 = vld [vmem:[%s3909_s22 + $0x4f] sm:$0xff] }
  0x55   : > { %398 = vmatmul.f32.gmra.mxu3 %v266_v34  ;;  %426 = vmatpush.msrb.mxu1 %v218_v35  ;;  %v189_v32 = vld [vmem:[%s3909_s22 + $0x3d] sm:$0xff]  ;;  %v1434_v34 = vld [vmem:[%s5804_s1 + $0x350] sm:$0xff] }
  0x56   : > { %816 = vmatpush.msrb.mxu3 %v785_v36  ;;  %1440 = vmatpush.msra.mxu2 %v1439_v37  ;;  %v969_v37 = vld [vmem:[%s3909_s22 + $0x50] sm:$0xff] }
  0x57   : > { %1028 = vmatpush.msrb.mxu0 %v999_v38  ;;  %1227 = vmatpush.msra.mxu1 %v1226_v40  ;;  %v1647_v38 = vld [vmem:[%s5804_s1 + $0x3d0] sm:$0xff] }
  0x58   : > { %1653 = vmatpush.msra.mxu3 %v1652_v39  ;;  %1441 = vmatpush.msra.mxu2 %v1438_v51  ;;  %v758_v51 = vld [vmem:[%s3909_s22 + $0x5f] sm:$0xff] }
  0x59   : > { %317 = vmatmul.f32.gmra.mxu0 %v239_v41  ;;  %1228 = vmatpush.msra.mxu1 %v1225_v53  ;;  %v190_v41 = vld [vmem:[%s3909_s22 + $0x45] sm:$0xff] }
  0x5a   : > { %1029 = vmatpush.msrb.mxu0 %v998_v42  ;;  %1654 = vmatpush.msra.mxu3 %v1651_v52  ;;  %v1221_v42 = vld [vmem:[%s5804_s1 + $0x2d0] sm:$0xff] }
  0x5b   : > { %347 = vmatmul.f32.gmra.mxu1 %v249_v43  ;;  %374 = vmatmul.f32.gmra.mxu2 %v258_v44  ;;  %v757_v43 = vld [vmem:[%s3909_s22 + $0x57] sm:$0xff] }
  0x5c   : > { %1866 = vmatpush.msra.mxu0 %v1865_v46  ;;  %1442 = vmatpush.msra.mxu2 %v1437_v63  ;;  %v970_v46 = vld [vmem:[%s3909_s22 + $0x58] sm:$0xff] }
  0x5d   : > { %401 = vmatmul.f32.gmra.mxu3 %v267_v45  ;;  %1229 = vmatpush.msra.mxu1 %v1224_v5  ;;  %v760_v5 = vld [vmem:[%s3909_s22 + $0x6f] sm:$0xff] }
  0x5e   : > { %1867 = vmatpush.msra.mxu0 %v1864_v58  ;;  %1655 = vmatpush.msra.mxu3 %v1650_v0  ;;  %v192_v58 = vld [vmem:[%s3909_s22 + $0x55] sm:$0xff]  ;;  %v972_v0 = vld [vmem:[%s3909_s22 + $0x68] sm:$0xff] }
  0x5f   : > { %1443 = vmatpush.msra.mxu2 %v1436_v12  ;;  %1230 = vmatpush.msra.mxu1 %v1223_v15  ;;  %v1432_v12 = vld [vmem:[%s5804_s1 + $0x340] sm:$0xff] }
  0x60   : > { %1868 = vmatpush.msra.mxu0 %v1863_v6  ;;  %1656 = vmatpush.msra.mxu3 %v1649_v14  ;;  %v1645_v14 = vld [vmem:[%s5804_s1 + $0x3c0] sm:$0xff] }
  0x61   : > { %320 = vmatmul.f32.gmra.mxu0 %v240_v47  ;;  %1444 = vmatpush.msra.mxu2 %v1435_v23  ;;  %v1860_v47 = vld [vmem:[%s5804_s1 + $0x450] sm:$0xff]  ;;  %v1219_v15 = vld [vmem:[%s5804_s1 + $0x2c0] sm:$0xff] }
  0x62   : > { %1869 = vmatpush.msra.mxu0 %v1862_v19  ;;  %1657 = vmatpush.msra.mxu3 %v1648_v24  ;;  %v1858_v23 = vld [vmem:[%s5804_s1 + $0x440] sm:$0xff] }
  0x63   : > { %350 = vmatmul.f32.gmra.mxu1 %v250_v48  ;;  %377 = vmatmul.f32.gmra.mxu2 %v259_v49 }
  0x64   : > { %1231 = vmatpush.msra.mxu1 %v1222_v26  ;;  %1870 = vmatpush.msra.mxu0 %v1861_v29  ;;  %v975_v26 = vld [vmem:[%s3909_s22 + $0x80] sm:$0xff]  ;;  %v196_v29 = vld [vmem:[%s3909_s22 + $0x75] sm:$0xff] }
  0x65   : > { %404 = vmatmul.f32.gmra.mxu3 %v268_v50  ;;  %1445 = vmatpush.msra.mxu2 %v1434_v34  ;;  %v191_v50 = vld [vmem:[%s3909_s22 + $0x4d] sm:$0xff] }
  0x66   : > { %1658 = vmatpush.msra.mxu3 %v1647_v38  ;;  %1232 = vmatpush.msra.mxu1 %v1221_v42  ;;  %v976_v38 = vld [vmem:[%s3909_s22 + $0x88] sm:$0xff] }
  0x67   : > { %1871 = vmatpush.msra.mxu0 %v1860_v47  ;;  %v764_v47 = vld [vmem:[%s3909_s22 + $0x8f] sm:$0xff] }
  0x69   : > { %323 = vmatmul.f32.gmra.mxu0 %v241_v54  ;;  %v971_v54 = vld [vmem:[%s3909_s22 + $0x60] sm:$0xff] }
  0x6b   : > { %353 = vmatmul.f32.gmra.mxu1 %v251_v55  ;;  %380 = vmatmul.f32.gmra.mxu2 %v260_v56  ;;  %v1433_v55 = vld [vmem:[%s5804_s1 + $0x348] sm:$0xff] }
  0x6c   : > { %1446 = vmatpush.msra.mxu2 %v1433_v55  ;;  %v977_v55 = vld [vmem:[%s3909_s22 + $0x90] sm:$0xff] }
  0x6d   : > { %407 = vmatmul.f32.gmra.mxu3 %v269_v57 }
  0x6e   : > { %1447 = vmatpush.msra.mxu2 %v1432_v12  ;;  %v1643_v12 = vld [vmem:[%s5804_s1 + $0x3b0] sm:$0xff] }
  0x71   : > { %326 = vmatmul.f32.gmra.mxu0 %v242_v59  ;;  %v1646_v59 = vld [vmem:[%s5804_s1 + $0x3c8] sm:$0xff] }
  0x72   : > { %1659 = vmatpush.msra.mxu3 %v1646_v59 }
  0x73   : > { %427 = vmatmul.f32.vlgmr.msrb.gmra.mxu1 %v182_v60  ;;  %604 = vmatmul.f32.vlgmr.msrb.gmra.mxu2 %v536_v61  ;;  %v759_v60 = vld [vmem:[%s3909_s22 + $0x67] sm:$0xff] }
  0x74   : > { %v1220_v61 = vld [vmem:[%s5804_s1 + $0x2c8] sm:$0xff]  ;;  %1660 = vmatpush.msra.mxu3 %v1645_v14 }
  0x75   : > { %817 = vmatmul.f32.vlgmr.msrb.gmra.mxu3 %v749_v62  ;;  %1233 = vmatpush.msra.mxu1 %v1220_v61  ;;  %v765_v61 = vld [vmem:[%s3909_s22 + $0x97] sm:$0xff] }
  0x77   : > { %1234 = vmatpush.msra.mxu1 %v1219_v15  ;;  %v199_v15 = vld [vmem:[%s3909_s22 + $0x8d] sm:$0xff] }
  0x79   : > { %1030 = vmatmul.f32.vlgmr.msrb.gmra.mxu0 %v962_v1 }
  0x7b   : > { %430 = vmatmul.f32.gmra.mxu1 %v183_v2  ;;  %607 = vmatmul.f32.gmra.mxu2 %v537_v3  ;;  %v193_v3 = vld [vmem:[%s3909_s22 + $0x5d] sm:$0xff] }
  0x7d   : > { %820 = vmatmul.f32.gmra.mxu3 %v750_v4 }
  0x81   : > { %1033 = vmatmul.f32.gmra.mxu0 %v963_v7 }
  0x83   : > { %433 = vmatmul.f32.gmra.mxu1 %v184_v8  ;;  %610 = vmatmul.f32.gmra.mxu2 %v749_v62  ;;  %v973_v8 = vld [vmem:[%s3909_s22 + $0x70] sm:$0xff] }
  0x85   : > { %823 = vmatmul.f32.gmra.mxu3 %v751_v9 }
  0x89   : > { %1036 = vmatmul.f32.gmra.mxu0 %v964_v10 }
  0x8b   : > { %436 = vmatmul.f32.gmra.mxu1 %v185_v11  ;;  %613 = vmatmul.f32.gmra.mxu2 %v750_v4  ;;  %v1859_v4 = vld [vmem:[%s5804_s1 + $0x448] sm:$0xff] }
  0x8c   : > { %1872 = vmatpush.msra.mxu0 %v1859_v4  ;;  %v194_v11 = vld [vmem:[%s3909_s22 + $0x65] sm:$0xff] }
  0x8d   : > { %826 = vmatmul.f32.gmra.mxu3 %v752_v13 }
  0x8e   : > { %1873 = vmatpush.msra.mxu0 %v1858_v23 }
  0x91   : > { %1039 = vmatmul.f32.gmra.mxu0 %v965_v16 }
  0x93   : > { %439 = vmatmul.f32.gmra.mxu1 %v186_v17  ;;  %616 = vmatmul.f32.gmra.mxu2 %v751_v9 }
  0x95   : > { %829 = vmatmul.f32.gmra.mxu3 %v753_v18 }
  0x99   : > { %1042 = vmatmul.f32.gmra.mxu0 %v966_v20 }
  0x9b   : > { %442 = vmatmul.f32.gmra.mxu1 %v187_v21  ;;  %619 = vmatmul.f32.gmra.mxu2 %v752_v13  ;;  %v761_v13 = vld [vmem:[%s3909_s22 + $0x77] sm:$0xff]  ;;  %v195_v21 = vld [vmem:[%s3909_s22 + $0x6d] sm:$0xff] }
  0x9d   : > { %832 = vmatmul.f32.gmra.mxu3 %v754_v22 }
  0xa1   : > { %1045 = vmatmul.f32.gmra.mxu0 %v967_v25 }
  0xa3   : > { %445 = vmatmul.f32.gmra.mxu1 %v188_v27  ;;  %622 = vmatmul.f32.gmra.mxu2 %v753_v18  ;;  %v974_v18 = vld [vmem:[%s3909_s22 + $0x78] sm:$0xff] }
  0xa5   : > { %835 = vmatmul.f32.gmra.mxu3 %v755_v28 }
  0xa8   : > { %v4225_v31 = vpop.f32.mrf.mxu1 }
  0xa9   : > { %1048 = vmatmul.f32.gmra.mxu0 %v968_v30  ;;  %v763_v30 = vld [vmem:[%s3909_s22 + $0x87] sm:$0xff] }
  0xab   : > { %448 = vmatmul.f32.gmra.mxu1 %v189_v32  ;;  %625 = vmatmul.f32.gmra.mxu2 %v754_v22  ;;  %v762_v22 = vld [vmem:[%s3909_s22 + $0x7f] sm:$0xff] }
  0xac   : > { %v1431_v32 = vld [vmem:[%s5804_s1 + $0x338] sm:$0xff] }
  0xad   : > { %838 = vmatmul.f32.gmra.mxu3 %v756_v33  ;;  %1448 = vmatpush.msra.mxu2 %v1431_v32 }
  0xae   : > { %v4232_v35 = vpop.f32.mrf.mxu2  ;;  %v4234_v36 = vpop.f32.mrf.mxu0 }
  0xb0   : > { %v4240_v39 = vpop.f32.mrf.mxu1  ;;  %v4242_v40 = vpop.f32.mrf.mxu3 }
  0xb1   : > { %1051 = vmatmul.f32.gmra.mxu0 %v969_v37 }
  0xb3   : > { %451 = vmatmul.f32.gmra.mxu1 %v190_v41  ;;  %628 = vmatmul.f32.gmra.mxu2 %v755_v28  ;;  %v1218_v41 = vld [vmem:[%s5804_s1 + $0x2b8] sm:$0xff] }
  0xb4   : > { %1235 = vmatpush.msra.mxu1 %v1218_v41 }
  0xb5   : > { %841 = vmatmul.f32.gmra.mxu3 %v757_v43 }
  0xb6   : > { %v4249_v44 = vpop.f32.mrf.mxu2  ;;  %v4251_v45 = vpop.f32.mrf.mxu0 }
  0xb8   : > { %v4257_v48 = vpop.f32.mrf.mxu1  ;;  %v4259_v49 = vpop.f32.mrf.mxu3 }
  0xb9   : > { %1054 = vmatmul.f32.gmra.mxu0 %v970_v46  ;;  %v197_v46 = vld [vmem:[%s3909_s22 + $0x7d] sm:$0xff] }
  0xbb   : > { %454 = vmatmul.f32.gmra.mxu1 %v191_v50  ;;  %631 = vmatmul.f32.gmra.mxu2 %v756_v33  ;;  %v1644_v33 = vld [vmem:[%s5804_s1 + $0x3b8] sm:$0xff] }
  0xbc   : > { %1661 = vmatpush.msra.mxu3 %v1644_v33  ;;  %v1857_v50 = vld [vmem:[%s5804_s1 + $0x438] sm:$0xff]  ;;  %v1856_v33 = vld [vmem:[%s5804_s1 + $0x430] sm:$0xff] }
  0xbd   : > { %844 = vmatmul.f32.gmra.mxu3 %v758_v51  ;;  %1874 = vmatpush.msra.mxu0 %v1857_v50 }
  0xbe   : > { %v4263_v52 = vpop.f32.mrf.mxu2  ;;  %v4265_v53 = vpop.f32.mrf.mxu0  ;;  %1662 = vmatpush.msra.mxu3 %v1643_v12 }
  0xbf   : > { %1875 = vmatpush.msra.mxu0 %v1856_v33 }
  0xc0   : > { %v4271_v56 = vpop.f32.mrf.mxu1  ;;  %v4273_v57 = vpop.f32.mrf.mxu3 }
  0xc1   : > { %1057 = vmatmul.f32.gmra.mxu0 %v971_v54 }
  0xc3   : > { %457 = vmatmul.f32.gmra.mxu1 %v192_v58  ;;  %634 = vmatmul.f32.gmra.mxu2 %v757_v43 }
  0xc5   : > { %847 = vmatmul.f32.gmra.mxu3 %v759_v60 }
  0xc6   : > { %v4283_v62 = vpop.f32.mrf.mxu2  ;;  %v4285_v63 = vpop.f32.mrf.mxu0 }
  0xc8   : > { %v4288_v1 = vpop.f32.mrf.mxu1  ;;  %v4290_v2 = vpop.f32.mrf.mxu3 }
  0xc9   : > { %1060 = vmatmul.f32.gmra.mxu0 %v972_v0 }
  0xcb   : > { %460 = vmatmul.f32.gmra.mxu1 %v193_v3  ;;  %637 = vmatmul.f32.gmra.mxu2 %v758_v51  ;;  %v1430_v3 = vld [vmem:[%s5804_s1 + $0x330] sm:$0xff] }
  0xcc   : > { %1449 = vmatpush.msra.mxu2 %v1430_v3 }
  0xcd   : > { %850 = vmatmul.f32.gmra.mxu3 %v760_v5 }
  0xce   : > { %v4297_v6 = vpop.f32.mrf.mxu2  ;;  %v4299_v7 = vpop.f32.mrf.mxu0 }
  0xd0   : > { %v4302_v9 = vpop.f32.mrf.mxu1  ;;  %v4304_v10 = vpop.f32.mrf.mxu3 }
  0xd1   : > { %1063 = vmatmul.f32.gmra.mxu0 %v973_v8  ;;  %v978_v8 = vld [vmem:[%s3909_s22 + $0x98] sm:$0xff] }
  0xd3   : > { %463 = vmatmul.f32.gmra.mxu1 %v194_v11  ;;  %640 = vmatmul.f32.gmra.mxu2 %v759_v60  ;;  %v198_v60 = vld [vmem:[%s3909_s22 + $0x85] sm:$0xff] }
  0xd5   : > { %853 = vmatmul.f32.gmra.mxu3 %v761_v13 }
  0xd6   : > { %v4317_v16 = vpop.f32.mrf.mxu2  ;;  %v4319_v17 = vpop.f32.mrf.mxu0 }
  0xd8   : > { %v4322_v19 = vpop.f32.mrf.mxu1  ;;  %v4324_v20 = vpop.f32.mrf.mxu3 }
  0xd9   : > { %1066 = vmatmul.f32.gmra.mxu0 %v974_v18  ;;  %v1217_v18 = vld [vmem:[%s5804_s1 + $0x2b0] sm:$0xff] }
  0xda   : > { %1236 = vmatpush.msra.mxu1 %v1217_v18 }
  0xdb   : > { %466 = vmatmul.f32.gmra.mxu1 %v195_v21  ;;  %643 = vmatmul.f32.gmra.mxu2 %v760_v5  ;;  %v766_v21 = vld [vmem:[%s3909_s22 + $0x9f] sm:$0xff] }
  0xdd   : > { %856 = vmatmul.f32.gmra.mxu3 %v762_v22 }
  0xde   : > { %v4331_v24 = vpop.f32.mrf.mxu2  ;;  %v4333_v25 = vpop.f32.mrf.mxu0 }
  0xe0   : > { %v4336_v27 = vpop.f32.mrf.mxu1  ;;  %v4338_v28 = vpop.f32.mrf.mxu3 }
  0xe1   : > { %1069 = vmatmul.f32.gmra.mxu0 %v975_v26 }
  0xe3   : > { %469 = vmatmul.f32.gmra.mxu1 %v196_v29  ;;  %646 = vmatmul.f32.gmra.mxu2 %v761_v13 }
  0xe5   : > { %859 = vmatmul.f32.gmra.mxu3 %v763_v30 }
  0xe6   : > { %v4348_v34 = vpop.f32.mrf.mxu2  ;;  %v4350_v37 = vpop.f32.mrf.mxu0 }
  0xe8   : > { %v4356_v42 = vpop.f32.mrf.mxu1  ;;  %v4358_v43 = vpop.f32.mrf.mxu3 }
  0xe9   : > { %1072 = vmatmul.f32.gmra.mxu0 %v976_v38 }
  0xeb   : > { %472 = vmatmul.f32.gmra.mxu1 %v197_v46  ;;  %649 = vmatmul.f32.gmra.mxu2 %v762_v22  ;;  %v200_v46 = vld [vmem:[%s3909_s22 + $0x95] sm:$0xff] }
  0xed   : > { %862 = vmatmul.f32.gmra.mxu3 %v764_v47 }
  0xee   : > { %v4365_v51 = vpop.f32.mrf.mxu2  ;;  %v4367_v54 = vpop.f32.mrf.mxu0 }
  0xf0   : > { %v4370_v58 = vpop.f32.mrf.mxu3  ;;  %v428_v59 = vpop.f32.mrf.mxu1 }
  0xf1   : > { %1075 = vmatmul.f32.gmra.mxu0 %v977_v55  ;;  %v429_v0 = vadd.f32 %v428_v59, %v4234_v36 }
  0xf3   : > { %475 = vmatmul.f32.gmra.mxu1 %v198_v60  ;;  %652 = vmatmul.f32.gmra.mxu2 %v763_v30  ;;  %v979_v30 = vld [vmem:[%s3909_s22 + $0xa0] sm:$0xff] }
  0xf5   : > { %865 = vmatmul.f32.gmra.mxu3 %v765_v61 }
  0xf6   : > { %v605_v4 = vpop.f32.mrf.mxu2  ;;  %v1031_v5 = vpop.f32.mrf.mxu0 }
  0xf7   : > { %v713_v11 = vadd.f32 %v605_v4, %v429_v0  ;;  %v980_v0 = vld [vmem:[%s3909_s22 + $0xa8] sm:$0xff] }
  0xf8   : > { %v431_v13 = vpop.f32.mrf.mxu1  ;;  %v818_v14 = vpop.f32.mrf.mxu3  ;;  %v1429_v4 = vld [vmem:[%s5804_s1 + $0x328] sm:$0xff] }
  0xf9   : > { %v926_v36 = vadd.f32 %v818_v14, %v713_v11  ;;  %1078 = vmatmul.f32.gmra.mxu0 %v978_v8  ;;  %v432_v23 = vadd.f32 %v431_v13, %v4251_v45  ;;  %v201_v11 = vld [vmem:[%s3909_s22 + $0x9d] sm:$0xff]  ;;  %1450 = vmatpush.msra.mxu2 %v1429_v4  ;;  %v1216_v14 = vld [vmem:[%s5804_s1 + $0x2a8] sm:$0xff] }
  0xfa   : > { %1237 = vmatpush.msra.mxu1 %v1216_v14 }
  0xfb   : > { %v4387_v22 = vadd.f32 %v1031_v5, %v926_v36  ;;  %478 = vmatmul.f32.gmra.mxu1 %v199_v15  ;;  %655 = vmatmul.f32.gmra.mxu2 %v764_v47  ;;  %v767_v47 = vld [vmem:[%s3909_s22 + $0xa7] sm:$0xff] }
  0xfd   : > { %868 = vmatmul.f32.gmra.mxu3 %v766_v21 }
  0xfe   : > { %v608_v26 = vpop.f32.mrf.mxu2  ;;  %v1034_v29 = vpop.f32.mrf.mxu0 }
  0xff   : > { %v714_v32 = vadd.f32 %v608_v26, %v432_v23  ;;  %v981_v23 = vld [vmem:[%s3909_s22 + $0xb0] sm:$0xff] }
 0x100   : > { %v434_v38 = vpop.f32.mrf.mxu1  ;;  %v821_v41 = vpop.f32.mrf.mxu3 }
 0x101   : > { %v927_v50 = vadd.f32 %v821_v41, %v714_v32  ;;  %1081 = vmatmul.f32.gmra.mxu0 %v979_v30  ;;  %v435_v45 = vadd.f32 %v434_v38, %v4265_v53  ;;  %v1642_v53 = vld [vmem:[%s5804_s1 + $0x3a8] sm:$0xff]  ;;  %v769_v38 = vld [vmem:[%s3909_s22 + $0xb7] sm:$0xff] }
 0x102   : > { %1663 = vmatpush.msra.mxu3 %v1642_v53  ;;  %v202_v32 = vld [vmem:[%s3909_s22 + $0xa5] sm:$0xff] }
 0x103   : > { %v4396_v55 = vadd.f32 %v1034_v29, %v927_v50  ;;  %481 = vmatmul.f32.gmra.mxu1 %v200_v46  ;;  %658 = vmatmul.f32.gmra.mxu2 %v765_v61  ;;  %v768_v61 = vld [vmem:[%s3909_s22 + $0xaf] sm:$0xff] }
 0x105   : > { %871 = vmatmul.f32.gmra.mxu3 %v767_v47 }
 0x106   : > { %v611_v59 = vpop.f32.mrf.mxu2  ;;  %v1037_v60 = vpop.f32.mrf.mxu0 }
 0x107   : > { %v715_v3 = vadd.f32 %v611_v59, %v435_v45  ;;  %v982_v45 = vld [vmem:[%s3909_s22 + $0xb8] sm:$0xff] }
 0x108   : > { %v437_v5 = vpop.f32.mrf.mxu1  ;;  %v824_v8 = vpop.f32.mrf.mxu3 }
 0x109   : > { %v928_v12 = vadd.f32 %v824_v8, %v715_v3  ;;  %1084 = vmatmul.f32.gmra.mxu0 %v980_v0  ;;  %v438_v15 = vadd.f32 %v437_v5, %v4285_v63  ;;  %v203_v3 = vld [vmem:[%s3909_s22 + $0xad] sm:$0xff]  ;;  %v1428_v5 = vld [vmem:[%s5804_s1 + $0x320] sm:$0xff] }
 0x10a   : > { %v770_v8 = vld [vmem:[%s3909_s22 + $0xbf] sm:$0xff]  ;;  %1451 = vmatpush.msra.mxu2 %v1428_v5 }
 0x10b   : > { %v4408_v13 = vadd.f32 %v1037_v60, %v928_v12  ;;  %484 = vmatmul.f32.gmra.mxu1 %v201_v11  ;;  %661 = vmatmul.f32.gmra.mxu2 %v766_v21  ;;  %v1855_v21 = vld [vmem:[%s5804_s1 + $0x428] sm:$0xff]  ;;  %v1215_v12 = vld [vmem:[%s5804_s1 + $0x2a0] sm:$0xff] }
 0x10c   : > { %1876 = vmatpush.msra.mxu0 %v1855_v21  ;;  %1238 = vmatpush.msra.mxu1 %v1215_v12 }
 0x10d   : > { %874 = vmatmul.f32.gmra.mxu3 %v768_v61 }
 0x10e   : > { %v614_v36 = vpop.f32.mrf.mxu2  ;;  %v1040_v18 = vpop.f32.mrf.mxu0 }
 0x10f   : > { %v716_v26 = vadd.f32 %v614_v36, %v438_v15  ;;  %v983_v15 = vld [vmem:[%s3909_s22 + $0xc0] sm:$0xff] }
 0x110   : > { %v440_v29 = vpop.f32.mrf.mxu1  ;;  %v827_v30 = vpop.f32.mrf.mxu3 }
 0x111   : > { %v929_v33 = vadd.f32 %v827_v30, %v716_v26  ;;  %1087 = vmatmul.f32.gmra.mxu0 %v981_v23  ;;  %v441_v41 = vadd.f32 %v440_v29, %v4299_v7  ;;  %v1641_v7 = vld [vmem:[%s5804_s1 + $0x3a0] sm:$0xff]  ;;  %v204_v23 = vld [vmem:[%s3909_s22 + $0xb5] sm:$0xff] }
 0x112   : > { %1664 = vmatpush.msra.mxu3 %v1641_v7  ;;  %v771_v29 = vld [vmem:[%s3909_s22 + $0xc7] sm:$0xff] }
 0x113   : > { %v4420_v63 = vadd.f32 %v1040_v18, %v929_v33  ;;  %487 = vmatmul.f32.gmra.mxu1 %v202_v32  ;;  %664 = vmatmul.f32.gmra.mxu2 %v767_v47 }
 0x115   : > { %877 = vmatmul.f32.gmra.mxu3 %v769_v38 }
 0x116   : > { %v617_v46 = vpop.f32.mrf.mxu2  ;;  %v1043_v50 = vpop.f32.mrf.mxu0 }
 0x117   : > { %v717_v59 = vadd.f32 %v617_v46, %v441_v41  ;;  %v984_v41 = vld [vmem:[%s3909_s22 + $0xc8] sm:$0xff] }
 0x118   : > { %v443_v60 = vpop.f32.mrf.mxu1  ;;  %v830_v0 = vpop.f32.mrf.mxu3 }
 0x119   : > { %v930_v4 = vadd.f32 %v830_v0, %v717_v59  ;;  %1090 = vmatmul.f32.gmra.mxu0 %v982_v45  ;;  %v444_v11 = vadd.f32 %v443_v60, %v4319_v17  ;;  %v1854_v17 = vld [vmem:[%s5804_s1 + $0x420] sm:$0xff]  ;;  %v772_v0 = vld [vmem:[%s3909_s22 + $0xcf] sm:$0xff] }
 0x11a   : > { %1877 = vmatpush.msra.mxu0 %v1854_v17  ;;  %v205_v59 = vld [vmem:[%s3909_s22 + $0xbd] sm:$0xff] }
 0x11b   : > { %v4429_v47 = vadd.f32 %v1043_v50, %v930_v4  ;;  %490 = vmatmul.f32.gmra.mxu1 %v203_v3  ;;  %667 = vmatmul.f32.gmra.mxu2 %v768_v61  ;;  %v1640_v4 = vld [vmem:[%s5804_s1 + $0x398] sm:$0xff] }
 0x11c   : > { %1665 = vmatpush.msra.mxu3 %v1640_v4 }
 0x11d   : > { %880 = vmatmul.f32.gmra.mxu3 %v770_v8 }
 0x11e   : > { %v620_v53 = vpop.f32.mrf.mxu2  ;;  %v1046_v14 = vpop.f32.mrf.mxu0 }
 0x11f   : > { %v718_v36 = vadd.f32 %v620_v53, %v444_v11  ;;  %v985_v11 = vld [vmem:[%s3909_s22 + $0xd0] sm:$0xff] }
 0x120   : > { %v446_v61 = vpop.f32.mrf.mxu1  ;;  %v833_v18 = vpop.f32.mrf.mxu3 }
 0x121   : > { %v931_v26 = vadd.f32 %v833_v18, %v718_v36  ;;  %1093 = vmatmul.f32.gmra.mxu0 %v983_v15  ;;  %v447_v32 = vadd.f32 %v446_v61, %v4333_v25  ;;  %v1427_v25 = vld [vmem:[%s5804_s1 + $0x318] sm:$0xff]  ;;  %v206_v15 = vld [vmem:[%s3909_s22 + $0xc5] sm:$0xff] }
 0x122   : > { %1452 = vmatpush.msra.mxu2 %v1427_v25  ;;  %v773_v36 = vld [vmem:[%s3909_s22 + $0xd7] sm:$0xff] }
 0x123   : > { %v4441_v30 = vadd.f32 %v1046_v14, %v931_v26  ;;  %493 = vmatmul.f32.gmra.mxu1 %v204_v23  ;;  %670 = vmatmul.f32.gmra.mxu2 %v769_v38  ;;  %v1853_v23 = vld [vmem:[%s5804_s1 + $0x418] sm:$0xff] }
 0x124   : > { %1878 = vmatpush.msra.mxu0 %v1853_v23 }
 0x125   : > { %883 = vmatmul.f32.gmra.mxu3 %v771_v29 }
 0x126   : > { %v623_v33 = vpop.f32.mrf.mxu2  ;;  %v1049_v21 = vpop.f32.mrf.mxu0 }
 0x127   : > { %v719_v46 = vadd.f32 %v623_v33, %v447_v32  ;;  %v986_v32 = vld [vmem:[%s3909_s22 + $0xd8] sm:$0xff] }
 0x128   : > { %v449_v50 = vpop.f32.mrf.mxu1  ;;  %v836_v45 = vpop.f32.mrf.mxu3 }
 0x129   : > { %v932_v60 = vadd.f32 %v836_v45, %v719_v46  ;;  %1096 = vmatmul.f32.gmra.mxu0 %v984_v41  ;;  %v450_v3 = vadd.f32 %v449_v50, %v4350_v37  ;;  %v207_v46 = vld [vmem:[%s3909_s22 + $0xcd] sm:$0xff] }
 0x12b   : > { %v4450_v38 = vadd.f32 %v1049_v21, %v932_v60  ;;  %496 = vmatmul.f32.gmra.mxu1 %v205_v59  ;;  %673 = vmatmul.f32.gmra.mxu2 %v770_v8  ;;  %v1214_v8 = vld [vmem:[%s5804_s1 + $0x298] sm:$0xff]  ;;  %v1426_v59 = vld [vmem:[%s5804_s1 + $0x310] sm:$0xff] }
 0x12c   : > { %1239 = vmatpush.msra.mxu1 %v1214_v8  ;;  %1453 = vmatpush.msra.mxu2 %v1426_v59  ;;  %v775_v8 = vld [vmem:[%s3909_s22 + $0xe7] sm:$0xff] }
 0x12d   : > { %886 = vmatmul.f32.gmra.mxu3 %v772_v0 }
 0x12e   : > { %v626_v5 = vpop.f32.mrf.mxu2  ;;  %v1052_v7 = vpop.f32.mrf.mxu0 }
 0x12f   : > { %v720_v12 = vadd.f32 %v626_v5, %v450_v3  ;;  %v987_v3 = vld [vmem:[%s3909_s22 + $0xe0] sm:$0xff]  ;;  %v1639_v5 = vld [vmem:[%s5804_s1 + $0x390] sm:$0xff] }
 0x130   : > { %v452_v53 = vpop.f32.mrf.mxu1  ;;  %v839_v14 = vpop.f32.mrf.mxu3  ;;  %1666 = vmatpush.msra.mxu3 %v1639_v5 }
 0x131   : > { %v933_v37 = vadd.f32 %v839_v14, %v720_v12  ;;  %1099 = vmatmul.f32.gmra.mxu0 %v985_v11  ;;  %v453_v18 = vadd.f32 %v452_v53, %v4367_v54  ;;  %v208_v11 = vld [vmem:[%s3909_s22 + $0xd5] sm:$0xff] }
 0x132   : > { %v1213_v12 = vld [vmem:[%s5804_s1 + $0x290] sm:$0xff] }
 0x133   : > { %v4465_v61 = vadd.f32 %v1052_v7, %v933_v37  ;;  %499 = vmatmul.f32.gmra.mxu1 %v206_v15  ;;  %676 = vmatmul.f32.gmra.mxu2 %v771_v29  ;;  %v774_v29 = vld [vmem:[%s3909_s22 + $0xdf] sm:$0xff] }
 0x134   : > { %1240 = vmatpush.msra.mxu1 %v1213_v12 }
 0x135   : > { %889 = vmatmul.f32.gmra.mxu3 %v773_v36 }
 0x136   : > { %v629_v26 = vpop.f32.mrf.mxu2  ;;  %v1055_v17 = vpop.f32.mrf.mxu0 }
 0x137   : > { %v721_v33 = vadd.f32 %v629_v26, %v453_v18  ;;  %v988_v18 = vld [vmem:[%s3909_s22 + $0xe8] sm:$0xff]  ;;  %v1852_v26 = vld [vmem:[%s5804_s1 + $0x410] sm:$0xff] }
 0x138   : > { %v455_v21 = vpop.f32.mrf.mxu1  ;;  %v842_v41 = vpop.f32.mrf.mxu3  ;;  %1879 = vmatpush.msra.mxu0 %v1852_v26 }
 0x139   : > { %v934_v50 = vadd.f32 %v842_v41, %v721_v33  ;;  %1102 = vmatmul.f32.gmra.mxu0 %v986_v32  ;;  %v456_v54 = vadd.f32 %v455_v21, %v4225_v31  ;;  %v209_v33 = vld [vmem:[%s3909_s22 + $0xdd] sm:$0xff] }
 0x13b   : > { %v4474_v45 = vadd.f32 %v1055_v17, %v934_v50  ;;  %502 = vmatmul.f32.gmra.mxu1 %v207_v46  ;;  %679 = vmatmul.f32.gmra.mxu2 %v772_v0 }
 0x13d   : > { %892 = vmatmul.f32.gmra.mxu3 %v774_v29 }
 0x13e   : > { %v632_v60 = vpop.f32.mrf.mxu2  ;;  %v1058_v25 = vpop.f32.mrf.mxu0 }
 0x13f   : > { %v722_v4 = vadd.f32 %v632_v60, %v456_v54  ;;  %v989_v54 = vld [vmem:[%s3909_s22 + $0xf0] sm:$0xff]  ;;  %v1425_v60 = vld [vmem:[%s5804_s1 + $0x308] sm:$0xff] }
 0x140   : > { %v458_v7 = vpop.f32.mrf.mxu1  ;;  %v845_v0 = vpop.f32.mrf.mxu3  ;;  %1454 = vmatpush.msra.mxu2 %v1425_v60 }
 0x141   : > { %v935_v31 = vadd.f32 %v845_v0, %v722_v4  ;;  %1105 = vmatmul.f32.gmra.mxu0 %v987_v3  ;;  %v459_v14 = vadd.f32 %v458_v7, %v4240_v39  ;;  %v210_v4 = vld [vmem:[%s3909_s22 + $0xe5] sm:$0xff] }
 0x142   : > { %v1212_v0 = vld [vmem:[%s5804_s1 + $0x288] sm:$0xff] }
 0x143   : > { %v4489_v53 = vadd.f32 %v1058_v25, %v935_v31  ;;  %505 = vmatmul.f32.gmra.mxu1 %v208_v11  ;;  %682 = vmatmul.f32.gmra.mxu2 %v773_v36  ;;  %v776_v36 = vld [vmem:[%s3909_s22 + $0xef] sm:$0xff] }
 0x144   : > { %1241 = vmatpush.msra.mxu1 %v1212_v0 }
 0x145   : > { %895 = vmatmul.f32.gmra.mxu3 %v775_v8 }
 0x146   : > { %v635_v15 = vpop.f32.mrf.mxu2  ;;  %v1061_v37 = vpop.f32.mrf.mxu0 }
 0x147   : > { %v723_v23 = vadd.f32 %v635_v15, %v459_v14  ;;  %v990_v14 = vld [vmem:[%s3909_s22 + $0xf8] sm:$0xff] }
 0x148   : > { %v461_v17 = vpop.f32.mrf.mxu1  ;;  %v848_v32 = vpop.f32.mrf.mxu3 }
 0x149   : > { %v936_v21 = vadd.f32 %v848_v32, %v723_v23  ;;  %1108 = vmatmul.f32.gmra.mxu0 %v988_v18  ;;  %v462_v39 = vadd.f32 %v461_v17, %v4257_v48  ;;  %v1638_v48 = vld [vmem:[%s5804_s1 + $0x388] sm:$0xff]  ;;  %v778_v17 = vld [vmem:[%s3909_s22 + $0xff] sm:$0xff] }
 0x14a   : > { %1667 = vmatpush.msra.mxu3 %v1638_v48  ;;  %v211_v23 = vld [vmem:[%s3909_s22 + $0xed] sm:$0xff] }
 0x14b   : > { %v4498_v41 = vadd.f32 %v1061_v37, %v936_v21  ;;  %508 = vmatmul.f32.gmra.mxu1 %v209_v33  ;;  %685 = vmatmul.f32.gmra.mxu2 %v774_v29  ;;  %v777_v29 = vld [vmem:[%s3909_s22 + $0xf7] sm:$0xff] }
 0x14d   : > { %898 = vmatmul.f32.gmra.mxu3 %v776_v36 }
 0x14e   : > { %v638_v46 = vpop.f32.mrf.mxu2  ;;  %v1064_v50 = vpop.f32.mrf.mxu0 }
 0x14f   : > { %v724_v59 = vadd.f32 %v638_v46, %v462_v39  ;;  %v991_v39 = vld [vmem:[%s3909_s22 + $0x100] sm:$0xff] }
 0x150   : > { %v464_v25 = vpop.f32.mrf.mxu1  ;;  %v851_v3 = vpop.f32.mrf.mxu3 }
 0x151   : > { %v937_v5 = vadd.f32 %v851_v3, %v724_v59  ;;  %1111 = vmatmul.f32.gmra.mxu0 %v989_v54  ;;  %v465_v11 = vadd.f32 %v464_v25, %v4271_v56  ;;  %v212_v59 = vld [vmem:[%s3909_s22 + $0xf5] sm:$0xff]  ;;  %v1424_v25 = vld [vmem:[%s5804_s1 + $0x300] sm:$0xff] }
 0x152   : > { %v779_v3 = vld [vmem:[%s3909_s22 + $0x107] sm:$0xff]  ;;  %1455 = vmatpush.msra.mxu2 %v1424_v25  ;;  %v994_v25 = vld [vmem:[%s3909_s22 + $0x118] sm:$0xff] }
 0x153   : > { %v4510_v7 = vadd.f32 %v1064_v50, %v937_v5  ;;  %511 = vmatmul.f32.gmra.mxu1 %v210_v4  ;;  %688 = vmatmul.f32.gmra.mxu2 %v775_v8  ;;  %v1851_v8 = vld [vmem:[%s5804_s1 + $0x408] sm:$0xff]  ;;  %v1211_v5 = vld [vmem:[%s5804_s1 + $0x280] sm:$0xff] }
 0x154   : > { %1880 = vmatpush.msra.mxu0 %v1851_v8  ;;  %1242 = vmatpush.msra.mxu1 %v1211_v5 }
 0x155   : > { %901 = vmatmul.f32.gmra.mxu3 %v777_v29 }
 0x156   : > { %v641_v31 = vpop.f32.mrf.mxu2  ;;  %v1067_v12 = vpop.f32.mrf.mxu0 }
 0x157   : > { %v725_v15 = vadd.f32 %v641_v31, %v465_v11  ;;  %v992_v11 = vld [vmem:[%s3909_s22 + $0x108] sm:$0xff] }
 0x158   : > { %v467_v37 = vpop.f32.mrf.mxu1  ;;  %v854_v18 = vpop.f32.mrf.mxu3 }
 0x159   : > { %v938_v26 = vadd.f32 %v854_v18, %v725_v15  ;;  %1114 = vmatmul.f32.gmra.mxu0 %v990_v14  ;;  %v468_v32 = vadd.f32 %v467_v37, %v4288_v1  ;;  %v1637_v1 = vld [vmem:[%s5804_s1 + $0x380] sm:$0xff]  ;;  %v780_v37 = vld [vmem:[%s3909_s22 + $0x10f] sm:$0xff] }
 0x15a   : > { %1668 = vmatpush.msra.mxu3 %v1637_v1  ;;  %v213_v14 = vld [vmem:[%s3909_s22 + $0xfd] sm:$0xff] }
 0x15b   : > { %v4522_v56 = vadd.f32 %v1067_v12, %v938_v26  ;;  %514 = vmatmul.f32.gmra.mxu1 %v211_v23  ;;  %691 = vmatmul.f32.gmra.mxu2 %v776_v36 }
 0x15d   : > { %904 = vmatmul.f32.gmra.mxu3 %v778_v17 }
 0x15e   : > { %v644_v33 = vpop.f32.mrf.mxu2  ;;  %v1070_v21 = vpop.f32.mrf.mxu0 }
 0x15f   : > { %v726_v46 = vadd.f32 %v644_v33, %v468_v32  ;;  %v993_v32 = vld [vmem:[%s3909_s22 + $0x110] sm:$0xff] }
 0x160   : > { %v470_v50 = vpop.f32.mrf.mxu1  ;;  %v857_v54 = vpop.f32.mrf.mxu3 }
 0x161   : > { %v939_v60 = vadd.f32 %v857_v54, %v726_v46  ;;  %1117 = vmatmul.f32.gmra.mxu0 %v991_v39  ;;  %v471_v4 = vadd.f32 %v470_v50, %v4302_v9  ;;  %v1850_v9 = vld [vmem:[%s5804_s1 + $0x400] sm:$0xff] }
 0x162   : > { %1881 = vmatpush.msra.mxu0 %v1850_v9  ;;  %v214_v46 = vld [vmem:[%s3909_s22 + $0x105] sm:$0xff] }
 0x163   : > { %v4531_v36 = vadd.f32 %v1070_v21, %v939_v60  ;;  %517 = vmatmul.f32.gmra.mxu1 %v212_v59  ;;  %694 = vmatmul.f32.gmra.mxu2 %v777_v29 }
 0x165   : > { %907 = vmatmul.f32.gmra.mxu3 %v779_v3 }
 0x166   : > { %v647_v48 = vpop.f32.mrf.mxu2  ;;  %v1073_v0 = vpop.f32.mrf.mxu0 }
 0x167   : > { %v727_v31 = vadd.f32 %v647_v48, %v471_v4  ;;  %v215_v48 = vld [vmem:[%s3909_s22 + $0x10d] sm:$0xff] }
 0x168   : > { %v473_v29 = vpop.f32.mrf.mxu1  ;;  %v860_v12 = vpop.f32.mrf.mxu3 }
 0x169   : > { %v940_v15 = vadd.f32 %v860_v12, %v727_v31  ;;  %1120 = vmatmul.f32.gmra.mxu0 %v992_v11  ;;  %v474_v23 = vadd.f32 %v473_v29, %v4322_v19  ;;  %v782_v11 = vld [vmem:[%s3909_s22 + $0x11f] sm:$0xff] }
 0x16a   : > { %v995_v12 = vld [vmem:[%s3909_s22 + $0x120] sm:$0xff] }
 0x16b   : > { %v4543_v18 = vadd.f32 %v1073_v0, %v940_v15  ;;  %520 = vmatmul.f32.gmra.mxu1 %v213_v14  ;;  %697 = vmatmul.f32.gmra.mxu2 %v778_v17  ;;  %v781_v17 = vld [vmem:[%s3909_s22 + $0x117] sm:$0xff] }
 0x16d   : > { %910 = vmatmul.f32.gmra.mxu3 %v780_v37 }
 0x16e   : > { %v650_v26 = vpop.f32.mrf.mxu2  ;;  %v1076_v8 = vpop.f32.mrf.mxu0 }
 0x16f   : > { %v728_v33 = vadd.f32 %v650_v26, %v474_v23  ;;  %v216_v23 = vld [vmem:[%s3909_s22 + $0x115] sm:$0xff] }
 0x170   : > { %v476_v21 = vpop.f32.mrf.mxu1  ;;  %v863_v39 = vpop.f32.mrf.mxu3 }
 0x171   : > { %v941_v50 = vadd.f32 %v863_v39, %v728_v33  ;;  %1123 = vmatmul.f32.gmra.mxu0 %v993_v32  ;;  %v477_v19 = vadd.f32 %v476_v21, %v4336_v27  ;;  %v996_v21 = vld [vmem:[%s3909_s22 + $0x128] sm:$0xff] }
 0x173   : > { %v4552_v54 = vadd.f32 %v1076_v8, %v941_v50  ;;  %523 = vmatmul.f32.gmra.mxu1 %v214_v46  ;;  %700 = vmatmul.f32.gmra.mxu2 %v779_v3  ;;  %v783_v8 = vld [vmem:[%s3909_s22 + $0x127] sm:$0xff] }
 0x175   : > { %913 = vmatmul.f32.gmra.mxu3 %v781_v17 }
 0x176   : > { %v653_v59 = vpop.f32.mrf.mxu2  ;;  %v1079_v60 = vpop.f32.mrf.mxu0 }
 0x177   : > { %v729_v1 = vadd.f32 %v653_v59, %v477_v19  ;;  %v217_v19 = vld [vmem:[%s3909_s22 + $0x11d] sm:$0xff] }
 0x178   : > { %v479_v4 = vpop.f32.mrf.mxu1  ;;  %v866_v5 = vpop.f32.mrf.mxu3 }
 0x179   : > { %v942_v0 = vadd.f32 %v866_v5, %v729_v1  ;;  %1126 = vmatmul.f32.gmra.mxu0 %v994_v25  ;;  %v480_v27 = vadd.f32 %v479_v4, %v4356_v42  ;;  %v997_v4 = vld [vmem:[%s3909_s22 + $0x130] sm:$0xff] }
 0x17b   : > { %v4558_v31 = vadd.f32 %v1079_v60, %v942_v0  ;;  %526 = vmatmul.f32.gmra.mxu1 %v215_v48  ;;  %703 = vmatmul.f32.gmra.mxu2 %v780_v37  ;;  %v784_v60 = vld [vmem:[%s3909_s22 + $0x12f] sm:$0xff] }
 0x17d   : > { %916 = vmatmul.f32.gmra.mxu3 %v782_v11 }
 0x17e   : > { %v656_v3 = vpop.f32.mrf.mxu2  ;;  %v1082_v29 = vpop.f32.mrf.mxu0 }
 0x17f   : > { %v730_v14 = vadd.f32 %v656_v3, %v480_v27  ;;  %v1175_v27 = vld [vmem:[%s3909_s22 + $0x19] sm:$0xff]  ;;  %v1388_v3 = vld [vmem:[%s3909_s22 + $0x29] sm:$0xff] }
 0x180   : > { %v482_v15 = vpop.f32.mrf.mxu1  ;;  %v869_v9 = vpop.f32.mrf.mxu3 }
 0x181   : > { %v943_v26 = vadd.f32 %v869_v9, %v730_v14  ;;  %1129 = vmatmul.f32.gmra.mxu0 %v995_v12  ;;  %v483_v42 = vadd.f32 %v482_v15, %v4232_v35  ;;  %v1601_v12 = vld [vmem:[%s3909_s22 + $0x2a] sm:$0xff] }
 0x182   : > { %v1814_v9 = vld [vmem:[%s3909_s22 + $0x2b] sm:$0xff] }
 0x183   : > { %v4564_v32 = vadd.f32 %v1082_v29, %v943_v26  ;;  %529 = vmatmul.f32.gmra.mxu1 %v216_v23  ;;  %706 = vmatmul.f32.gmra.mxu2 %v781_v17 }
 0x185   : > { %919 = vmatmul.f32.gmra.mxu3 %v783_v8 }
 0x186   : > { %v659_v37 = vpop.f32.mrf.mxu2  ;;  %v1085_v33 = vpop.f32.mrf.mxu0 }
 0x187   : > { %v731_v39 = vadd.f32 %v659_v37, %v483_v42  ;;  %v1176_v42 = vld [vmem:[%s3909_s22 + $0x21] sm:$0xff]  ;;  %v1389_v37 = vld [vmem:[%s3909_s22 + $0x31] sm:$0xff] }
 0x188   : > { %v485_v46 = vpop.f32.mrf.mxu1  ;;  %v872_v50 = vpop.f32.mrf.mxu3 }
 0x189   : > { %v944_v59 = vadd.f32 %v872_v50, %v731_v39  ;;  %1132 = vmatmul.f32.gmra.mxu0 %v996_v21  ;;  %v486_v35 = vadd.f32 %v485_v46, %v4249_v44  ;;  %v1602_v21 = vld [vmem:[%s3909_s22 + $0x32] sm:$0xff] }
 0x18b   : > { %v4570_v25 = vadd.f32 %v1085_v33, %v944_v59  ;;  %532 = vmatmul.f32.gmra.mxu1 %v217_v19  ;;  %709 = vmatmul.f32.gmra.mxu2 %v782_v11  ;;  %v1815_v19 = vld [vmem:[%s3909_s22 + $0x33] sm:$0xff] }
 0x18d   : > { %922 = vmatmul.f32.gmra.mxu3 %v784_v60 }
 0x18e   : > { %v662_v17 = vpop.f32.mrf.mxu2  ;;  %v1088_v1 = vpop.f32.mrf.mxu0 }
 0x18f   : > { %v732_v5 = vadd.f32 %v662_v17, %v486_v35  ;;  %v1390_v17 = vld [vmem:[%s3909_s22 + $0x39] sm:$0xff] }
 0x190   : > { %v488_v48 = vpop.f32.mrf.mxu1  ;;  %v875_v0 = vpop.f32.mrf.mxu3 }
 0x191   : > { %v945_v29 = vadd.f32 %v875_v0, %v732_v5  ;;  %1135 = vmatmul.f32.gmra.mxu0 %v997_v4  ;;  %v489_v44 = vadd.f32 %v488_v48, %v4263_v52  ;;  %v1603_v4 = vld [vmem:[%s3909_s22 + $0x3a] sm:$0xff] }
 0x193   : > { %v4577_v14 = vadd.f32 %v1088_v1, %v945_v29  ;;  %1243 = vmatmul.f32.vlgmr.msra.gmra.mxu1 %v1175_v27  ;;  %1456 = vmatmul.f32.vlgmr.msra.gmra.mxu2 %v1388_v3  ;;  %v1816_v27 = vld [vmem:[%s3909_s22 + $0x3b] sm:$0xff] }
 0x195   : > { %1669 = vmatmul.f32.vlgmr.msra.gmra.mxu3 %v1601_v12 }
 0x196   : > { %v665_v11 = vpop.f32.mrf.mxu2  ;;  %v1091_v15 = vpop.f32.mrf.mxu0 }
 0x197   : > { %v733_v23 = vadd.f32 %v665_v11, %v489_v44  ;;  %v1391_v11 = vld [vmem:[%s3909_s22 + $0x41] sm:$0xff] }
 0x198   : > { %v491_v26 = vpop.f32.mrf.mxu1  ;;  %v878_v8 = vpop.f32.mrf.mxu3 }
 0x199   : > { %v946_v33 = vadd.f32 %v878_v8, %v733_v23  ;;  %1882 = vmatmul.f32.vlgmr.msra.gmra.mxu0 %v1814_v9  ;;  %v492_v52 = vadd.f32 %v491_v26, %v4283_v62  ;;  %v1604_v9 = vld [vmem:[%s3909_s22 + $0x42] sm:$0xff] }
 0x19a   : > { %v1817_v8 = vld [vmem:[%s3909_s22 + $0x43] sm:$0xff] }
 0x19b   : > { %v4584_v39 = vadd.f32 %v1091_v15, %v946_v33  ;;  %1246 = vmatmul.f32.gmra.mxu1 %v1176_v42  ;;  %1459 = vmatmul.f32.gmra.mxu2 %v1389_v37 }
 0x19d   : > { %1672 = vmatmul.f32.gmra.mxu3 %v1602_v21 }
 0x19e   : > { %v668_v46 = vpop.f32.mrf.mxu2  ;;  %v1094_v50 = vpop.f32.mrf.mxu0 }
 0x19f   : > { %v734_v59 = vadd.f32 %v668_v46, %v492_v52  ;;  %v1392_v52 = vld [vmem:[%s3909_s22 + $0x49] sm:$0xff] }
 0x1a0   : > { %v494_v60 = vpop.f32.mrf.mxu1  ;;  %v881_v35 = vpop.f32.mrf.mxu3 }
 0x1a1   : > { %v947_v1 = vadd.f32 %v881_v35, %v734_v59  ;;  %1885 = vmatmul.f32.gmra.mxu0 %v1815_v19  ;;  %v495_v62 = vadd.f32 %v494_v60, %v4297_v6  ;;  %v1818_v60 = vld [vmem:[%s3909_s22 + $0x4b] sm:$0xff] }
 0x1a3   : > { %v4590_v5 = vadd.f32 %v1094_v50, %v947_v1  ;;  %1249 = vmatmul.f32.gmra.mxu1 %v1388_v3  ;;  %1462 = vmatmul.f32.gmra.mxu2 %v1390_v17  ;;  %v1605_v50 = vld [vmem:[%s3909_s22 + $0x4a] sm:$0xff] }
 0x1a5   : > { %1675 = vmatmul.f32.gmra.mxu3 %v1603_v4 }
 0x1a6   : > { %v671_v48 = vpop.f32.mrf.mxu2  ;;  %v1097_v0 = vpop.f32.mrf.mxu0 }
 0x1a7   : > { %v735_v29 = vadd.f32 %v671_v48, %v495_v62  ;;  %v1393_v62 = vld [vmem:[%s3909_s22 + $0x51] sm:$0xff] }
 0x1a8   : > { %v497_v12 = vpop.f32.mrf.mxu1  ;;  %v884_v44 = vpop.f32.mrf.mxu3 }
 0x1a9   : > { %v948_v15 = vadd.f32 %v884_v44, %v735_v29  ;;  %1888 = vmatmul.f32.gmra.mxu0 %v1816_v27  ;;  %v498_v6 = vadd.f32 %v497_v12, %v4317_v16  ;;  %v1819_v12 = vld [vmem:[%s3909_s22 + $0x53] sm:$0xff] }
 0x1ab   : > { %v4596_v23 = vadd.f32 %v1097_v0, %v948_v15  ;;  %1252 = vmatmul.f32.gmra.mxu1 %v1389_v37  ;;  %1465 = vmatmul.f32.gmra.mxu2 %v1391_v11  ;;  %v1606_v0 = vld [vmem:[%s3909_s22 + $0x52] sm:$0xff] }
 0x1ad   : > { %1678 = vmatmul.f32.gmra.mxu3 %v1604_v9 }
 0x1ae   : > { %v674_v3 = vpop.f32.mrf.mxu2  ;;  %v1100_v26 = vpop.f32.mrf.mxu0 }
 0x1af   : > { %v736_v42 = vadd.f32 %v674_v3, %v498_v6  ;;  %v1394_v6 = vld [vmem:[%s3909_s22 + $0x59] sm:$0xff] }
 0x1b0   : > { %v500_v33 = vpop.f32.mrf.mxu1  ;;  %v887_v21 = vpop.f32.mrf.mxu3 }
 0x1b1   : > { %v949_v46 = vadd.f32 %v887_v21, %v736_v42  ;;  %1891 = vmatmul.f32.gmra.mxu0 %v1817_v8  ;;  %v501_v16 = vadd.f32 %v500_v33, %v4331_v24  ;;  %v1820_v33 = vld [vmem:[%s3909_s22 + $0x5b] sm:$0xff] }
 0x1b3   : > { %v4602_v19 = vadd.f32 %v1100_v26, %v949_v46  ;;  %1255 = vmatmul.f32.gmra.mxu1 %v1390_v17  ;;  %1468 = vmatmul.f32.gmra.mxu2 %v1392_v52  ;;  %v1607_v26 = vld [vmem:[%s3909_s22 + $0x5a] sm:$0xff] }
 0x1b5   : > { %1681 = vmatmul.f32.gmra.mxu3 %v1605_v50 }
 0x1b6   : > { %v677_v37 = vpop.f32.mrf.mxu2  ;;  %v1103_v59 = vpop.f32.mrf.mxu0 }
 0x1b7   : > { %v737_v35 = vadd.f32 %v677_v37, %v501_v16  ;;  %v1395_v16 = vld [vmem:[%s3909_s22 + $0x61] sm:$0xff] }
 0x1b8   : > { %v503_v1 = vpop.f32.mrf.mxu1  ;;  %v890_v4 = vpop.f32.mrf.mxu3 }
 0x1b9   : > { %v950_v48 = vadd.f32 %v890_v4, %v737_v35  ;;  %1894 = vmatmul.f32.gmra.mxu0 %v1818_v60  ;;  %v504_v24 = vadd.f32 %v503_v1, %v4348_v34  ;;  %v1821_v1 = vld [vmem:[%s3909_s22 + $0x63] sm:$0xff] }
 0x1bb   : > { %v4608_v27 = vadd.f32 %v1103_v59, %v950_v48  ;;  %1258 = vmatmul.f32.gmra.mxu1 %v1391_v11  ;;  %1471 = vmatmul.f32.gmra.mxu2 %v1393_v62  ;;  %v1608_v59 = vld [vmem:[%s3909_s22 + $0x62] sm:$0xff] }
 0x1bd   : > { %1684 = vmatmul.f32.gmra.mxu3 %v1606_v0 }
 0x1be   : > { %v680_v17 = vpop.f32.mrf.mxu2  ;;  %v1106_v29 = vpop.f32.mrf.mxu0 }
 0x1bf   : > { %v738_v44 = vadd.f32 %v680_v17, %v504_v24  ;;  %v1396_v24 = vld [vmem:[%s3909_s22 + $0x69] sm:$0xff] }
 0x1c0   : > { %v506_v15 = vpop.f32.mrf.mxu1  ;;  %v893_v9 = vpop.f32.mrf.mxu3 }
 0x1c1   : > { %v951_v3 = vadd.f32 %v893_v9, %v738_v44  ;;  %1897 = vmatmul.f32.gmra.mxu0 %v1819_v12  ;;  %v507_v34 = vadd.f32 %v506_v15, %v4365_v51  ;;  %v1822_v15 = vld [vmem:[%s3909_s22 + $0x6b] sm:$0xff] }
 0x1c3   : > { %v4614_v8 = vadd.f32 %v1106_v29, %v951_v3  ;;  %1261 = vmatmul.f32.gmra.mxu1 %v1392_v52  ;;  %1474 = vmatmul.f32.gmra.mxu2 %v1394_v6  ;;  %v1609_v29 = vld [vmem:[%s3909_s22 + $0x6a] sm:$0xff] }
 0x1c5   : > { %1687 = vmatmul.f32.gmra.mxu3 %v1607_v26 }
 0x1c6   : > { %v683_v11 = vpop.f32.mrf.mxu2  ;;  %v1109_v42 = vpop.f32.mrf.mxu0 }
 0x1c7   : > { %v739_v21 = vadd.f32 %v683_v11, %v507_v34  ;;  %v1397_v34 = vld [vmem:[%s3909_s22 + $0x71] sm:$0xff] }
 0x1c8   : > { %v509_v46 = vpop.f32.mrf.mxu1  ;;  %v896_v50 = vpop.f32.mrf.mxu3 }
 0x1c9   : > { %v952_v37 = vadd.f32 %v896_v50, %v739_v21  ;;  %1900 = vmatmul.f32.gmra.mxu0 %v1820_v33  ;;  %v510_v51 = vadd.f32 %v509_v46, %v4242_v40  ;;  %v1823_v46 = vld [vmem:[%s3909_s22 + $0x73] sm:$0xff] }
 0x1cb   : > { %v4620_v60 = vadd.f32 %v1109_v42, %v952_v37  ;;  %1264 = vmatmul.f32.gmra.mxu1 %v1393_v62  ;;  %1477 = vmatmul.f32.gmra.mxu2 %v1395_v16  ;;  %v1610_v42 = vld [vmem:[%s3909_s22 + $0x72] sm:$0xff]  ;;  %v2027_v37 = vlaneseq }
 0x1cd   : > { %5809 = vst [vmem:[#allocation2_spill] sm:$0xff] %v4620_v60  ;;  %1690 = vmatmul.f32.gmra.mxu3 %v1608_v59 }
 0x1ce   : > { %v686_v52 = vpop.f32.mrf.mxu2  ;;  %v1112_v35 = vpop.f32.mrf.mxu0 }
 0x1cf   : > { %v740_v4 = vadd.f32 %v686_v52, %v510_v51  ;;  %v4637_v52 = vld [vmem:[%s3909_s22 + $0x79] sm:$0xff] }
 0x1d0   : > { %v512_v48 = vpop.f32.mrf.mxu1  ;;  %v899_v0 = vpop.f32.mrf.mxu3 }
 0x1d1   : > { %v953_v17 = vadd.f32 %v899_v0, %v740_v4  ;;  %1903 = vmatmul.f32.gmra.mxu0 %v1821_v1  ;;  %v513_v40 = vadd.f32 %v512_v48, %v4259_v49  ;;  %v4639_v1 = vshrl.u32 %v2027_v37, 7  ;;  %v1611_v4 = vld [vmem:[%s3909_s22 + $0x7a] sm:$0xff]  ;;  %v5807_v37 = vmov 0  }
 0x1d3   : > { %v4626_v12 = vadd.f32 %v1112_v35, %v953_v17  ;;  %1267 = vmatmul.f32.gmra.mxu1 %v1394_v6  ;;  %1480 = vmatmul.f32.gmra.mxu2 %v1396_v24  ;;  %v2068_v0 = vshrl.u32 %v4639_v1, 16 }
 0x1d5   : > { %5810 = vst [vmem:[#allocation3_spill] sm:$0xff] %v4626_v12  ;;  %1693 = vmatmul.f32.gmra.mxu3 %v1609_v29 }
 0x1d6   : > { %v689_v62 = vpop.f32.mrf.mxu2  ;;  %v1115_v44 = vpop.f32.mrf.mxu0 }
 0x1d7   : > { %v741_v9 = vadd.f32 %v689_v62, %v513_v40  ;;  %v1824_v62 = vld [vmem:[%s3909_s22 + $0x7b] sm:$0xff] }
 0x1d8   : > { %v515_v3 = vpop.f32.mrf.mxu1  ;;  %v902_v26 = vpop.f32.mrf.mxu3 }
 0x1d9   : > { %v954_v11 = vadd.f32 %v902_v26, %v741_v9  ;;  %1906 = vmatmul.f32.gmra.mxu0 %v1822_v15  ;;  %v516_v49 = vadd.f32 %v515_v3, %v4273_v57  ;;  %v2067_v57 = vand.u32 65535, %v4639_v1  ;;  %v2072_v9 = vmul.u32 14564, %v2068_v0 }
 0x1db   : > { %v4632_v33 = vadd.f32 %v1115_v44, %v954_v11  ;;  %1270 = vmatmul.f32.gmra.mxu1 %v1395_v16  ;;  %1483 = vmatmul.f32.gmra.mxu2 %v1397_v34  ;;  %v2071_v17 = vmul.u32 58254, %v2067_v57  ;;  %v2070_v15 = vmul.u32 14564, %v2067_v57  ;;  %v4650_v11 = vld [vmem:[%s3909_s22 + $0x81] sm:$0xff] }
 0x1dd   : > { %5811 = vst [vmem:[#allocation4_spill] sm:$0xff] %v4632_v33  ;;  %1696 = vmatmul.f32.gmra.mxu3 %v1610_v42  ;;  %v2074_v3 = vshll.u32 %v2071_v17, 16  ;;  %v2075_v57 = vshrl.u32 %v2071_v17, 16 }
 0x1de   : > { %v692_v6 = vpop.f32.mrf.mxu2  ;;  %v1118_v21 = vpop.f32.mrf.mxu0 }
 0x1df   : > { %v742_v50 = vadd.f32 %v692_v6, %v516_v49  ;;  %v2073_v49 = vmul.u32 58254, %v2068_v0  ;;  %v1612_v6 = vld [vmem:[%s3909_s22 + $0x82] sm:$0xff]  ;;  %vm2078_vm0 = vc.u32 %v2070_v15, %v2074_v3 }
 0x1e0   : > { %v518_v59 = vpop.f32.mrf.mxu1  ;;  %v905_v51 = vpop.f32.mrf.mxu3 }
 0x1e1   : > { %v955_v35 = vadd.f32 %v905_v51, %v742_v50  ;;  %1909 = vmatmul.f32.gmra.mxu0 %v1823_v46  ;;  %v519_v48 = vadd.f32 %v518_v59, %v4290_v2  ;;  %v2076_v2 = vshll.u32 %v2072_v9, 16  ;;  %v4654_v46 = vadd.s32 8, %v4639_v1 }
 0x1e2   : > { %v2079_v59 = vsel %vm2078_vm0, 1, %v5807_v37 }
 0x1e3   : > { %v4642_v16 = vadd.f32 %v1118_v21, %v955_v35  ;;  %1273 = vmatmul.f32.gmra.mxu1 %v1396_v24  ;;  %1486 = vmatmul.f32.gmra.mxu2 %v4637_v52  ;;  %v2080_v21 = vadd.s32 %v2074_v3, %v2070_v15  ;;  %v2081_v51 = vadd.s32 %v2079_v59, %v2073_v49  ;;  %v2096_v35 = vand.u32 65535, %v4654_v46 }
 0x1e4   : > { %v2097_v0 = vshrl.u32 %v4654_v46, 16 }
 0x1e5   : > { %5812 = vst [vmem:[#allocation5_spill] sm:$0xff] %v4642_v16  ;;  %1699 = vmatmul.f32.gmra.mxu3 %v1611_v4  ;;  %vm2082_vm1 = vc.u32 %v2080_v21, %v2076_v2  ;;  %v2099_v3 = vmul.u32 14564, %v2096_v35  ;;  %v4668_v2 = vld [vmem:[%s3909_s22 + $0x89] sm:$0xff]  ;;  %v1614_v16 = vld [vmem:[%s3909_s22 + $0x92] sm:$0xff] }
 0x1e6   : > { %v695_v29 = vpop.f32.mrf.mxu2  ;;  %v1121_v40 = vpop.f32.mrf.mxu0  ;;  %v2102_v21 = vmul.u32 58254, %v2097_v0 }
 0x1e7   : > { %v743_v44 = vadd.f32 %v695_v29, %v519_v48  ;;  %v2083_v48 = vsel %vm2082_vm1, 1, %v5807_v37  ;;  %v1613_v37 = vld [vmem:[%s3909_s22 + $0x8a] sm:$0xff] }
 0x1e8   : > { %v521_v24 = vpop.f32.mrf.mxu1  ;;  %v908_v26 = vpop.f32.mrf.mxu3 }
 0x1e9   : > { %v956_v42 = vadd.f32 %v908_v26, %v743_v44  ;;  %1912 = vmatmul.f32.gmra.mxu0 %v1824_v62  ;;  %v522_v4 = vadd.f32 %v521_v24, %v4304_v10  ;;  %v2085_v62 = vadd.s32 %v2083_v48, %v2081_v51  ;;  %v2100_v44 = vmul.u32 58254, %v2096_v35 }
 0x1ea   : > { %v4665_v26 = vmul.u32 14564, %v2097_v0  ;;  %v2077_v10 = vshrl.u32 %v2072_v9, 16  ;;  %v4673_v35 = vadd.s32 16, %v4639_v1  ;;  %v5815_v9 = vmov 0  }
 0x1eb   : > { %v4656_v50 = vadd.f32 %v1121_v40, %v956_v42  ;;  %1276 = vmatmul.f32.gmra.mxu1 %v1397_v34  ;;  %1489 = vmatmul.f32.gmra.mxu2 %v4650_v11  ;;  %v1825_v40 = vld [vmem:[%s3909_s22 + $0x83] sm:$0xff]  ;;  %v2086_v17 = vadd.s32 %v2085_v62, %v2075_v57  ;;  %v2103_v24 = vshll.u32 %v2100_v44, 16 }
 0x1ec   : > { %v2105_v59 = vshll.u32 %v4665_v26, 16  ;;  %v2125_v0 = vand.u32 65535, %v4673_v35  ;;  %v2106_v33 = vshrl.u32 %v4665_v26, 16 }
 0x1ed   : > { %5813 = vst [vmem:[#allocation6_spill] sm:$0xff] %v4656_v50  ;;  %1702 = vmatmul.f32.gmra.mxu3 %v1612_v6  ;;  %vm2107_vm2 = vc.u32 %v2099_v3, %v2103_v24  ;;  %v2109_v51 = vadd.s32 %v2103_v24, %v2099_v3  ;;  %v2087_v48 = vadd.s32 %v2086_v17, %v2077_v10 }
 0x1ee   : > { %v698_v29 = vpop.f32.mrf.mxu2  ;;  %v1124_v34 = vpop.f32.mrf.mxu0  ;;  %v2108_v57 = vsel %vm2107_vm2, 1, %v5815_v9  ;;  %v2128_v17 = vmul.u32 14564, %v2125_v0 }
 0x1ef   : > { %v744_v15 = vadd.f32 %v698_v29, %v522_v4  ;;  %v2110_v29 = vadd.s32 %v2108_v57, %v2102_v21  ;;  %vm2111_vm3 = vc.u32 %v2109_v51, %v2105_v59  ;;  %v4686_v57 = vld [vmem:[%s3909_s22 + $0x91] sm:$0xff] }
 0x1f0   : > { %v524_v42 = vpop.f32.mrf.mxu1  ;;  %v911_v49 = vpop.f32.mrf.mxu3  ;;  %v2112_v62 = vsel %vm2111_vm3, 1, %v5815_v9 }
 0x1f1   : > { %v957_v6 = vadd.f32 %v911_v49, %v744_v15  ;;  %1915 = vmatmul.f32.gmra.mxu0 %v1825_v40  ;;  %v525_v40 = vadd.f32 %v524_v42, %v4324_v20  ;;  %v2104_v49 = vshrl.u32 %v2100_v44, 16  ;;  %v2114_v24 = vadd.s32 %v2112_v62, %v2110_v29 }
 0x1f2   : > { %v2088_v20 = vshrl.u32 %v2087_v48, 4  ;;  %v4695_v48 = vadd.s32 24, %v4639_v1 }
 0x1f3   : > { %v4675_v4 = vadd.f32 %v1124_v34, %v957_v6  ;;  %1279 = vmatmul.f32.gmra.mxu1 %v4637_v52  ;;  %1492 = vmatmul.f32.gmra.mxu2 %v4668_v2  ;;  %v2126_v34 = vshrl.u32 %v4673_v35, 16  ;;  %v1826_v52 = vld [vmem:[%s3909_s22 + $0x8b] sm:$0xff]  ;;  %v2129_v6 = vmul.u32 58254, %v2125_v0  ;;  %v2115_v12 = vadd.s32 %v2114_v24, %v2104_v49 }
 0x1f4   : > { %v2089_v0 = vmul.u32 18, %v2088_v20  ;;  %v2154_v49 = vand.u32 65535, %v4695_v48  ;;  %v2155_v24 = vshrl.u32 %v4695_v48, 16 }
 0x1f5   : > { %5814 = vst [vmem:[#allocation7_spill] sm:$0xff] %v4675_v4  ;;  %1705 = vmatmul.f32.gmra.mxu3 %v1613_v37  ;;  %v2130_v21 = vmul.u32 14564, %v2126_v34  ;;  %v2132_v37 = vshll.u32 %v2129_v6, 16  ;;  %v2131_v4 = vmul.u32 58254, %v2126_v34  ;;  %v2133_v26 = vshrl.u32 %v2129_v6, 16 }
 0x1f6   : > { %v701_v15 = vpop.f32.mrf.mxu2  ;;  %v1127_v3 = vpop.f32.mrf.mxu0  ;;  %v2159_v6 = vmul.u32 14564, %v2155_v24 }
 0x1f7   : > { %v745_v10 = vadd.f32 %v701_v15, %v525_v40  ;;  %v2134_v50 = vshll.u32 %v2130_v21, 16  ;;  %vm2136_vm4 = vc.u32 %v2128_v17, %v2132_v37  ;;  %v2138_v29 = vadd.s32 %v2132_v37, %v2128_v17 }
 0x1f8   : > { %v527_v59 = vpop.f32.mrf.mxu1  ;;  %v914_v51 = vpop.f32.mrf.mxu3  ;;  %v2137_v40 = vsel %vm2136_vm4, 1, %v5815_v9  ;;  %v2116_v17 = vadd.s32 %v2115_v12, %v2106_v33  ;;  %v2163_v33 = vshll.u32 %v2159_v6, 16 }
 0x1f9   : > { %v958_v42 = vadd.f32 %v914_v51, %v745_v10  ;;  %1918 = vmatmul.f32.gmra.mxu0 %v1826_v52  ;;  %v528_v62 = vadd.f32 %v527_v59, %v4338_v28  ;;  %v2139_v34 = vadd.s32 %v2137_v40, %v2131_v4  ;;  %vm2140_vm5 = vc.u32 %v2138_v29, %v2134_v50  ;;  %v4704_v59 = vld [vmem:[%s3909_s22 + $0x99] sm:$0xff] }
 0x1fa   : > { %v2141_v52 = vsel %vm2140_vm5, 1, %v5815_v9  ;;  %v2157_v50 = vmul.u32 14564, %v2154_v49  ;;  %v2158_v4 = vmul.u32 58254, %v2154_v49  ;;  %v1615_v40 = vld [vmem:[%s3909_s22 + $0x9a] sm:$0xff]  ;;  %v2117_v12 = vshrl.u32 %v2116_v17, 4 }
 0x1fb   : > { %v4690_v44 = vadd.f32 %v1127_v3, %v958_v42  ;;  %1282 = vmatmul.f32.gmra.mxu1 %v4650_v11  ;;  %1495 = vmatmul.f32.gmra.mxu2 %v4686_v57  ;;  %v1827_v11 = vld [vmem:[%s3909_s22 + $0x93] sm:$0xff]  ;;  %v2143_v51 = vadd.s32 %v2141_v52, %v2139_v34  ;;  %v2135_v42 = vshrl.u32 %v2130_v21, 16  ;;  %v1828_v52 = vld [vmem:[%s3909_s22 + $0x9b] sm:$0xff] }
 0x1fc   : > { %v2161_v60 = vshll.u32 %v2158_v4, 16 }
 0x1fd   : > { %5816 = vst [vmem:[#allocation8_spill] sm:$0xff] %v4690_v44  ;;  %1708 = vmatmul.f32.gmra.mxu3 %v1614_v16  ;;  %v4707_v16 = vsub.s32 %v4639_v1, %v2089_v0  ;;  %v2144_v29 = vadd.s32 %v2143_v51, %v2133_v26  ;;  %v2160_v44 = vmul.u32 58254, %v2155_v24  ;;  %v4715_v0 = vadd.s32 32, %v4639_v1 }
 0x1fe   : > { %v704_v15 = vpop.f32.mrf.mxu2  ;;  %v1130_v3 = vpop.f32.mrf.mxu0  ;;  %vm2165_vm7 = vc.u32 %v2157_v50, %v2161_v60  ;;  %v2167_v21 = vadd.s32 %v2161_v60, %v2157_v50  ;;  %v2118_v60 = vmul.u32 18, %v2117_v12  ;;  %v2164_v51 = vshrl.u32 %v2159_v6, 16  ;;  %v4725_v50 = vld [vmem:[%s3909_s22 + $0xa1] sm:$0xff] }
 0x1ff   : > { %v746_v10 = vadd.f32 %v704_v15, %v528_v62  ;;  %vm3108_vm6 = vcmp.ne.s32.totalorder %v4707_v16, 0  ;;  %v2145_v34 = vadd.s32 %v2144_v29, %v2135_v42  ;;  %v2162_v15 = vshrl.u32 %v2158_v4, 16 }
 0x200   : > { %v530_v20 = vpop.f32.mrf.mxu1  ;;  %v917_v28 = vpop.f32.mrf.mxu3  ;;  %vm2169_vm8 = vc.u32 %v2167_v21, %v2163_v33  ;;  %v2183_v24 = vand.u32 65535, %v4715_v0  ;;  %vm3144_vm9 = vcmp.lt.s32.totalorder %v4707_v16, 0  ;;  %v1616_v21 = vld [vmem:[%s3909_s22 + $0xa2] sm:$0xff] }
 0x201   : > { %v959_v37 = vadd.f32 %v917_v28, %v746_v10  ;;  %1921 = vmatmul.f32.gmra.mxu0 %v1827_v11  ;;  %v531_v26 = vadd.f32 %v530_v20, %v4358_v43  ;;  %v2184_v10 = vshrl.u32 %v4715_v0, 16  ;;  %v2170_v43 = vsel %vm2169_vm8, 1, %v5815_v9  ;;  %vm4745_vm10 = vmand %vm3144_vm9, %vm3108_vm6 }
 0x202   : > { %v2187_v42 = vmul.u32 58254, %v2183_v24 }
 0x203   : > { %v4710_v62 = vadd.f32 %v1130_v3, %v959_v37  ;;  %1285 = vmatmul.f32.gmra.mxu1 %v4668_v2  ;;  %1498 = vmatmul.f32.gmra.mxu2 %v4704_v59  ;;  %v2166_v3 = vsel %vm2165_vm7, 1, %v5815_v9  ;;  %v2186_v37 = vmul.u32 14564, %v2183_v24  ;;  %v4727_v29 = vmul.u32 14564, %v2184_v10 }
 0x204   : > { %v2168_v49 = vadd.s32 %v2166_v3, %v2160_v44  ;;  %v2189_v33 = vmul.u32 58254, %v2184_v10  ;;  %v2190_v6 = vshll.u32 %v2187_v42, 16  ;;  %v4733_v3 = vadd.s32 40, %v4639_v1 }
 0x205   : > { %5817 = vst [vmem:[#allocation9_spill] sm:$0xff] %v4710_v62  ;;  %1711 = vmatmul.f32.gmra.mxu3 %v1615_v40  ;;  %v2146_v40 = vshrl.u32 %v2145_v34, 4  ;;  %v4741_v34 = vsub.s32 %v4654_v46, %v2118_v60 }
 0x206   : > { %v707_v2 = vpop.f32.mrf.mxu2  ;;  %v1133_v11 = vpop.f32.mrf.mxu0  ;;  %v2172_v4 = vadd.s32 %v2170_v43, %v2168_v49  ;;  %vm2194_vm11 = vc.u32 %v2186_v37, %v2190_v6  ;;  %v2212_v24 = vand.u32 65535, %v4733_v3  ;;  %v2213_v46 = vshrl.u32 %v4733_v3, 16 }
 0x207   : > { %v747_v17 = vadd.f32 %v707_v2, %v531_v26  ;;  %v2192_v26 = vshll.u32 %v4727_v29, 16  ;;  %v2147_v10 = vmul.u32 18, %v2146_v40  ;;  %vm3109_vm14 = vcmp.ne.s32.totalorder %v4741_v34, 0 }
 0x208   : > { %v533_v20 = vpop.f32.mrf.mxu1  ;;  %v920_v28 = vpop.f32.mrf.mxu3  ;;  %v2173_v12 = vadd.s32 %v2172_v4, %v2162_v15  ;;  %v4767_v15 = vadd.s32 48, %v4639_v1  ;;  %vm3145_vm15 = vcmp.lt.s32.totalorder %v4741_v34, 0 }
 0x209   : > { %v960_v44 = vadd.f32 %v920_v28, %v747_v17  ;;  %1924 = vmatmul.f32.gmra.mxu0 %v1828_v52  ;;  %v3216_v52 = vadd.s32 18, %v4707_v16  ;;  %v2195_v17 = vsel %vm2194_vm11, 1, %v5815_v9  ;;  %v1829_v28 = vld [vmem:[%s3909_s22 + $0xa3] sm:$0xff]  ;;  %vm4807_vm4 = vmand %vm3145_vm15, %vm3109_vm14 }
 0x20a   : > { %v2174_v49 = vadd.s32 %v2173_v12, %v2164_v51  ;;  %v4760_v12 = vld [vmem:[%s3909_s22 + $0xa9] sm:$0xff] }
 0x20b   : > { %v4735_v2 = vadd.f32 %v1133_v11, %v960_v44  ;;  %1288 = vmatmul.f32.gmra.mxu1 %v4686_v57  ;;  %1501 = vmatmul.f32.gmra.mxu2 %v4725_v50  ;;  %v2196_v11 = vadd.s32 %v2190_v6, %v2186_v37  ;;  %v534_v57 = vadd.f32 %v533_v20, %v4370_v58  ;;  %v2191_v44 = vshrl.u32 %v2187_v42, 16 }
 0x20c   : > { %v2175_v4 = vshrl.u32 %v2174_v49, 4  ;;  %v3252_v58 = vsel %vm4745_vm10, %v3216_v52, %v4707_v16  ;;  %v2193_v20 = vshrl.u32 %v4727_v29, 16  ;;  %v4762_v49 = vmul.u32 58254, %v2212_v24  ;;  %v1617_v16 = vld [vmem:[%s3909_s22 + $0xaa] sm:$0xff] }
 0x20d   : > { %5818 = vst [vmem:[#allocation10_spill] sm:$0xff] %v4735_v2  ;;  %1714 = vmatmul.f32.gmra.mxu3 %v1616_v21  ;;  %v2197_v2 = vadd.s32 %v2195_v17, %v2189_v33  ;;  %vm2198_vm12 = vc.u32 %v2196_v11, %v2192_v26  ;;  %v4764_v42 = vmul.u32 14564, %v2213_v46  ;;  %v2215_v26 = vmul.u32 14564, %v2212_v24 }
 0x20e   : > { %v710_v60 = vpop.f32.mrf.mxu2  ;;  %v1136_v43 = vpop.f32.mrf.mxu0  ;;  %v2199_v37 = vsel %vm2198_vm12, 1, %v5815_v9  ;;  %v2176_v6 = vmul.u32 18, %v2175_v4  ;;  %vm4770_vm13 = vcmp.lt.s32.totalorder %v3252_v58, 16  ;;  %v4776_v52 = vsub.s32 %v4673_v35, %v2147_v10  ;;  %v1830_v4 = vld [vmem:[%s3909_s22 + $0xab] sm:$0xff] }
 0x20f   : > { %v748_v51 = vadd.f32 %v710_v60, %v534_v57  ;;  %v2201_v62 = vadd.s32 %v2199_v37, %v2197_v2  ;;  %v2219_v11 = vshll.u32 %v4762_v49, 16  ;;  %v2218_v17 = vmul.u32 58254, %v2213_v46 }
 0x210   : > { %v923_v40 = vpop.f32.mrf.mxu3  ;;  %v1244_v21 = vpop.f32.mrf.mxu1  ;;  %v4784_v24 = vsub.s32 %v4695_v48, %v2176_v6  ;;  %v2241_v60 = vand.u32 65535, %v4767_v15  ;;  %v3217_v35 = vadd.s32 18, %v4741_v34  ;;  %v2221_v10 = vshll.u32 %v4764_v42, 16 }
 0x211   : > { %v961_v33 = vadd.f32 %v923_v40, %v748_v51  ;;  %1927 = vmatmul.f32.gmra.mxu0 %v1829_v28  ;;  %v2202_v2 = vadd.s32 %v2201_v62, %v2191_v44  ;;  %vm2223_vm0 = vc.u32 %v2215_v26, %v2219_v11  ;;  %v2242_v48 = vshrl.u32 %v4767_v15, 16 }
 0x212   : > { %vm3110_vm1 = vcmp.ne.s32.totalorder %v4776_v52, 0  ;;  %v2224_v51 = vsel %vm2223_vm0, 1, %v5815_v9  ;;  %v4795_v58 = vmul.u32 58254, %v2241_v60  ;;  %vm3146_vm2 = vcmp.lt.s32.totalorder %v4776_v52, 0 }
 0x213   : > { %v4779_v57 = vadd.f32 %v1136_v43, %v961_v33  ;;  %1291 = vmatmul.f32.gmra.mxu1 %v4704_v59  ;;  %1504 = vmatmul.f32.gmra.mxu2 %v4760_v12  ;;  %v2203_v62 = vadd.s32 %v2202_v2, %v2193_v20  ;;  %v1352_v43 = vadd.f32 %v1244_v21, %v4387_v22  ;;  %vm3111_vm3 = vcmp.ne.s32.totalorder %v4784_v24, 0  ;;  %v4801_v21 = vld [vmem:[%s3909_s22 + $0xb1] sm:$0xff]  ;;  %vm4834_vm7 = vmand %vm3146_vm2, %vm3110_vm1 }
 0x214   : > { %v2225_v59 = vadd.s32 %v2219_v11, %v2215_v26  ;;  %v2226_v22 = vadd.s32 %v2224_v51, %v2218_v17  ;;  %vm3147_vm5 = vcmp.lt.s32.totalorder %v4784_v24, 0  ;;  %v2220_v33 = vshrl.u32 %v4762_v49, 16 }
 0x215   : > { %5823 = vst [vmem:[#allocation11_spill] sm:$0xff] %v4779_v57  ;;  %1717 = vmatmul.f32.gmra.mxu3 %v1617_v16  ;;  %v2204_v44 = vshrl.u32 %v2203_v62, 4  ;;  %v4813_v26 = vmul.u32 14564, %v2242_v48  ;;  %v2244_v17 = vmul.u32 14564, %v2241_v60  ;;  %v1618_v62 = vld [vmem:[%s3909_s22 + $0xb2] sm:$0xff]  ;;  %v2248_v57 = vshll.u32 %v4795_v58, 16  ;;  %vm4846_vm8 = vmand %vm3147_vm5, %vm3111_vm3 }
 0x216   : > { %v1457_v28 = vpop.f32.mrf.mxu2  ;;  %v1883_v46 = vpop.f32.mrf.mxu0  ;;  %vm2227_vm6 = vc.u32 %v2225_v59, %v2221_v10  ;;  %v3253_v60 = vsel %vm4807_vm4, %v3217_v35, %v4741_v34  ;;  %v4839_v10 = vadd.s32 18, %v4784_v24 }
 0x217   : > { %v1565_v20 = vadd.f32 %v1457_v28, %v1352_v43  ;;  %v2205_v2 = vmul.u32 18, %v2204_v44  ;;  %v2228_v11 = vsel %vm2227_vm6, 1, %v5815_v9  ;;  %v3218_v43 = vadd.s32 18, %v4776_v52 }
 0x218   : > { %v1247_v37 = vpop.f32.mrf.mxu1  ;;  %v1670_v40 = vpop.f32.mrf.mxu3  ;;  %v2222_v28 = vshrl.u32 %v4764_v42, 16  ;;  %v2230_v51 = vadd.s32 %v2228_v11, %v2226_v22  ;;  %vm2252_vm9 = vc.u32 %v2244_v17, %v2248_v57  ;;  %vm4860_vm10 = vcmp.lt.s32.totalorder %v3253_v60, 16 }
 0x219   : > { %v1778_v16 = vadd.f32 %v1670_v40, %v1565_v20  ;;  %1930 = vmatmul.f32.gmra.mxu0 %v1830_v4  ;;  %v1353_v59 = vadd.f32 %v1247_v37, %v4396_v55  ;;  %v4852_v4 = vadd.s32 56, %v4639_v1  ;;  %v4857_v55 = vsub.s32 %v4715_v0, %v2205_v2  ;;  %v1831_v40 = vld [vmem:[%s3909_s22 + $0xb3] sm:$0xff] }
 0x21a   : > { %v2231_v35 = vadd.s32 %v2230_v51, %v2220_v33  ;;  %v3254_v29 = vsel %vm4834_vm7, %v3218_v43, %v4776_v52  ;;  %v2253_v33 = vsel %vm2252_vm9, 1, %v5815_v9 }
 0x21b   : > { %v1991_v49 = vadd.f32 %v1883_v46, %v1778_v16  ;;  %1294 = vmatmul.f32.gmra.mxu1 %v4725_v50  ;;  %1507 = vmatmul.f32.gmra.mxu2 %v4801_v21  ;;  %v2247_v50 = vmul.u32 58254, %v2242_v48  ;;  %v2250_v46 = vshll.u32 %v4813_v26, 16  ;;  %v2254_v48 = vadd.s32 %v2248_v57, %v2244_v17 }
 0x21c   : > { %v2232_v6 = vadd.s32 %v2231_v35, %v2222_v28  ;;  %v3255_v57 = vsel %vm4846_vm8, %v4839_v10, %v4784_v24  ;;  %v2249_v16 = vshrl.u32 %v4795_v58, 16  ;;  %v2270_v52 = vand.u32 65535, %v4852_v4  ;;  %v1619_v58 = vld [vmem:[%s3909_s22 + $0xba] sm:$0xff] }
 0x21d   : > { %v3468_v44 = vsel %vm4770_vm13, %v1991_v49, 0.0  ;;  %1720 = vmatmul.f32.gmra.mxu3 %v1618_v62  ;;  %v2255_v2 = vadd.s32 %v2253_v33, %v2247_v50  ;;  %v4875_v62 = vld [vmem:[%s3909_s22 + $0xb9] sm:$0xff]  ;;  %vm2256_vm11 = vc.u32 %v2254_v48, %v2250_v46  ;;  %v2271_v43 = vshrl.u32 %v4852_v4, 16 }
 0x21e   : > { %3504 = vst [vmem:[%s4823_s19] sm:$0xff] %v3468_v44  ;;  %v1460_v20 = vpop.f32.mrf.mxu2  ;;  %v1886_v22 = vpop.f32.mrf.mxu0  ;;  %v2233_v51 = vshrl.u32 %v2232_v6, 4  ;;  %vm3112_vm12 = vcmp.ne.s32.totalorder %v4857_v55, 0  ;;  %vm3148_vm13 = vcmp.lt.s32.totalorder %v4857_v55, 0  ;;  %v2257_v24 = vsel %vm2256_vm11, 1, %v5815_v9 }
 0x21f   : > { %v1566_v0 = vadd.f32 %v1460_v20, %v1353_v59  ;;  %vm4883_vm14 = vcmp.lt.s32.totalorder %v3254_v29, 16  ;;  %v2259_v42 = vadd.s32 %v2257_v24, %v2255_v2  ;;  %v4887_v10 = vmul.u32 58254, %v2270_v52  ;;  %vm4935_vm4 = vmand %vm3148_vm13, %vm3112_vm12 }
 0x220   : > { %v1250_v11 = vpop.f32.mrf.mxu1  ;;  %v1673_v17 = vpop.f32.mrf.mxu3  ;;  %v2234_v60 = vmul.u32 18, %v2233_v51  ;;  %v4890_v50 = vadd.s32 64, %v4639_v1  ;;  %v4895_v34 = vadd.s32 18, %v4857_v55  ;;  %v2251_v35 = vshrl.u32 %v4813_v26, 16 }
 0x221   : > { %v1779_v28 = vadd.f32 %v1673_v17, %v1566_v0  ;;  %1933 = vmatmul.f32.gmra.mxu0 %v1831_v40  ;;  %v4898_v46 = vmul.u32 14564, %v2271_v43  ;;  %v2260_v20 = vadd.s32 %v2259_v42, %v2249_v16  ;;  %v2273_v40 = vmul.u32 14564, %v2270_v52 }
 0x222   : > { %v4901_v48 = vsub.s32 %v4733_v3, %v2234_v60  ;;  %v2277_v29 = vshll.u32 %v4887_v10, 16  ;;  %v2276_v33 = vmul.u32 58254, %v2271_v43  ;;  %v1832_v3 = vld [vmem:[%s3909_s22 + $0xbb] sm:$0xff]  ;;  %v2299_v51 = vand.u32 65535, %v4890_v50 }
 0x223   : > { %v1992_v59 = vadd.f32 %v1886_v22, %v1779_v28  ;;  %1297 = vmatmul.f32.gmra.mxu1 %v4760_v12  ;;  %1510 = vmatmul.f32.gmra.mxu2 %v4875_v62  ;;  %v3582_v22 = vmul.f32 %v3468_v44, %v3468_v44  ;;  %v1354_v12 = vadd.f32 %v1250_v11, %v4408_v13  ;;  %v2279_v16 = vshll.u32 %v4898_v46, 16 }
 0x224   : > { %v2261_v28 = vadd.s32 %v2260_v20, %v2251_v35  ;;  %v2278_v13 = vshrl.u32 %v4887_v10, 16  ;;  %v2300_v37 = vshrl.u32 %v4890_v50, 16  ;;  %vm3113_vm15 = vcmp.ne.s32.totalorder %v4901_v48, 0  ;;  %v1620_v10 = vld [vmem:[%s3909_s22 + $0xc2] sm:$0xff] }
 0x225   : > { %v3469_v6 = vsel %vm4860_vm10, %v1992_v59, 0.0  ;;  %1723 = vmatmul.f32.gmra.mxu3 %v1619_v58  ;;  %v4914_v58 = vld [vmem:[%s3909_s22 + $0xc1] sm:$0xff]  ;;  %vm2281_vm0 = vc.u32 %v2273_v40, %v2277_v29  ;;  %vm3149_vm1 = vcmp.lt.s32.totalorder %v4901_v48, 0  ;;  %v4919_v42 = vadd.s32 18, %v4901_v48 }
 0x226   : > { %3505 = vst [vmem:[%s4823_s19 + $0x8] sm:$0xff] %v3469_v6  ;;  %v3540_v26 = vadd.f32 %v3469_v6, %v3468_v44  ;;  %v3583_v0 = vmul.f32 %v3469_v6, %v3469_v6  ;;  %v1463_v2 = vpop.f32.mrf.mxu2  ;;  %v1889_v17 = vpop.f32.mrf.mxu0  ;;  %v2283_v44 = vadd.s32 %v2277_v29, %v2273_v40  ;;  %v2262_v59 = vshrl.u32 %v2261_v28, 4  ;;  %vm4945_vm5 = vmand %vm3149_vm1, %vm3113_vm15 }
 0x227   : > { %v1567_v52 = vadd.f32 %v1463_v2, %v1354_v12  ;;  %vm4922_vm2 = vcmp.lt.s32.totalorder %v3255_v57, 16  ;;  %v2282_v20 = vsel %vm2281_vm0, 1, %v5815_v9  ;;  %v4927_v12 = vmul.u32 58254, %v2299_v51 }
 0x228   : > { %v3618_v11 = vadd.f32 %v3583_v0, %v3582_v22  ;;  %v1253_v43 = vpop.f32.mrf.mxu1  ;;  %v1676_v24 = vpop.f32.mrf.mxu3  ;;  %vm2285_vm3 = vc.u32 %v2283_v44, %v2279_v16  ;;  %v2302_v22 = vmul.u32 14564, %v2299_v51  ;;  %v2263_v29 = vmul.u32 18, %v2262_v59 }
 0x229   : > { %v1780_v60 = vadd.f32 %v1676_v24, %v1567_v52  ;;  %1936 = vmatmul.f32.gmra.mxu0 %v1832_v3  ;;  %v2284_v6 = vadd.s32 %v2282_v20, %v2276_v33  ;;  %v2286_v0 = vsel %vm2285_vm3, 1, %v5815_v9  ;;  %v1355_v2 = vadd.f32 %v1253_v43, %v4420_v63 }
 0x22a   : > { %v4950_v3 = vmul.u32 14564, %v2300_v37  ;;  %v2306_v16 = vshll.u32 %v4927_v12, 16  ;;  %v4956_v63 = vsub.s32 %v4767_v15, %v2263_v29  ;;  %v2305_v52 = vmul.u32 58254, %v2300_v37 }
 0x22b   : > { %v1993_v40 = vadd.f32 %v1889_v17, %v1780_v60  ;;  %1300 = vmatmul.f32.gmra.mxu1 %v4801_v21  ;;  %1513 = vmatmul.f32.gmra.mxu2 %v4914_v58  ;;  %v2280_v17 = vshrl.u32 %v4898_v46, 16  ;;  %v2288_v51 = vadd.s32 %v2286_v0, %v2284_v6  ;;  %v1833_v46 = vld [vmem:[%s3909_s22 + $0xc3] sm:$0xff]  ;;  %v4961_v60 = vadd.s32 72, %v4639_v1 }
 0x22c   : > { %vm2310_vm6 = vc.u32 %v2302_v22, %v2306_v16  ;;  %v3256_v15 = vsel %vm4935_vm4, %v4895_v34, %v4857_v55  ;;  %v3257_v49 = vsel %vm4945_vm5, %v4919_v42, %v4901_v48  ;;  %v2307_v6 = vshrl.u32 %v4927_v12, 16  ;;  %v1621_v34 = vld [vmem:[%s3909_s22 + $0xca] sm:$0xff] }
 0x22d   : > { %v3470_v33 = vsel %vm4883_vm14, %v1993_v40, 0.0  ;;  %1726 = vmatmul.f32.gmra.mxu3 %v1620_v10  ;;  %v4973_v40 = vld [vmem:[%s3909_s22 + $0xc9] sm:$0xff]  ;;  %v2289_v29 = vadd.s32 %v2288_v51, %v2278_v13  ;;  %v2311_v0 = vsel %vm2310_vm6, 1, %v5815_v9  ;;  %vm3114_vm7 = vcmp.ne.s32.totalorder %v4956_v63, 0 }
 0x22e   : > { %3506 = vst [vmem:[%s4823_s19 + $0x10] sm:$0xff] %v3470_v33  ;;  %v3541_v28 = vadd.f32 %v3540_v26, %v3470_v33  ;;  %v3584_v43 = vmul.f32 %v3470_v33, %v3470_v33  ;;  %v1466_v24 = vpop.f32.mrf.mxu2  ;;  %v1892_v44 = vpop.f32.mrf.mxu0  ;;  %v2308_v26 = vshll.u32 %v4950_v3, 16  ;;  %vm3150_vm8 = vcmp.lt.s32.totalorder %v4956_v63, 0 }
 0x22f   : > { %v1568_v59 = vadd.f32 %v1466_v24, %v1355_v2  ;;  %v2312_v55 = vadd.s32 %v2306_v16, %v2302_v22  ;;  %vm4980_vm9 = vcmp.lt.s32.totalorder %v3256_v15, 16  ;;  %v2290_v13 = vadd.s32 %v2289_v29, %v2280_v17  ;;  %v1834_v29 = vld [vmem:[%s3909_s22 + $0xcb] sm:$0xff]  ;;  %vm5006_vm11 = vmand %vm3150_vm8, %vm3114_vm7 }
 0x230   : > { %v3619_v37 = vadd.f32 %v3618_v11, %v3584_v43  ;;  %v1256_v10 = vpop.f32.mrf.mxu1  ;;  %v1679_v20 = vpop.f32.mrf.mxu3  ;;  %v4985_v11 = vadd.s32 18, %v4956_v63  ;;  %v2313_v33 = vadd.s32 %v2311_v0, %v2305_v52  ;;  %v2328_v12 = vand.u32 65535, %v4961_v60 }
 0x231   : > { %v1781_v57 = vadd.f32 %v1679_v20, %v1568_v59  ;;  %1939 = vmatmul.f32.gmra.mxu0 %v1833_v46  ;;  %v2309_v22 = vshrl.u32 %v4950_v3, 16  ;;  %vm2314_vm10 = vc.u32 %v2312_v55, %v2308_v26  ;;  %v2329_v16 = vshrl.u32 %v4961_v60, 16 }
 0x232   : > { %v2291_v43 = vshrl.u32 %v2290_v13, 4  ;;  %v2315_v24 = vsel %vm2314_vm10, 1, %v5815_v9  ;;  %v2331_v46 = vmul.u32 14564, %v2328_v12  ;;  %v4993_v17 = vmul.u32 58254, %v2328_v12  ;;  %v5015_v12 = vld [vmem:[%s3909_s22 + $0xd1] sm:$0xff] }
 0x233   : > { %v1994_v51 = vadd.f32 %v1892_v44, %v1781_v57  ;;  %1303 = vmatmul.f32.gmra.mxu1 %v4875_v62  ;;  %1516 = vmatmul.f32.gmra.mxu2 %v4973_v40  ;;  %v1356_v52 = vadd.f32 %v1256_v10, %v4429_v47  ;;  %v2317_v62 = vadd.s32 %v2315_v24, %v2313_v33  ;;  %v4998_v59 = vmul.u32 14564, %v2329_v16 }
 0x234   : > { %v2292_v35 = vmul.u32 18, %v2291_v43  ;;  %v2335_v10 = vshll.u32 %v4993_v17, 16  ;;  %v2334_v55 = vmul.u32 58254, %v2329_v16  ;;  %vm5070_vm1 = vcmp.lt.s32.totalorder %v3257_v49, 16 }
 0x235   : > { %v3471_v44 = vsel %vm4922_vm2, %v1994_v51, 0.0  ;;  %1729 = vmatmul.f32.gmra.mxu3 %v1621_v34  ;;  %v2318_v57 = vadd.s32 %v2317_v62, %v2307_v6  ;;  %v2337_v24 = vshll.u32 %v4998_v59, 16  ;;  %v3258_v6 = vsel %vm5006_vm11, %v4985_v11, %v4956_v63 }
 0x236   : > { %3507 = vst [vmem:[%s4823_s19 + $0x18] sm:$0xff] %v3471_v44  ;;  %v3542_v3 = vadd.f32 %v3541_v28, %v3471_v44  ;;  %v3585_v15 = vmul.f32 %v3471_v44, %v3471_v44  ;;  %v1469_v26 = vpop.f32.mrf.mxu2  ;;  %v1895_v20 = vpop.f32.mrf.mxu0  ;;  %v5012_v28 = vadd.s32 80, %v4639_v1  ;;  %v5018_v51 = vsub.s32 %v4852_v4, %v2292_v35 }
 0x237   : > { %v1569_v0 = vadd.f32 %v1469_v26, %v1356_v52  ;;  %vm2339_vm12 = vc.u32 %v2331_v46, %v2335_v10  ;;  %v2319_v16 = vadd.s32 %v2318_v57, %v2309_v22  ;;  %v1622_v52 = vld [vmem:[%s3909_s22 + $0xd2] sm:$0xff]  ;;  %v2336_v4 = vshrl.u32 %v4993_v17, 16 }
 0x238   : > { %v3620_v34 = vadd.f32 %v3619_v37, %v3585_v15  ;;  %v1259_v13 = vpop.f32.mrf.mxu1  ;;  %v1682_v33 = vpop.f32.mrf.mxu3  ;;  %v2340_v37 = vsel %vm2339_vm12, 1, %v5815_v9  ;;  %vm3115_vm13 = vcmp.ne.s32.totalorder %v5018_v51, 0  ;;  %vm3151_vm14 = vcmp.lt.s32.totalorder %v5018_v51, 0 }
 0x239   : > { %v1782_v43 = vadd.f32 %v1682_v33, %v1569_v0  ;;  %1942 = vmatmul.f32.gmra.mxu0 %v1834_v29  ;;  %v2341_v44 = vadd.s32 %v2335_v10, %v2331_v46  ;;  %v2320_v15 = vshrl.u32 %v2319_v16, 4  ;;  %v2342_v26 = vadd.s32 %v2340_v37, %v2334_v55  ;;  %vm5048_vm0 = vmand %vm3151_vm14, %vm3115_vm13  ;;  %v5063_v37 = vld [vmem:[%s3909_s22 + $0xd9] sm:$0xff] }
 0x23a   : > { %v2357_v63 = vand.u32 65535, %v5012_v28  ;;  %v1357_v11 = vadd.f32 %v1259_v13, %v4441_v30  ;;  %v2338_v22 = vshrl.u32 %v4998_v59, 16  ;;  %v2358_v29 = vshrl.u32 %v5012_v28, 16  ;;  %v1835_v59 = vld [vmem:[%s3909_s22 + $0xd3] sm:$0xff] }
 0x23b   : > { %v1995_v62 = vadd.f32 %v1895_v20, %v1782_v43  ;;  %1306 = vmatmul.f32.gmra.mxu1 %v4914_v58  ;;  %1519 = vmatmul.f32.gmra.mxu2 %v5015_v12  ;;  %vm2343_vm15 = vc.u32 %v2341_v44, %v2337_v24  ;;  %v5039_v58 = vadd.s32 18, %v5018_v51  ;;  %v2321_v17 = vmul.u32 18, %v2320_v15 }
 0x23c   : > { %v2344_v20 = vsel %vm2343_vm15, 1, %v5815_v9  ;;  %v5053_v57 = vadd.s32 88, %v4639_v1  ;;  %v5058_v13 = vmul.u32 58254, %v2357_v63  ;;  %v5060_v33 = vmul.u32 14564, %v2358_v29 }
 0x23d   : > { %v3472_v46 = vsel %vm4980_vm9, %v1995_v62, 0.0  ;;  %1732 = vmatmul.f32.gmra.mxu3 %v1622_v52  ;;  %v2346_v0 = vadd.s32 %v2344_v20, %v2342_v26  ;;  %v2360_v44 = vmul.u32 14564, %v2357_v63  ;;  %v2363_v15 = vmul.u32 58254, %v2358_v29  ;;  %v1623_v26 = vld [vmem:[%s3909_s22 + $0xda] sm:$0xff] }
 0x23e   : > { %3508 = vst [vmem:[%s4823_s19 + $0x20] sm:$0xff] %v3472_v46  ;;  %v3543_v47 = vadd.f32 %v3542_v3, %v3472_v46  ;;  %v3586_v35 = vmul.f32 %v3472_v46, %v3472_v46  ;;  %v1472_v30 = vpop.f32.mrf.mxu2  ;;  %v1898_v10 = vpop.f32.mrf.mxu0  ;;  %v5056_v3 = vsub.s32 %v4890_v50, %v2321_v17  ;;  %vm5080_vm2 = vcmp.lt.s32.totalorder %v3258_v6, 16  ;;  %v5112_v50 = vld [vmem:[%s3909_s22 + $0xe1] sm:$0xff] }
 0x23f   : > { %v1570_v55 = vadd.f32 %v1472_v30, %v1357_v11  ;;  %v2347_v52 = vadd.s32 %v2346_v0, %v2336_v4  ;;  %v2364_v48 = vshll.u32 %v5058_v13, 16  ;;  %v2386_v42 = vand.u32 65535, %v5053_v57 }
 0x240   : > { %v3621_v24 = vadd.f32 %v3620_v34, %v3586_v35  ;;  %v1262_v43 = vpop.f32.mrf.mxu1  ;;  %v1685_v16 = vpop.f32.mrf.mxu3  ;;  %v3259_v34 = vsel %vm5048_vm0, %v5039_v58, %v5018_v51  ;;  %vm3116_vm3 = vcmp.ne.s32.totalorder %v5056_v3, 0  ;;  %v2387_v6 = vshrl.u32 %v5053_v57, 16 }
 0x241   : > { %v1783_v62 = vadd.f32 %v1685_v16, %v1570_v55  ;;  %1945 = vmatmul.f32.gmra.mxu0 %v1835_v59  ;;  %v1358_v4 = vadd.f32 %v1262_v43, %v4450_v38  ;;  %v2348_v21 = vadd.s32 %v2347_v52, %v2338_v22  ;;  %v2366_v38 = vshll.u32 %v5060_v33, 16  ;;  %v1836_v59 = vld [vmem:[%s3909_s22 + $0xdb] sm:$0xff] }
 0x242   : > { %vm3152_vm4 = vcmp.lt.s32.totalorder %v5056_v3, 0  ;;  %vm2368_vm5 = vc.u32 %v2360_v44, %v2364_v48  ;;  %v2370_v22 = vadd.s32 %v2364_v48, %v2360_v44  ;;  %v2365_v46 = vshrl.u32 %v5058_v13, 16 }
 0x243   : > { %v1996_v49 = vadd.f32 %v1898_v10, %v1783_v62  ;;  %1309 = vmatmul.f32.gmra.mxu1 %v4973_v40  ;;  %1522 = vmatmul.f32.gmra.mxu2 %v5063_v37  ;;  %v2349_v11 = vshrl.u32 %v2348_v21, 4  ;;  %v5095_v40 = vadd.s32 18, %v5056_v3  ;;  %v2369_v17 = vsel %vm2368_vm5, 1, %v5815_v9  ;;  %vm5105_vm6 = vmand %vm3152_vm4, %vm3116_vm3 }
 0x244   : > { %v2371_v55 = vadd.s32 %v2369_v17, %v2363_v15  ;;  %vm2372_vm7 = vc.u32 %v2370_v22, %v2366_v38  ;;  %v2390_v13 = vmul.u32 58254, %v2386_v42  ;;  %v5109_v52 = vmul.u32 14564, %v2387_v6  ;;  %v1624_v22 = vld [vmem:[%s3909_s22 + $0xe2] sm:$0xff] }
 0x245   : > { %v3473_v29 = vsel %vm5070_vm1, %v1996_v49, 0.0  ;;  %1735 = vmatmul.f32.gmra.mxu3 %v1623_v26  ;;  %v2350_v0 = vmul.u32 18, %v2349_v11  ;;  %v2389_v26 = vmul.u32 14564, %v2386_v42  ;;  %v2367_v48 = vshrl.u32 %v5060_v33, 16 }
 0x246   : > { %3509 = vst [vmem:[%s4823_s19 + $0x28] sm:$0xff] %v3473_v29  ;;  %v3544_v20 = vadd.f32 %v3543_v47, %v3473_v29  ;;  %v3587_v35 = vmul.f32 %v3473_v29, %v3473_v29  ;;  %v1475_v30 = vpop.f32.mrf.mxu2  ;;  %v1901_v10 = vpop.f32.mrf.mxu0  ;;  %v2393_v38 = vshll.u32 %v2390_v13, 16  ;;  %v2394_v17 = vshrl.u32 %v2390_v13, 16 }
 0x247   : > { %v1571_v43 = vadd.f32 %v1475_v30, %v1358_v4  ;;  %v5115_v15 = vsub.s32 %v4961_v60, %v2350_v0  ;;  %v2373_v4 = vsel %vm2372_vm7, 1, %v5815_v9  ;;  %v2392_v60 = vmul.u32 58254, %v2387_v6  ;;  %v1837_v0 = vld [vmem:[%s3909_s22 + $0xe3] sm:$0xff] }
 0x248   : > { %v3622_v47 = vadd.f32 %v3621_v24, %v3587_v35  ;;  %v1265_v44 = vpop.f32.mrf.mxu1  ;;  %v1688_v62 = vpop.f32.mrf.mxu3  ;;  %v2375_v49 = vadd.s32 %v2373_v4, %v2371_v55  ;;  %v3260_v24 = vsel %vm5105_vm6, %v5095_v40, %v5056_v3  ;;  %vm2397_vm10 = vc.u32 %v2389_v26, %v2393_v38 }
 0x249   : > { %v1784_v21 = vadd.f32 %v1688_v62, %v1571_v43  ;;  %1948 = vmatmul.f32.gmra.mxu0 %v1836_v59  ;;  %v1359_v11 = vadd.f32 %v1265_v44, %v4465_v61  ;;  %vm3117_vm8 = vcmp.ne.s32.totalorder %v5115_v15, 0  ;;  %vm3153_vm9 = vcmp.lt.s32.totalorder %v5115_v15, 0 }
 0x24a   : > { %v2376_v33 = vadd.s32 %v2375_v49, %v2365_v46  ;;  %v2395_v61 = vshll.u32 %v5109_v52, 16  ;;  %v5131_v42 = vadd.s32 18, %v5115_v15  ;;  %v2399_v3 = vadd.s32 %v2393_v38, %v2389_v26  ;;  %v5144_v26 = vld [vmem:[%s3909_s22 + $0xe9] sm:$0xff]  ;;  %vm5150_vm12 = vmand %vm3153_vm9, %vm3117_vm8 }
 0x24b   : > { %v1997_v29 = vadd.f32 %v1901_v10, %v1784_v21  ;;  %1312 = vmatmul.f32.gmra.mxu1 %v5015_v12  ;;  %1525 = vmatmul.f32.gmra.mxu2 %v5112_v50  ;;  %v5134_v40 = vadd.s32 96, %v4639_v1  ;;  %v2398_v35 = vsel %vm2397_vm10, 1, %v5815_v9  ;;  %v2396_v21 = vshrl.u32 %v5109_v52, 16 }
 0x24c   : > { %v2377_v12 = vadd.s32 %v2376_v33, %v2367_v48  ;;  %v2400_v55 = vadd.s32 %v2398_v35, %v2392_v60  ;;  %vm2401_vm11 = vc.u32 %v2399_v3, %v2395_v61  ;;  %vm5161_vm13 = vcmp.lt.s32.totalorder %v3259_v34, 16  ;;  %v1625_v60 = vld [vmem:[%s3909_s22 + $0xea] sm:$0xff] }
 0x24d   : > { %v3474_v6 = vsel %vm5080_vm2, %v1997_v29, 0.0  ;;  %1738 = vmatmul.f32.gmra.mxu3 %v1624_v22  ;;  %v2402_v63 = vsel %vm2401_vm11, 1, %v5815_v9  ;;  %v2415_v44 = vand.u32 65535, %v5134_v40  ;;  %v2416_v49 = vshrl.u32 %v5134_v40, 16 }
 0x24e   : > { %3510 = vst [vmem:[%s4823_s19 + $0x30] sm:$0xff] %v3474_v6  ;;  %v3545_v46 = vadd.f32 %v3544_v20, %v3474_v6  ;;  %v3588_v30 = vmul.f32 %v3474_v6, %v3474_v6  ;;  %v1478_v10 = vpop.f32.mrf.mxu2  ;;  %v1904_v59 = vpop.f32.mrf.mxu0  ;;  %v2378_v16 = vshrl.u32 %v2377_v12, 4  ;;  %v2404_v48 = vadd.s32 %v2402_v63, %v2400_v55 }
 0x24f   : > { %v1572_v43 = vadd.f32 %v1478_v10, %v1359_v11  ;;  %v5166_v22 = vadd.s32 104, %v4639_v1  ;;  %vm5169_vm14 = vcmp.lt.s32.totalorder %v3260_v24, 16  ;;  %v2419_v33 = vmul.u32 58254, %v2415_v44 }
 0x250   : > { %v3623_v62 = vadd.f32 %v3622_v47, %v3588_v30  ;;  %v1268_v13 = vpop.f32.mrf.mxu1  ;;  %v1691_v4 = vpop.f32.mrf.mxu3  ;;  %v2379_v11 = vmul.u32 18, %v2378_v16  ;;  %v2405_v29 = vadd.s32 %v2404_v48, %v2394_v17  ;;  %v5173_v2 = vmul.u32 14564, %v2416_v49 }
 0x251   : > { %v1785_v38 = vadd.f32 %v1691_v4, %v1572_v43  ;;  %1951 = vmatmul.f32.gmra.mxu0 %v1837_v0  ;;  %v3261_v58 = vsel %vm5150_vm12, %v5131_v42, %v5115_v15  ;;  %v2418_v24 = vmul.u32 14564, %v2415_v44  ;;  %v1360_v61 = vadd.f32 %v1268_v13, %v4474_v45  ;;  %v1838_v45 = vld [vmem:[%s3909_s22 + $0xeb] sm:$0xff] }
 0x252   : > { %v5182_v34 = vsub.s32 %v5012_v28, %v2379_v11  ;;  %v2406_v3 = vadd.s32 %v2405_v29, %v2396_v21  ;;  %v2421_v6 = vmul.u32 58254, %v2416_v49  ;;  %v2422_v12 = vshll.u32 %v2419_v33, 16  ;;  %v5194_v13 = vld [vmem:[%s3909_s22 + $0xf1] sm:$0xff] }
 0x253   : > { %v1998_v51 = vadd.f32 %v1904_v59, %v1785_v38  ;;  %1315 = vmatmul.f32.gmra.mxu1 %v5063_v37  ;;  %1528 = vmatmul.f32.gmra.mxu2 %v5144_v26  ;;  %v2424_v17 = vshll.u32 %v5173_v2, 16  ;;  %v2444_v35 = vand.u32 65535, %v5166_v22  ;;  %v2445_v15 = vshrl.u32 %v5166_v22, 16  ;;  %v1626_v49 = vld [vmem:[%s3909_s22 + $0xf2] sm:$0xff] }
 0x254   : > { %v2407_v59 = vshrl.u32 %v2406_v3, 4  ;;  %v2423_v0 = vshrl.u32 %v2419_v33, 16  ;;  %vm3118_vm15 = vcmp.ne.s32.totalorder %v5182_v34, 0  ;;  %vm2426_vm0 = vc.u32 %v2418_v24, %v2422_v12 }
 0x255   : > { %v3475_v37 = vsel %vm5161_vm13, %v1998_v51, 0.0  ;;  %1741 = vmatmul.f32.gmra.mxu3 %v1625_v60  ;;  %v2428_v43 = vadd.s32 %v2422_v12, %v2418_v24  ;;  %vm3154_vm1 = vcmp.lt.s32.totalorder %v5182_v34, 0  ;;  %v2427_v4 = vsel %vm2426_vm0, 1, %v5815_v9 }
 0x256   : > { %3511 = vst [vmem:[%s4823_s19 + $0x38] sm:$0xff] %v3475_v37  ;;  %v3546_v28 = vadd.f32 %v3545_v46, %v3475_v37  ;;  %v3589_v42 = vmul.f32 %v3475_v37, %v3475_v37  ;;  %v1481_v30 = vpop.f32.mrf.mxu2  ;;  %v1907_v10 = vpop.f32.mrf.mxu0  ;;  %v2408_v46 = vmul.u32 18, %v2407_v59  ;;  %v5199_v21 = vadd.s32 18, %v5182_v34  ;;  %vm5219_vm4 = vmand %vm3154_vm1, %vm3118_vm15 }
 0x257   : > { %v1573_v55 = vadd.f32 %v1481_v30, %v1360_v61  ;;  %v2429_v48 = vadd.s32 %v2427_v4, %v2421_v6  ;;  %vm2430_vm2 = vc.u32 %v2428_v43, %v2424_v17  ;;  %vm5202_vm3 = vcmp.lt.s32.totalorder %v3261_v58, 16 }
 0x258   : > { %v3624_v16 = vadd.f32 %v3623_v62, %v3589_v42  ;;  %v1271_v63 = vpop.f32.mrf.mxu1  ;;  %v1694_v44 = vpop.f32.mrf.mxu3  ;;  %v5207_v62 = vsub.s32 %v5053_v57, %v2408_v46  ;;  %v2425_v47 = vshrl.u32 %v5173_v2, 16  ;;  %v2431_v11 = vsel %vm2430_vm2, 1, %v5815_v9 }
 0x259   : > { %v1786_v20 = vadd.f32 %v1694_v44, %v1573_v55  ;;  %1954 = vmatmul.f32.gmra.mxu0 %v1838_v45  ;;  %v5211_v60 = vmul.u32 58254, %v2444_v35  ;;  %v2433_v57 = vadd.s32 %v2431_v11, %v2429_v48  ;;  %v2447_v2 = vmul.u32 14564, %v2444_v35  ;;  %v1839_v35 = vld [vmem:[%s3909_s22 + $0xf3] sm:$0xff] }
 0x25a   : > { %v5223_v51 = vmul.u32 14564, %v2445_v15  ;;  %v1361_v58 = vadd.f32 %v1271_v63, %v4489_v53  ;;  %vm3119_vm5 = vcmp.ne.s32.totalorder %v5207_v62, 0  ;;  %vm3155_vm6 = vcmp.lt.s32.totalorder %v5207_v62, 0  ;;  %v5249_v55 = vld [vmem:[%s3909_s22 + $0xf9] sm:$0xff] }
 0x25b   : > { %v1999_v29 = vadd.f32 %v1907_v10, %v1786_v20  ;;  %1318 = vmatmul.f32.gmra.mxu1 %v5112_v50  ;;  %1531 = vmatmul.f32.gmra.mxu2 %v5194_v13  ;;  %v2451_v50 = vshll.u32 %v5211_v60, 16  ;;  %v5232_v61 = vadd.s32 18, %v5207_v62  ;;  %v2434_v3 = vadd.s32 %v2433_v57, %v2423_v0  ;;  %vm5242_vm7 = vmand %vm3155_vm6, %vm3119_vm5 }
 0x25c   : > { %v2450_v6 = vmul.u32 58254, %v2445_v15  ;;  %v3262_v42 = vsel %vm5219_vm4, %v5199_v21, %v5182_v34  ;;  %v2453_v15 = vshll.u32 %v5223_v51, 16  ;;  %v2452_v10 = vshrl.u32 %v5211_v60, 16 }
 0x25d   : > { %v3476_v24 = vsel %vm5169_vm14, %v1999_v29, 0.0  ;;  %1744 = vmatmul.f32.gmra.mxu3 %v1626_v49  ;;  %vm2455_vm8 = vc.u32 %v2447_v2, %v2451_v50  ;;  %v2457_v43 = vadd.s32 %v2451_v50, %v2447_v2  ;;  %v5253_v63 = vadd.s32 112, %v4639_v1 }
 0x25e   : > { %3512 = vst [vmem:[%s4823_s19 + $0x40] sm:$0xff] %v3476_v24  ;;  %v3547_v12 = vadd.f32 %v3546_v28, %v3476_v24  ;;  %v3590_v37 = vmul.f32 %v3476_v24, %v3476_v24  ;;  %v1484_v53 = vpop.f32.mrf.mxu2  ;;  %v1910_v17 = vpop.f32.mrf.mxu0  ;;  %v2435_v28 = vadd.s32 %v2434_v3, %v2425_v47  ;;  %v2456_v34 = vsel %vm2455_vm8, 1, %v5815_v9 }
 0x25f   : > { %v1574_v30 = vadd.f32 %v1484_v53, %v1361_v58  ;;  %v3263_v46 = vsel %vm5242_vm7, %v5232_v61, %v5207_v62  ;;  %v2458_v20 = vadd.s32 %v2456_v34, %v2450_v6  ;;  %v2454_v21 = vshrl.u32 %v5223_v51, 16  ;;  %v1840_v6 = vld [vmem:[%s3909_s22 + $0xfb] sm:$0xff] }
 0x260   : > { %v3625_v45 = vadd.f32 %v3624_v16, %v3590_v37  ;;  %v1274_v59 = vpop.f32.mrf.mxu1  ;;  %v1697_v0 = vpop.f32.mrf.mxu3  ;;  %v2436_v4 = vshrl.u32 %v2435_v28, 4  ;;  %v1627_v16 = vld [vmem:[%s3909_s22 + $0xfa] sm:$0xff]  ;;  %vm2459_vm9 = vc.u32 %v2457_v43, %v2453_v15  ;;  %v2473_v48 = vand.u32 65535, %v5253_v63  ;;  %v1630_v15 = vld [vmem:[%s3909_s22 + $0x112] sm:$0xff] }
 0x261   : > { %v1787_v44 = vadd.f32 %v1697_v0, %v1574_v30  ;;  %1957 = vmatmul.f32.gmra.mxu0 %v1839_v35  ;;  %v2474_v49 = vshrl.u32 %v5253_v63, 16  ;;  %v1362_v47 = vadd.f32 %v1274_v59, %v4498_v41  ;;  %v2460_v62 = vsel %vm2459_vm9, 1, %v5815_v9 }
 0x262   : > { %v2437_v60 = vmul.u32 18, %v2436_v4  ;;  %v2462_v29 = vadd.s32 %v2460_v62, %v2458_v20  ;;  %v5267_v33 = vmul.u32 58254, %v2473_v48  ;;  %v5272_v2 = vadd.s32 120, %v4639_v1 }
 0x263   : > { %v2000_v11 = vadd.f32 %v1910_v17, %v1787_v44  ;;  %1321 = vmatmul.f32.gmra.mxu1 %v5144_v26  ;;  %1534 = vmatmul.f32.gmra.mxu2 %v5249_v55  ;;  %v5269_v57 = vmul.u32 14564, %v2474_v49  ;;  %v2476_v51 = vmul.u32 14564, %v2473_v48  ;;  %v2479_v58 = vmul.u32 58254, %v2474_v49  ;;  %v1628_v44 = vld [vmem:[%s3909_s22 + $0x102] sm:$0xff] }
 0x264   : > { %v5277_v26 = vsub.s32 %v5134_v40, %v2437_v60  ;;  %v2463_v37 = vadd.s32 %v2462_v29, %v2452_v10  ;;  %v2480_v53 = vshll.u32 %v5267_v33, 16  ;;  %v2502_v10 = vand.u32 65535, %v5272_v2 }
 0x265   : > { %v3477_v41 = vsel %vm5202_vm3, %v2000_v11, 0.0  ;;  %1747 = vmatmul.f32.gmra.mxu3 %v1627_v16  ;;  %v2482_v28 = vshll.u32 %v5269_v57, 16  ;;  %vm5296_vm13 = vcmp.lt.s32.totalorder %v3262_v42, 16  ;;  %v5302_v34 = vadd.s32 128, %v4639_v1 }
 0x266   : > { %3513 = vst [vmem:[%s4823_s19 + $0x48] sm:$0xff] %v3477_v41  ;;  %v3548_v50 = vadd.f32 %v3547_v12, %v3477_v41  ;;  %v3591_v24 = vmul.f32 %v3477_v41, %v3477_v41  ;;  %v1487_v61 = vpop.f32.mrf.mxu2  ;;  %v1913_v3 = vpop.f32.mrf.mxu0  ;;  %vm3120_vm10 = vcmp.ne.s32.totalorder %v5277_v26, 0  ;;  %vm3156_vm11 = vcmp.lt.s32.totalorder %v5277_v26, 0  ;;  %v5288_v12 = vld [vmem:[%s3909_s22 + $0x101] sm:$0xff] }
 0x267   : > { %v1575_v17 = vadd.f32 %v1487_v61, %v1362_v47  ;;  %v5285_v40 = vadd.s32 18, %v5277_v26  ;;  %vm5290_vm12 = vmand %vm3156_vm11, %vm3120_vm10  ;;  %v2464_v30 = vadd.s32 %v2463_v37, %v2454_v21  ;;  %vm5306_vm14 = vcmp.lt.s32.totalorder %v3263_v46, 16 }
 0x268   : > { %v3626_v38 = vadd.f32 %v3625_v45, %v3591_v24  ;;  %v1277_v35 = vpop.f32.mrf.mxu1  ;;  %v1700_v52 = vpop.f32.mrf.mxu3  ;;  %v2481_v45 = vshrl.u32 %v5267_v33, 16  ;;  %vm2484_vm15 = vc.u32 %v2476_v51, %v2480_v53  ;;  %v2486_v16 = vadd.s32 %v2480_v53, %v2476_v51  ;;  %v1841_v24 = vld [vmem:[%s3909_s22 + $0x103] sm:$0xff] }
 0x269   : > { %v1788_v59 = vadd.f32 %v1700_v52, %v1575_v17  ;;  %1960 = vmatmul.f32.gmra.mxu0 %v1840_v6  ;;  %v1363_v43 = vadd.f32 %v1277_v35, %v4510_v7  ;;  %v2465_v20 = vshrl.u32 %v2464_v30, 4  ;;  %v3264_v21 = vsel %vm5290_vm12, %v5285_v40, %v5277_v26  ;;  %v5333_v30 = vld [vmem:[%s3909_s22 + $0x109] sm:$0xff] }
 0x26a   : > { %v2485_v7 = vsel %vm2484_vm15, 1, %v5815_v9  ;;  %v2503_v46 = vshrl.u32 %v5272_v2, 16  ;;  %vm2488_vm0 = vc.u32 %v2486_v16, %v2482_v28  ;;  %v5318_v47 = vmul.u32 58254, %v2502_v10 }
 0x26b   : > { %v2001_v42 = vadd.f32 %v1913_v3, %v1788_v59  ;;  %1324 = vmatmul.f32.gmra.mxu1 %v5194_v13  ;;  %1537 = vmatmul.f32.gmra.mxu2 %v5288_v12  ;;  %v2466_v48 = vmul.u32 18, %v2465_v20  ;;  %v2487_v49 = vadd.s32 %v2485_v7, %v2479_v58  ;;  %v2489_v11 = vsel %vm2488_vm0, 1, %v5815_v9 }
 0x26c   : > { %v2505_v60 = vmul.u32 14564, %v2502_v10  ;;  %v5323_v62 = vmul.u32 14564, %v2503_v46  ;;  %v2483_v6 = vshrl.u32 %v5269_v57, 16  ;;  %v2508_v37 = vmul.u32 58254, %v2503_v46 }
 0x26d   : > { %v3478_v13 = vsel %vm5296_vm13, %v2001_v42, 0.0  ;;  %1750 = vmatmul.f32.gmra.mxu3 %v1628_v44  ;;  %v5328_v58 = vsub.s32 %v5166_v22, %v2466_v48  ;;  %v2491_v61 = vadd.s32 %v2489_v11, %v2487_v49  ;;  %v2509_v53 = vshll.u32 %v5318_v47, 16 }
 0x26e   : > { %3514 = vst [vmem:[%s4823_s19 + $0x50] sm:$0xff] %v3478_v13  ;;  %v3549_v29 = vadd.f32 %v3548_v50, %v3478_v13  ;;  %v3592_v33 = vmul.f32 %v3478_v13, %v3478_v13  ;;  %v1490_v41 = vpop.f32.mrf.mxu2  ;;  %v1916_v51 = vpop.f32.mrf.mxu0  ;;  %v2510_v50 = vshrl.u32 %v5318_v47, 16  ;;  %v2511_v22 = vshll.u32 %v5323_v62, 16 }
 0x26f   : > { %v1576_v3 = vadd.f32 %v1490_v41, %v1363_v43  ;;  %vm3121_vm1 = vcmp.ne.s32.totalorder %v5328_v58, 0  ;;  %vm3157_vm2 = vcmp.lt.s32.totalorder %v5328_v58, 0  ;;  %v3229_v57 = vadd.s32 18, %v5328_v58 }
 0x270   : > { %v3627_v17 = vadd.f32 %v3626_v38, %v3592_v33  ;;  %v1280_v35 = vpop.f32.mrf.mxu1  ;;  %v1703_v52 = vpop.f32.mrf.mxu3  ;;  %v2492_v10 = vadd.s32 %v2491_v61, %v2481_v45  ;;  %v1629_v38 = vld [vmem:[%s3909_s22 + $0x10a] sm:$0xff]  ;;  %vm2513_vm3 = vc.u32 %v2505_v60, %v2509_v53  ;;  %v2515_v0 = vadd.s32 %v2509_v53, %v2505_v60  ;;  %vm5349_vm4 = vmand %vm3157_vm2, %vm3121_vm1 }
 0x271   : > { %v1789_v28 = vadd.f32 %v1703_v52, %v1576_v3  ;;  %1963 = vmatmul.f32.gmra.mxu0 %v1841_v24  ;;  %v1364_v59 = vadd.f32 %v1280_v35, %v4522_v56  ;;  %v2531_v43 = vand.u32 65535, %v5302_v34  ;;  %v2512_v16 = vshrl.u32 %v5323_v62, 16  ;;  %v1842_v33 = vld [vmem:[%s3909_s22 + $0x10b] sm:$0xff] }
 0x272   : > { %v2493_v20 = vadd.s32 %v2492_v10, %v2483_v6  ;;  %v2514_v42 = vsel %vm2513_vm3, 1, %v5815_v9  ;;  %vm2517_vm5 = vc.u32 %v2515_v0, %v2511_v22  ;;  %v2532_v7 = vshrl.u32 %v5302_v34, 16  ;;  %v5377_v35 = vld [vmem:[%s3909_s22 + $0x111] sm:$0xff] }
 0x273   : > { %v2002_v44 = vadd.f32 %v1916_v51, %v1789_v28  ;;  %1327 = vmatmul.f32.gmra.mxu1 %v5249_v55  ;;  %1540 = vmatmul.f32.gmra.mxu2 %v5333_v30  ;;  %v2516_v45 = vadd.s32 %v2514_v42, %v2508_v37  ;;  %v2534_v46 = vmul.u32 14564, %v2531_v43  ;;  %v2518_v49 = vsel %vm2517_vm5, 1, %v5815_v9 }
 0x274   : > { %v2494_v48 = vshrl.u32 %v2493_v20, 4  ;;  %v5357_v47 = vmul.u32 58254, %v2531_v43  ;;  %v5361_v51 = vmul.u32 14564, %v2532_v7  ;;  %v3265_v4 = vsel %vm5349_vm4, %v3229_v57, %v5328_v58 }
 0x275   : > { %v3479_v55 = vsel %vm5306_vm14, %v2002_v44, 0.0  ;;  %1753 = vmatmul.f32.gmra.mxu3 %v1629_v38  ;;  %v2520_v41 = vadd.s32 %v2518_v49, %v2516_v45  ;;  %vm5372_vm6 = vcmp.lt.s32.totalorder %v3264_v21, 16  ;;  %v2537_v28 = vmul.u32 58254, %v2532_v7 }
 0x276   : > { %3515 = vst [vmem:[%s4823_s19 + $0x58] sm:$0xff] %v3479_v55  ;;  %v3550_v13 = vadd.f32 %v3549_v29, %v3479_v55  ;;  %v3593_v11 = vmul.f32 %v3479_v55, %v3479_v55  ;;  %v1493_v60 = vpop.f32.mrf.mxu2  ;;  %v1919_v62 = vpop.f32.mrf.mxu0  ;;  %v2495_v61 = vmul.u32 18, %v2494_v48  ;;  %v2538_v3 = vshll.u32 %v5357_v47, 16 }
 0x277   : > { %v1577_v24 = vadd.f32 %v1493_v60, %v1364_v59  ;;  %v2521_v52 = vadd.s32 %v2520_v41, %v2510_v50  ;;  %v2540_v58 = vshll.u32 %v5361_v51, 16  ;;  %v2539_v57 = vshrl.u32 %v5357_v47, 16  ;;  %v5409_v41 = vld [vmem:[%s3909_s22 + $0x119] sm:$0xff] }
 0x278   : > { %v3628_v6 = vadd.f32 %v3627_v17, %v3593_v11  ;;  %v1283_v37 = vpop.f32.mrf.mxu1  ;;  %v1706_v53 = vpop.f32.mrf.mxu3  ;;  %v2496_v17 = vsub.s32 %v5253_v63, %v2495_v61  ;;  %vm5383_vm7 = vcmp.lt.s32.totalorder %v3265_v4, 16  ;;  %vm2542_vm8 = vc.u32 %v2534_v46, %v2538_v3 }
 0x279   : > { %v1790_v22 = vadd.f32 %v1706_v53, %v1577_v24  ;;  %1966 = vmatmul.f32.gmra.mxu0 %v1842_v33  ;;  %v2522_v26 = vadd.s32 %v2521_v52, %v2512_v16  ;;  %v2544_v40 = vadd.s32 %v2538_v3, %v2534_v46  ;;  %v5388_v21 = vadd.s32 136, %v4639_v1  ;;  %v1843_v46 = vld [vmem:[%s3909_s22 + $0x113] sm:$0xff] }
 0x27a   : > { %vm3122_vm9 = vcmp.ne.s32.totalorder %v2496_v17, 0  ;;  %vm3158_vm10 = vcmp.lt.s32.totalorder %v2496_v17, 0  ;;  %v3230_v63 = vadd.s32 18, %v2496_v17  ;;  %v2543_v0 = vsel %vm2542_vm8, 1, %v5815_v9  ;;  %v1631_v53 = vld [vmem:[%s3909_s22 + $0x11a] sm:$0xff] }
 0x27b   : > { %v2003_v50 = vadd.f32 %v1919_v62, %v1790_v22  ;;  %1330 = vmatmul.f32.gmra.mxu1 %v5288_v12  ;;  %1543 = vmatmul.f32.gmra.mxu2 %v5377_v35  ;;  %vm5392_vm11 = vmand %vm3158_vm10, %vm3122_vm9  ;;  %v2523_v38 = vshrl.u32 %v2522_v26, 4  ;;  %vm2546_vm12 = vc.u32 %v2544_v40, %v2540_v58  ;;  %v2560_v43 = vand.u32 65535, %v5388_v21 }
 0x27c   : > { %v1365_v44 = vadd.f32 %v1283_v37, %v4531_v36  ;;  %v2545_v20 = vadd.s32 %v2543_v0, %v2537_v28  ;;  %v2547_v16 = vsel %vm2546_vm12, 1, %v5815_v9  ;;  %v2541_v48 = vshrl.u32 %v5361_v51, 16  ;;  %v1844_v0 = vld [vmem:[%s3909_s22 + $0x11b] sm:$0xff] }
 0x27d   : > { %v3480_v12 = vsel %vm5372_vm6, %v2003_v50, 0.0  ;;  %1756 = vmatmul.f32.gmra.mxu3 %v1630_v15  ;;  %v2524_v55 = vmul.u32 18, %v2523_v38  ;;  %v3266_v36 = vsel %vm5392_vm11, %v3230_v63, %v2496_v17  ;;  %v2561_v11 = vshrl.u32 %v5388_v21, 16 }
 0x27e   : > { %3516 = vst [vmem:[%s4823_s19 + $0x60] sm:$0xff] %v3480_v12  ;;  %v3551_v42 = vadd.f32 %v3550_v13, %v3480_v12  ;;  %v3594_v56 = vmul.f32 %v3480_v12, %v3480_v12  ;;  %v1496_v45 = vpop.f32.mrf.mxu2  ;;  %v1922_v7 = vpop.f32.mrf.mxu0  ;;  %v2549_v47 = vadd.s32 %v2547_v16, %v2545_v20  ;;  %v5412_v24 = vmul.u32 58254, %v2560_v43 }
 0x27f   : > { %v1578_v49 = vadd.f32 %v1496_v45, %v1365_v44  ;;  %v2525_v13 = vsub.s32 %v5272_v2, %v2524_v55  ;;  %v5415_v4 = vadd.s32 144, %v4639_v1  ;;  %v2563_v3 = vmul.u32 14564, %v2560_v43 }
 0x280   : > { %v3629_v60 = vadd.f32 %v3628_v6, %v3594_v56  ;;  %v1286_v62 = vpop.f32.mrf.mxu1  ;;  %v1709_v33 = vpop.f32.mrf.mxu3  ;;  %v2550_v61 = vadd.s32 %v2549_v47, %v2539_v57  ;;  %v5417_v37 = vmul.u32 14564, %v2561_v11  ;;  %vm5420_vm13 = vcmp.lt.s32.totalorder %v3266_v36, 16 }
 0x281   : > { %v1791_v51 = vadd.f32 %v1709_v33, %v1578_v49  ;;  %1969 = vmatmul.f32.gmra.mxu0 %v1843_v46  ;;  %vm3123_vm14 = vcmp.ne.s32.totalorder %v2525_v13, 0  ;;  %vm3159_vm15 = vcmp.lt.s32.totalorder %v2525_v13, 0  ;;  %v3231_v29 = vadd.s32 18, %v2525_v13  ;;  %v5444_v46 = vld [vmem:[%s3909_s22 + $0x121] sm:$0xff] }
 0x282   : > { %vm5426_vm0 = vmand %vm3159_vm15, %vm3123_vm14  ;;  %v2551_v58 = vadd.s32 %v2550_v61, %v2541_v48  ;;  %v2566_v22 = vmul.u32 58254, %v2561_v11  ;;  %v2567_v17 = vshll.u32 %v5412_v24, 16  ;;  %v1366_v28 = vadd.f32 %v1286_v62, %v4543_v18  ;;  %v1632_v11 = vld [vmem:[%s3909_s22 + $0x122] sm:$0xff] }
 0x283   : > { %v2004_v2 = vadd.f32 %v1922_v7, %v1791_v51  ;;  %1333 = vmatmul.f32.gmra.mxu1 %v5333_v30  ;;  %1546 = vmatmul.f32.gmra.mxu2 %v5409_v41  ;;  %v2568_v57 = vshrl.u32 %v5412_v24, 16  ;;  %v2569_v15 = vshll.u32 %v5417_v37, 16  ;;  %v2589_v26 = vand.u32 65535, %v5415_v4 }
 0x284   : > { %v3267_v40 = vsel %vm5426_vm0, %v3231_v29, %v2525_v13  ;;  %v2552_v50 = vshrl.u32 %v2551_v58, 4  ;;  %vm2571_vm1 = vc.u32 %v2563_v3, %v2567_v17  ;;  %v2573_v44 = vadd.s32 %v2567_v17, %v2563_v3  ;;  %v1845_v17 = vld [vmem:[%s3909_s22 + $0x123] sm:$0xff] }
 0x285   : > { %v3481_v30 = vsel %vm5383_vm7, %v2004_v2, 0.0  ;;  %1759 = vmatmul.f32.gmra.mxu3 %v1631_v53  ;;  %v2572_v43 = vsel %vm2571_vm1, 1, %v5815_v9  ;;  %v2590_v16 = vshrl.u32 %v5415_v4, 16  ;;  %v5447_v55 = vmul.u32 58254, %v2589_v26 }
 0x286   : > { %3517 = vst [vmem:[%s4823_s19 + $0x68] sm:$0xff] %v3481_v30  ;;  %v3552_v63 = vadd.f32 %v3551_v42, %v3481_v30  ;;  %v3595_v59 = vmul.f32 %v3481_v30, %v3481_v30  ;;  %v1499_v18 = vpop.f32.mrf.mxu2  ;;  %v1925_v38 = vpop.f32.mrf.mxu0  ;;  %v2553_v10 = vmul.u32 18, %v2552_v50  ;;  %v2574_v20 = vadd.s32 %v2572_v43, %v2566_v22 }
 0x287   : > { %v1579_v12 = vadd.f32 %v1499_v18, %v1366_v28  ;;  %v2570_v42 = vshrl.u32 %v5417_v37, 16  ;;  %vm2575_vm2 = vc.u32 %v2573_v44, %v2569_v15  ;;  %v2592_v47 = vmul.u32 14564, %v2589_v26 }
 0x288   : > { %v3630_v56 = vadd.f32 %v3629_v60, %v3595_v59  ;;  %v1289_v45 = vpop.f32.mrf.mxu1  ;;  %v1712_v7 = vpop.f32.mrf.mxu3  ;;  %v2554_v49 = vsub.s32 %v5302_v34, %v2553_v10  ;;  %v2576_v36 = vsel %vm2575_vm2, 1, %v5815_v9  ;;  %vm5452_vm3 = vcmp.lt.s32.totalorder %v3267_v40, 16 }
 0x289   : > { %v1792_v48 = vadd.f32 %v1712_v7, %v1579_v12  ;;  %1972 = vmatmul.f32.gmra.mxu0 %v1844_v0  ;;  %v2578_v60 = vadd.s32 %v2576_v36, %v2574_v20  ;;  %v5456_v33 = vmul.u32 14564, %v2590_v16  ;;  %v2596_v13 = vshll.u32 %v5447_v55, 16  ;;  %v1633_v20 = vld [vmem:[%s3909_s22 + $0x12a] sm:$0xff] }
 0x28a   : > { %vm3124_vm4 = vcmp.ne.s32.totalorder %v2554_v49, 0  ;;  %vm3160_vm5 = vcmp.lt.s32.totalorder %v2554_v49, 0  ;;  %v3232_v34 = vadd.s32 18, %v2554_v49  ;;  %v1367_v51 = vadd.f32 %v1289_v45, %v4552_v54 }
 0x28b   : > { %v2005_v24 = vadd.f32 %v1925_v38, %v1792_v48  ;;  %1336 = vmatmul.f32.gmra.mxu1 %v5377_v35  ;;  %1549 = vmatmul.f32.gmra.mxu2 %v5444_v46  ;;  %vm5462_vm6 = vmand %vm3160_vm5, %vm3124_vm4  ;;  %v2579_v3 = vadd.s32 %v2578_v60, %v2568_v57  ;;  %v2595_v37 = vmul.u32 58254, %v2590_v16  ;;  %v2598_v53 = vshll.u32 %v5456_v33, 16 }
 0x28c   : > { %v2597_v35 = vshrl.u32 %v5447_v55, 16  ;;  %vm2600_vm7 = vc.u32 %v2592_v47, %v2596_v13  ;;  %v2602_v2 = vadd.s32 %v2596_v13, %v2592_v47  ;;  %v3268_v28 = vsel %vm5462_vm6, %v3232_v34, %v2554_v49 }
 0x28d   : > { %v3482_v29 = vsel %vm5420_vm13, %v2005_v24, 0.0  ;;  %1762 = vmatmul.f32.gmra.mxu3 %v1632_v11  ;;  %v2580_v57 = vadd.s32 %v2579_v3, %v2570_v42  ;;  %v2601_v6 = vsel %vm2600_vm7, 1, %v5815_v9  ;;  %v5476_v26 = vadd.s32 152, %v4639_v1 }
 0x28e   : > { %3518 = vst [vmem:[%s4823_s19 + $0x70] sm:$0xff] %v3482_v29  ;;  %v3553_v52 = vadd.f32 %v3552_v63, %v3482_v29  ;;  %v3596_v54 = vmul.f32 %v3482_v29, %v3482_v29  ;;  %v1502_v58 = vpop.f32.mrf.mxu2  ;;  %v1928_v22 = vpop.f32.mrf.mxu0  ;;  %vm2604_vm8 = vc.u32 %v2602_v2, %v2598_v53  ;;  %v5479_v63 = vld [vmem:[%s3909_s22 + $0x129] sm:$0xff]  ;;  %v2603_v18 = vadd.s32 %v2601_v6, %v2595_v37 }
 0x28f   : > { %v1580_v15 = vadd.f32 %v1502_v58, %v1367_v51  ;;  %v2581_v59 = vshrl.u32 %v2580_v57, 4  ;;  %v2605_v38 = vsel %vm2604_vm8, 1, %v5815_v9  ;;  %v2599_v43 = vshrl.u32 %v5456_v33, 16 }
 0x290   : > { %v3631_v30 = vadd.f32 %v3630_v56, %v3596_v54  ;;  %v1292_v40 = vpop.f32.mrf.mxu1  ;;  %v1715_v50 = vpop.f32.mrf.mxu3  ;;  %v2618_v44 = vand.u32 65535, %v5476_v26  ;;  %v2619_v12 = vshrl.u32 %v5476_v26, 16  ;;  %vm5487_vm9 = vcmp.lt.s32.totalorder %v3268_v28, 16 }
 0x291   : > { %v1793_v0 = vadd.f32 %v1715_v50, %v1580_v15  ;;  %1975 = vmatmul.f32.gmra.mxu0 %v1845_v17  ;;  %v1368_v10 = vadd.f32 %v1292_v40, %v4558_v31  ;;  %v2582_v56 = vmul.u32 18, %v2581_v59  ;;  %v2607_v45 = vadd.s32 %v2605_v38, %v2603_v18  ;;  %v1634_v40 = vld [vmem:[%s3909_s22 + $0x132] sm:$0xff] }
 0x292   : > { %v5492_v7 = vadd.s32 160, %v4639_v1  ;;  %v5496_v55 = vmul.u32 58254, %v2618_v44  ;;  %v5498_v48 = vmul.u32 14564, %v2619_v12  ;;  %v5501_v31 = vadd.s32 168, %v4639_v1 }
 0x293   : > { %v2006_v42 = vadd.f32 %v1928_v22, %v1793_v0  ;;  %1339 = vmatmul.f32.gmra.mxu1 %v5409_v41  ;;  %1552 = vmatmul.f32.gmra.mxu2 %v5479_v63  ;;  %v2583_v49 = vsub.s32 %v5388_v21, %v2582_v56  ;;  %v2608_v36 = vadd.s32 %v2607_v45, %v2597_v35  ;;  %v2621_v47 = vmul.u32 14564, %v2618_v44  ;;  %v1846_v21 = vld [vmem:[%s3909_s22 + $0x12b] sm:$0xff] }
 0x294   : > { %v2624_v11 = vmul.u32 58254, %v2619_v12  ;;  %v2625_v41 = vshll.u32 %v5496_v55, 16  ;;  %v2627_v33 = vshll.u32 %v5498_v48, 16  ;;  %v2647_v13 = vand.u32 65535, %v5492_v7 }
 0x295   : > { %v3483_v60 = vsel %vm5452_vm3, %v2006_v42, 0.0  ;;  %1765 = vmatmul.f32.gmra.mxu3 %v1633_v20  ;;  %vm3125_vm10 = vcmp.ne.s32.totalorder %v2583_v49, 0  ;;  %vm3161_vm11 = vcmp.lt.s32.totalorder %v2583_v49, 0  ;;  %v3233_v37 = vadd.s32 18, %v2583_v49 }
 0x296   : > { %3519 = vst [vmem:[%s4823_s19 + $0x78] sm:$0xff] %v3483_v60  ;;  %v3554_v24 = vadd.f32 %v3553_v52, %v3483_v60  ;;  %v3597_v34 = vmul.f32 %v3483_v60, %v3483_v60  ;;  %v1505_v51 = vpop.f32.mrf.mxu2  ;;  %v1931_v61 = vpop.f32.mrf.mxu0  ;;  %vm5511_vm12 = vmand %vm3161_vm11, %vm3125_vm10  ;;  %v2609_v53 = vadd.s32 %v2608_v36, %v2599_v43  ;;  %v2626_v29 = vshrl.u32 %v5496_v55, 16  ;;  %v5517_v52 = vld [vmem:[%s3909_s22 + $0x131] sm:$0xff] }
 0x297   : > { %v1581_v3 = vadd.f32 %v1505_v51, %v1368_v10  ;;  %vm2629_vm13 = vc.u32 %v2621_v47, %v2625_v41  ;;  %v2631_v58 = vadd.s32 %v2625_v41, %v2621_v47  ;;  %v2648_v22 = vshrl.u32 %v5492_v7, 16 }
 0x298   : > { %v3632_v35 = vadd.f32 %v3631_v30, %v3597_v34  ;;  %v1295_v2 = vpop.f32.mrf.mxu1  ;;  %v1718_v54 = vpop.f32.mrf.mxu3  ;;  %v3269_v28 = vsel %vm5511_vm12, %v3233_v37, %v2583_v49  ;;  %v2610_v57 = vshrl.u32 %v2609_v53, 4  ;;  %v2628_v15 = vshrl.u32 %v5498_v48, 16  ;;  %v1847_v49 = vld [vmem:[%s3909_s22 + $0x133] sm:$0xff] }
 0x299   : > { %v1794_v17 = vadd.f32 %v1718_v54, %v1581_v3  ;;  %1978 = vmatmul.f32.gmra.mxu0 %v1846_v21  ;;  %v1369_v6 = vadd.f32 %v1295_v2, %v4564_v32  ;;  %vm5525_vm14 = vcmp.lt.s32.totalorder %v3269_v28, 16  ;;  %v2630_v50 = vsel %vm2629_vm13, 1, %v5815_v9  ;;  %v1635_v37 = vld [vmem:[%s3909_s22 + $0x13a] sm:$0xff] }
 0x29a   : > { %vm2633_vm15 = vc.u32 %v2631_v58, %v2627_v33  ;;  %v2611_v18 = vmul.u32 18, %v2610_v57  ;;  %v2632_v38 = vadd.s32 %v2630_v50, %v2624_v11  ;;  %v2650_v32 = vmul.u32 14564, %v2647_v13  ;;  %v1422_v33 = vld [vmem:[%s3909_s22 + $0x139] sm:$0xff] }
 0x29b   : > { %v2007_v59 = vadd.f32 %v1931_v61, %v1794_v17  ;;  %1342 = vmatmul.f32.gmra.mxu1 %v5444_v46  ;;  %1555 = vmatmul.f32.gmra.mxu2 %v5517_v52  ;;  %v2634_v0 = vsel %vm2633_vm15, 1, %v5815_v9  ;;  %v5533_v43 = vmul.u32 58254, %v2647_v13  ;;  %v5535_v44 = vmul.u32 14564, %v2648_v22 }
 0x29c   : > { %v2653_v12 = vmul.u32 58254, %v2648_v22  ;;  %v2612_v20 = vsub.s32 %v5415_v4, %v2611_v18  ;;  %v2636_v46 = vadd.s32 %v2634_v0, %v2632_v38  ;;  %v2676_v56 = vand.u32 65535, %v5501_v31  ;;  %v1848_v38 = vld [vmem:[%s3909_s22 + $0x13b] sm:$0xff] }
 0x29d   : > { %v3484_v10 = vsel %vm5487_vm9, %v2007_v59, 0.0  ;;  %1768 = vmatmul.f32.gmra.mxu3 %v1634_v40  ;;  %v2654_v36 = vshll.u32 %v5533_v43, 16  ;;  %v2677_v47 = vshrl.u32 %v5501_v31, 16  ;;  %v2655_v34 = vshrl.u32 %v5533_v43, 16 }
 0x29e   : > { %3520 = vst [vmem:[%s4823_s19 + $0x80] sm:$0xff] %v3484_v10  ;;  %v3555_v45 = vadd.f32 %v3554_v24, %v3484_v10  ;;  %v3598_v42 = vmul.f32 %v3484_v10, %v3484_v10  ;;  %v1508_v55 = vpop.f32.mrf.mxu2  ;;  %v1934_v48 = vpop.f32.mrf.mxu0  ;;  %vm3126_vm0 = vcmp.ne.s32.totalorder %v2612_v20, 0  ;;  %vm3162_vm1 = vcmp.lt.s32.totalorder %v2612_v20, 0 }
 0x29f   : > { %v1582_v11 = vadd.f32 %v1508_v55, %v1369_v6  ;;  %v3234_v16 = vadd.s32 18, %v2612_v20  ;;  %vm5546_vm2 = vmand %vm3162_vm1, %vm3126_vm0  ;;  %v2637_v24 = vadd.s32 %v2636_v46, %v2626_v29  ;;  %v2656_v51 = vshll.u32 %v5535_v44, 16  ;;  %v1423_v46 = vld [vmem:[%s3909_s22 + $0x141] sm:$0xff] }
 0x2a0   : > { %v3633_v4 = vadd.f32 %v3632_v35, %v3598_v42  ;;  %v1298_v60 = vpop.f32.mrf.mxu1  ;;  %v1721_v41 = vpop.f32.mrf.mxu3  ;;  %v2657_v3 = vshrl.u32 %v5535_v44, 16  ;;  %vm2658_vm3 = vc.u32 %v2650_v32, %v2654_v36  ;;  %v2660_v2 = vadd.s32 %v2654_v36, %v2650_v32 }
 0x2a1   : > { %v1795_v61 = vadd.f32 %v1721_v41, %v1582_v11  ;;  %1981 = vmatmul.f32.gmra.mxu0 %v1847_v49  ;;  %v3270_v21 = vsel %vm5546_vm2, %v3234_v16, %v2612_v20  ;;  %v1370_v62 = vadd.f32 %v1298_v60, %v4570_v25  ;;  %v2638_v53 = vadd.s32 %v2637_v24, %v2628_v15 }
 0x2a2   : > { %v2659_v35 = vsel %vm2658_vm3, 1, %v5815_v9  ;;  %v2679_v58 = vmul.u32 14564, %v2676_v56  ;;  %v5559_v22 = vmul.u32 58254, %v2676_v56  ;;  %vm5561_vm4 = vcmp.lt.s32.totalorder %v3270_v21, 16 }
 0x2a3   : > { %v2008_v29 = vadd.f32 %v1934_v48, %v1795_v61  ;;  %1345 = vmatmul.f32.gmra.mxu1 %v5479_v63  ;;  %1558 = vmatmul.f32.gmra.mxu2 %v1422_v33  ;;  %v2661_v54 = vadd.s32 %v2659_v35, %v2653_v12  ;;  %v2639_v25 = vshrl.u32 %v2638_v53, 4  ;;  %vm2662_vm5 = vc.u32 %v2660_v2, %v2656_v51  ;;  %v1849_v53 = vld [vmem:[%s3909_s22 + $0x143] sm:$0xff] }
 0x2a4   : > { %v5565_v28 = vmul.u32 14564, %v2677_v47  ;;  %v2663_v63 = vsel %vm2662_vm5, 1, %v5815_v9  ;;  %v2682_v15 = vmul.u32 58254, %v2677_v47  ;;  %v2683_v6 = vshll.u32 %v5559_v22, 16  ;;  %v1636_v47 = vld [vmem:[%s3909_s22 + $0x142] sm:$0xff]  ;;  %s3755_s22 = sshll.u32 %s5921_s13, 1 }
 0x2a5   : > { %v3485_v57 = vsel %vm5525_vm14, %v2008_v29, 0.0  ;;  %1771 = vmatmul.f32.gmra.mxu3 %v1635_v37  ;;  %v2640_v0 = vmul.u32 18, %v2639_v25  ;;  %v2665_v32 = vadd.s32 %v2663_v63, %v2661_v54  ;;  %v2684_v30 = vshrl.u32 %v5559_v22, 16  ;;  %s181_s23 = scalar_lea.vmem %s5806_s3, %s3755_s22 }
 0x2a6   : > { %3521 = vst [vmem:[%s4823_s19 + $0x88] sm:$0xff] %v3485_v57  ;;  %v3556_v40 = vadd.f32 %v3555_v45, %v3485_v57  ;;  %v3599_v50 = vmul.f32 %v3485_v57, %v3485_v57  ;;  %v1511_v59 = vpop.f32.mrf.mxu2  ;;  %v1937_v18 = vpop.f32.mrf.mxu0  ;;  %v2685_v44 = vshll.u32 %v5565_v28, 16  ;;  %vm2687_vm6 = vc.u32 %v2679_v58, %v2683_v6 }
 0x2a7   : > { %v1583_v43 = vadd.f32 %v1511_v59, %v1370_v62  ;;  %v2641_v56 = vsub.s32 %v5476_v26, %v2640_v0  ;;  %v2666_v45 = vadd.s32 %v2665_v32, %v2655_v34  ;;  %v2688_v42 = vsel %vm2687_vm6, 1, %v5815_v9 }
 0x2a8   : > { %v3634_v12 = vadd.f32 %v3633_v4, %v3599_v50  ;;  %v1301_v10 = vpop.f32.mrf.mxu1  ;;  %v1724_v20 = vpop.f32.mrf.mxu3  ;;  %v2686_v48 = vshrl.u32 %v5565_v28, 16  ;;  %v2689_v49 = vadd.s32 %v2683_v6, %v2679_v58  ;;  %v2690_v36 = vadd.s32 %v2688_v42, %v2682_v15 }
 0x2a9   : > { %v1796_v55 = vadd.f32 %v1724_v20, %v1583_v43  ;;  %1984 = vmatmul.f32.gmra.mxu0 %v1848_v38  ;;  %vm3127_vm7 = vcmp.ne.s32.totalorder %v2641_v56, 0  ;;  %vm3163_vm8 = vcmp.lt.s32.totalorder %v2641_v56, 0  ;;  %v3235_v11 = vadd.s32 18, %v2641_v56 }
 0x2aa   : > { %v2667_v16 = vadd.s32 %v2666_v45, %v2657_v3  ;;  %v1371_v4 = vadd.f32 %v1301_v10, %v4577_v14  ;;  %vm5582_vm9 = vmand %vm3163_vm8, %vm3127_vm7  ;;  %vm2691_vm10 = vc.u32 %v2689_v49, %v2685_v44  ;;  %v5587_v41 = vadd.s32 176, %v4639_v1 }
 0x2ab   : > { %v2009_v60 = vadd.f32 %v1937_v18, %v1796_v55  ;;  %1348 = vmatmul.f32.gmra.mxu1 %v5517_v52  ;;  %1561 = vmatmul.f32.gmra.mxu2 %v1423_v46  ;;  %v3271_v33 = vsel %vm5582_vm9, %v3235_v11, %v2641_v56  ;;  %v2692_v14 = vsel %vm2691_vm10, 1, %v5815_v9  ;;  %v5593_v24 = vadd.s32 184, %v4639_v1 }
 0x2ac   : > { %v2668_v13 = vshrl.u32 %v2667_v16, 4  ;;  %v2694_v34 = vadd.s32 %v2692_v14, %v2690_v36  ;;  %v2705_v51 = vand.u32 65535, %v5587_v41  ;;  %v5599_v61 = vadd.s32 192, %v4639_v1 }
 0x2ad   : > { %v3486_v52 = vsel %vm5561_vm4, %v2009_v60, 0.0  ;;  %1774 = vmatmul.f32.gmra.mxu3 %v1636_v47  ;;  %v2706_v2 = vshrl.u32 %v5587_v41, 16  ;;  %vm5604_vm11 = vcmp.lt.s32.totalorder %v3271_v33, 16  ;;  %v2734_v10 = vand.u32 65535, %v5593_v24 }
 0x2ae   : > { %3522 = vst [vmem:[%s4823_s19 + $0x90] sm:$0xff] %v3486_v52  ;;  %v3557_v21 = vadd.f32 %v3556_v40, %v3486_v52  ;;  %v3600_v3 = vmul.f32 %v3486_v52, %v3486_v52  ;;  %v1514_v62 = vpop.f32.mrf.mxu2  ;;  %v1940_v37 = vpop.f32.mrf.mxu0  ;;  %v2669_v35 = vmul.u32 18, %v2668_v13  ;;  %v2695_v58 = vadd.s32 %v2694_v34, %v2684_v30 }
 0x2af   : > { %v1584_v29 = vadd.f32 %v1514_v62, %v1371_v4  ;;  %v2709_v22 = vmul.u32 58254, %v2705_v51  ;;  %v2708_v63 = vmul.u32 14564, %v2705_v51  ;;  %v2710_v15 = vmul.u32 14564, %v2706_v2 }
 0x2b0   : > { %v3635_v17 = vadd.f32 %v3634_v12, %v3600_v3  ;;  %v1304_v25 = vpop.f32.mrf.mxu1  ;;  %v1727_v28 = vpop.f32.mrf.mxu3  ;;  %v2670_v57 = vsub.s32 %v5492_v7, %v2669_v35  ;;  %v2696_v40 = vadd.s32 %v2695_v58, %v2686_v48  ;;  %v2711_v50 = vmul.u32 58254, %v2706_v2 }
 0x2b1   : > { %v1797_v6 = vadd.f32 %v1727_v28, %v1584_v29  ;;  %1987 = vmatmul.f32.gmra.mxu0 %v1849_v53  ;;  %v2712_v59 = vshll.u32 %v2709_v22, 16  ;;  %v1372_v18 = vadd.f32 %v1304_v25, %v4584_v39  ;;  %v2713_v7 = vshrl.u32 %v2709_v22, 16 }
 0x2b2   : > { %vm3128_vm12 = vcmp.ne.s32.totalorder %v2670_v57, 0  ;;  %vm3164_vm13 = vcmp.lt.s32.totalorder %v2670_v57, 0  ;;  %v3236_v38 = vadd.s32 18, %v2670_v57  ;;  %v2697_v43 = vshrl.u32 %v2696_v40, 4 }
 0x2b3   : > { %v2010_v0 = vadd.f32 %v1940_v37, %v1797_v6  ;;  %vm5610_vm14 = vmand %vm3164_vm13, %vm3128_vm12  ;;  %v2714_v30 = vshll.u32 %v2710_v15, 16  ;;  %v2715_v44 = vshrl.u32 %v2710_v15, 16  ;;  %vm2716_vm15 = vc.u32 %v2708_v63, %v2712_v59 }
 0x2b4   : > { %v2718_v12 = vadd.s32 %v2712_v59, %v2708_v63  ;;  %v3272_v20 = vsel %vm5610_vm14, %v3236_v38, %v2670_v57  ;;  %v2698_v46 = vmul.u32 18, %v2697_v43  ;;  %v2717_v56 = vsel %vm2716_vm15, 1, %v5815_v9 }
 0x2b5   : > { %v3487_v39 = vsel %vm5604_vm11, %v2010_v0, 0.0  ;;  %v2719_v49 = vadd.s32 %v2717_v56, %v2711_v50  ;;  %v2735_v16 = vshrl.u32 %v5593_v24, 16  ;;  %vm5624_vm1 = vcmp.lt.s32.totalorder %v3272_v20, 16 }
 0x2b6   : > { %3523 = vst [vmem:[%s4823_s19 + $0x98] sm:$0xff] %v3487_v39  ;;  %v3558_v45 = vadd.f32 %v3557_v21, %v3487_v39  ;;  %v3601_v42 = vmul.f32 %v3487_v39, %v3487_v39  ;;  %v1517_v55 = vpop.f32.mrf.mxu2  ;;  %v1943_v48 = vpop.f32.mrf.mxu0  ;;  %vm2720_vm0 = vc.u32 %v2718_v12, %v2714_v30  ;;  %v2699_v47 = vsub.s32 %v5501_v31, %v2698_v46 }
 0x2b7   : > { %v1585_v36 = vadd.f32 %v1517_v55, %v1372_v18  ;;  %v2721_v11 = vsel %vm2720_vm0, 1, %v5815_v9  ;;  %v2738_v14 = vmul.u32 58254, %v2734_v10  ;;  %v2737_v34 = vmul.u32 14564, %v2734_v10 }
 0x2b8   : > { %v3636_v4 = vadd.f32 %v3635_v17, %v3601_v42  ;;  %v1307_v60 = vpop.f32.mrf.mxu1  ;;  %v1730_v26 = vpop.f32.mrf.mxu3  ;;  %v2723_v13 = vadd.s32 %v2721_v11, %v2719_v49  ;;  %vm3129_vm2 = vcmp.ne.s32.totalorder %v2699_v47, 0  ;;  %vm3165_vm3 = vcmp.lt.s32.totalorder %v2699_v47, 0 }
 0x2b9   : > { %v1798_v52 = vadd.f32 %v1730_v26, %v1585_v36  ;;  %v1373_v51 = vadd.f32 %v1307_v60, %v4590_v5  ;;  %vm5629_vm4 = vmand %vm3165_vm3, %vm3129_vm2  ;;  %v3237_v21 = vadd.s32 18, %v2699_v47  ;;  %v2739_v62 = vmul.u32 14564, %v2735_v16 }
 0x2ba   : > { %v2724_v3 = vadd.s32 %v2723_v13, %v2713_v7  ;;  %v2740_v53 = vmul.u32 58254, %v2735_v16  ;;  %v2741_v35 = vshll.u32 %v2738_v14, 16  ;;  %v2742_v2 = vshrl.u32 %v2738_v14, 16 }
 0x2bb   : > { %v2011_v37 = vadd.f32 %v1943_v48, %v1798_v52  ;;  %v3273_v29 = vsel %vm5629_vm4, %v3237_v21, %v2699_v47  ;;  %v2743_v58 = vshll.u32 %v2739_v62, 16  ;;  %v2763_v22 = vand.u32 65535, %v5599_v61 }
 0x2bc   : > { %v2725_v54 = vadd.s32 %v2724_v3, %v2715_v44  ;;  %v2744_v17 = vshrl.u32 %v2739_v62, 16  ;;  %vm2745_vm5 = vc.u32 %v2737_v34, %v2741_v35  ;;  %v2747_v25 = vadd.s32 %v2741_v35, %v2737_v34 }
 0x2bd   : > { %v3488_v5 = vsel %vm5624_vm1, %v2011_v37, 0.0  ;;  %v2746_v40 = vsel %vm2745_vm5, 1, %v5815_v9  ;;  %v2764_v18 = vshrl.u32 %v5599_v61, 16  ;;  %vm5641_vm7 = vcmp.lt.s32.totalorder %v3273_v29, 16 }
 0x2be   : > { %3524 = vst [vmem:[%s4823_s19 + $0xa0] sm:$0xff] %v3488_v5  ;;  %v3559_v28 = vadd.f32 %v3558_v45, %v3488_v5  ;;  %v3602_v57 = vmul.f32 %v3488_v5, %v3488_v5  ;;  %v1520_v63 = vpop.f32.mrf.mxu2  ;;  %v1946_v15 = vpop.f32.mrf.mxu0  ;;  %v2726_v6 = vshrl.u32 %v2725_v54, 4  ;;  %v2748_v59 = vadd.s32 %v2746_v40, %v2740_v53 }
 0x2bf   : > { %v1586_v50 = vadd.f32 %v1520_v63, %v1373_v51  ;;  %vm2749_vm6 = vc.u32 %v2747_v25, %v2743_v58  ;;  %v2766_v10 = vmul.u32 14564, %v2763_v22  ;;  %v2767_v39 = vmul.u32 58254, %v2763_v22 }
 0x2c0   : > { %v3637_v38 = vadd.f32 %v3636_v4, %v3602_v57  ;;  %v1310_v0 = vpop.f32.mrf.mxu1  ;;  %v1733_v32 = vpop.f32.mrf.mxu3  ;;  %v2727_v7 = vmul.u32 18, %v2726_v6  ;;  %v2750_v30 = vsel %vm2749_vm6, 1, %v5815_v9  ;;  %v5648_v56 = vmul.u32 14564, %v2764_v18 }
 0x2c1   : > { %v1799_v44 = vadd.f32 %v1733_v32, %v1586_v50  ;;  %v2752_v12 = vadd.s32 %v2750_v30, %v2748_v59  ;;  %v1374_v20 = vadd.f32 %v1310_v0, %v4596_v23  ;;  %v2769_v45 = vmul.u32 58254, %v2764_v18 }
 0x2c2   : > { %v2728_v46 = vsub.s32 %v5587_v41, %v2727_v7  ;;  %v2770_v48 = vshll.u32 %v2767_v39, 16  ;;  %v5651_v49 = vadd.s32 200, %v4639_v1  ;;  %v2771_v47 = vshrl.u32 %v2767_v39, 16 }
 0x2c3   : > { %v2012_v42 = vadd.f32 %v1946_v15, %v1799_v44  ;;  %v2753_v55 = vadd.s32 %v2752_v12, %v2742_v2  ;;  %v2772_v16 = vshll.u32 %v5648_v56, 16  ;;  %v2773_v51 = vshrl.u32 %v5648_v56, 16 }
 0x2c4   : > { %vm3130_vm8 = vcmp.ne.s32.totalorder %v2728_v46, 0  ;;  %vm3166_vm9 = vcmp.lt.s32.totalorder %v2728_v46, 0  ;;  %v3238_v36 = vadd.s32 18, %v2728_v46  ;;  %vm2774_vm11 = vc.u32 %v2766_v10, %v2770_v48 }
 0x2c5   : > { %v3489_v11 = vsel %vm5641_vm7, %v2012_v42, 0.0  ;;  %vm5655_vm10 = vmand %vm3166_vm9, %vm3130_vm8  ;;  %v2754_v41 = vadd.s32 %v2753_v55, %v2744_v17  ;;  %v2775_v14 = vsel %vm2774_vm11, 1, %v5815_v9  ;;  %v2776_v31 = vadd.s32 %v2770_v48, %v2766_v10 }
 0x2c6   : > { %3525 = vst [vmem:[%s4823_s19 + $0xa8] sm:$0xff] %v3489_v11  ;;  %v3560_v4 = vadd.f32 %v3559_v28, %v3489_v11  ;;  %v3603_v60 = vmul.f32 %v3489_v11, %v3489_v11  ;;  %v1523_v26 = vpop.f32.mrf.mxu2  ;;  %v1949_v33 = vpop.f32.mrf.mxu0  ;;  %v3274_v13 = vsel %vm5655_vm10, %v3238_v36, %v2728_v46  ;;  %v2777_v37 = vadd.s32 %v2775_v14, %v2769_v45 }
 0x2c7   : > { %v1587_v52 = vadd.f32 %v1523_v26, %v1374_v20  ;;  %v2755_v34 = vshrl.u32 %v2754_v41, 4  ;;  %v2792_v53 = vand.u32 65535, %v5651_v49  ;;  %v2793_v35 = vshrl.u32 %v5651_v49, 16 }
 0x2c8   : > { %v3638_v21 = vadd.f32 %v3637_v38, %v3603_v60  ;;  %v1313_v3 = vpop.f32.mrf.mxu1  ;;  %v1736_v62 = vpop.f32.mrf.mxu3  ;;  %vm3310_vm12 = vcmp.lt.s32.totalorder %v3274_v13, 16  ;;  %vm2778_vm13 = vc.u32 %v2776_v31, %v2772_v16  ;;  %v5673_v45 = vadd.s32 208, %v4639_v1 }
 0x2c9   : > { %v1800_v2 = vadd.f32 %v1736_v62, %v1587_v52  ;;  %v2756_v29 = vmul.u32 18, %v2755_v34  ;;  %v2779_v54 = vsel %vm2778_vm13, 1, %v5815_v9  ;;  %v2795_v58 = vmul.u32 14564, %v2792_v53 }
 0x2ca   : > { %v2796_v22 = vmul.u32 58254, %v2792_v53  ;;  %v2797_v5 = vmul.u32 14564, %v2793_v35  ;;  %v1375_v17 = vadd.f32 %v1313_v3, %v4602_v19  ;;  %v2781_v57 = vadd.s32 %v2779_v54, %v2777_v37 }
 0x2cb   : > { %v2013_v25 = vadd.f32 %v1949_v33, %v1800_v2  ;;  %v2757_v28 = vsub.s32 %v5593_v24, %v2756_v29  ;;  %v2798_v63 = vmul.u32 58254, %v2793_v35  ;;  %v5678_v36 = vadd.s32 216, %v4639_v1 }
 0x2cc   : > { %v2799_v15 = vshll.u32 %v2796_v22, 16  ;;  %v2800_v6 = vshrl.u32 %v2796_v22, 16  ;;  %v2801_v40 = vshll.u32 %v2797_v5, 16  ;;  %v2782_v43 = vadd.s32 %v2781_v57, %v2771_v47 }
 0x2cd   : > { %v3490_v50 = vsel %vm3310_vm12, %v2013_v25, 0.0  ;;  %vm3131_vm14 = vcmp.ne.s32.totalorder %v2757_v28, 0  ;;  %vm3167_vm15 = vcmp.lt.s32.totalorder %v2757_v28, 0  ;;  %v3239_v59 = vadd.s32 18, %v2757_v28 }
 0x2ce   : > { %3526 = vst [vmem:[%s4823_s19 + $0xb0] sm:$0xff] %v3490_v50  ;;  %v3561_v18 = vadd.f32 %v3560_v4, %v3490_v50  ;;  %v3604_v38 = vmul.f32 %v3490_v50, %v3490_v50  ;;  %v1526_v0 = vpop.f32.mrf.mxu2  ;;  %v1952_v32 = vpop.f32.mrf.mxu0  ;;  %vm3203_vm0 = vmand %vm3167_vm15, %vm3131_vm14  ;;  %vm2803_vm1 = vc.u32 %v2795_v58, %v2799_v15  ;;  %v2805_v30 = vadd.s32 %v2799_v15, %v2795_v58 }
 0x2cf   : > { %v1588_v19 = vadd.f32 %v1526_v0, %v1375_v17  ;;  %v3275_v7 = vsel %vm3203_vm0, %v3239_v59, %v2757_v28  ;;  %v2804_v24 = vsel %vm2803_vm1, 1, %v5815_v9  ;;  %v2783_v39 = vadd.s32 %v2782_v43, %v2773_v51 }
 0x2d0   : > { %v3639_v44 = vadd.f32 %v3638_v21, %v3604_v38  ;;  %v1316_v12 = vpop.f32.mrf.mxu1  ;;  %v1739_v10 = vpop.f32.mrf.mxu3  ;;  %v2802_v20 = vshrl.u32 %v2797_v5, 16  ;;  %v2806_v46 = vadd.s32 %v2804_v24, %v2798_v63  ;;  %vm3311_vm2 = vcmp.lt.s32.totalorder %v3275_v7, 16 }
 0x2d1   : > { %v1801_v56 = vadd.f32 %v1739_v10, %v1588_v19  ;;  %vm2807_vm3 = vc.u32 %v2805_v30, %v2801_v40  ;;  %v1376_v42 = vadd.f32 %v1316_v12, %v4608_v27  ;;  %v2784_v55 = vshrl.u32 %v2783_v39, 4 }
 0x2d2   : > { %v2808_v48 = vsel %vm2807_vm3, 1, %v5815_v9  ;;  %v2821_v23 = vand.u32 65535, %v5673_v45  ;;  %v2822_v41 = vshrl.u32 %v5673_v45, 16  ;;  %v2850_v4 = vand.u32 65535, %v5678_v36 }
 0x2d3   : > { %v2014_v47 = vadd.f32 %v1952_v32, %v1801_v56  ;;  %v2810_v11 = vadd.s32 %v2808_v48, %v2806_v46  ;;  %v2785_v16 = vmul.u32 18, %v2784_v55  ;;  %v2851_v60 = vshrl.u32 %v5678_v36, 16 }
 0x2d4   : > { %v5685_v27 = vadd.s32 224, %v4639_v1  ;;  %v2824_v13 = vmul.u32 14564, %v2821_v23  ;;  %v5687_v14 = vmul.u32 58254, %v2821_v23  ;;  %v5691_v3 = vmul.u32 14564, %v2822_v41 }
 0x2d5   : > { %v3491_v26 = vsel %vm3311_vm2, %v2014_v47, 0.0  ;;  %v2811_v33 = vadd.s32 %v2810_v11, %v2800_v6  ;;  %v2786_v21 = vsub.s32 %v5599_v61, %v2785_v16  ;;  %v2827_v53 = vmul.u32 58254, %v2822_v41  ;;  %v5910_v11 = vld [vmem:[#allocation2_spill] sm:$0xff] }
 0x2d6   : > { %3527 = vst [vmem:[%s4823_s19 + $0xb8] sm:$0xff] %v3491_v26  ;;  %v3562_v52 = vadd.f32 %v3561_v18, %v3491_v26  ;;  %v3605_v34 = vmul.f32 %v3491_v26, %v3491_v26  ;;  %v1529_v51 = vpop.f32.mrf.mxu2  ;;  %v1955_v31 = vpop.f32.mrf.mxu0  ;;  %v2828_v35 = vshll.u32 %v5687_v14, 16  ;;  %v2879_v61 = vand.u32 65535, %v5685_v27 }
 0x2d7   : > { %v1589_v62 = vadd.f32 %v1529_v51, %v1376_v42  ;;  %v2812_v37 = vadd.s32 %v2811_v33, %v2802_v20  ;;  %vm3132_vm4 = vcmp.ne.s32.totalorder %v2786_v21, 0  ;;  %vm3168_vm5 = vcmp.lt.s32.totalorder %v2786_v21, 0 }
 0x2d8   : > { %v3640_v2 = vadd.f32 %v3639_v44, %v3605_v34  ;;  %v1319_v29 = vpop.f32.mrf.mxu1  ;;  %v1742_v54 = vpop.f32.mrf.mxu3  ;;  %v3240_v58 = vadd.s32 18, %v2786_v21  ;;  %vm3204_vm6 = vmand %vm3168_vm5, %vm3132_vm4  ;;  %v2829_v28 = vshrl.u32 %v5687_v14, 16  ;;  %v2830_v57 = vshll.u32 %v5691_v3, 16 }
 0x2d9   : > { %v1377_v22 = vadd.f32 %v1319_v29, %v4614_v8  ;;  %v1802_v5 = vadd.f32 %v1742_v54, %v1589_v62  ;;  %v2813_v17 = vshrl.u32 %v2812_v37, 4  ;;  %vm2832_vm7 = vc.u32 %v2824_v13, %v2828_v35 }
 0x2da   : > { %v3276_v25 = vsel %vm3204_vm6, %v3240_v58, %v2786_v21  ;;  %v2833_v6 = vsel %vm2832_vm7, 1, %v5815_v9  ;;  %v2831_v40 = vshrl.u32 %v5691_v3, 16  ;;  %v2834_v8 = vadd.s32 %v2828_v35, %v2824_v13 }
 0x2db   : > { %v2015_v63 = vadd.f32 %v1955_v31, %v1802_v5  ;;  %vm3312_vm8 = vcmp.lt.s32.totalorder %v3276_v25, 16  ;;  %v2814_v15 = vmul.u32 18, %v2813_v17  ;;  %v2835_v50 = vadd.s32 %v2833_v6, %v2827_v53 }
 0x2dc   : > { %v2854_v59 = vmul.u32 58254, %v2850_v4  ;;  %v2853_v0 = vmul.u32 14564, %v2850_v4  ;;  %v2855_v32 = vmul.u32 14564, %v2851_v60  ;;  %vm2836_vm9 = vc.u32 %v2834_v8, %v2830_v57 }
 0x2dd   : > { %v3492_v18 = vsel %vm3312_vm8, %v2015_v63, 0.0  ;;  %v2815_v38 = vsub.s32 %v5651_v49, %v2814_v15  ;;  %v2837_v46 = vsel %vm2836_vm9, 1, %v5815_v9  ;;  %v2856_v49 = vmul.u32 58254, %v2851_v60 }
 0x2de   : > { %3528 = vst [vmem:[%s4823_s19 + $0xc0] sm:$0xff] %v3492_v18  ;;  %v3563_v43 = vadd.f32 %v3562_v52, %v3492_v18  ;;  %v3606_v19 = vmul.f32 %v3492_v18, %v3492_v18  ;;  %v1532_v7 = vpop.f32.mrf.mxu2  ;;  %v1958_v24 = vpop.f32.mrf.mxu0  ;;  %v2857_v30 = vshll.u32 %v2854_v59, 16  ;;  %v2859_v56 = vshll.u32 %v2855_v32, 16 }
 0x2df   : > { %v1590_v44 = vadd.f32 %v1532_v7, %v1377_v22  ;;  %vm3133_vm10 = vcmp.ne.s32.totalorder %v2815_v38, 0  ;;  %vm3169_vm11 = vcmp.lt.s32.totalorder %v2815_v38, 0  ;;  %v3241_v12 = vadd.s32 18, %v2815_v38 }
 0x2e0   : > { %v3641_v10 = vadd.f32 %v3640_v2, %v3606_v19  ;;  %v1322_v39 = vpop.f32.mrf.mxu1  ;;  %v1745_v20 = vpop.f32.mrf.mxu3  ;;  %vm3205_vm12 = vmand %vm3169_vm11, %vm3133_vm10  ;;  %v2839_v48 = vadd.s32 %v2837_v46, %v2835_v50  ;;  %v2858_v47 = vshrl.u32 %v2854_v59, 16  ;;  %vm2861_vm14 = vc.u32 %v2853_v0, %v2857_v30  ;;  %v5911_v59 = vld [vmem:[#allocation3_spill] sm:$0xff] }
 0x2e1   : > { %v1803_v42 = vadd.f32 %v1745_v20, %v1590_v44  ;;  %v3277_v55 = vsel %vm3205_vm12, %v3241_v12, %v2815_v38  ;;  %v1378_v23 = vadd.f32 %v1322_v39, %v5910_v11  ;;  %v2863_v41 = vadd.s32 %v2857_v30, %v2853_v0 }
 0x2e2   : > { %vm3313_vm13 = vcmp.lt.s32.totalorder %v3277_v55, 16  ;;  %v2840_v4 = vadd.s32 %v2839_v48, %v2829_v28  ;;  %v2862_v26 = vsel %vm2861_vm14, 1, %v5815_v9  ;;  %v2880_v33 = vshrl.u32 %v5685_v27, 16 }
 0x2e3   : > { %v2016_v16 = vadd.f32 %v1958_v24, %v1803_v42  ;;  %v2864_v13 = vadd.s32 %v2862_v26, %v2856_v49  ;;  %vm2865_vm15 = vc.u32 %v2863_v41, %v2859_v56  ;;  %v2882_v60 = vmul.u32 14564, %v2879_v61 }
 0x2e4   : > { %v2883_v14 = vmul.u32 58254, %v2879_v61  ;;  %v2841_v34 = vadd.s32 %v2840_v4, %v2831_v40  ;;  %v2866_v51 = vsel %vm2865_vm15, 1, %v5815_v9  ;;  %v5707_v31 = vmul.u32 14564, %v2880_v33 }
 0x2e5   : > { %v3493_v52 = vsel %vm3313_vm13, %v2016_v16, 0.0  ;;  %v2860_v53 = vshrl.u32 %v2855_v32, 16  ;;  %v2868_v35 = vadd.s32 %v2866_v51, %v2864_v13  ;;  %v2885_v54 = vmul.u32 58254, %v2880_v33  ;;  %v5912_v16 = vld [vmem:[#allocation4_spill] sm:$0xff] }
 0x2e6   : > { %3529 = vst [vmem:[%s4823_s19 + $0xc8] sm:$0xff] %v3493_v52  ;;  %v3564_v21 = vadd.f32 %v3563_v43, %v3493_v52  ;;  %v3607_v3 = vmul.f32 %v3493_v52, %v3493_v52  ;;  %v1535_v62 = vpop.f32.mrf.mxu2  ;;  %v1961_v37 = vpop.f32.mrf.mxu0  ;;  %v2842_v29 = vshrl.u32 %v2841_v34, 4  ;;  %v2886_v58 = vshll.u32 %v2883_v14, 16 }
 0x2e7   : > { %v1591_v2 = vadd.f32 %v1535_v62, %v1378_v23  ;;  %v2869_v61 = vadd.s32 %v2868_v35, %v2858_v47  ;;  %v2887_v25 = vshrl.u32 %v2883_v14, 16  ;;  %v2888_v28 = vshll.u32 %v5707_v31, 16 }
 0x2e8   : > { %v3642_v22 = vadd.f32 %v3641_v10, %v3607_v3  ;;  %v1325_v5 = vpop.f32.mrf.mxu1  ;;  %v1748_v17 = vpop.f32.mrf.mxu3  ;;  %v2843_v63 = vmul.u32 18, %v2842_v29  ;;  %v2889_v15 = vshrl.u32 %v5707_v31, 16  ;;  %vm2890_vm0 = vc.u32 %v2882_v60, %v2886_v58 }
 0x2e9   : > { %v1804_v57 = vadd.f32 %v1748_v17, %v1591_v2  ;;  %v2870_v6 = vadd.s32 %v2869_v61, %v2860_v53  ;;  %v2891_v40 = vsel %vm2890_vm0, 1, %v5815_v9  ;;  %v2892_v8 = vadd.s32 %v2886_v58, %v2882_v60 }
 0x2ea   : > { %v5714_v50 = vadd.s32 232, %v4639_v1  ;;  %v1379_v18 = vadd.f32 %v1325_v5, %v5911_v59  ;;  %v2844_v0 = vsub.s32 %v5673_v45, %v2843_v63  ;;  %v2893_v32 = vadd.s32 %v2891_v40, %v2885_v54 }
 0x2eb   : > { %v2017_v38 = vadd.f32 %v1961_v37, %v1804_v57  ;;  %v2871_v43 = vshrl.u32 %v2870_v6, 4  ;;  %vm2894_vm1 = vc.u32 %v2892_v8, %v2888_v28  ;;  %v5722_v45 = vadd.s32 240, %v4639_v1 }
 0x2ec   : > { %v2908_v19 = vand.u32 65535, %v5714_v50  ;;  %v2909_v7 = vshrl.u32 %v5714_v50, 16  ;;  %vm3134_vm2 = vcmp.ne.s32.totalorder %v2844_v0, 0  ;;  %vm3170_vm3 = vcmp.lt.s32.totalorder %v2844_v0, 0 }
 0x2ed   : > { %v3242_v24 = vadd.s32 18, %v2844_v0  ;;  %v2895_v30 = vsel %vm2894_vm1, 1, %v5815_v9  ;;  %vm3206_vm4 = vmand %vm3170_vm3, %vm3134_vm2  ;;  %v2872_v10 = vmul.u32 18, %v2871_v43  ;;  %v2937_v35 = vand.u32 65535, %v5722_v45 }
 0x2ee   : > { %v1538_v44 = vpop.f32.mrf.mxu2  ;;  %v1964_v12 = vpop.f32.mrf.mxu0  ;;  %v2897_v39 = vadd.s32 %v2895_v30, %v2893_v32  ;;  %v2912_v20 = vmul.u32 58254, %v2908_v19  ;;  %v2911_v56 = vmul.u32 14564, %v2908_v19  ;;  %v2913_v42 = vmul.u32 14564, %v2909_v7 }
 0x2ef   : > { %v3278_v46 = vsel %vm3206_vm4, %v3242_v24, %v2844_v0  ;;  %v1592_v49 = vadd.f32 %v1538_v44, %v1379_v18  ;;  %v2873_v47 = vsub.s32 %v5678_v36, %v2872_v10  ;;  %v2914_v33 = vmul.u32 58254, %v2909_v7 }
 0x2f0   : > { %vm3314_vm5 = vcmp.lt.s32.totalorder %v3278_v46, 16  ;;  %v1328_v55 = vpop.f32.mrf.mxu1  ;;  %v1751_v48 = vpop.f32.mrf.mxu3  ;;  %v2898_v11 = vadd.s32 %v2897_v39, %v2887_v25  ;;  %v2915_v23 = vshll.u32 %v2912_v20, 16  ;;  %v2917_v51 = vshll.u32 %v2913_v42, 16 }
 0x2f1   : > { %v3494_v41 = vsel %vm3314_vm5, %v2017_v38, 0.0  ;;  %v1380_v4 = vadd.f32 %v1328_v55, %v5912_v16  ;;  %v1805_v26 = vadd.f32 %v1751_v48, %v1592_v49  ;;  %vm3135_vm6 = vcmp.ne.s32.totalorder %v2873_v47, 0  ;;  %v5913_v38 = vld [vmem:[#allocation5_spill] sm:$0xff] }
 0x2f2   : > { %3530 = vst [vmem:[%s4823_s19 + $0xd0] sm:$0xff] %v3494_v41  ;;  %v3565_v13 = vadd.f32 %v3564_v21, %v3494_v41  ;;  %v3608_v60 = vmul.f32 %v3494_v41, %v3494_v41  ;;  %vm3171_vm7 = vcmp.lt.s32.totalorder %v2873_v47, 0  ;;  %v3243_v52 = vadd.s32 18, %v2873_v47 }
 0x2f3   : > { %v2018_v14 = vadd.f32 %v1964_v12, %v1805_v26  ;;  %vm3207_vm8 = vmand %vm3171_vm7, %vm3135_vm6  ;;  %v2899_v34 = vadd.s32 %v2898_v11, %v2889_v15  ;;  %v2916_v3 = vshrl.u32 %v2912_v20, 16  ;;  %vm2919_vm9 = vc.u32 %v2911_v56, %v2915_v23 }
 0x2f4   : > { %v3643_v31 = vadd.f32 %v3642_v22, %v3608_v60  ;;  %v2921_v36 = vadd.s32 %v2915_v23, %v2911_v56  ;;  %v3279_v62 = vsel %vm3207_vm8, %v3243_v52, %v2873_v47  ;;  %v2920_v53 = vsel %vm2919_vm9, 1, %v5815_v9 }
 0x2f5   : > { %v2900_v37 = vshrl.u32 %v2899_v34, 4  ;;  %vm3315_vm10 = vcmp.lt.s32.totalorder %v3279_v62, 16  ;;  %v2922_v29 = vadd.s32 %v2920_v53, %v2914_v33  ;;  %v2938_v54 = vshrl.u32 %v5722_v45, 16  ;;  %v5914_v34 = vld [vmem:[#allocation6_spill] sm:$0xff] }
 0x2f6   : > { %v1541_v21 = vpop.f32.mrf.mxu2  ;;  %v1967_v2 = vpop.f32.mrf.mxu0  ;;  %vm2923_vm11 = vc.u32 %v2921_v36, %v2917_v51  ;;  %v3495_v58 = vsel %vm3315_vm10, %v2018_v14, 0.0  ;;  %v2918_v63 = vshrl.u32 %v2913_v42, 16  ;;  %v2940_v8 = vmul.u32 14564, %v2937_v35 }
 0x2f7   : > { %v1593_v5 = vadd.f32 %v1541_v21, %v1380_v4  ;;  %v2901_v22 = vmul.u32 18, %v2900_v37  ;;  %v2924_v17 = vsel %vm2923_vm11, 1, %v5815_v9  ;;  %3531 = vst [vmem:[%s4823_s19 + $0xd8] sm:$0xff] %v3495_v58  ;;  %v3566_v61 = vadd.f32 %v3565_v13, %v3495_v58 }
 0x2f8   : > { %v3609_v25 = vmul.f32 %v3495_v58, %v3495_v58  ;;  %v1331_v28 = vpop.f32.mrf.mxu1  ;;  %v1754_v57 = vpop.f32.mrf.mxu3  ;;  %v2926_v15 = vadd.s32 %v2924_v17, %v2922_v29  ;;  %v2941_v59 = vmul.u32 58254, %v2937_v35  ;;  %v2942_v43 = vmul.u32 14564, %v2938_v54 }
 0x2f9   : > { %v1806_v6 = vadd.f32 %v1754_v57, %v1593_v5  ;;  %v2902_v40 = vsub.s32 %v5685_v27, %v2901_v22  ;;  %v1381_v0 = vadd.f32 %v1331_v28, %v5913_v38  ;;  %v2943_v30 = vmul.u32 58254, %v2938_v54 }
 0x2fa   : > { %v3644_v18 = vadd.f32 %v3643_v31, %v3609_v25  ;;  %v2927_v32 = vadd.s32 %v2926_v15, %v2916_v3  ;;  %v2944_v44 = vshll.u32 %v2941_v59, 16  ;;  %v2945_v12 = vshrl.u32 %v2941_v59, 16 }
 0x2fb   : > { %v2019_v19 = vadd.f32 %v1967_v2, %v1806_v6  ;;  %vm3136_vm12 = vcmp.ne.s32.totalorder %v2902_v40, 0  ;;  %vm3172_vm13 = vcmp.lt.s32.totalorder %v2902_v40, 0  ;;  %v3244_v7 = vadd.s32 18, %v2902_v40 }
 0x2fc   : > { %vm3208_vm14 = vmand %vm3172_vm13, %vm3136_vm12  ;;  %v2928_v24 = vadd.s32 %v2927_v32, %v2918_v63  ;;  %v2946_v39 = vshll.u32 %v2942_v43, 16  ;;  %v2947_v27 = vshrl.u32 %v2942_v43, 16  ;;  %v5735_v20 = vadd.s32 248, %v4639_v1 }
 0x2fd   : > { %v3280_v10 = vsel %vm3208_vm14, %v3244_v7, %v2902_v40  ;;  %vm2948_vm0 = vc.u32 %v2940_v8, %v2944_v44  ;;  %v2950_v42 = vadd.s32 %v2944_v44, %v2940_v8  ;;  %v5742_v14 = vadd.s32 256, %v4639_v1 }
 0x2fe   : > { %vm3316_vm15 = vcmp.lt.s32.totalorder %v3280_v10, 16  ;;  %v1544_v46 = vpop.f32.mrf.mxu2  ;;  %v1970_v49 = vpop.f32.mrf.mxu0  ;;  %v2929_v56 = vshrl.u32 %v2928_v24, 4  ;;  %v2949_v47 = vsel %vm2948_vm0, 1, %v5815_v9  ;;  %v2966_v11 = vand.u32 65535, %v5735_v20 }
 0x2ff   : > { %v3496_v55 = vsel %vm3316_vm15, %v2019_v19, 0.0  ;;  %v1594_v48 = vadd.f32 %v1544_v46, %v1381_v0  ;;  %v2951_v33 = vadd.s32 %v2949_v47, %v2943_v30  ;;  %vm2952_vm1 = vc.u32 %v2950_v42, %v2946_v39  ;;  %v5915_v30 = vld [vmem:[#allocation7_spill] sm:$0xff] }
 0x300   : > { %3532 = vst [vmem:[%s4823_s19 + $0xe0] sm:$0xff] %v3496_v55  ;;  %v3567_v23 = vadd.f32 %v3566_v61, %v3496_v55  ;;  %v3610_v41 = vmul.f32 %v3496_v55, %v3496_v55  ;;  %v1334_v16 = vpop.f32.mrf.mxu1  ;;  %v1757_v4 = vpop.f32.mrf.mxu3  ;;  %v2930_v26 = vmul.u32 18, %v2929_v56  ;;  %v2967_v60 = vshrl.u32 %v5735_v20, 16 }
 0x301   : > { %v1807_v13 = vadd.f32 %v1757_v4, %v1594_v48  ;;  %v1382_v51 = vadd.f32 %v1334_v16, %v5914_v34  ;;  %v2953_v3 = vsel %vm2952_vm1, 1, %v5815_v9  ;;  %v2969_v62 = vmul.u32 14564, %v2966_v11 }
 0x302   : > { %v3645_v52 = vadd.f32 %v3644_v18, %v3610_v41  ;;  %v2931_v31 = vsub.s32 %v5714_v50, %v2930_v26  ;;  %v2955_v36 = vadd.s32 %v2953_v3, %v2951_v33  ;;  %v2970_v37 = vmul.u32 58254, %v2966_v11 }
 0x303   : > { %v2971_v53 = vmul.u32 14564, %v2967_v60  ;;  %v2020_v35 = vadd.f32 %v1970_v49, %v1807_v13  ;;  %v2972_v29 = vmul.u32 58254, %v2967_v60  ;;  %v2995_v50 = vand.u32 65535, %v5742_v14 }
 0x304   : > { %vm3137_vm2 = vcmp.ne.s32.totalorder %v2931_v31, 0  ;;  %vm3173_vm3 = vcmp.lt.s32.totalorder %v2931_v31, 0  ;;  %v3245_v21 = vadd.s32 18, %v2931_v31  ;;  %v2956_v2 = vadd.s32 %v2955_v36, %v2945_v12 }
 0x305   : > { %vm3209_vm4 = vmand %vm3173_vm3, %vm3137_vm2  ;;  %v2973_v54 = vshll.u32 %v2970_v37, 16  ;;  %v2974_v58 = vshrl.u32 %v2970_v37, 16  ;;  %v2975_v17 = vshll.u32 %v2971_v53, 16  ;;  %v2996_v61 = vshrl.u32 %v5742_v14, 16 }
 0x306   : > { %v3281_v5 = vsel %vm3209_vm4, %v3245_v21, %v2931_v31  ;;  %v1547_v22 = vpop.f32.mrf.mxu2  ;;  %v1973_v28 = vpop.f32.mrf.mxu0  ;;  %v2957_v57 = vadd.s32 %v2956_v2, %v2947_v27  ;;  %v2976_v40 = vshrl.u32 %v2971_v53, 16  ;;  %v2998_v32 = vmul.u32 14564, %v2995_v50 }
 0x307   : > { %vm3317_vm5 = vcmp.lt.s32.totalorder %v3281_v5, 16  ;;  %v1595_v25 = vadd.f32 %v1547_v22, %v1382_v51  ;;  %vm2977_vm6 = vc.u32 %v2969_v62, %v2973_v54  ;;  %v2979_v59 = vadd.s32 %v2973_v54, %v2969_v62  ;;  %v5916_v62 = vld [vmem:[#allocation8_spill] sm:$0xff] }
 0x308   : > { %v3497_v63 = vsel %vm3317_vm5, %v2020_v35, 0.0  ;;  %v1337_v15 = vpop.f32.mrf.mxu1  ;;  %v1760_v6 = vpop.f32.mrf.mxu3  ;;  %v2978_v8 = vsel %vm2977_vm6, 1, %v5815_v9  ;;  %v2958_v43 = vshrl.u32 %v2957_v57, 4  ;;  %v2999_v7 = vmul.u32 58254, %v2995_v50 }
 0x309   : > { %3533 = vst [vmem:[%s4823_s19 + $0xe8] sm:$0xff] %v3497_v63  ;;  %v3568_v18 = vadd.f32 %v3567_v23, %v3497_v63  ;;  %v3611_v38 = vmul.f32 %v3497_v63, %v3497_v63  ;;  %v1808_v0 = vadd.f32 %v1760_v6, %v1595_v25  ;;  %v2980_v19 = vadd.s32 %v2978_v8, %v2972_v29 }
 0x30a   : > { %vm2981_vm7 = vc.u32 %v2979_v59, %v2975_v17  ;;  %v1383_v44 = vadd.f32 %v1337_v15, %v5915_v30  ;;  %v3000_v10 = vmul.u32 14564, %v2996_v61  ;;  %v2959_v27 = vmul.u32 18, %v2958_v43  ;;  %v5917_v43 = vld [vmem:[#allocation9_spill] sm:$0xff] }
 0x30b   : > { %v3646_v24 = vadd.f32 %v3645_v52, %v3611_v38  ;;  %v2982_v12 = vsel %vm2981_vm7, 1, %v5815_v9  ;;  %v2021_v39 = vadd.f32 %v1973_v28, %v1808_v0  ;;  %v3002_v49 = vshll.u32 %v2999_v7, 16 }
 0x30c   : > { %v2984_v46 = vadd.s32 %v2982_v12, %v2980_v19  ;;  %v3001_v56 = vmul.u32 58254, %v2996_v61  ;;  %v3003_v42 = vshrl.u32 %v2999_v7, 16  ;;  %v3004_v55 = vshll.u32 %v3000_v10, 16 }
 0x30d   : > { %v5754_v48 = vadd.s32 264, %v4639_v1  ;;  %v2960_v47 = vsub.s32 %v5722_v45, %v2959_v27  ;;  %vm3006_vm8 = vc.u32 %v2998_v32, %v3002_v49  ;;  %v3008_v41 = vadd.s32 %v3002_v49, %v2998_v32 }
 0x30e   : > { %v1550_v11 = vpop.f32.mrf.mxu2  ;;  %v2985_v23 = vadd.s32 %v2984_v46, %v2974_v58  ;;  %v3007_v4 = vsel %vm3006_vm8, 1, %v5815_v9  ;;  %v1976_v45 = vpop.f32.mrf.mxu0  ;;  %v3005_v31 = vshrl.u32 %v3000_v10, 16  ;;  %v5771_v10 = vadd.s32 272, %v4639_v1 }
 0x30f   : > { %v1596_v16 = vadd.f32 %v1550_v11, %v1383_v44  ;;  %v3024_v26 = vand.u32 65535, %v5754_v48  ;;  %v3025_v33 = vshrl.u32 %v5754_v48, 16  ;;  %vm3138_vm9 = vcmp.ne.s32.totalorder %v2960_v47, 0 }
 0x310   : > { %vm3174_vm10 = vcmp.lt.s32.totalorder %v2960_v47, 0  ;;  %v3246_v13 = vadd.s32 18, %v2960_v47  ;;  %v1340_v60 = vpop.f32.mrf.mxu1  ;;  %v1763_v52 = vpop.f32.mrf.mxu3  ;;  %v2986_v34 = vadd.s32 %v2985_v23, %v2976_v40  ;;  %v3009_v3 = vadd.s32 %v3007_v4, %v3001_v56 }
 0x311   : > { %vm3210_vm11 = vmand %vm3174_vm10, %vm3138_vm9  ;;  %v1809_v51 = vadd.f32 %v1763_v52, %v1596_v16  ;;  %vm3010_vm12 = vc.u32 %v3008_v41, %v3004_v55  ;;  %v1384_v37 = vadd.f32 %v1340_v60, %v5916_v62  ;;  %v3027_v2 = vmul.u32 14564, %v3024_v26 }
 0x312   : > { %v3282_v36 = vsel %vm3210_vm11, %v3246_v13, %v2960_v47  ;;  %v2987_v53 = vshrl.u32 %v2986_v34, 4  ;;  %v3011_v35 = vsel %vm3010_vm12, 1, %v5815_v9  ;;  %v3028_v29 = vmul.u32 58254, %v3024_v26 }
 0x313   : > { %vm3318_vm13 = vcmp.lt.s32.totalorder %v3282_v36, 16  ;;  %v3013_v21 = vadd.s32 %v3011_v35, %v3009_v3  ;;  %v2022_v58 = vadd.f32 %v1976_v45, %v1809_v51  ;;  %v5762_v22 = vmul.u32 14564, %v3025_v33 }
 0x314   : > { %v3498_v54 = vsel %vm3318_vm13, %v2021_v39, 0.0  ;;  %v2988_v5 = vmul.u32 18, %v2987_v53  ;;  %v3031_v25 = vshll.u32 %v3028_v29, 16  ;;  %v3030_v63 = vmul.u32 58254, %v3025_v33 }
 0x315   : > { %3534 = vst [vmem:[%s4823_s19 + $0xf0] sm:$0xff] %v3498_v54  ;;  %v3569_v17 = vadd.f32 %v3568_v18, %v3498_v54  ;;  %v3612_v50 = vmul.f32 %v3498_v54, %v3498_v54  ;;  %v3014_v61 = vadd.s32 %v3013_v21, %v3003_v42  ;;  %v3032_v15 = vshrl.u32 %v3028_v29, 16 }
 0x316   : > { %v2989_v28 = vsub.s32 %v5735_v20, %v2988_v5  ;;  %v1553_v57 = vpop.f32.mrf.mxu2  ;;  %v3033_v6 = vshll.u32 %v5762_v22, 16  ;;  %vm3035_vm14 = vc.u32 %v3027_v2, %v3031_v25  ;;  %v3034_v7 = vshrl.u32 %v5762_v22, 16  ;;  %v1979_v39 = vpop.f32.mrf.mxu0 }
 0x317   : > { %v3647_v40 = vadd.f32 %v3646_v24, %v3612_v50  ;;  %v1597_v8 = vadd.f32 %v1553_v57, %v1384_v37  ;;  %v3015_v59 = vadd.s32 %v3014_v61, %v3005_v31  ;;  %v3036_v18 = vsel %vm3035_vm14, 1, %v5815_v9 }
 0x318   : > { %vm3139_vm15 = vcmp.ne.s32.totalorder %v2989_v28, 0  ;;  %vm3175_vm0 = vcmp.lt.s32.totalorder %v2989_v28, 0  ;;  %v3247_v38 = vadd.s32 18, %v2989_v28  ;;  %v1343_v0 = vpop.f32.mrf.mxu1  ;;  %v1766_v32 = vpop.f32.mrf.mxu3  ;;  %v3037_v30 = vadd.s32 %v3031_v25, %v3027_v2 }
 0x319   : > { %vm3211_vm1 = vmand %vm3175_vm0, %vm3139_vm15  ;;  %v1385_v19 = vadd.f32 %v1343_v0, %v5917_v43  ;;  %v3016_v20 = vshrl.u32 %v3015_v59, 4  ;;  %v1810_v24 = vadd.f32 %v1766_v32, %v1597_v8  ;;  %v3038_v12 = vadd.s32 %v3036_v18, %v3030_v63  ;;  %v5918_v0 = vld [vmem:[#allocation10_spill] sm:$0xff] }
 0x31a   : > { %v3283_v44 = vsel %vm3211_vm1, %v3247_v38, %v2989_v28  ;;  %vm3039_vm3 = vc.u32 %v3037_v30, %v3033_v6  ;;  %v5774_v46 = vadd.s32 280, %v4639_v1  ;;  %v3053_v42 = vand.u32 65535, %v5771_v10 }
 0x31b   : > { %vm3319_vm2 = vcmp.lt.s32.totalorder %v3283_v44, 16  ;;  %v3017_v27 = vmul.u32 18, %v3016_v20  ;;  %v3040_v56 = vsel %vm3039_vm3, 1, %v5815_v9  ;;  %v3054_v55 = vshrl.u32 %v5771_v10, 16 }
 0x31c   : > { %v3499_v49 = vsel %vm3319_vm2, %v2022_v58, 0.0  ;;  %v3042_v41 = vadd.s32 %v3040_v56, %v3038_v12  ;;  %v2023_v16 = vadd.f32 %v1979_v39, %v1810_v24  ;;  %v3056_v26 = vmul.u32 14564, %v3053_v42 }
 0x31d   : > { %3535 = vst [vmem:[%s4823_s19 + $0xf8] sm:$0xff] %v3499_v49  ;;  %v3570_v47 = vadd.f32 %v3569_v17, %v3499_v49  ;;  %v3613_v11 = vmul.f32 %v3499_v49, %v3499_v49  ;;  %v3018_v23 = vsub.s32 %v5742_v14, %v3017_v27  ;;  %v3057_v33 = vmul.u32 58254, %v3053_v42 }
 0x31e   : > { %v1556_v4 = vpop.f32.mrf.mxu2  ;;  %v3058_v13 = vmul.u32 14564, %v3054_v55  ;;  %v3043_v52 = vadd.s32 %v3042_v41, %v3032_v15  ;;  %v3059_v3 = vmul.u32 58254, %v3054_v55  ;;  %v3082_v35 = vand.u32 65535, %v5774_v46  ;;  %v1982_v22 = vpop.f32.mrf.mxu0 }
 0x31f   : > { %v3648_v1 = vadd.f32 %v3647_v40, %v3613_v11  ;;  %vm3140_vm4 = vcmp.ne.s32.totalorder %v3018_v23, 0  ;;  %vm3176_vm5 = vcmp.lt.s32.totalorder %v3018_v23, 0  ;;  %v3248_v60 = vadd.s32 18, %v3018_v23 }
 0x320   : > { %vm3212_vm6 = vmand %vm3176_vm5, %vm3140_vm4  ;;  %v3060_v34 = vshll.u32 %v3057_v33, 16  ;;  %v1598_v45 = vadd.f32 %v1556_v4, %v1385_v19  ;;  %v1769_v31 = vpop.f32.mrf.mxu3  ;;  %v3062_v36 = vshll.u32 %v3058_v13, 16  ;;  %v3044_v14 = vadd.s32 %v3043_v52, %v3034_v7  ;;  %v1346_v58 = vpop.f32.mrf.mxu1  ;;  %v5919_v52 = vld [vmem:[#allocation11_spill] sm:$0xff] }
 0x321   : > { %v3284_v51 = vsel %vm3212_vm6, %v3248_v60, %v3018_v23  ;;  %v3061_v54 = vshrl.u32 %v3057_v33, 16  ;;  %v3083_v50 = vshrl.u32 %v5774_v46, 16  ;;  %v3086_v57 = vmul.u32 58254, %v3082_v35 }
 0x322   : > { %vm3320_vm7 = vcmp.lt.s32.totalorder %v3284_v51, 16  ;;  %vm3064_vm8 = vc.u32 %v3056_v26, %v3060_v34  ;;  %v3066_v53 = vadd.s32 %v3060_v34, %v3056_v26  ;;  %v3045_v29 = vshrl.u32 %v3044_v14, 4 }
 0x323   : > { %v3500_v62 = vsel %vm3320_vm7, %v2023_v16, 0.0  ;;  %v3065_v37 = vsel %vm3064_vm8, 1, %v5815_v9  ;;  %v1811_v5 = vadd.f32 %v1769_v31, %v1598_v45  ;;  %v3063_v15 = vshrl.u32 %v3058_v13, 16 }
 0x324   : > { %3536 = vst [vmem:[%s4823_s19 + $0x100] sm:$0xff] %v3500_v62  ;;  %v3571_v21 = vadd.f32 %v3570_v47, %v3500_v62  ;;  %v3614_v2 = vmul.f32 %v3500_v62, %v3500_v62  ;;  %v3067_v17 = vadd.s32 %v3065_v37, %v3059_v3  ;;  %vm3068_vm9 = vc.u32 %v3066_v53, %v3062_v36 }
 0x325   : > { %v3046_v25 = vmul.u32 18, %v3045_v29  ;;  %v3069_v28 = vsel %vm3068_vm9, 1, %v5815_v9  ;;  %v3085_v40 = vmul.u32 14564, %v3082_v35  ;;  %v3087_v8 = vmul.u32 14564, %v3083_v50 }
 0x326   : > { %v3649_v61 = vadd.f32 %v3648_v1, %v3614_v2  ;;  %v1559_v63 = vpop.f32.mrf.mxu2  ;;  %v3071_v6 = vadd.s32 %v3069_v28, %v3067_v17  ;;  %v3089_v38 = vshll.u32 %v3086_v57, 16  ;;  %v1386_v32 = vadd.f32 %v1346_v58, %v5918_v0  ;;  %v1985_v16 = vpop.f32.mrf.mxu0 }
 0x327   : > { %v3047_v59 = vsub.s32 %v5754_v48, %v3046_v25  ;;  %v3088_v43 = vmul.u32 58254, %v3083_v50  ;;  %v3091_v19 = vshll.u32 %v3087_v8, 16  ;;  %v2024_v20 = vadd.f32 %v1982_v22, %v1811_v5 }
 0x328   : > { %v3072_v18 = vadd.s32 %v3071_v6, %v3061_v54  ;;  %v1599_v30 = vadd.f32 %v1559_v63, %v1386_v32  ;;  %v1772_v44 = vpop.f32.mrf.mxu3  ;;  %vm3093_vm13 = vc.u32 %v3085_v40, %v3089_v38  ;;  %v3095_v12 = vadd.s32 %v3089_v38, %v3085_v40  ;;  %v1349_v23 = vpop.f32.mrf.mxu1 }
 0x329   : > { %vm3141_vm10 = vcmp.ne.s32.totalorder %v3047_v59, 0  ;;  %vm3177_vm11 = vcmp.lt.s32.totalorder %v3047_v59, 0  ;;  %v3249_v7 = vadd.s32 18, %v3047_v59  ;;  %v3094_v48 = vsel %vm3093_vm13, 1, %v5815_v9 }
 0x32a   : > { %vm3213_vm12 = vmand %vm3177_vm11, %vm3141_vm10  ;;  %v3073_v24 = vadd.s32 %v3072_v18, %v3063_v15  ;;  %v3096_v49 = vadd.s32 %v3094_v48, %v3088_v43  ;;  %vm3097_vm15 = vc.u32 %v3095_v12, %v3091_v19  ;;  %v3090_v42 = vshrl.u32 %v3086_v57, 16 }
 0x32b   : > { %v3285_v39 = vsel %vm3213_vm12, %v3249_v7, %v3047_v59  ;;  %v3098_v55 = vsel %vm3097_vm15, 1, %v5815_v9  ;;  %v1812_v41 = vadd.f32 %v1772_v44, %v1599_v30  ;;  %v3092_v26 = vshrl.u32 %v3087_v8, 16 }
 0x32c   : > { %vm3321_vm14 = vcmp.lt.s32.totalorder %v3285_v39, 16  ;;  %v3074_v27 = vshrl.u32 %v3073_v24, 4  ;;  %v3100_v33 = vadd.s32 %v3098_v55, %v3096_v49  ;;  %v1387_v34 = vadd.f32 %v1349_v23, %v5919_v52 }
 0x32d   : > { %v3501_v56 = vsel %vm3321_vm14, %v2024_v20, 0.0  ;;  %v2025_v45 = vadd.f32 %v1985_v16, %v1812_v41 }
 0x32e   : > { %3537 = vst [vmem:[%s4823_s19 + $0x108] sm:$0xff] %v3501_v56  ;;  %v3572_v47 = vadd.f32 %v3571_v21, %v3501_v56  ;;  %v3615_v11 = vmul.f32 %v3501_v56, %v3501_v56  ;;  %v3075_v4 = vmul.u32 18, %v3074_v27  ;;  %v1562_v60 = vpop.f32.mrf.mxu2  ;;  %v3101_v51 = vadd.s32 %v3100_v33, %v3090_v42  ;;  %v1988_v2 = vpop.f32.mrf.mxu0 }
 0x32f   : > { %v1600_v31 = vadd.f32 %v1562_v60, %v1387_v34 }
 0x330   : > { %v3650_v13 = vadd.f32 %v3649_v61, %v3615_v11  ;;  %v3076_v1 = vsub.s32 %v5771_v10, %v3075_v4  ;;  %v3102_v3 = vadd.s32 %v3101_v51, %v3092_v26  ;;  %v1775_v14 = vpop.f32.mrf.mxu3 }
 0x331   : > { %v1813_v35 = vadd.f32 %v1775_v14, %v1600_v31 }
 0x332   : > { %vm3142_vm0 = vcmp.ne.s32.totalorder %v3076_v1, 0  ;;  %vm3178_vm1 = vcmp.lt.s32.totalorder %v3076_v1, 0  ;;  %v3250_v9 = vadd.s32 18, %v3076_v1  ;;  %v3103_v62 = vshrl.u32 %v3102_v3, 4 }
 0x333   : > { %vm3214_vm2 = vmand %vm3178_vm1, %vm3142_vm0  ;;  %v2026_v58 = vadd.f32 %v1988_v2, %v1813_v35 }
 0x334   : > { %v3286_v36 = vsel %vm3214_vm2, %v3250_v9, %v3076_v1  ;;  %v3104_v21 = vmul.u32 18, %v3103_v62 }
 0x335   : > { %vm3322_vm3 = vcmp.lt.s32.totalorder %v3286_v36, 16 }
 0x336   : > { %v3502_v37 = vsel %vm3322_vm3, %v2025_v45, 0.0  ;;  %v3105_v54 = vsub.s32 %v5774_v46, %v3104_v21 }
 0x337   : > { %3538 = vst [vmem:[%s4823_s19 + $0x110] sm:$0xff] %v3502_v37  ;;  %v3573_v10 = vadd.f32 %v3572_v47, %v3502_v37  ;;  %v3616_v53 = vmul.f32 %v3502_v37, %v3502_v37 }
 0x338   : > { %vm3143_vm4 = vcmp.ne.s32.totalorder %v3105_v54, 0  ;;  %vm3179_vm5 = vcmp.lt.s32.totalorder %v3105_v54, 0  ;;  %v3251_v5 = vadd.s32 18, %v3105_v54 }
 0x339   : > { %v3651_v29 = vadd.f32 %v3650_v13, %v3616_v53  ;;  %vm3215_vm6 = vmand %vm3179_vm5, %vm3143_vm4 }
 0x33a   : > { %v3287_v22 = vsel %vm3215_vm6, %v3251_v5, %v3105_v54 }
 0x33b   : > { %vm3323_vm7 = vcmp.lt.s32.totalorder %v3287_v22, 16 }
 0x33c   : > { %v3503_v17 = vsel %vm3323_vm7, %v2026_v58, 0.0 }
 0x33d   : > { %3539 = vst [vmem:[%s4823_s19 + $0x118] sm:$0xff] %v3503_v17  ;;  %v3574_v50 = vadd.f32 %v3573_v10, %v3503_v17  ;;  %v3617_v61 = vmul.f32 %v3503_v17, %v3503_v17 }
 0x33f   : > { %v3575_v25 = vrot.slane %v3574_v50, 4  ;;  %v3652_v28 = vadd.f32 %v3651_v29, %v3617_v61 }
 0x341   : > { %v3576_v57 = vadd.f32 %v3575_v25, %v3574_v50  ;;  %v3653_v63 = vrot.slane %v3652_v28, 4 }
 0x343   : > { %v3577_v15 = vrot.slane %v3576_v57, 2  ;;  %v3654_v6 = vadd.f32 %v3653_v63, %v3652_v28 }
 0x345   : > { %v3578_v46 = vadd.f32 %v3577_v15, %v3576_v57  ;;  %v3655_v40 = vrot.slane %v3654_v6, 2 }
 0x347   : > { %v3579_v8 = vrot.slane %v3578_v46, 1  ;;  %v3656_v59 = vadd.f32 %v3655_v40, %v3654_v6 }
 0x349   : > { %v3580_v38 = vadd.f32 %v3579_v8, %v3578_v46  ;;  %v3657_v0 = vrot.slane %v3656_v59, 1 }
 0x34b   : > { %v3658_v32 = vadd.f32 %v3657_v0, %v3656_v59  ;;  %3660 = vst [vmem:[%s181_s23] sm:$0x1] %v3580_v38 }
 0x34d   : > { %3661 = vst [vmem:[%s181_s23 + $0x1] sm:$0x1] %v3658_v32 }
 0x34e PF: > { %s14_s12 = sadd.s32 1, %s3823_s12  }
 0x34f   : > { %p11_p4 = scmp.ge.s32.totalorder %s14_s12, 4  }
 0x351   :  { %13 = sbr.rel (!%p11_p4) target bundleno = 1 (0x1), region = 70 }

// kernel: conv_block_nested.3
= control target key start
LH: loop header
LB: loop body
LE: loop exit
PB: predicated region body
PF: predicated region fallthrough
CT: control target
= control target key end

     0   :  { %s4155_s18 = smov 0   ;;  %s6075_s0 = inlined_call_operand.vmem [shape: f32[2,288,128], index: 0, kind: input, shape index: {}]   ;;  %s6076_s1 = inlined_call_operand.vmem [shape: f32[1,128], index: 1, kind: input, shape index: {}]   ;;  %s6077_s2 = inlined_call_operand.vmem [shape: f32[1,128], index: 2, kind: input, shape index: {}]   ;;  %s6078_s3 = inlined_call_operand.vmem [shape: f32[1152,128], index: 3, kind: input, shape index: {}]   ;;  %s6079_s4 = inlined_call_operand.vmem [shape: f32[2,288,128], index: 4, kind: output, shape index: {0}]   ;;  %s6080_s5 = inlined_call_operand.vmem [shape: f32[2,2,128], index: 5, kind: output, shape index: {1}]  }
   0x1 LB: > { %s4032_s19 = sadd.s32 4294967295, %s4121_s18   ;;  %p4036_p0 = scmp.ge.s32.totalorder %s4121_s18, 1  ;;  %s4121_s18 = sphi %s4155_s18, %s16_s18  }
   0x2   : > { %p190_p1 = scmp.lt.s32.totalorder %s4121_s18, 3 }
   0x4   : > { %p191_p2 = pnand %p4036_p0, %p190_p1 }
   0x6   : > { %194 = sbr.rel (%p191_p2) target bundleno = 1052 (0x41c), region = 36 }
   0xb   : > { %v2010_v0 = vld [vmem:[%s6078_s3 + $0xf8] sm:$0xff]  ;;  %v2009_v1 = vld [vmem:[%s6078_s3 + $0xf0] sm:$0xff]  ;;  %p222_p3 = scmp.lt.s32.totalorder %s4032_s19, 1  ;;  %v358_v2 = vlaneseq  ;;  %v2008_v3 = vld [vmem:[%s6078_s3 + $0xe8] sm:$0xff]  ;;  %v6104_v40 = vmov 0  }
   0xc   : > { %4042 = vmatpush.msra.mxu1 %v2010_v0  ;;  %4043 = vmatpush.msra.mxu2 %v2010_v0  ;;  %v2007_v5 = vld [vmem:[%s6078_s3 + $0xe0] sm:$0xff]  ;;  %v2006_v9 = vld [vmem:[%s6078_s3 + $0xd8] sm:$0xff]  ;;  %v2005_v17 = vld [vmem:[%s6078_s3 + $0xd0] sm:$0xff] }
   0xd   : > { %4044 = vmatpush.msra.mxu3 %v2010_v0  ;;  %2011 = vmatpush.msra.mxu0 %v2010_v0  ;;  %s6324_s19 = smov (!%p222_p3, %s4032_s19), 1  ;;  %v4174_v4 = vshrl.u32 %v358_v2, 7  ;;  %v4189_v8 = vld [vmem:[%s6076_s1] ss:$0 sm:$0xff]  ;;  %v2004_v25 = vld [vmem:[%s6078_s3 + $0xc8] sm:$0xff]  ;;  %v2002_v44 = vld [vmem:[%s6078_s3 + $0xb8] sm:$0xff] }
   0xe   : > { %4045 = vmatpush.msra.mxu1 %v2009_v1  ;;  %4046 = vmatpush.msra.mxu2 %v2009_v1  ;;  %s4090_s28 = smul.u32 288, %s6324_s19  ;;  %v4208_v14 = vld [vmem:[%s6077_s2] ss:$0 sm:$0xff]  ;;  %v2001_v52 = vld [vmem:[%s6078_s3 + $0xb0] sm:$0xff]  ;;  %v2000_v60 = vld [vmem:[%s6078_s3 + $0xa8] sm:$0xff] }
   0xf   : > { %4047 = vmatpush.msra.mxu3 %v2009_v1  ;;  %2012 = vmatpush.msra.mxu0 %v2009_v1  ;;  %v4181_v6 = vadd.s32 48, %v4174_v4  ;;  %v4184_v7 = vadd.s32 56, %v4174_v4  ;;  %v4224_v24 = vadd.s32 120, %v4174_v4  ;;  %v4231_v29 = vadd.s32 128, %v4174_v4  ;;  %v2003_v34 = vld [vmem:[%s6078_s3 + $0xc0] sm:$0xff] }
  0x10   : > { %4048 = vmatpush.msra.mxu1 %v2008_v3  ;;  %4049 = vmatpush.msra.mxu2 %v2008_v3  ;;  %s4199_s10 = scalar_lea.vmem %s6075_s0, %s4090_s28  ;;  %s5874_s9 = scalar_lea.vmem %s6079_s4, %s4090_s28 }
  0x11   : > { %4050 = vmatpush.msra.mxu3 %v2008_v3  ;;  %2013 = vmatpush.msra.mxu0 %v2008_v3  ;;  %v572_v10 = vand.u32 65535, %v4181_v6  ;;  %v573_v11 = vshrl.u32 %v4181_v6, 16  ;;  %v248_v12 = vld [vmem:[%s4199_s10 + $0x30] sm:$0xff]  ;;  %v249_v13 = vld [vmem:[%s4199_s10 + $0x38] sm:$0xff]  ;;  %v601_v15 = vand.u32 65535, %v4184_v7  ;;  %v602_v16 = vshrl.u32 %v4184_v7, 16 }
  0x12   : > { %4051 = vmatpush.msra.mxu1 %v2007_v5  ;;  %4052 = vmatpush.msra.mxu2 %v2007_v5  ;;  %v288_v18 = vmul.f32 %v4189_v8, %v248_v12  ;;  %v289_v19 = vmul.f32 %v4189_v8, %v249_v13  ;;  %v257_v43 = vld [vmem:[%s4199_s10 + $0x78] sm:$0xff]  ;;  %v258_v51 = vld [vmem:[%s4199_s10 + $0x80] sm:$0xff]  ;;  %v833_v56 = vand.u32 65535, %v4224_v24  ;;  %v834_v58 = vshrl.u32 %v4224_v24, 16  ;;  %s4039_s28 = sshll.u32 %s6324_s19, 1 }
  0x13   : > { %4053 = vmatpush.msra.mxu3 %v2007_v5  ;;  %2014 = vmatpush.msra.mxu0 %v2007_v5  ;;  %v575_v20 = vmul.u32 14564, %v572_v10  ;;  %v4217_v21 = vmul.u32 58254, %v572_v10  ;;  %v4219_v22 = vmul.u32 14564, %v573_v11  ;;  %v4221_v23 = vmul.u32 58254, %v601_v15  ;;  %s235_s13 = scalar_lea.vmem %s6080_s5, %s4039_s28 }
  0x14   : > { %4054 = vmatpush.msra.mxu1 %v2006_v9  ;;  %4055 = vmatpush.msra.mxu2 %v2006_v9  ;;  %v578_v26 = vmul.u32 58254, %v573_v11  ;;  %v604_v28 = vmul.u32 14564, %v601_v15  ;;  %v4234_v30 = vadd.f32 %v4208_v14, %v288_v18  ;;  %v4237_v31 = vadd.f32 %v4208_v14, %v289_v19  ;;  %v1998_v19 = vld [vmem:[%s6078_s3 + $0x98] sm:$0xff] }
  0x15   : > { %4056 = vmatpush.msra.mxu3 %v2006_v9  ;;  %2015 = vmatpush.msra.mxu0 %v2006_v9  ;;  %v579_v27 = vshll.u32 %v4217_v21, 16  ;;  %v581_v32 = vshll.u32 %v4219_v22, 16  ;;  %v4240_v33 = vmul.u32 14564, %v602_v16  ;;  %v607_v36 = vmul.u32 58254, %v602_v16  ;;  %v1999_v9 = vld [vmem:[%s6078_s3 + $0xa0] sm:$0xff] }
  0x16   : > { %4057 = vmatpush.msra.mxu1 %v2005_v17  ;;  %4058 = vmatpush.msra.mxu2 %v2005_v17  ;;  %v608_v37 = vshll.u32 %v4221_v23, 16  ;;  %v580_v38 = vshrl.u32 %v4217_v21, 16  ;;  %v582_v39 = vshrl.u32 %v4219_v22, 16  ;;  %v609_v46 = vshrl.u32 %v4221_v23, 16 }
  0x17   : > { %4059 = vmatpush.msra.mxu3 %v2005_v17  ;;  %2016 = vmatpush.msra.mxu0 %v2005_v17  ;;  %vm583_vm0 = vc.u32 %v575_v20, %v579_v27  ;;  %v585_v35 = vadd.s32 %v579_v27, %v575_v20  ;;  %v610_v42 = vshll.u32 %v4240_v33, 16  ;;  %v611_v48 = vshrl.u32 %v4240_v33, 16 }
  0x18   : > { %4060 = vmatpush.msra.mxu1 %v2004_v25  ;;  %4061 = vmatpush.msra.mxu2 %v2004_v25  ;;  %v584_v41 = vsel %vm583_vm0, 1, %v6104_v40  ;;  %vm612_vm2 = vc.u32 %v604_v28, %v608_v37  ;;  %v614_v50 = vadd.s32 %v608_v37, %v604_v28  ;;  %v297_v55 = vmul.f32 %v4189_v8, %v257_v43  ;;  %v1997_v28 = vld [vmem:[%s6078_s3 + $0x90] sm:$0xff] }
  0x19   : > { %4062 = vmatpush.msra.mxu3 %v2004_v25  ;;  %2017 = vmatpush.msra.mxu0 %v2004_v25  ;;  %v586_v45 = vadd.s32 %v584_v41, %v578_v26  ;;  %vm587_vm1 = vc.u32 %v585_v35, %v581_v32  ;;  %v613_v49 = vsel %vm612_vm2, 1, %v6104_v40  ;;  %v1733_v57 = vmax.f32 %v4234_v30, 0.0 }
  0x1a   : > { %4063 = vmatpush.msra.mxu1 %v2003_v34  ;;  %4064 = vmatpush.msra.mxu2 %v2003_v34  ;;  %v588_v47 = vsel %vm587_vm1, 1, %v6104_v40  ;;  %v615_v54 = vadd.s32 %v613_v49, %v607_v36  ;;  %vm616_vm3 = vc.u32 %v614_v50, %v610_v42  ;;  %v862_v59 = vand.u32 65535, %v4231_v29 }
  0x1b   : > { %4065 = vmatpush.msra.mxu3 %v2003_v34  ;;  %2018 = vmatpush.msra.mxu0 %v2003_v34  ;;  %v590_v53 = vadd.s32 %v588_v47, %v586_v45  ;;  %v617_v62 = vsel %vm616_vm3, 1, %v6104_v40  ;;  %v1734_v63 = vmax.f32 %v4237_v31, 0.0  ;;  %v298_v0 = vmul.f32 %v4189_v8, %v258_v51 }
  0x1c   : > { %4066 = vmatpush.msra.mxu1 %v2002_v44  ;;  %4067 = vmatpush.msra.mxu2 %v2002_v44  ;;  %v619_v1 = vadd.s32 %v617_v62, %v615_v54  ;;  %v836_v2 = vmul.u32 14564, %v833_v56  ;;  %v4273_v3 = vmul.u32 58254, %v833_v56  ;;  %v4275_v5 = vmul.u32 14564, %v834_v58  ;;  %v267_v56 = vld [vmem:[%s4199_s10 + $0xc8] sm:$0xff] }
  0x1d   : > { %4068 = vmatpush.msra.mxu3 %v2002_v44  ;;  %2019 = vmatpush.msra.mxu0 %v2002_v44  ;;  %v591_v61 = vadd.s32 %v590_v53, %v580_v38  ;;  %v4281_v11 = vadd.f32 %v4208_v14, %v297_v55  ;;  %v863_v12 = vshrl.u32 %v4231_v29, 16  ;;  %v4284_v13 = vmul.u32 58254, %v862_v59  ;;  %v2312_v55 = vld [vmem:[%s6078_s3 + $0x178] sm:$0xff] }
  0x1e   : > { %4069 = vmatpush.msra.mxu1 %v2001_v52  ;;  %4070 = vmatpush.msra.mxu2 %v2001_v52  ;;  %v620_v15 = vadd.s32 %v619_v1, %v609_v46  ;;  %v839_v16 = vmul.u32 58254, %v834_v58  ;;  %v840_v17 = vshll.u32 %v4273_v3, 16  ;;  %v842_v18 = vshll.u32 %v4275_v5, 16 }
  0x1f   : > { %4071 = vmatpush.msra.mxu3 %v2001_v52  ;;  %2020 = vmatpush.msra.mxu0 %v2001_v52  ;;  %v592_v10 = vadd.s32 %v591_v61, %v582_v39  ;;  %v4292_v21 = vadd.f32 %v4208_v14, %v298_v0  ;;  %v865_v22 = vmul.u32 14564, %v862_v59  ;;  %v4294_v23 = vmul.u32 14564, %v863_v12  ;;  %v1996_v39 = vld [vmem:[%s6078_s3 + $0x88] sm:$0xff]  ;;  %v2311_v52 = vld [vmem:[%s6078_s3 + $0x170] sm:$0xff] }
  0x20   : > { %4072 = vmatpush.msra.mxu1 %v2000_v60  ;;  %4073 = vmatpush.msra.mxu2 %v2000_v60  ;;  %v621_v25 = vadd.s32 %v620_v15, %v611_v48  ;;  %vm844_vm4 = vc.u32 %v836_v2, %v840_v17  ;;  %v846_v26 = vadd.s32 %v840_v17, %v836_v2  ;;  %v869_v27 = vshll.u32 %v4284_v13, 16  ;;  %v266_v48 = vld [vmem:[%s4199_s10 + $0xc0] sm:$0xff] }
  0x21   : > { %4074 = vmatpush.msra.mxu3 %v2000_v60  ;;  %2021 = vmatpush.msra.mxu0 %v2000_v60  ;;  %v593_v20 = vshrl.u32 %v592_v10, 4  ;;  %v841_v33 = vshrl.u32 %v4273_v3, 16  ;;  %v845_v34 = vsel %vm844_vm4, 1, %v6104_v40  ;;  %v868_v35 = vmul.u32 58254, %v863_v12 }
  0x22   : > { %4075 = vmatpush.msra.mxu1 %v1999_v9  ;;  %4076 = vmatpush.msra.mxu2 %v1999_v9  ;;  %v622_v36 = vshrl.u32 %v621_v25, 4  ;;  %v847_v37 = vadd.s32 %v845_v34, %v839_v16  ;;  %vm848_vm5 = vc.u32 %v846_v26, %v842_v18  ;;  %v871_v38 = vshll.u32 %v4294_v23, 16 }
  0x23   : > { %4077 = vmatpush.msra.mxu3 %v1999_v9  ;;  %v594_v32 = vmul.u32 18, %v593_v20  ;;  %2022 = vmatpush.msra.mxu0 %v1999_v9  ;;  %v849_v42 = vsel %vm848_vm5, 1, %v6104_v40  ;;  %vm873_vm6 = vc.u32 %v865_v22, %v869_v27  ;;  %v875_v43 = vadd.s32 %v869_v27, %v865_v22 }
  0x24   : > { %4078 = vmatpush.msra.mxu1 %v1998_v19  ;;  %4079 = vmatpush.msra.mxu2 %v1998_v19  ;;  %v623_v44 = vmul.u32 18, %v622_v36  ;;  %v843_v45 = vshrl.u32 %v4275_v5, 16  ;;  %v851_v46 = vadd.s32 %v849_v42, %v847_v37  ;;  %v874_v47 = vsel %vm873_vm6, 1, %v6104_v40 }
  0x25   : > { %4080 = vmatpush.msra.mxu3 %v1998_v19  ;;  %v595_v41 = vsub.s32 %v4181_v6, %v594_v32  ;;  %2023 = vmatpush.msra.mxu0 %v1998_v19  ;;  %v1995_v6 = vld [vmem:[%s6078_s3 + $0x80] sm:$0xff]  ;;  %v876_v50 = vadd.s32 %v874_v47, %v868_v35  ;;  %v870_v54 = vshrl.u32 %v4284_v13, 16  ;;  %vm877_vm10 = vc.u32 %v875_v43, %v871_v38 }
  0x26   : > { %4081 = vmatpush.msra.mxu1 %v1997_v28  ;;  %4082 = vmatpush.msra.mxu2 %v1997_v28  ;;  %v624_v51 = vsub.s32 %v4184_v7, %v623_v44  ;;  %v852_v53 = vadd.s32 %v851_v46, %v841_v33  ;;  %v872_v59 = vshrl.u32 %v4294_v23, 16  ;;  %v878_v7 = vsel %vm877_vm10, 1, %v6104_v40 }
  0x27   : > { %4083 = vmatpush.msra.mxu3 %v1997_v28  ;;  %vm1445_vm7 = vcmp.ne.s32.totalorder %v595_v41, 0  ;;  %vm1481_vm8 = vcmp.lt.s32.totalorder %v595_v41, 0  ;;  %v1553_v49 = vadd.s32 18, %v595_v41  ;;  %2024 = vmatpush.msra.mxu0 %v1997_v28  ;;  %v306_v60 = vmul.f32 %v4189_v8, %v266_v48 }
  0x28   : > { %4084 = vmatpush.msra.mxu1 %v1996_v39  ;;  %4085 = vmatpush.msra.mxu2 %v1996_v39  ;;  %vm4315_vm9 = vmand %vm1481_vm8, %vm1445_vm7  ;;  %vm1446_vm11 = vcmp.ne.s32.totalorder %v624_v51, 0  ;;  %vm1482_vm12 = vcmp.lt.s32.totalorder %v624_v51, 0  ;;  %v1554_v61 = vadd.s32 18, %v624_v51  ;;  %v6140_v62 = vmov 0 }
  0x29   : > { %4086 = vmatpush.msra.mxu3 %v1996_v39  ;;  %v1589_v58 = vsel %vm4315_vm9, %v1553_v49, %v595_v41  ;;  %2025 = vmatpush.msra.mxu0 %v1996_v39  ;;  %vm1518_vm14 = vmand %vm1482_vm12, %vm1446_vm11  ;;  %v853_v1 = vadd.s32 %v852_v53, %v843_v45  ;;  %v880_v2 = vadd.s32 %v878_v7, %v876_v50  ;;  %v1742_v9 = vmax.f32 %v4281_v11, 0.0  ;;  %v2525_v49 = vld [vmem:[%s6078_s3 + $0x1f8] sm:$0xff]  ;;  %v2524_v53 = vld [vmem:[%s6078_s3 + $0x1f0] sm:$0xff] }
  0x2a   : > { %4087 = vmatpush.msra.mxu1 %v1995_v6  ;;  %4088 = vmatpush.msra.mxu2 %v1995_v6  ;;  %vm4329_vm13 = vcmp.lt.s32.totalorder %v1589_v58, 16  ;;  %v307_v3 = vmul.f32 %v4189_v8, %v267_v56  ;;  %v1590_v5 = vsel %vm1518_vm14, %v1554_v61, %v624_v51  ;;  %v4340_v10 = vadd.s32 192, %v4174_v4  ;;  %v250_v58 = vld [vmem:[%s4199_s10 + $0x40] sm:$0xff] }
  0x2b   : > { %v6141_v62 = vsel %vm4329_vm13, 4294967295, %v6140_v62  ;;  %v1841_v0 = vsel %vm4329_vm13, %v1733_v57, 0.0  ;;  %4089 = vmatpush.msra.mxu3 %v1995_v6  ;;  %v4343_v12 = vadd.s32 200, %v4174_v4  ;;  %2026 = vmatpush.msra.mxu0 %v1995_v6  ;;  %vm4345_vm15 = vcmp.lt.s32.totalorder %v1590_v5, 16 }
  0x2c   : > { %6142 = vst [vmem:[#allocation3_spill] sm:$0xff] %v6141_v62  ;;  %2313 = vmatpush.msrb.mxu2 %v2312_v55  ;;  %v6143_v30 = vmov 0  ;;  %v854_v57 = vshrl.u32 %v853_v1, 4  ;;  %v881_v13 = vadd.s32 %v880_v2, %v870_v54  ;;  %v4350_v15 = vadd.f32 %v4208_v14, %v306_v60 }
  0x2d   : > { %1877 = vst [vmem:[#allocation2 + $0x48] sm:$0xff] %v1841_v0  ;;  %v6144_v30 = vsel %vm4345_vm15, 4294967295, %v6143_v30  ;;  %v1842_v11 = vsel %vm4345_vm15, %v1734_v63, 0.0  ;;  %v1094_v16 = vand.u32 65535, %v4340_v10  ;;  %v1095_v17 = vshrl.u32 %v4340_v10, 16  ;;  %2526 = vmatpush.msrb.mxu3 %v2525_v49  ;;  %v259_v0 = vld [vmem:[%s4199_s10 + $0x88] sm:$0xff] }
  0x2e   : > { %6145 = vst [vmem:[#allocation4_spill] sm:$0xff] %v6144_v30  ;;  %v1123_v18 = vand.u32 65535, %v4343_v12  ;;  %v855_v19 = vmul.u32 18, %v854_v57  ;;  %v882_v20 = vadd.s32 %v881_v13, %v872_v59  ;;  %v1743_v22 = vmax.f32 %v4292_v21, 0.0  ;;  %2314 = vmatpush.msrb.mxu2 %v2311_v52 }
  0x2f   : > { %1878 = vst [vmem:[#allocation2 + $0x50] sm:$0xff] %v1842_v11  ;;  %v4361_v23 = vadd.f32 %v4208_v14, %v307_v3  ;;  %v1097_v25 = vmul.u32 14564, %v1094_v16  ;;  %v1098_v26 = vmul.u32 58254, %v1094_v16  ;;  %v4363_v31 = vmul.u32 14564, %v1095_v17  ;;  %2527 = vmatpush.msrb.mxu3 %v2524_v53 }
  0x30   : > { %v1124_v63 = vshrl.u32 %v4343_v12, 16  ;;  %v856_v27 = vsub.s32 %v4224_v24, %v855_v19  ;;  %v883_v28 = vshrl.u32 %v882_v20, 4  ;;  %v4367_v32 = vmul.u32 58254, %v1123_v18 }
  0x31   : > { %v1751_v33 = vmax.f32 %v4350_v15, 0.0  ;;  %v1100_v34 = vmul.u32 58254, %v1095_v17  ;;  %v1101_v35 = vshll.u32 %v1098_v26, 16  ;;  %v1103_v21 = vshll.u32 %v4363_v31, 16 }
  0x32   : > { %v1126_v36 = vmul.u32 14564, %v1123_v18  ;;  %v884_v37 = vmul.u32 18, %v883_v28  ;;  %vm1454_vm0 = vcmp.ne.s32.totalorder %v856_v27, 0  ;;  %vm1490_vm1 = vcmp.lt.s32.totalorder %v856_v27, 0 }
  0x33   : > { %v1562_v38 = vadd.s32 18, %v856_v27  ;;  %vm1526_vm2 = vmand %vm1490_vm1, %vm1454_vm0  ;;  %v1102_v39 = vshrl.u32 %v1098_v26, 16  ;;  %vm1105_vm3 = vc.u32 %v1097_v25, %v1101_v35  ;;  %v1107_v41 = vadd.s32 %v1101_v35, %v1097_v25 }
  0x34   : > { %v4371_v42 = vmul.u32 14564, %v1124_v63  ;;  %v885_v24 = vsub.s32 %v4231_v29, %v884_v37  ;;  %v1106_v44 = vsel %vm1105_vm3, 1, %v6104_v40  ;;  %v1130_v45 = vshll.u32 %v4367_v32, 16  ;;  %v1958_v29 = vld [vmem:[%s6078_s3 + $0x78] sm:$0xff] }
  0x35   : > { %v1598_v43 = vsel %vm1526_vm2, %v1562_v38, %v856_v27  ;;  %v6146_v47 = vmov 0  ;;  %v1108_v48 = vadd.s32 %v1106_v44, %v1100_v34  ;;  %vm1109_vm5 = vc.u32 %v1107_v41, %v1103_v21  ;;  %2136 = vmatpush.msrb.mxu1 %v1958_v29 }
  0x36   : > { %v1968_v46 = vld [vmem:[#allocation2 + $0x4e] sm:$0xff]  ;;  %vm4376_vm4 = vcmp.lt.s32.totalorder %v1598_v43, 16  ;;  %v1129_v6 = vmul.u32 58254, %v1124_v63  ;;  %vm1455_vm6 = vcmp.ne.s32.totalorder %v885_v24, 0  ;;  %vm1491_vm7 = vcmp.lt.s32.totalorder %v885_v24, 0 }
  0x37   : > { %v6147_v47 = vsel %vm4376_vm4, 4294967295, %v6146_v47  ;;  %2054 = vmatmul.f32.vlgmr.msra.gmra.mxu1 %v1968_v46  ;;  %v1563_v50 = vadd.s32 18, %v885_v24  ;;  %v1850_v51 = vsel %vm4376_vm4, %v1742_v9, 0.0  ;;  %vm1527_vm8 = vmand %vm1491_vm7, %vm1455_vm6  ;;  %v1104_v54 = vshrl.u32 %v4363_v31, 16 }
  0x38   : > { %6148 = vst [vmem:[#allocation5_spill] sm:$0xff] %v6147_v47  ;;  %v1110_v55 = vsel %vm1109_vm5, 1, %v6104_v40  ;;  %v1132_v56 = vshll.u32 %v4371_v42, 16  ;;  %vm1134_vm9 = vc.u32 %v1126_v36, %v1130_v45  ;;  %v1136_v61 = vadd.s32 %v1130_v45, %v1126_v36 }
  0x39   : > { %1886 = vst [vmem:[#allocation2 + $0x90] sm:$0xff] %v1850_v51  ;;  %v1599_v59 = vsel %vm1527_vm8, %v1563_v50, %v885_v24  ;;  %v1112_v7 = vadd.s32 %v1110_v55, %v1108_v48  ;;  %v1135_v60 = vsel %vm1134_vm9, 1, %v6104_v40  ;;  %v6149_v1 = vmov 0  ;;  %v2310_v55 = vld [vmem:[%s6078_s3 + $0x168] sm:$0xff] }
  0x3a   : > { %vm4400_vm10 = vcmp.lt.s32.totalorder %v1599_v59, 16  ;;  %v1131_v2 = vshrl.u32 %v4367_v32, 16  ;;  %v1137_v3 = vadd.s32 %v1135_v60, %v1129_v6  ;;  %v4406_v5 = vadd.s32 64, %v4174_v4  ;;  %2315 = vmatpush.msrb.mxu2 %v2310_v55 }
  0x3b   : > { %v6150_v1 = vsel %vm4400_vm10, 4294967295, %v6149_v1  ;;  %v1851_v9 = vsel %vm4400_vm10, %v1743_v22, 0.0  ;;  %v1113_v57 = vadd.s32 %v1112_v7, %v1102_v39  ;;  %vm1138_vm11 = vc.u32 %v1136_v61, %v1132_v56 }
  0x3c   : > { %6151 = vst [vmem:[#allocation6_spill] sm:$0xff] %v6150_v1  ;;  %v290_v13 = vmul.f32 %v4189_v8, %v250_v58  ;;  %v1139_v11 = vsel %vm1138_vm11, 1, %v6104_v40  ;;  %v630_v16 = vand.u32 65535, %v4406_v5  ;;  %v631_v17 = vshrl.u32 %v4406_v5, 16 }
  0x3d   : > { %1887 = vst [vmem:[#allocation2 + $0x98] sm:$0xff] %v1851_v9  ;;  %v299_v18 = vmul.f32 %v4189_v8, %v259_v0  ;;  %v1114_v19 = vadd.s32 %v1113_v57, %v1104_v54  ;;  %v1133_v20 = vshrl.u32 %v4371_v42, 16  ;;  %v1141_v25 = vadd.s32 %v1139_v11, %v1137_v3 }
  0x3e   : > { %v4417_v26 = vadd.s32 136, %v4174_v4  ;;  %v1752_v22 = vmax.f32 %v4361_v23, 0.0  ;;  %v633_v31 = vmul.u32 14564, %v630_v16  ;;  %v634_v63 = vmul.u32 58254, %v630_v16  ;;  %v251_v16 = vld [vmem:[%s4199_s10 + $0x48] sm:$0xff] }
  0x3f   : > { %v4420_v27 = vmul.u32 14564, %v631_v17  ;;  %v1115_v28 = vshrl.u32 %v1114_v19, 4  ;;  %v1142_v32 = vadd.s32 %v1141_v25, %v1131_v2  ;;  %v4423_v34 = vadd.f32 %v4208_v14, %v290_v13  ;;  %v268_v2 = vld [vmem:[%s4199_s10 + $0xd0] sm:$0xff] }
  0x40   : > { %v891_v35 = vand.u32 65535, %v4417_v26  ;;  %v636_v21 = vmul.u32 58254, %v631_v17  ;;  %v637_v36 = vshll.u32 %v634_v63, 16  ;;  %v4428_v38 = vadd.f32 %v4208_v14, %v299_v18  ;;  %v2702_v47 = vld [vmem:[#allocation2 + $0x90] sm:$0xff] }
  0x41   : > { %v639_v37 = vshll.u32 %v4420_v27, 16  ;;  %v1116_v39 = vmul.u32 18, %v1115_v28  ;;  %v1143_v41 = vadd.s32 %v1142_v32, %v1133_v20  ;;  %v638_v42 = vshrl.u32 %v634_v63, 16 }
  0x42   : > { %v892_v24 = vshrl.u32 %v4417_v26, 16  ;;  %vm641_vm12 = vc.u32 %v633_v31, %v637_v36  ;;  %v643_v43 = vadd.s32 %v637_v36, %v633_v31  ;;  %v894_v44 = vmul.u32 14564, %v891_v35 }
  0x43   : > { %v4431_v45 = vmul.u32 58254, %v891_v35  ;;  %v1117_v48 = vsub.s32 %v4340_v10, %v1116_v39  ;;  %v1144_v6 = vshrl.u32 %v1143_v41, 4  ;;  %v642_v49 = vsel %vm641_vm12, 1, %v6104_v40  ;;  %v1957_v10 = vld [vmem:[%s6078_s3 + $0x70] sm:$0xff] }
  0x44   : > { %v1977_v46 = vld [vmem:[#allocation2 + $0x96] sm:$0xff]  ;;  %v4435_v29 = vmul.u32 14564, %v892_v24  ;;  %v640_v50 = vshrl.u32 %v4420_v27, 16  ;;  %v644_v51 = vadd.s32 %v642_v49, %v636_v21  ;;  %vm645_vm14 = vc.u32 %v643_v43, %v639_v37  ;;  %2137 = vmatpush.msrb.mxu1 %v1957_v10  ;;  %v2523_v10 = vld [vmem:[%s6078_s3 + $0x1e8] sm:$0xff] }
  0x45   : > { %2081 = vmatmul.f32.vlgmr.msra.gmra.mxu2 %v1977_v46  ;;  %v898_v52 = vshll.u32 %v4431_v45, 16  ;;  %v1145_v53 = vmul.u32 18, %v1144_v6  ;;  %vm1463_vm0 = vcmp.ne.s32.totalorder %v1117_v48, 0  ;;  %vm1499_vm1 = vcmp.lt.s32.totalorder %v1117_v48, 0  ;;  %2528 = vmatpush.msrb.mxu3 %v2523_v10  ;;  %v2490_v1 = vld [vmem:[#allocation2 + $0x97] sm:$0xff] }
  0x46   : > { %v1571_v54 = vadd.s32 18, %v1117_v48  ;;  %vm1535_vm2 = vmand %vm1499_vm1, %vm1463_vm0  ;;  %v646_v56 = vsel %vm645_vm14, 1, %v6104_v40  ;;  %v897_v58 = vmul.u32 58254, %v892_v24  ;;  %v899_v59 = vshrl.u32 %v4431_v45, 16 }
  0x47   : > { %v900_v7 = vshll.u32 %v4435_v29, 16  ;;  %v1146_v60 = vsub.s32 %v4343_v12, %v1145_v53  ;;  %v648_v0 = vadd.s32 %v646_v56, %v644_v51  ;;  %vm902_vm3 = vc.u32 %v894_v44, %v898_v52 }
  0x48   : > { %v1607_v61 = vsel %vm1535_vm2, %v1571_v54, %v1117_v48  ;;  %v6152_v3 = vmov 0  ;;  %v903_v9 = vsel %vm902_vm3, 1, %v6104_v40  ;;  %v904_v57 = vadd.s32 %v898_v52, %v894_v44  ;;  %v2738_v54 = vld [vmem:[%s6078_s3 + $0x278] sm:$0xff] }
  0x49   : > { %vm4450_vm5 = vcmp.lt.s32.totalorder %v1607_v61, 16  ;;  %vm1464_vm6 = vcmp.ne.s32.totalorder %v1146_v60, 0  ;;  %vm1500_vm7 = vcmp.lt.s32.totalorder %v1146_v60, 0  ;;  %v1572_v13 = vadd.s32 18, %v1146_v60  ;;  %2739 = vmatpush.msrb.mxu0 %v2738_v54 }
  0x4a   : > { %v6153_v3 = vsel %vm4450_vm5, 4294967295, %v6152_v3  ;;  %v1859_v11 = vsel %vm4450_vm5, %v1751_v33, 0.0  ;;  %v4124_v12 = vmov 0.0   ;;  %vm1536_vm8 = vmand %vm1500_vm7, %vm1464_vm6  ;;  %v649_v17 = vadd.s32 %v648_v0, %v638_v42 }
  0x4b   : > { %6154 = vst [vmem:[#allocation7_spill] sm:$0xff] %v6153_v3  ;;  %v905_v18 = vadd.s32 %v903_v9, %v897_v58  ;;  %vm906_vm9 = vc.u32 %v904_v57, %v900_v7  ;;  %v308_v19 = vmul.f32 %v4189_v8, %v268_v2  ;;  %v1608_v20 = vsel %vm1536_vm8, %v1572_v13, %v1146_v60  ;;  %v2737_v7 = vld [vmem:[%s6078_s3 + $0x270] sm:$0xff] }
  0x4c   : > { %236 = vst [vmem:[#allocation2] sm:$0xff] %v4124_v12  ;;  %v901_v25 = vshrl.u32 %v4435_v29, 16  ;;  %v907_v31 = vsel %vm906_vm9, 1, %v6104_v40  ;;  %v4464_v15 = vadd.s32 208, %v4174_v4  ;;  %vm4466_vm11 = vcmp.lt.s32.totalorder %v1608_v20, 16  ;;  %2740 = vmatpush.msrb.mxu0 %v2737_v7 }
  0x4d   : > { %1895 = vst [vmem:[#allocation2 + $0xd8] sm:$0xff] %v1859_v11  ;;  %v6155_v33 = vmov 0  ;;  %v650_v63 = vadd.s32 %v649_v17, %v640_v50  ;;  %v909_v27 = vadd.s32 %v907_v31, %v905_v18  ;;  %v291_v28 = vmul.f32 %v4189_v8, %v251_v16 }
  0x4e   : > { %237 = vst [vmem:[#allocation2 + $0x8] sm:$0xff] %v4124_v12  ;;  %v6156_v33 = vsel %vm4466_vm11, 4294967295, %v6155_v33  ;;  %v1860_v32 = vsel %vm4466_vm11, %v1752_v22, 0.0  ;;  %v4476_v35 = vadd.f32 %v4208_v14, %v308_v19  ;;  %v1152_v21 = vand.u32 65535, %v4464_v15 }
  0x4f   : > { %6157 = vst [vmem:[#allocation8_spill] sm:$0xff] %v6156_v33  ;;  %v1153_v36 = vshrl.u32 %v4464_v15, 16  ;;  %v651_v37 = vshrl.u32 %v650_v63, 4  ;;  %v1735_v39 = vmax.f32 %v4423_v34, 0.0  ;;  %v910_v41 = vadd.s32 %v909_v27, %v899_v59  ;;  %v2309_v59 = vld [vmem:[%s6078_s3 + $0x160] sm:$0xff]  ;;  %v260_v63 = vld [vmem:[%s4199_s10 + $0x90] sm:$0xff] }
  0x50   : > { %238 = vst [vmem:[#allocation2 + $0x10] sm:$0xff] %v4124_v12  ;;  %v4482_v42 = vadd.s32 72, %v4174_v4  ;;  %v1744_v23 = vmax.f32 %v4428_v38, 0.0  ;;  %v1155_v22 = vmul.u32 14564, %v1152_v21  ;;  %v4485_v24 = vmul.u32 58254, %v1152_v21  ;;  %2316 = vmatpush.msrb.mxu2 %v2309_v59  ;;  %v2944_v33 = vld [vmem:[%s6078_s3 + $0x2c0] sm:$0xff] }
  0x51   : > { %239 = vst [vmem:[#allocation2 + $0x138] sm:$0xff] %v4124_v12  ;;  %v4487_v43 = vmul.u32 14564, %v1153_v36  ;;  %v652_v44 = vmul.u32 18, %v651_v37  ;;  %v911_v45 = vadd.s32 %v910_v41, %v901_v25  ;;  %v1753_v49 = vmax.f32 %v4476_v35, 0.0  ;;  %v4631_v35 = vld [vmem:[%s6076_s1] ss:$0 sm:$0xff] }
  0x52   : > { %1896 = vst [vmem:[#allocation2 + $0xe0] sm:$0xff] %v1860_v32  ;;  %v659_v46 = vand.u32 65535, %v4482_v42  ;;  %v660_v48 = vshrl.u32 %v4482_v42, 16  ;;  %v1159_v34 = vshll.u32 %v4485_v24, 16  ;;  %v4495_v29 = vadd.f32 %v4208_v14, %v291_v28 }
  0x53   : > { %240 = vst [vmem:[#allocation2 + $0x140] sm:$0xff] %v4124_v12  ;;  %v1161_v6 = vshll.u32 %v4487_v43, 16  ;;  %v653_v50 = vsub.s32 %v4406_v5, %v652_v44  ;;  %v912_v51 = vshrl.u32 %v911_v45, 4  ;;  %v1158_v53 = vmul.u32 58254, %v1153_v36  ;;  %v1956_v5 = vld [vmem:[%s6078_s3 + $0x68] sm:$0xff] }
  0x54   : > { %241 = vst [vmem:[#allocation2 + $0x148] sm:$0xff] %v4124_v12  ;;  %v4504_v55 = vmul.u32 58254, %v659_v46  ;;  %vm4506_vm12 = vc.u32 %v1155_v22, %v1159_v34  ;;  %v1165_v58 = vadd.s32 %v1159_v34, %v1155_v22  ;;  %v662_v60 = vmul.u32 14564, %v659_v46  ;;  %2138 = vmatpush.msrb.mxu1 %v1956_v5 }
  0x55   : > { %v1959_v52 = vld [vmem:[#allocation2 + $0x6] sm:$0xff]  ;;  %v4519_v61 = vmul.u32 14564, %v660_v48  ;;  %vm1447_vm14 = vcmp.ne.s32.totalorder %v653_v50, 0  ;;  %vm1483_vm0 = vcmp.lt.s32.totalorder %v653_v50, 0  ;;  %v1555_v0 = vadd.s32 18, %v653_v50 }
  0x56   : > { %2027 = vmatmul.f32.vlgmr.msra.gmra.mxu0 %v1959_v52  ;;  %v913_v2 = vmul.u32 18, %v912_v51  ;;  %vm1519_vm1 = vmand %vm1483_vm0, %vm1447_vm14  ;;  %v1164_v57 = vsel %vm4506_vm12, 1, %v6104_v40  ;;  %vm1167_vm2 = vc.u32 %v1165_v58, %v1161_v6  ;;  %v665_v13 = vmul.u32 58254, %v660_v48 }
  0x57   : > { %v666_v11 = vshll.u32 %v4504_v55, 16  ;;  %v1591_v12 = vsel %vm1519_vm1, %v1555_v0, %v653_v50  ;;  %v1166_v17 = vadd.s32 %v1164_v57, %v1158_v53  ;;  %v1168_v18 = vsel %vm1167_vm2, 1, %v6104_v40  ;;  %v1960_v57 = vld [vmem:[#allocation2 + $0xe] sm:$0xff] }
  0x58   : > { %v914_v16 = vsub.s32 %v4417_v26, %v913_v2  ;;  %vm4527_vm3 = vcmp.lt.s32.totalorder %v1591_v12, 16  ;;  %v6160_v19 = vmov 0  ;;  %v1160_v20 = vshrl.u32 %v4485_v24, 16 }
  0x59   : > { %v1986_v9 = vld [vmem:[#allocation2 + $0xde] sm:$0xff]  ;;  %v6161_v19 = vsel %vm4527_vm3, 4294967295, %v6160_v19  ;;  %v668_v25 = vshll.u32 %v4519_v61, 16  ;;  %vm670_vm6 = vc.u32 %v662_v60, %v666_v11  ;;  %v1843_v31 = vsel %vm4527_vm3, %v1735_v39, 0.0 }
  0x5a   : > { %2108 = vmatmul.f32.vlgmr.msra.gmra.mxu3 %v1986_v9  ;;  %6162 = vst [vmem:[#allocation9_spill] sm:$0xff] %v6161_v19  ;;  %vm1456_vm7 = vcmp.ne.s32.totalorder %v914_v16, 0  ;;  %vm1492_vm8 = vcmp.lt.s32.totalorder %v914_v16, 0  ;;  %v1564_v26 = vadd.s32 18, %v914_v16  ;;  %v1162_v27 = vshrl.u32 %v4487_v43, 16  ;;  %v269_v39 = vld [vmem:[%s4199_s10 + $0xd8] sm:$0xff] }
  0x5b   : > { %1879 = vst [vmem:[#allocation2 + $0x58] sm:$0xff] %v1843_v31  ;;  %vm1528_vm9 = vmand %vm1492_vm8, %vm1456_vm7  ;;  %v1170_v28 = vadd.s32 %v1168_v18, %v1166_v17  ;;  %v671_v32 = vsel %vm670_vm6, 1, %v6104_v40  ;;  %v672_v21 = vadd.s32 %v666_v11, %v662_v60  ;;  %v667_v37 = vshrl.u32 %v4504_v55, 16  ;;  %v2522_v9 = vld [vmem:[%s6078_s3 + $0x1e0] sm:$0xff] }
  0x5c   : > { %v1600_v36 = vsel %vm1528_vm9, %v1564_v26, %v914_v16  ;;  %v673_v41 = vadd.s32 %v671_v32, %v665_v13  ;;  %v4540_v22 = vadd.s32 144, %v4174_v4  ;;  %v6163_v24 = vmov 0  ;;  %2529 = vmatpush.msrb.mxu3 %v2522_v9  ;;  %v2308_v32 = vld [vmem:[%s6078_s3 + $0x158] sm:$0xff] }
  0x5d   : > { %vm4543_vm12 = vcmp.lt.s32.totalorder %v1600_v36, 16  ;;  %v1171_v44 = vadd.s32 %v1170_v28, %v1160_v20  ;;  %vm674_vm14 = vc.u32 %v672_v21, %v668_v25  ;;  %v300_v43 = vmul.f32 %v4189_v8, %v260_v63  ;;  %2317 = vmatpush.msrb.mxu2 %v2308_v32 }
  0x5e   : > { %v6164_v24 = vsel %vm4543_vm12, 4294967295, %v6163_v24  ;;  %v1852_v45 = vsel %vm4543_vm12, %v1744_v23, 0.0  ;;  %v669_v46 = vshrl.u32 %v4519_v61, 16  ;;  %v675_v48 = vsel %vm674_vm14, 1, %v6104_v40  ;;  %2030 = vmatmul.f32.gmra.mxu0 %v1960_v57 }
  0x5f   : > { %6165 = vst [vmem:[#allocation10_spill] sm:$0xff] %v6164_v24  ;;  %v920_v34 = vand.u32 65535, %v4540_v22  ;;  %v1172_v6 = vadd.s32 %v1171_v44, %v1162_v27  ;;  %v677_v50 = vadd.s32 %v675_v48, %v673_v41  ;;  %v921_v51 = vshrl.u32 %v4540_v22, 16  ;;  %v2736_v44 = vld [vmem:[%s6078_s3 + $0x268] sm:$0xff]  ;;  %v1925_v24 = vld [vmem:[#allocation2 + $0x95] sm:$0xff] }
  0x60   : > { %1888 = vst [vmem:[#allocation2 + $0xa0] sm:$0xff] %v1852_v45  ;;  %v309_v52 = vmul.f32 %v4189_v8, %v269_v39  ;;  %v1736_v53 = vmax.f32 %v4495_v29, 0.0  ;;  %v4561_v23 = vadd.s32 216, %v4174_v4  ;;  %v4564_v56 = vadd.f32 %v4208_v14, %v300_v43  ;;  %v2521_v43 = vld [vmem:[%s6078_s3 + $0x1d8] sm:$0xff]  ;;  %2741 = vmatpush.msrb.mxu0 %v2736_v44  ;;  %v4656_v29 = vld [vmem:[%s6077_s2] ss:$0 sm:$0xff] }
  0x61   : > { %v923_v54 = vmul.u32 14564, %v920_v34  ;;  %v4558_v38 = vmul.u32 58254, %v920_v34  ;;  %v1173_v10 = vshrl.u32 %v1172_v6, 4  ;;  %v678_v55 = vadd.s32 %v677_v50, %v667_v37  ;;  %v1954_v34 = vld [vmem:[%s6078_s3 + $0x58] sm:$0xff]  ;;  %v2307_v6 = vld [vmem:[%s6078_s3 + $0x150] sm:$0xff]  ;;  %2530 = vmatpush.msrb.mxu3 %v2521_v43 }
  0x62   : > { %v4566_v58 = vmul.u32 14564, %v921_v51  ;;  %v1969_v5 = vld [vmem:[#allocation2 + $0x56] sm:$0xff]  ;;  %v926_v59 = vmul.u32 58254, %v921_v51  ;;  %v1181_v8 = vand.u32 65535, %v4561_v23  ;;  %v1182_v60 = vshrl.u32 %v4561_v23, 16  ;;  %2318 = vmatpush.msrb.mxu2 %v2307_v6 }
  0x63   : > { %v927_v7 = vshll.u32 %v4558_v38, 16  ;;  %2057 = vmatmul.f32.gmra.mxu1 %v1969_v5  ;;  %v1174_v61 = vmul.u32 18, %v1173_v10  ;;  %v679_v0 = vadd.s32 %v678_v55, %v669_v46  ;;  %v4576_v13 = vadd.f32 %v4208_v14, %v309_v52 }
  0x64   : > { %v929_v2 = vshll.u32 %v4566_v58, 16  ;;  %v1184_v12 = vmul.u32 14564, %v1181_v8  ;;  %v4578_v16 = vmul.u32 58254, %v1181_v8  ;;  %v4582_v25 = vmul.u32 14564, %v1182_v60 }
  0x65   : > { %vm931_vm0 = vc.u32 %v923_v54, %v927_v7  ;;  %v933_v11 = vadd.s32 %v927_v7, %v923_v54  ;;  %v1175_v17 = vsub.s32 %v4464_v15, %v1174_v61  ;;  %v680_v18 = vshrl.u32 %v679_v0, 4  ;;  %v1955_v15 = vld [vmem:[%s6078_s3 + $0x60] sm:$0xff]  ;;  %v252_v54 = vld [vmem:[%s4199_s10 + $0x50] sm:$0xff] }
  0x66   : > { %v932_v20 = vsel %vm931_vm0, 1, %v6104_v40  ;;  %v1745_v14 = vmax.f32 %v4564_v56, 0.0  ;;  %v1188_v63 = vshll.u32 %v4578_v16, 16  ;;  %v928_v36 = vshrl.u32 %v4558_v38, 16  ;;  %2139 = vmatpush.msrb.mxu1 %v1955_v15 }
  0x67   : > { %v1978_v31 = vld [vmem:[#allocation2 + $0x9e] sm:$0xff]  ;;  %v934_v26 = vadd.s32 %v932_v20, %v926_v59  ;;  %vm935_vm1 = vc.u32 %v933_v11, %v929_v2  ;;  %vm1465_vm2 = vcmp.ne.s32.totalorder %v1175_v17, 0  ;;  %vm1501_vm6 = vcmp.lt.s32.totalorder %v1175_v17, 0 }
  0x68   : > { %2084 = vmatmul.f32.gmra.mxu2 %v1978_v31  ;;  %v1573_v27 = vadd.s32 18, %v1175_v17  ;;  %v681_v28 = vmul.u32 18, %v680_v18  ;;  %vm4592_vm7 = vmand %vm1501_vm6, %vm1465_vm2  ;;  %v936_v37 = vsel %vm935_vm1, 1, %v6104_v40  ;;  %v1187_v41 = vmul.u32 58254, %v1182_v60  ;;  %2140 = vmatpush.msrb.mxu1 %v1954_v34  ;;  %v261_v59 = vld [vmem:[%s4199_s10 + $0x98] sm:$0xff]  ;;  %v2704_v62 = vld [vmem:[#allocation2 + $0xa0] sm:$0xff] }
  0x69   : > { %v1190_v39 = vshll.u32 %v4582_v25, 16  ;;  %v938_v48 = vadd.s32 %v936_v37, %v934_v26  ;;  %vm1192_vm8 = vc.u32 %v1184_v12, %v1188_v63  ;;  %v6168_v50 = vmov 0 }
  0x6a   : > { %v1609_v45 = vsel %vm4592_vm7, %v1573_v27, %v1175_v17  ;;  %v682_v46 = vsub.s32 %v4482_v42, %v681_v28  ;;  %v930_v51 = vshrl.u32 %v4566_v58, 16  ;;  %v1193_v52 = vsel %vm1192_vm8, 1, %v6104_v40 }
  0x6b   : > { %vm4614_vm9 = vcmp.lt.s32.totalorder %v1609_v45, 16  ;;  %v1194_v42 = vadd.s32 %v1188_v63, %v1184_v12  ;;  %v939_v55 = vadd.s32 %v938_v48, %v928_v36  ;;  %v1189_v58 = vshrl.u32 %v4578_v16, 16 }
  0x6c   : > { %v6169_v50 = vsel %vm4614_vm9, 4294967295, %v6168_v50  ;;  %v1861_v38 = vsel %vm4614_vm9, %v1753_v49, 0.0  ;;  %vm1448_vm14 = vcmp.ne.s32.totalorder %v682_v46, 0  ;;  %vm1484_vm0 = vcmp.lt.s32.totalorder %v682_v46, 0 }
  0x6d   : > { %6170 = vst [vmem:[#allocation11_spill] sm:$0xff] %v6169_v50  ;;  %v1556_v10 = vadd.s32 18, %v682_v46  ;;  %vm1520_vm1 = vmand %vm1484_vm0, %vm1448_vm14  ;;  %v1195_v5 = vadd.s32 %v1193_v52, %v1187_v41  ;;  %vm1196_vm2 = vc.u32 %v1194_v42, %v1190_v39  ;;  %v292_v49 = vmul.f32 %v4631_v35, %v252_v54 }
  0x6e   : > { %1897 = vst [vmem:[#allocation2 + $0xe8] sm:$0xff] %v1861_v38  ;;  %v1197_v8 = vsel %vm1196_vm2, 1, %v6104_v40  ;;  %v4635_v60 = vadd.s32 80, %v4174_v4  ;;  %v6171_v61 = vmov 0  ;;  %v940_v0 = vadd.s32 %v939_v55, %v930_v51 }
  0x6f   : > { %v1592_v7 = vsel %vm1520_vm1, %v1556_v10, %v682_v46  ;;  %v1191_v2 = vshrl.u32 %v4582_v25, 16  ;;  %v1199_v9 = vadd.s32 %v1197_v8, %v1195_v5  ;;  %v301_v16 = vmul.f32 %v4631_v35, %v261_v59  ;;  %v2735_v59 = vld [vmem:[%s6078_s3 + $0x260] sm:$0xff] }
  0x70   : > { %vm4637_vm6 = vcmp.lt.s32.totalorder %v1592_v7, 16  ;;  %v688_v11 = vand.u32 65535, %v4635_v60  ;;  %v689_v12 = vshrl.u32 %v4635_v60, 16  ;;  %v941_v17 = vshrl.u32 %v940_v0, 4  ;;  %v2520_v7 = vld [vmem:[%s6078_s3 + $0x1d0] sm:$0xff]  ;;  %2742 = vmatpush.msrb.mxu0 %v2735_v59 }
  0x71   : > { %v6172_v61 = vsel %vm4637_vm6, 4294967295, %v6171_v61  ;;  %v1844_v57 = vsel %vm4637_vm6, %v1736_v53, 0.0  ;;  %v1200_v18 = vadd.s32 %v1199_v9, %v1189_v58  ;;  %v1754_v20 = vmax.f32 %v4576_v13, 0.0  ;;  %2531 = vmatpush.msrb.mxu3 %v2520_v7 }
  0x72   : > { %6173 = vst [vmem:[#allocation12_spill] sm:$0xff] %v6172_v61  ;;  %v4651_v31 = vadd.s32 152, %v4174_v4  ;;  %v4659_v53 = vadd.f32 %v4656_v29, %v292_v49  ;;  %v691_v25 = vmul.u32 14564, %v688_v11  ;;  %v692_v26 = vmul.u32 58254, %v688_v11 }
  0x73   : > { %1880 = vst [vmem:[#allocation2 + $0x60] sm:$0xff] %v1844_v57  ;;  %v4661_v63 = vmul.u32 14564, %v689_v12  ;;  %v942_v27 = vmul.u32 18, %v941_v17  ;;  %v1201_v28 = vadd.s32 %v1200_v18, %v1191_v2  ;;  %v694_v36 = vmul.u32 58254, %v689_v12 }
  0x74   : > { %v949_v15 = vand.u32 65535, %v4651_v31  ;;  %v950_v32 = vshrl.u32 %v4651_v31, 16  ;;  %v695_v37 = vshll.u32 %v692_v26, 16  ;;  %v4667_v39 = vadd.f32 %v4656_v29, %v301_v16  ;;  %v242_v16 = vld [vmem:[%s4199_s10] sm:$0xff] }
  0x75   : > { %v1987_v21 = vld [vmem:[#allocation2 + $0xe6] sm:$0xff]  ;;  %v697_v41 = vshll.u32 %v4661_v63, 16  ;;  %v943_v44 = vsub.s32 %v4540_v22, %v942_v27  ;;  %v1202_v43 = vshrl.u32 %v1201_v28, 4  ;;  %v696_v45 = vshrl.u32 %v692_v26, 16 }
  0x76   : > { %2111 = vmatmul.f32.gmra.mxu3 %v1987_v21  ;;  %v953_v46 = vmul.u32 58254, %v949_v15  ;;  %vm699_vm7 = vc.u32 %v691_v25, %v695_v37  ;;  %v701_v48 = vadd.s32 %v695_v37, %v691_v25  ;;  %v952_v34 = vmul.u32 14564, %v949_v15 }
  0x77   : > { %v4670_v6 = vmul.u32 14564, %v950_v32  ;;  %vm1457_vm8 = vcmp.ne.s32.totalorder %v943_v44, 0  ;;  %vm1493_vm14 = vcmp.lt.s32.totalorder %v943_v44, 0  ;;  %v1565_v51 = vadd.s32 18, %v943_v44 }
  0x78   : > { %v1203_v52 = vmul.u32 18, %v1202_v43  ;;  %vm1529_vm0 = vmand %vm1493_vm14, %vm1457_vm8  ;;  %v700_v54 = vsel %vm699_vm7, 1, %v6104_v40  ;;  %vm703_vm1 = vc.u32 %v701_v48, %v697_v41  ;;  %v955_v38 = vmul.u32 58254, %v950_v32 }
  0x79   : > { %v956_v10 = vshll.u32 %v953_v46, 16  ;;  %v1601_v22 = vsel %vm1529_vm0, %v1565_v51, %v943_v44  ;;  %v702_v58 = vadd.s32 %v700_v54, %v694_v36  ;;  %v704_v5 = vsel %vm703_vm1, 1, %v6104_v40  ;;  %v270_v44 = vld [vmem:[%s4199_s10 + $0xe0] sm:$0xff] }
  0x7a   : > { %v1970_v42 = vld [vmem:[#allocation2 + $0x5e] sm:$0xff]  ;;  %v1204_v55 = vsub.s32 %v4561_v23, %v1203_v52  ;;  %vm4681_vm2 = vcmp.lt.s32.totalorder %v1601_v22, 16  ;;  %v6174_v8 = vmov 0  ;;  %v698_v49 = vshrl.u32 %v4661_v63, 16 }
  0x7b   : > { %2060 = vmatmul.f32.gmra.mxu1 %v1970_v42  ;;  %v6175_v8 = vsel %vm4681_vm2, 4294967295, %v6174_v8  ;;  %v958_v23 = vshll.u32 %v4670_v6, 16  ;;  %vm960_vm7 = vc.u32 %v952_v34, %v956_v10  ;;  %v1853_v0 = vsel %vm4681_vm2, %v1745_v14, 0.0 }
  0x7c   : > { %6176 = vst [vmem:[#allocation13_spill] sm:$0xff] %v6175_v8  ;;  %vm1466_vm8 = vcmp.ne.s32.totalorder %v1204_v55, 0  ;;  %vm1502_vm14 = vcmp.lt.s32.totalorder %v1204_v55, 0  ;;  %v1574_v2 = vadd.s32 18, %v1204_v55  ;;  %v706_v9 = vadd.s32 %v704_v5, %v702_v58 }
  0x7d   : > { %1889 = vst [vmem:[#allocation2 + $0xa8] sm:$0xff] %v1853_v0  ;;  %vm1538_vm0 = vmand %vm1502_vm14, %vm1466_vm8  ;;  %v957_v57 = vshrl.u32 %v953_v46, 16  ;;  %v961_v11 = vsel %vm960_vm7, 1, %v6104_v40  ;;  %v962_v12 = vadd.s32 %v956_v10, %v952_v34  ;;  %v959_v18 = vshrl.u32 %v4670_v6, 16 }
  0x7e   : > { %v1610_v17 = vsel %vm1538_vm0, %v1574_v2, %v1204_v55  ;;  %v963_v25 = vadd.s32 %v961_v11, %v955_v38  ;;  %v398_v56 = vand.u32 65535, %v4174_v4  ;;  %v6177_v14 = vmov 0 }
  0x7f   : > { %vm4695_vm1 = vcmp.lt.s32.totalorder %v1610_v17, 16  ;;  %v707_v26 = vadd.s32 %v706_v9, %v696_v45  ;;  %vm964_vm9 = vc.u32 %v962_v12, %v958_v23  ;;  %v399_v63 = vshrl.u32 %v4174_v4, 16 }
  0x80   : > { %v6178_v14 = vsel %vm4695_vm1, 4294967295, %v6177_v14  ;;  %v1862_v27 = vsel %vm4695_vm1, %v1754_v20, 0.0  ;;  %v965_v28 = vsel %vm964_vm9, 1, %v6104_v40  ;;  %v282_v15 = vmul.f32 %v4631_v35, %v242_v16  ;;  %v2306_v16 = vld [vmem:[%s6078_s3 + $0x148] sm:$0xff] }
  0x81   : > { %6179 = vst [vmem:[#allocation14_spill] sm:$0xff] %v6178_v14  ;;  %v401_v32 = vmul.u32 14564, %v398_v56  ;;  %v708_v21 = vadd.s32 %v707_v26, %v698_v49  ;;  %v967_v36 = vadd.s32 %v965_v28, %v963_v25  ;;  %v402_v37 = vmul.u32 58254, %v398_v56  ;;  %2319 = vmatpush.msrb.mxu2 %v2306_v16  ;;  %v2734_v26 = vld [vmem:[%s6078_s3 + $0x258] sm:$0xff] }
  0x82   : > { %1898 = vst [vmem:[#allocation2 + $0xf0] sm:$0xff] %v1862_v27  ;;  %v4706_v41 = vmul.u32 14564, %v399_v63  ;;  %v1737_v43 = vmax.f32 %v4659_v53, 0.0  ;;  %v1746_v45 = vmax.f32 %v4667_v39, 0.0  ;;  %v4712_v13 = vadd.s32 224, %v4174_v4  ;;  %2743 = vmatpush.msrb.mxu0 %v2734_v26 }
  0x83   : > { %v709_v20 = vshrl.u32 %v708_v21, 4  ;;  %v968_v46 = vadd.s32 %v967_v36, %v957_v57  ;;  %v404_v48 = vmul.u32 58254, %v399_v63  ;;  %v405_v34 = vshll.u32 %v402_v37, 16  ;;  %v2519_v63 = vld [vmem:[%s6078_s3 + $0x1c8] sm:$0xff] }
  0x84   : > { %v1979_v6 = vld [vmem:[#allocation2 + $0xa6] sm:$0xff]  ;;  %v4715_v51 = vadd.f32 %v4656_v29, %v282_v15  ;;  %v407_v52 = vshll.u32 %v4706_v41, 16  ;;  %v310_v42 = vmul.f32 %v4631_v35, %v270_v44  ;;  %v1210_v54 = vand.u32 65535, %v4712_v13  ;;  %2532 = vmatpush.msrb.mxu3 %v2519_v63 }
  0x85   : > { %2087 = vmatmul.f32.gmra.mxu2 %v1979_v6  ;;  %v710_v53 = vmul.u32 18, %v709_v20  ;;  %v969_v38 = vadd.s32 %v968_v46, %v959_v18  ;;  %vm409_vm9 = vc.u32 %v401_v32, %v405_v34  ;;  %v411_v10 = vadd.s32 %v405_v34, %v401_v32  ;;  %v1952_v32 = vld [vmem:[%s6078_s3 + $0x48] sm:$0xff] }
  0x86   : > { %v410_v22 = vsel %vm409_vm9, 1, %v6104_v40  ;;  %v1211_v55 = vshrl.u32 %v4712_v13, 16  ;;  %v1213_v58 = vmul.u32 14564, %v1210_v54  ;;  %v4722_v5 = vmul.u32 58254, %v1210_v54  ;;  %v1927_v61 = vld [vmem:[#allocation2 + $0xa5] sm:$0xff] }
  0x87   : > { %v711_v59 = vsub.s32 %v4635_v60, %v710_v53  ;;  %v970_v7 = vshrl.u32 %v969_v38, 4  ;;  %v412_v49 = vadd.s32 %v410_v22, %v404_v48  ;;  %vm413_vm7 = vc.u32 %v411_v10, %v407_v52  ;;  %v1953_v60 = vld [vmem:[%s6078_s3 + $0x50] sm:$0xff]  ;;  %v262_v22 = vld [vmem:[%s4199_s10 + $0xa0] sm:$0xff] }
  0x88   : > { %v406_v0 = vshrl.u32 %v402_v37, 16  ;;  %v414_v2 = vsel %vm413_vm7, 1, %v6104_v40  ;;  %v4726_v9 = vmul.u32 14564, %v1211_v55  ;;  %v1217_v57 = vshll.u32 %v4722_v5, 16  ;;  %2141 = vmatpush.msrb.mxu1 %v1953_v60  ;;  %v2492_v30 = vld [vmem:[#allocation2 + $0xa7] sm:$0xff] }
  0x89   : > { %v1988_v23 = vld [vmem:[#allocation2 + $0xee] sm:$0xff]  ;;  %vm1449_vm8 = vcmp.ne.s32.totalorder %v711_v59, 0  ;;  %vm1485_vm14 = vcmp.lt.s32.totalorder %v711_v59, 0  ;;  %v1557_v11 = vadd.s32 18, %v711_v59  ;;  %v971_v12 = vmul.u32 18, %v970_v7 }
  0x8a   : > { %2114 = vmatmul.f32.gmra.mxu3 %v1988_v23  ;;  %vm1521_vm0 = vmand %vm1485_vm14, %vm1449_vm8  ;;  %v408_v17 = vshrl.u32 %v4706_v41, 16  ;;  %v416_v18 = vadd.s32 %v414_v2, %v412_v49  ;;  %v1216_v25 = vmul.u32 58254, %v1211_v55  ;;  %v1219_v56 = vshll.u32 %v4726_v9, 16  ;;  %2142 = vmatpush.msrb.mxu1 %v1952_v32 }
  0x8b   : > { %v1593_v27 = vsel %vm1521_vm0, %v1557_v11, %v711_v59  ;;  %v972_v28 = vsub.s32 %v4651_v31, %v971_v12  ;;  %vm1221_vm9 = vc.u32 %v1213_v58, %v1217_v57  ;;  %v1223_v15 = vadd.s32 %v1217_v57, %v1213_v58 }
  0x8c   : > { %vm4747_vm7 = vcmp.lt.s32.totalorder %v1593_v27, 16  ;;  %v6180_v21 = vmov 0  ;;  %v417_v36 = vadd.s32 %v416_v18, %v406_v0  ;;  %v4752_v37 = vadd.f32 %v4656_v29, %v310_v42  ;;  %v253_v42 = vld [vmem:[%s4199_s10 + $0x58] sm:$0xff] }
  0x8d   : > { %v6181_v21 = vsel %vm4747_vm7, 4294967295, %v6180_v21  ;;  %v1222_v41 = vsel %vm1221_vm9, 1, %v6104_v40  ;;  %v1845_v31 = vsel %vm4747_vm7, %v1737_v43, 0.0  ;;  %vm1458_vm8 = vcmp.ne.s32.totalorder %v972_v28, 0 }
  0x8e   : > { %6182 = vst [vmem:[#allocation15_spill] sm:$0xff] %v6181_v21  ;;  %vm1494_vm14 = vcmp.lt.s32.totalorder %v972_v28, 0  ;;  %v1566_v44 = vadd.s32 18, %v972_v28  ;;  %v418_v20 = vadd.s32 %v417_v36, %v408_v17  ;;  %v1218_v46 = vshrl.u32 %v4722_v5, 16 }
  0x8f   : > { %1881 = vst [vmem:[#allocation2 + $0x68] sm:$0xff] %v1845_v31  ;;  %vm1530_vm0 = vmand %vm1494_vm14, %vm1458_vm8  ;;  %v1224_v48 = vadd.s32 %v1222_v41, %v1216_v25  ;;  %vm1225_vm1 = vc.u32 %v1223_v15, %v1219_v56  ;;  %v1727_v6 = vmax.f32 %v4715_v51, 0.0  ;;  %v4762_v54 = vadd.s32 88, %v4174_v4 }
  0x90   : > { %v1602_v34 = vsel %vm1530_vm0, %v1566_v44, %v972_v28  ;;  %v1226_v52 = vsel %vm1225_vm1, 1, %v6104_v40  ;;  %v6183_v43 = vmov 0  ;;  %v419_v53 = vshrl.u32 %v418_v20, 4 }
  0x91   : > { %vm4764_vm9 = vcmp.lt.s32.totalorder %v1602_v34, 16  ;;  %v1220_v38 = vshrl.u32 %v4726_v9, 16  ;;  %v1228_v10 = vadd.s32 %v1226_v52, %v1224_v48  ;;  %v1755_v55 = vmax.f32 %v4752_v37, 0.0 }
  0x92   : > { %v6184_v43 = vsel %vm4764_vm9, 4294967295, %v6183_v43  ;;  %v1854_v51 = vsel %vm4764_vm9, %v1746_v45, 0.0  ;;  %v717_v58 = vand.u32 65535, %v4762_v54  ;;  %v718_v5 = vshrl.u32 %v4762_v54, 16 }
  0x93   : > { %6185 = vst [vmem:[#allocation16_spill] sm:$0xff] %v6184_v43  ;;  %v420_v59 = vmul.u32 18, %v419_v53  ;;  %v1229_v7 = vadd.s32 %v1228_v10, %v1218_v46  ;;  %v293_v49 = vmul.f32 %v4631_v35, %v253_v42  ;;  %v4779_v23 = vadd.s32 160, %v4174_v4  ;;  %v2305_v53 = vld [vmem:[%s6078_s3 + $0x140] sm:$0xff] }
  0x94   : > { %1890 = vst [vmem:[#allocation2 + $0xb0] sm:$0xff] %v1854_v51  ;;  %v720_v0 = vmul.u32 14564, %v717_v58  ;;  %v721_v2 = vmul.u32 58254, %v717_v58  ;;  %v722_v39 = vmul.u32 14564, %v718_v5  ;;  %v302_v9 = vmul.f32 %v4631_v35, %v262_v22  ;;  %2320 = vmatpush.msrb.mxu2 %v2305_v53  ;;  %v243_v58 = vld [vmem:[%s4199_s10 + $0x8] sm:$0xff] }
  0x95   : > { %v421_v45 = vsub.s32 %v4174_v4, %v420_v59  ;;  %v1230_v57 = vadd.s32 %v1229_v7, %v1220_v38  ;;  %v978_v11 = vand.u32 65535, %v4779_v23  ;;  %v979_v12 = vshrl.u32 %v4779_v23, 16  ;;  %v2733_v38 = vld [vmem:[%s6078_s3 + $0x250] sm:$0xff] }
  0x96   : > { %v1971_v60 = vld [vmem:[#allocation2 + $0x66] sm:$0xff]  ;;  %v723_v16 = vmul.u32 58254, %v718_v5  ;;  %v724_v17 = vshll.u32 %v721_v2, 16  ;;  %v725_v18 = vshrl.u32 %v721_v2, 16  ;;  %v726_v25 = vshll.u32 %v722_v39, 16  ;;  %2744 = vmatpush.msrb.mxu0 %v2733_v38 }
  0x97   : > { %2063 = vmatmul.f32.gmra.mxu1 %v1971_v60  ;;  %vm1439_vm1 = vcmp.ne.s32.totalorder %v421_v45, 0  ;;  %vm1475_vm8 = vcmp.lt.s32.totalorder %v421_v45, 0  ;;  %v1547_v56 = vadd.s32 18, %v421_v45  ;;  %v1231_v26 = vshrl.u32 %v1230_v57, 4 }
  0x98   : > { %vm1511_vm14 = vmand %vm1475_vm8, %vm1439_vm1  ;;  %vm728_vm0 = vc.u32 %v720_v0, %v724_v17  ;;  %v730_v63 = vadd.s32 %v724_v17, %v720_v0  ;;  %v981_v27 = vmul.u32 14564, %v978_v11  ;;  %v982_v28 = vmul.u32 58254, %v978_v11  ;;  %v271_v0 = vld [vmem:[%s4199_s10 + $0xe8] sm:$0xff] }
  0x99   : > { %v1583_v15 = vsel %vm1511_vm14, %v1547_v56, %v421_v45  ;;  %v1232_v32 = vmul.u32 18, %v1231_v26  ;;  %v729_v36 = vsel %vm728_vm0, 1, %v6104_v40  ;;  %v4786_v41 = vmul.u32 14564, %v979_v12 }
  0x9a   : > { %vm4788_vm11 = vcmp.lt.s32.totalorder %v1583_v15, 16  ;;  %v731_v20 = vadd.s32 %v729_v36, %v723_v16  ;;  %vm732_vm5 = vc.u32 %v730_v63, %v726_v25  ;;  %v984_v46 = vmul.u32 58254, %v979_v12 }
  0x9b   : > { %v1980_v31 = vld [vmem:[#allocation2 + $0xae] sm:$0xff]  ;;  %v1835_v48 = vsel %vm4788_vm11, %v1727_v6, 0.0  ;;  %v1233_v34 = vsub.s32 %v4712_v13, %v1232_v32  ;;  %v733_v52 = vsel %vm732_vm5, 1, %v6104_v40  ;;  %v985_v42 = vshll.u32 %v982_v28, 16 }
  0x9c   : > { %2090 = vmatmul.f32.gmra.mxu2 %v1980_v31  ;;  %1871 = vst [vmem:[#allocation2 + $0x18] sm:$0xff] %v1835_v48  ;;  %v4803_v10 = vadd.f32 %v4656_v29, %v293_v49  ;;  %v727_v6 = vshrl.u32 %v722_v39, 16  ;;  %v735_v22 = vadd.s32 %v733_v52, %v731_v20  ;;  %v987_v13 = vshll.u32 %v4786_v41, 16 }
  0x9d   : > { %vm1467_vm5 = vcmp.ne.s32.totalorder %v1233_v34, 0  ;;  %vm1503_vm1 = vcmp.lt.s32.totalorder %v1233_v34, 0  ;;  %v1575_v51 = vadd.s32 18, %v1233_v34  ;;  %vm989_vm8 = vc.u32 %v981_v27, %v985_v42 }
  0x9e   : > { %vm1539_vm14 = vmand %vm1503_vm1, %vm1467_vm5  ;;  %v736_v5 = vadd.s32 %v735_v22, %v725_v18  ;;  %v4808_v59 = vadd.f32 %v4656_v29, %v302_v9  ;;  %v990_v7 = vsel %vm989_vm8, 1, %v6104_v40  ;;  %v991_v49 = vadd.s32 %v985_v42, %v981_v27 }
  0x9f   : > { %v1611_v2 = vsel %vm1539_vm14, %v1575_v51, %v1233_v34  ;;  %v986_v39 = vshrl.u32 %v982_v28, 16  ;;  %v992_v45 = vadd.s32 %v990_v7, %v984_v46  ;;  %v4813_v57 = vadd.s32 8, %v4174_v4 }
  0xa0   : > { %vm4815_vm0 = vcmp.lt.s32.totalorder %v1611_v2, 16  ;;  %v6188_v11 = vmov 0  ;;  %v737_v12 = vadd.s32 %v736_v5, %v727_v6  ;;  %vm993_vm5 = vc.u32 %v991_v49, %v987_v13 }
  0xa1   : > { %v6189_v11 = vsel %vm4815_vm0, 4294967295, %v6188_v11  ;;  %v283_v60 = vmul.f32 %v4631_v35, %v243_v58  ;;  %v1863_v9 = vsel %vm4815_vm0, %v1755_v55, 0.0  ;;  %v994_v16 = vsel %vm993_vm5, 1, %v6104_v40 }
  0xa2   : > { %6190 = vst [vmem:[#allocation17_spill] sm:$0xff] %v6189_v11  ;;  %v427_v17 = vand.u32 65535, %v4813_v57  ;;  %v311_v18 = vmul.f32 %v4631_v35, %v271_v0  ;;  %v738_v25 = vshrl.u32 %v737_v12, 4  ;;  %v988_v56 = vshrl.u32 %v4786_v41, 16 }
  0xa3   : > { %1899 = vst [vmem:[#allocation2 + $0xf8] sm:$0xff] %v1863_v9  ;;  %v996_v26 = vadd.s32 %v994_v16, %v992_v45  ;;  %v428_v63 = vshrl.u32 %v4813_v57, 16  ;;  %v1961_v27 = vld [vmem:[#allocation2 + $0x16] sm:$0xff]  ;;  %v1738_v28 = vmax.f32 %v4803_v10, 0.0  ;;  %v4831_v55 = vadd.s32 232, %v4174_v4  ;;  %v2518_v16 = vld [vmem:[%s6078_s3 + $0x1c0] sm:$0xff] }
  0xa4   : > { %v430_v37 = vmul.u32 14564, %v427_v17  ;;  %v431_v15 = vmul.u32 58254, %v427_v17  ;;  %2033 = vmatmul.f32.gmra.mxu0 %v1961_v27  ;;  %v739_v32 = vmul.u32 18, %v738_v25  ;;  %v4834_v31 = vadd.f32 %v4656_v29, %v283_v60  ;;  %v1951_v17 = vld [vmem:[%s6078_s3 + $0x40] sm:$0xff]  ;;  %2533 = vmatpush.msrb.mxu3 %v2518_v16  ;;  %v2732_v27 = vld [vmem:[%s6078_s3 + $0x248] sm:$0xff] }
  0xa5   : > { %v997_v36 = vadd.s32 %v996_v26, %v986_v39  ;;  %v432_v20 = vmul.u32 14564, %v428_v63  ;;  %v4837_v41 = vadd.f32 %v4656_v29, %v311_v18  ;;  %v1239_v48 = vand.u32 65535, %v4831_v55  ;;  %2143 = vmatpush.msrb.mxu1 %v1951_v17  ;;  %2745 = vmatpush.msrb.mxu0 %v2732_v27 }
  0xa6   : > { %v434_v46 = vshll.u32 %v431_v15, 16  ;;  %v1240_v34 = vshrl.u32 %v4831_v55, 16  ;;  %v740_v52 = vsub.s32 %v4762_v54, %v739_v32  ;;  %v433_v53 = vmul.u32 58254, %v428_v63  ;;  %v2304_v63 = vld [vmem:[%s6078_s3 + $0x138] sm:$0xff] }
  0xa7   : > { %v998_v42 = vadd.s32 %v997_v36, %v988_v56  ;;  %v436_v38 = vshll.u32 %v432_v20, 16  ;;  %v435_v10 = vshrl.u32 %v431_v15, 16  ;;  %v4842_v22 = vmul.u32 58254, %v1239_v48  ;;  %2321 = vmatpush.msrb.mxu2 %v2304_v63 }
  0xa8   : > { %vm438_vm1 = vc.u32 %v430_v37, %v434_v46  ;;  %v440_v6 = vadd.s32 %v434_v46, %v430_v37  ;;  %vm1450_vm8 = vcmp.ne.s32.totalorder %v740_v52, 0  ;;  %vm1486_vm14 = vcmp.lt.s32.totalorder %v740_v52, 0  ;;  %v2517_v37 = vld [vmem:[%s6078_s3 + $0x1b8] sm:$0xff] }
  0xa9   : > { %v1558_v13 = vadd.s32 18, %v740_v52  ;;  %v999_v51 = vshrl.u32 %v998_v42, 4  ;;  %vm1522_vm5 = vmand %vm1486_vm14, %vm1450_vm8  ;;  %v439_v5 = vsel %vm438_vm1, 1, %v6104_v40  ;;  %v1242_v7 = vmul.u32 14564, %v1239_v48  ;;  %2534 = vmatpush.msrb.mxu3 %v2517_v37 }
  0xaa   : > { %v1989_v58 = vld [vmem:[#allocation2 + $0xf6] sm:$0xff]  ;;  %vm442_vm0 = vc.u32 %v440_v6, %v436_v38  ;;  %v4845_v49 = vmul.u32 14564, %v1240_v34  ;;  %v441_v2 = vadd.s32 %v439_v5, %v433_v53  ;;  %v6191_v45 = vmov 0  ;;  %v254_v53 = vld [vmem:[%s4199_s10 + $0x60] sm:$0xff] }
  0xab   : > { %2117 = vmatmul.f32.gmra.mxu3 %v1989_v58  ;;  %v1594_v54 = vsel %vm1522_vm5, %v1558_v13, %v740_v52  ;;  %v1000_v0 = vmul.u32 18, %v999_v51  ;;  %v443_v39 = vsel %vm442_vm0, 1, %v6104_v40  ;;  %v437_v12 = vshrl.u32 %v432_v20, 16 }
  0xac   : > { %vm4848_vm9 = vcmp.lt.s32.totalorder %v1594_v54, 16  ;;  %v1246_v60 = vshll.u32 %v4842_v22, 16  ;;  %v1248_v9 = vshll.u32 %v4845_v49, 16  ;;  %v445_v56 = vadd.s32 %v443_v39, %v441_v2 }
  0xad   : > { %v6192_v45 = vsel %vm4848_vm9, 4294967295, %v6191_v45  ;;  %v1846_v18 = vsel %vm4848_vm9, %v1738_v28, 0.0  ;;  %v1001_v25 = vsub.s32 %v4779_v23, %v1000_v0  ;;  %v1245_v26 = vmul.u32 58254, %v1240_v34 }
  0xae   : > { %6193 = vst [vmem:[#allocation18_spill] sm:$0xff] %v6192_v45  ;;  %v1747_v28 = vmax.f32 %v4808_v59, 0.0  ;;  %vm1250_vm0 = vc.u32 %v1242_v7, %v1246_v60  ;;  %v1252_v23 = vadd.s32 %v1246_v60, %v1242_v7  ;;  %v4874_v15 = vadd.s32 96, %v4174_v4  ;;  %v263_v7 = vld [vmem:[%s4199_s10 + $0xa8] sm:$0xff]  ;;  %v2703_v45 = vld [vmem:[#allocation2 + $0x98] sm:$0xff] }
  0xaf   : > { %1882 = vst [vmem:[#allocation2 + $0x70] sm:$0xff] %v1846_v18  ;;  %vm1459_vm1 = vcmp.ne.s32.totalorder %v1001_v25, 0  ;;  %vm1495_vm8 = vcmp.lt.s32.totalorder %v1001_v25, 0  ;;  %v1567_v32 = vadd.s32 18, %v1001_v25  ;;  %v446_v36 = vadd.s32 %v445_v56, %v435_v10 }
  0xb0   : > { %vm1531_vm14 = vmand %vm1495_vm8, %vm1459_vm1  ;;  %v1247_v20 = vshrl.u32 %v4842_v22, 16  ;;  %v1251_v46 = vsel %vm1250_vm0, 1, %v6104_v40  ;;  %vm1254_vm5 = vc.u32 %v1252_v23, %v1248_v9  ;;  %v746_v59 = vand.u32 65535, %v4874_v15 }
  0xb1   : > { %v1603_v48 = vsel %vm1531_vm14, %v1567_v32, %v1001_v25  ;;  %v447_v34 = vadd.s32 %v446_v36, %v437_v12  ;;  %v1253_v52 = vadd.s32 %v1251_v46, %v1245_v26  ;;  %v1255_v42 = vsel %vm1254_vm5, 1, %v6104_v40 }
  0xb2   : > { %vm4881_vm2 = vcmp.lt.s32.totalorder %v1603_v48, 16  ;;  %v6194_v38 = vmov 0  ;;  %v1249_v10 = vshrl.u32 %v4845_v49, 16  ;;  %v747_v6 = vshrl.u32 %v4874_v15, 16 }
  0xb3   : > { %v6195_v38 = vsel %vm4881_vm2, 4294967295, %v6194_v38  ;;  %v749_v22 = vmul.u32 14564, %v746_v59  ;;  %v1855_v13 = vsel %vm4881_vm2, %v1747_v28, 0.0  ;;  %v448_v51 = vshrl.u32 %v447_v34, 4 }
  0xb4   : > { %6196 = vst [vmem:[#allocation19_spill] sm:$0xff] %v6195_v38  ;;  %v1257_v58 = vadd.s32 %v1255_v42, %v1253_v52  ;;  %v750_v5 = vmul.u32 58254, %v746_v59  ;;  %v1728_v54 = vmax.f32 %v4834_v31, 0.0  ;;  %v1756_v0 = vmax.f32 %v4837_v41, 0.0 }
  0xb5   : > { %1891 = vst [vmem:[#allocation2 + $0xb8] sm:$0xff] %v1855_v13  ;;  %v294_v2 = vmul.f32 %v4631_v35, %v254_v53  ;;  %v751_v39 = vmul.u32 14564, %v747_v6  ;;  %v449_v49 = vmul.u32 18, %v448_v51  ;;  %v752_v9 = vmul.u32 58254, %v747_v6  ;;  %v1950_v53 = vld [vmem:[%s6078_s3 + $0x38] sm:$0xff] }
  0xb6   : > { %v1972_v12 = vld [vmem:[#allocation2 + $0x6e] sm:$0xff]  ;;  %v1258_v60 = vadd.s32 %v1257_v58, %v1247_v20  ;;  %v753_v16 = vshll.u32 %v750_v5, 16  ;;  %v754_v17 = vshrl.u32 %v750_v5, 16  ;;  %v303_v25 = vmul.f32 %v4631_v35, %v263_v7  ;;  %2144 = vmatpush.msrb.mxu1 %v1950_v53 }
  0xb7   : > { %2066 = vmatmul.f32.gmra.mxu1 %v1972_v12  ;;  %v755_v18 = vshll.u32 %v751_v39, 16  ;;  %v4895_v56 = vadd.s32 168, %v4174_v4  ;;  %v450_v31 = vsub.s32 %v4813_v57, %v449_v49  ;;  %v756_v27 = vshrl.u32 %v751_v39, 16 }
  0xb8   : > { %v1259_v26 = vadd.s32 %v1258_v60, %v1249_v10  ;;  %vm757_vm0 = vc.u32 %v749_v22, %v753_v16  ;;  %v759_v63 = vadd.s32 %v753_v16, %v749_v22  ;;  %v2303_v10 = vld [vmem:[%s6078_s3 + $0x130] sm:$0xff]  ;;  %v4916_v7 = vadd.f32 %v4656_v29, %v294_v2 }
  0xb9   : > { %v758_v37 = vsel %vm757_vm0, 1, %v6104_v40  ;;  %v1007_v28 = vand.u32 65535, %v4895_v56  ;;  %v1008_v23 = vshrl.u32 %v4895_v56, 16  ;;  %vm1440_vm1 = vcmp.ne.s32.totalorder %v450_v31, 0  ;;  %2322 = vmatpush.msrb.mxu2 %v2303_v10 }
  0xba   : > { %vm1476_vm8 = vcmp.lt.s32.totalorder %v450_v31, 0  ;;  %v1548_v32 = vadd.s32 18, %v450_v31  ;;  %v1260_v36 = vshrl.u32 %v1259_v26, 4  ;;  %v760_v20 = vadd.s32 %v758_v37, %v752_v9 }
  0xbb   : > { %vm1512_vm14 = vmand %vm1476_vm8, %vm1440_vm1  ;;  %vm761_vm5 = vc.u32 %v759_v63, %v755_v18  ;;  %v1010_v46 = vmul.u32 14564, %v1007_v28  ;;  %v1011_v59 = vmul.u32 58254, %v1007_v28  ;;  %v1012_v42 = vmul.u32 14564, %v1008_v23 }
  0xbc   : > { %v1981_v57 = vld [vmem:[#allocation2 + $0xb6] sm:$0xff]  ;;  %v1584_v48 = vsel %vm1512_vm14, %v1548_v32, %v450_v31  ;;  %v1261_v34 = vmul.u32 18, %v1260_v36  ;;  %v762_v52 = vsel %vm761_vm5, 1, %v6104_v40  ;;  %v1013_v13 = vmul.u32 58254, %v1008_v23 }
  0xbd   : > { %2093 = vmatmul.f32.gmra.mxu2 %v1981_v57  ;;  %vm4908_vm0 = vcmp.lt.s32.totalorder %v1584_v48, 16  ;;  %v764_v22 = vadd.s32 %v762_v52, %v760_v20  ;;  %v1014_v51 = vshll.u32 %v1011_v59, 16  ;;  %v1016_v39 = vshll.u32 %v1012_v42, 16 }
  0xbe   : > { %v1836_v58 = vsel %vm4908_vm0, %v1728_v54, 0.0  ;;  %v1262_v5 = vsub.s32 %v4831_v55, %v1261_v34  ;;  %v4919_v49 = vadd.f32 %v4656_v29, %v303_v25  ;;  %v1015_v2 = vshrl.u32 %v1011_v59, 16  ;;  %v244_v25 = vld [vmem:[%s4199_s10 + $0x10] sm:$0xff] }
  0xbf   : > { %1872 = vst [vmem:[#allocation2 + $0x20] sm:$0xff] %v1836_v58  ;;  %v765_v12 = vadd.s32 %v764_v22, %v754_v17  ;;  %vm1018_vm1 = vc.u32 %v1010_v46, %v1014_v51  ;;  %v1020_v60 = vadd.s32 %v1014_v51, %v1010_v46  ;;  %v1739_v17 = vmax.f32 %v4916_v7, 0.0 }
  0xc0   : > { %vm1468_vm8 = vcmp.ne.s32.totalorder %v1262_v5, 0  ;;  %vm1504_vm14 = vcmp.lt.s32.totalorder %v1262_v5, 0  ;;  %v1576_v9 = vadd.s32 18, %v1262_v5  ;;  %v1019_v54 = vsel %vm1018_vm1, 1, %v6104_v40 }
  0xc1   : > { %vm1540_vm5 = vmand %vm1504_vm14, %vm1468_vm8  ;;  %v766_v55 = vadd.s32 %v765_v12, %v756_v27  ;;  %v1021_v16 = vadd.s32 %v1019_v54, %v1013_v13  ;;  %vm1022_vm2 = vc.u32 %v1020_v60, %v1016_v39  ;;  %v4926_v26 = vadd.s32 16, %v4174_v4  ;;  %v272_v27 = vld [vmem:[%s4199_s10 + $0xf0] sm:$0xff] }
  0xc2   : > { %v1612_v18 = vsel %vm1540_vm5, %v1576_v9, %v1262_v5  ;;  %v1023_v31 = vsel %vm1022_vm2, 1, %v6104_v40  ;;  %v6199_v63 = vmov 0  ;;  %v1017_v28 = vshrl.u32 %v1012_v42, 16 }
  0xc3   : > { %vm4928_vm12 = vcmp.lt.s32.totalorder %v1612_v18, 16  ;;  %v767_v37 = vshrl.u32 %v766_v55, 4  ;;  %v1025_v23 = vadd.s32 %v1023_v31, %v1021_v16  ;;  %v1748_v36 = vmax.f32 %v4919_v49, 0.0 }
  0xc4   : > { %v6200_v63 = vsel %vm4928_vm12, 4294967295, %v6199_v63  ;;  %v1864_v32 = vsel %vm4928_vm12, %v1756_v0, 0.0  ;;  %v456_v20 = vand.u32 65535, %v4926_v26  ;;  %v457_v46 = vshrl.u32 %v4926_v26, 16 }
  0xc5   : > { %6201 = vst [vmem:[#allocation20_spill] sm:$0xff] %v6200_v63  ;;  %v768_v59 = vmul.u32 18, %v767_v37  ;;  %v1026_v57 = vadd.s32 %v1025_v23, %v1015_v2  ;;  %v284_v48 = vmul.f32 %v4631_v35, %v244_v25  ;;  %v4942_v34 = vadd.s32 240, %v4174_v4 }
  0xc6   : > { %1900 = vst [vmem:[#allocation2 + $0x100] sm:$0xff] %v1864_v32  ;;  %v1962_v52 = vld [vmem:[#allocation2 + $0x1e] sm:$0xff]  ;;  %v459_v42 = vmul.u32 14564, %v456_v20  ;;  %v460_v41 = vmul.u32 58254, %v456_v20  ;;  %v4944_v53 = vmul.u32 14564, %v457_v46  ;;  %v312_v0 = vmul.f32 %v4631_v35, %v272_v27 }
  0xc7   : > { %2036 = vmatmul.f32.gmra.mxu0 %v1962_v52  ;;  %v769_v10 = vsub.s32 %v4874_v15, %v768_v59  ;;  %v1027_v22 = vadd.s32 %v1026_v57, %v1017_v28  ;;  %v1268_v13 = vand.u32 65535, %v4942_v34  ;;  %v1269_v51 = vshrl.u32 %v4942_v34, 16  ;;  %v2516_v59 = vld [vmem:[%s6078_s3 + $0x1b0] sm:$0xff] }
  0xc8   : > { %v462_v58 = vmul.u32 58254, %v457_v46  ;;  %v463_v5 = vshll.u32 %v460_v41, 16  ;;  %v464_v7 = vshrl.u32 %v460_v41, 16  ;;  %v465_v39 = vshll.u32 %v4944_v53, 16  ;;  %v2731_v46 = vld [vmem:[%s6078_s3 + $0x240] sm:$0xff]  ;;  %v1949_v57 = vld [vmem:[%s6078_s3 + $0x30] sm:$0xff]  ;;  %2535 = vmatpush.msrb.mxu3 %v2516_v59 }
  0xc9   : > { %vm1451_vm2 = vcmp.ne.s32.totalorder %v769_v10, 0  ;;  %vm1487_vm1 = vcmp.lt.s32.totalorder %v769_v10, 0  ;;  %v1559_v12 = vadd.s32 18, %v769_v10  ;;  %v1028_v60 = vshrl.u32 %v1027_v22, 4  ;;  %2746 = vmatpush.msrb.mxu0 %v2731_v46  ;;  %v2302_v41 = vld [vmem:[%s6078_s3 + $0x128] sm:$0xff]  ;;  %2145 = vmatpush.msrb.mxu1 %v1949_v57 }
  0xca   : > { %vm1523_vm8 = vmand %vm1487_vm1, %vm1451_vm2  ;;  %vm467_vm14 = vc.u32 %v459_v42, %v463_v5  ;;  %v469_v9 = vadd.s32 %v463_v5, %v459_v42  ;;  %v1271_v54 = vmul.u32 14564, %v1268_v13  ;;  %v4951_v55 = vmul.u32 58254, %v1268_v13  ;;  %2323 = vmatpush.msrb.mxu2 %v2302_v41 }
  0xcb   : > { %v1595_v15 = vsel %vm1523_vm8, %v1559_v12, %v769_v10  ;;  %v1029_v2 = vmul.u32 18, %v1028_v60  ;;  %v468_v16 = vsel %vm467_vm14, 1, %v6104_v40  ;;  %v4954_v18 = vmul.u32 14564, %v1269_v51  ;;  %v2730_v10 = vld [vmem:[%s6078_s3 + $0x238] sm:$0xff] }
  0xcc   : > { %vm4956_vm5 = vcmp.lt.s32.totalorder %v1595_v15, 16  ;;  %v6202_v25 = vmov 0  ;;  %v470_v37 = vadd.s32 %v468_v16, %v462_v58  ;;  %vm471_vm12 = vc.u32 %v469_v9, %v465_v39  ;;  %2747 = vmatpush.msrb.mxu0 %v2730_v10  ;;  %v255_v15 = vld [vmem:[%s4199_s10 + $0x68] sm:$0xff] }
  0xcd   : > { %v1990_v31 = vld [vmem:[#allocation2 + $0xfe] sm:$0xff]  ;;  %v6203_v25 = vsel %vm4956_vm5, 4294967295, %v6202_v25  ;;  %v1274_v28 = vmul.u32 58254, %v1269_v51  ;;  %v1847_v23 = vsel %vm4956_vm5, %v1739_v17, 0.0  ;;  %v1030_v27 = vsub.s32 %v4895_v56, %v1029_v2 }
  0xce   : > { %6204 = vst [vmem:[#allocation21_spill] sm:$0xff] %v6203_v25  ;;  %2120 = vmatmul.f32.gmra.mxu3 %v1990_v31  ;;  %v472_v32 = vsel %vm471_vm12, 1, %v6104_v40  ;;  %v1275_v20 = vshll.u32 %v4951_v55, 16  ;;  %v4975_v17 = vadd.f32 %v4656_v29, %v284_v48  ;;  %v466_v56 = vshrl.u32 %v4944_v53, 16  ;;  %v2515_v48 = vld [vmem:[%s6078_s3 + $0x1a8] sm:$0xff]  ;;  %v1926_v25 = vld [vmem:[#allocation2 + $0x9d] sm:$0xff] }
  0xcf   : > { %1883 = vst [vmem:[#allocation2 + $0x78] sm:$0xff] %v1847_v23  ;;  %v474_v52 = vadd.s32 %v472_v32, %v470_v37  ;;  %v1277_v42 = vshll.u32 %v4954_v18, 16  ;;  %vm1460_vm12 = vcmp.ne.s32.totalorder %v1030_v27, 0  ;;  %vm1496_vm2 = vcmp.lt.s32.totalorder %v1030_v27, 0  ;;  %2536 = vmatpush.msrb.mxu3 %v2515_v48 }
  0xd0   : > { %v1568_v22 = vadd.s32 18, %v1030_v27  ;;  %vm1279_vm1 = vc.u32 %v1271_v54, %v1275_v20  ;;  %vm1532_vm8 = vmand %vm1496_vm2, %vm1460_vm12  ;;  %v1281_v51 = vadd.s32 %v1275_v20, %v1271_v54  ;;  %v4990_v5 = vadd.f32 %v4656_v29, %v312_v0 }
  0xd1   : > { %v475_v53 = vadd.s32 %v474_v52, %v464_v7  ;;  %v1280_v13 = vsel %vm1279_vm1, 1, %v6104_v40  ;;  %v4993_v12 = vadd.s32 104, %v4174_v4  ;;  %v6205_v60 = vmov 0 }
  0xd2   : > { %v1604_v58 = vsel %vm1532_vm8, %v1568_v22, %v1030_v27  ;;  %v1282_v39 = vadd.s32 %v1280_v13, %v1274_v28  ;;  %v1276_v9 = vshrl.u32 %v4951_v55, 16  ;;  %vm1283_vm12 = vc.u32 %v1281_v51, %v1277_v42  ;;  %v264_v28 = vld [vmem:[%s4199_s10 + $0xb0] sm:$0xff] }
  0xd3   : > { %vm4995_vm14 = vcmp.lt.s32.totalorder %v1604_v58, 16  ;;  %v476_v7 = vadd.s32 %v475_v53, %v466_v56  ;;  %v1729_v29 = vmax.f32 %v4975_v17, 0.0  ;;  %v1284_v0 = vsel %vm1283_vm12, 1, %v6104_v40 }
  0xd4   : > { %v6206_v60 = vsel %vm4995_vm14, 4294967295, %v6205_v60  ;;  %v1856_v54 = vsel %vm4995_vm14, %v1748_v36, 0.0  ;;  %v775_v2 = vand.u32 65535, %v4993_v12  ;;  %v1278_v31 = vshrl.u32 %v4954_v18, 16 }
  0xd5   : > { %6207 = vst [vmem:[#allocation22_spill] sm:$0xff] %v6206_v60  ;;  %v477_v16 = vshrl.u32 %v476_v7, 4  ;;  %v1286_v37 = vadd.s32 %v1284_v0, %v1282_v39  ;;  %v776_v55 = vshrl.u32 %v4993_v12, 16  ;;  %v1757_v49 = vmax.f32 %v4990_v5, 0.0 }
  0xd6   : > { %1892 = vst [vmem:[#allocation2 + $0xc0] sm:$0xff] %v1856_v54  ;;  %v1973_v23 = vld [vmem:[#allocation2 + $0x76] sm:$0xff]  ;;  %v778_v27 = vmul.u32 14564, %v775_v2  ;;  %v779_v36 = vmul.u32 58254, %v775_v2  ;;  %v5013_v32 = vadd.s32 176, %v4174_v4  ;;  %v295_v59 = vmul.f32 %v4631_v35, %v255_v15 }
  0xd7   : > { %2069 = vmatmul.f32.gmra.mxu1 %v1973_v23  ;;  %v478_v20 = vmul.u32 18, %v477_v16  ;;  %v1287_v46 = vadd.s32 %v1286_v37, %v1276_v9  ;;  %v780_v57 = vmul.u32 14564, %v776_v55  ;;  %v5017_v18 = vmul.f32 %v4631_v35, %v264_v28  ;;  %v2699_v50 = vld [vmem:[#allocation2 + $0x78] sm:$0xff] }
  0xd8   : > { %v782_v17 = vshll.u32 %v779_v36, 16  ;;  %v1036_v56 = vand.u32 65535, %v5013_v32  ;;  %v1037_v52 = vshrl.u32 %v5013_v32, 16  ;;  %v781_v10 = vmul.u32 58254, %v776_v55  ;;  %v1948_v55 = vld [vmem:[%s6078_s3 + $0x28] sm:$0xff] }
  0xd9   : > { %v479_v42 = vsub.s32 %v4926_v26, %v478_v20  ;;  %v1288_v41 = vadd.s32 %v1287_v46, %v1278_v31  ;;  %v784_v22 = vshll.u32 %v780_v57, 16  ;;  %v783_v48 = vshrl.u32 %v779_v36, 16  ;;  %2146 = vmatpush.msrb.mxu1 %v1948_v55  ;;  %v5043_v20 = vld [vmem:[%s6077_s2] ss:$0 sm:$0xff] }
  0xda   : > { %vm786_vm2 = vc.u32 %v778_v27, %v782_v17  ;;  %v788_v53 = vadd.s32 %v782_v17, %v778_v27  ;;  %v5022_v13 = vmul.u32 58254, %v1036_v56  ;;  %v1039_v7 = vmul.u32 14564, %v1036_v56  ;;  %v245_v56 = vld [vmem:[%s4199_s10 + $0x18] sm:$0xff] }
  0xdb   : > { %vm1441_vm1 = vcmp.ne.s32.totalorder %v479_v42, 0  ;;  %vm1477_vm8 = vcmp.lt.s32.totalorder %v479_v42, 0  ;;  %v1549_v51 = vadd.s32 18, %v479_v42  ;;  %v1289_v58 = vshrl.u32 %v1288_v41, 4 }
  0xdc   : > { %vm1513_vm12 = vmand %vm1477_vm8, %vm1441_vm1  ;;  %v787_v39 = vsel %vm786_vm2, 1, %v6104_v40  ;;  %vm790_vm14 = vc.u32 %v788_v53, %v784_v22  ;;  %v5025_v9 = vmul.u32 14564, %v1037_v52  ;;  %v785_v16 = vshrl.u32 %v780_v57, 16 }
  0xdd   : > { %v1982_v35 = vld [vmem:[#allocation2 + $0xbe] sm:$0xff]  ;;  %v1585_v26 = vsel %vm1513_vm12, %v1549_v51, %v479_v42  ;;  %v1290_v54 = vmul.u32 18, %v1289_v58  ;;  %v789_v0 = vadd.s32 %v787_v39, %v781_v10  ;;  %v791_v15 = vsel %vm790_vm14, 1, %v6104_v40 }
  0xde   : > { %2096 = vmatmul.f32.gmra.mxu2 %v1982_v35  ;;  %vm5028_vm10 = vcmp.lt.s32.totalorder %v1585_v26, 16  ;;  %v1043_v31 = vshll.u32 %v5022_v13, 16  ;;  %v1045_v37 = vshll.u32 %v5025_v9, 16  ;;  %v1042_v36 = vmul.u32 58254, %v1037_v52 }
  0xdf   : > { %v1837_v28 = vsel %vm5028_vm10, %v1729_v29, 0.0  ;;  %v1291_v23 = vsub.s32 %v4942_v34, %v1290_v54  ;;  %v793_v27 = vadd.s32 %v791_v15, %v789_v0  ;;  %v5046_v46 = vadd.f32 %v5043_v20, %v295_v59  ;;  %v273_v59 = vld [vmem:[%s4199_s10 + $0xf8] sm:$0xff] }
  0xe0   : > { %1873 = vst [vmem:[#allocation2 + $0x28] sm:$0xff] %v1837_v28  ;;  %v1044_v57 = vshrl.u32 %v5022_v13, 16  ;;  %vm1047_vm14 = vc.u32 %v1039_v7, %v1043_v31  ;;  %v1049_v17 = vadd.s32 %v1043_v31, %v1039_v7  ;;  %v1046_v52 = vshrl.u32 %v5025_v9, 16 }
  0xe1   : > { %vm1469_vm2 = vcmp.ne.s32.totalorder %v1291_v23, 0  ;;  %vm1505_vm1 = vcmp.lt.s32.totalorder %v1291_v23, 0  ;;  %v1577_v34 = vadd.s32 18, %v1291_v23  ;;  %v794_v29 = vadd.s32 %v793_v27, %v783_v48  ;;  %v5064_v48 = vld [vmem:[%s6076_s1] ss:$0 sm:$0xff] }
  0xe2   : > { %vm1541_vm8 = vmand %vm1505_vm1, %vm1469_vm2  ;;  %v1048_v42 = vsel %vm1047_vm14, 1, %v6104_v40  ;;  %vm1051_vm12 = vc.u32 %v1049_v17, %v1045_v37  ;;  %v5053_v41 = vadd.s32 24, %v4174_v4  ;;  %v6210_v51 = vmov 0 }
  0xe3   : > { %v1613_v10 = vsel %vm1541_vm8, %v1577_v34, %v1291_v23  ;;  %v795_v22 = vadd.s32 %v794_v29, %v785_v16  ;;  %v1050_v53 = vadd.s32 %v1048_v42, %v1042_v36  ;;  %v1052_v13 = vsel %vm1051_vm12, 1, %v6104_v40 }
  0xe4   : > { %vm5057_vm4 = vcmp.lt.s32.totalorder %v1613_v10, 16  ;;  %v285_v58 = vmul.f32 %v5064_v48, %v245_v56  ;;  %v485_v35 = vand.u32 65535, %v5053_v41  ;;  %v486_v39 = vshrl.u32 %v5053_v41, 16 }
  0xe5   : > { %v6211_v51 = vsel %vm5057_vm4, 4294967295, %v6210_v51  ;;  %v1865_v7 = vsel %vm5057_vm4, %v1757_v49, 0.0  ;;  %v796_v9 = vshrl.u32 %v795_v22, 4  ;;  %v1054_v26 = vadd.s32 %v1052_v13, %v1050_v53 }
  0xe6   : > { %6212 = vst [vmem:[#allocation23_spill] sm:$0xff] %v6211_v51  ;;  %v313_v54 = vmul.f32 %v5064_v48, %v273_v59  ;;  %v5076_v0 = vadd.f32 %v5043_v20, %v5017_v18  ;;  %v488_v15 = vmul.u32 14564, %v485_v35  ;;  %v489_v16 = vmul.u32 58254, %v485_v35  ;;  %v3584_v51 = vld [vmem:[%s6078_s3 + $0x448] sm:$0xff] }
  0xe7   : > { %1901 = vst [vmem:[#allocation2 + $0x108] sm:$0xff] %v1865_v7  ;;  %v5078_v31 = vmul.u32 14564, %v486_v39  ;;  %v1963_v37 = vld [vmem:[#allocation2 + $0x26] sm:$0xff]  ;;  %v797_v55 = vmul.u32 18, %v796_v9  ;;  %v1740_v5 = vmax.f32 %v5046_v46, 0.0  ;;  %v1055_v28 = vadd.s32 %v1054_v26, %v1044_v57 }
  0xe8   : > { %v5082_v49 = vadd.s32 248, %v4174_v4  ;;  %2039 = vmatmul.f32.gmra.mxu0 %v1963_v37  ;;  %v5085_v23 = vadd.f32 %v5043_v20, %v285_v58  ;;  %v491_v27 = vmul.u32 58254, %v486_v39  ;;  %v492_v36 = vshll.u32 %v489_v16, 16 }
  0xe9   : > { %v494_v18 = vshll.u32 %v5078_v31, 16  ;;  %v798_v17 = vsub.s32 %v4993_v12, %v797_v55  ;;  %v1056_v34 = vadd.s32 %v1055_v28, %v1046_v52  ;;  %v5090_v29 = vadd.f32 %v5043_v20, %v313_v54 }
  0xea   : > { %v1297_v46 = vand.u32 65535, %v5082_v49  ;;  %v493_v57 = vshrl.u32 %v489_v16, 16  ;;  %vm496_vm14 = vc.u32 %v488_v15, %v492_v36  ;;  %v498_v56 = vadd.s32 %v492_v36, %v488_v15  ;;  %v2301_v15 = vld [vmem:[%s6078_s3 + $0x120] sm:$0xff]  ;;  %v2729_v16 = vld [vmem:[%s6078_s3 + $0x230] sm:$0xff] }
  0xeb   : > { %v1298_v42 = vshrl.u32 %v5082_v49, 16  ;;  %vm1452_vm2 = vcmp.ne.s32.totalorder %v798_v17, 0  ;;  %vm1488_vm1 = vcmp.lt.s32.totalorder %v798_v17, 0  ;;  %v1560_v59 = vadd.s32 18, %v798_v17  ;;  %2324 = vmatpush.msrb.mxu2 %v2301_v15  ;;  %2748 = vmatpush.msrb.mxu0 %v2729_v16  ;;  %v1947_v36 = vld [vmem:[%s6078_s3 + $0x20] sm:$0xff] }
  0xec   : > { %v1057_v10 = vshrl.u32 %v1056_v34, 4  ;;  %vm1524_vm8 = vmand %vm1488_vm1, %vm1452_vm2  ;;  %v497_v22 = vsel %vm496_vm14, 1, %v6104_v40  ;;  %vm500_vm12 = vc.u32 %v498_v56, %v494_v18  ;;  %v1300_v12 = vmul.u32 14564, %v1297_v46  ;;  %v2300_v18 = vld [vmem:[%s6078_s3 + $0x118] sm:$0xff]  ;;  %2147 = vmatpush.msrb.mxu1 %v1947_v36  ;;  %v2728_v34 = vld [vmem:[%s6078_s3 + $0x228] sm:$0xff] }
  0xed   : > { %v1301_v52 = vmul.u32 58254, %v1297_v46  ;;  %v1596_v13 = vsel %vm1524_vm8, %v1560_v59, %v798_v17  ;;  %v499_v35 = vadd.s32 %v497_v22, %v491_v27  ;;  %v501_v39 = vsel %vm500_vm12, 1, %v6104_v40  ;;  %2325 = vmatpush.msrb.mxu2 %v2300_v18  ;;  %2749 = vmatpush.msrb.mxu0 %v2728_v34 }
  0xee   : > { %v1991_v53 = vld [vmem:[#allocation2 + $0x106] sm:$0xff]  ;;  %v1058_v58 = vmul.u32 18, %v1057_v10  ;;  %vm5096_vm4 = vcmp.lt.s32.totalorder %v1596_v13, 16  ;;  %v6213_v7 = vmov 0  ;;  %v495_v9 = vshrl.u32 %v5078_v31, 16 }
  0xef   : > { %2123 = vmatmul.f32.gmra.mxu3 %v1991_v53  ;;  %v6214_v7 = vsel %vm5096_vm4, 4294967295, %v6213_v7  ;;  %v1302_v26 = vmul.u32 14564, %v1298_v42  ;;  %v1304_v54 = vshll.u32 %v1301_v52, 16  ;;  %v1848_v37 = vsel %vm5096_vm4, %v1740_v5, 0.0  ;;  %v2514_v31 = vld [vmem:[%s6078_s3 + $0x1a0] sm:$0xff] }
  0xf0   : > { %6215 = vst [vmem:[#allocation24_spill] sm:$0xff] %v6214_v7  ;;  %v1059_v55 = vsub.s32 %v5013_v32, %v1058_v58  ;;  %v503_v28 = vadd.s32 %v501_v39, %v499_v35  ;;  %v1303_v27 = vmul.u32 58254, %v1298_v42  ;;  %v1749_v32 = vmax.f32 %v5076_v0, 0.0  ;;  %2537 = vmatpush.msrb.mxu3 %v2514_v31  ;;  %v256_v42 = vld [vmem:[%s4199_s10 + $0x70] sm:$0xff] }
  0xf1   : > { %1884 = vst [vmem:[#allocation2 + $0x80] sm:$0xff] %v1848_v37  ;;  %v1306_v5 = vshll.u32 %v1302_v26, 16  ;;  %vm1308_vm14 = vc.u32 %v1300_v12, %v1304_v54  ;;  %v1310_v17 = vadd.s32 %v1304_v54, %v1300_v12  ;;  %v1305_v59 = vshrl.u32 %v1301_v52, 16 }
  0xf2   : > { %vm1461_vm2 = vcmp.ne.s32.totalorder %v1059_v55, 0  ;;  %vm1497_vm1 = vcmp.lt.s32.totalorder %v1059_v55, 0  ;;  %v1569_v46 = vadd.s32 18, %v1059_v55  ;;  %v504_v56 = vadd.s32 %v503_v28, %v493_v57 }
  0xf3   : > { %vm1533_vm8 = vmand %vm1497_vm1, %vm1461_vm2  ;;  %v1309_v0 = vsel %vm1308_vm14, 1, %v6104_v40  ;;  %vm1312_vm12 = vc.u32 %v1310_v17, %v1306_v5  ;;  %v5126_v10 = vadd.s32 112, %v4174_v4  ;;  %v6216_v58 = vmov 0 }
  0xf4   : > { %v1605_v22 = vsel %vm1533_vm8, %v1569_v46, %v1059_v55  ;;  %v505_v12 = vadd.s32 %v504_v56, %v495_v9  ;;  %v1311_v53 = vadd.s32 %v1309_v0, %v1303_v27  ;;  %v1313_v13 = vsel %vm1312_vm12, 1, %v6104_v40 }
  0xf5   : > { %vm5129_vm4 = vcmp.lt.s32.totalorder %v1605_v22, 16  ;;  %v296_v57 = vmul.f32 %v5064_v48, %v256_v42  ;;  %v804_v35 = vand.u32 65535, %v5126_v10  ;;  %v805_v52 = vshrl.u32 %v5126_v10, 16 }
  0xf6   : > { %v6217_v58 = vsel %vm5129_vm4, 4294967295, %v6216_v58  ;;  %v1857_v39 = vsel %vm5129_vm4, %v1749_v32, 0.0  ;;  %v506_v54 = vshrl.u32 %v505_v12, 4  ;;  %v1307_v15 = vshrl.u32 %v1302_v26, 16 }
  0xf7   : > { %6218 = vst [vmem:[#allocation25_spill] sm:$0xff] %v6217_v58  ;;  %v1315_v16 = vadd.s32 %v1313_v13, %v1311_v53  ;;  %v807_v9 = vmul.u32 14564, %v804_v35  ;;  %v808_v37 = vmul.u32 58254, %v804_v35  ;;  %v809_v55 = vmul.u32 14564, %v805_v52 }
  0xf8   : > { %1893 = vst [vmem:[#allocation2 + $0xc8] sm:$0xff] %v1857_v39  ;;  %v1974_v28 = vld [vmem:[#allocation2 + $0x7e] sm:$0xff]  ;;  %v507_v27 = vmul.u32 18, %v506_v54  ;;  %v6101_v31 = vmax.f32 %v5085_v23, 0.0  ;;  %v5140_v18 = vadd.s32 184, %v4174_v4  ;;  %v1758_v5 = vmax.f32 %v5090_v29, 0.0 }
  0xf9   : > { %v1316_v36 = vadd.s32 %v1315_v16, %v1305_v59  ;;  %2072 = vmatmul.f32.gmra.mxu1 %v1974_v28  ;;  %v5144_v32 = vadd.f32 %v5043_v20, %v296_v57  ;;  %v811_v26 = vshll.u32 %v808_v37, 16  ;;  %v813_v17 = vshll.u32 %v809_v55, 16  ;;  %v1922_v11 = vld [vmem:[#allocation2 + $0x7d] sm:$0xff] }
  0xfa   : > { %v508_v34 = vsub.s32 %v5053_v41, %v507_v27  ;;  %v810_v56 = vmul.u32 58254, %v805_v52  ;;  %v1065_v42 = vand.u32 65535, %v5140_v18  ;;  %v812_v0 = vshrl.u32 %v808_v37, 16  ;;  %v2513_v27 = vld [vmem:[%s6078_s3 + $0x198] sm:$0xff] }
  0xfb   : > { %v1317_v46 = vadd.s32 %v1316_v36, %v1307_v15  ;;  %vm815_vm14 = vc.u32 %v807_v9, %v811_v26  ;;  %v817_v59 = vadd.s32 %v811_v26, %v807_v9  ;;  %v1066_v22 = vshrl.u32 %v5140_v18, 16  ;;  %v265_v15 = vld [vmem:[%s4199_s10 + $0xb8] sm:$0xff]  ;;  %2538 = vmatpush.msrb.mxu3 %v2513_v27 }
  0xfc   : > { %vm1442_vm2 = vcmp.ne.s32.totalorder %v508_v34, 0  ;;  %vm1478_vm1 = vcmp.lt.s32.totalorder %v508_v34, 0  ;;  %v1550_v29 = vadd.s32 18, %v508_v34  ;;  %v816_v53 = vsel %vm815_vm14, 1, %v6104_v40 }
  0xfd   : > { %v1318_v12 = vshrl.u32 %v1317_v46, 4  ;;  %vm1514_vm8 = vmand %vm1478_vm1, %vm1442_vm2  ;;  %vm819_vm12 = vc.u32 %v817_v59, %v813_v17  ;;  %v1068_v13 = vmul.u32 14564, %v1065_v42  ;;  %v1069_v41 = vmul.u32 58254, %v1065_v42 }
  0xfe   : > { %v1586_v35 = vsel %vm1514_vm8, %v1550_v29, %v508_v34  ;;  %v818_v39 = vadd.s32 %v816_v53, %v810_v56  ;;  %v820_v54 = vsel %vm819_vm12, 1, %v6104_v40  ;;  %v6219_v16 = vmov 0  ;;  %v246_v29 = vld [vmem:[%s4199_s10 + $0x20] sm:$0xff] }
  0xff   : > { %v1983_v57 = vld [vmem:[#allocation2 + $0xc6] sm:$0xff]  ;;  %v1319_v52 = vmul.u32 18, %v1318_v12  ;;  %vm5152_vm4 = vcmp.lt.s32.totalorder %v1586_v35, 16  ;;  %v814_v9 = vshrl.u32 %v809_v55, 16  ;;  %v1070_v37 = vmul.u32 14564, %v1066_v22 }
 0x100   : > { %2099 = vmatmul.f32.gmra.mxu2 %v1983_v57  ;;  %v6220_v16 = vsel %vm5152_vm4, 4294967295, %v6219_v16  ;;  %v1072_v28 = vshll.u32 %v1069_v41, 16  ;;  %v1838_v36 = vsel %vm5152_vm4, %v6101_v31, 0.0  ;;  %v822_v17 = vadd.s32 %v820_v54, %v818_v39 }
 0x101   : > { %6221 = vst [vmem:[#allocation26_spill] sm:$0xff] %v6220_v16  ;;  %v1320_v26 = vsub.s32 %v5082_v49, %v1319_v52  ;;  %v1071_v34 = vmul.u32 58254, %v1066_v22  ;;  %v305_v55 = vmul.f32 %v5064_v48, %v265_v15  ;;  %v1074_v46 = vshll.u32 %v1070_v37, 16  ;;  %v2502_v16 = vld [vmem:[#allocation2 + $0xf7] sm:$0xff] }
 0x102   : > { %1874 = vst [vmem:[#allocation2 + $0x30] sm:$0xff] %v1838_v36  ;;  %vm1076_vm14 = vc.u32 %v1068_v13, %v1072_v28  ;;  %v1078_v56 = vadd.s32 %v1072_v28, %v1068_v13  ;;  %v823_v59 = vadd.s32 %v822_v17, %v812_v0  ;;  %v1073_v12 = vshrl.u32 %v1069_v41, 16 }
 0x103   : > { %vm1470_vm2 = vcmp.ne.s32.totalorder %v1320_v26, 0  ;;  %vm1506_vm1 = vcmp.lt.s32.totalorder %v1320_v26, 0  ;;  %v1578_v42 = vadd.s32 18, %v1320_v26  ;;  %v1077_v53 = vsel %vm1076_vm14, 1, %v6104_v40 }
 0x104   : > { %vm1542_vm8 = vmand %vm1506_vm1, %vm1470_vm2  ;;  %vm1080_vm12 = vc.u32 %v1078_v56, %v1074_v46  ;;  %v5168_v49 = vadd.s32 32, %v4174_v4  ;;  %v824_v57 = vadd.s32 %v823_v59, %v814_v9  ;;  %v1079_v35 = vadd.s32 %v1077_v53, %v1071_v34 }
 0x105   : > { %v1614_v22 = vsel %vm1542_vm8, %v1578_v42, %v1320_v26  ;;  %v1081_v52 = vsel %vm1080_vm12, 1, %v6104_v40  ;;  %v6222_v13 = vmov 0  ;;  %v286_v0 = vmul.f32 %v5064_v48, %v246_v29 }
 0x106   : > { %vm5171_vm5 = vcmp.lt.s32.totalorder %v1614_v22, 16  ;;  %v514_v39 = vand.u32 65535, %v5168_v49  ;;  %v515_v41 = vshrl.u32 %v5168_v49, 16  ;;  %v825_v15 = vshrl.u32 %v824_v57, 4 }
 0x107   : > { %v6223_v13 = vsel %vm5171_vm5, 4294967295, %v6222_v13  ;;  %v1866_v54 = vsel %vm5171_vm5, %v1758_v5, 0.0  ;;  %v1075_v28 = vshrl.u32 %v1070_v37, 16  ;;  %v1083_v27 = vadd.s32 %v1081_v52, %v1079_v35 }
 0x108   : > { %6224 = vst [vmem:[#allocation27_spill] sm:$0xff] %v6223_v13  ;;  %v517_v9 = vmul.u32 14564, %v514_v39  ;;  %v5180_v36 = vmul.u32 58254, %v514_v39  ;;  %v5182_v26 = vmul.u32 14564, %v515_v41  ;;  %v826_v34 = vmul.u32 18, %v825_v15  ;;  %v1921_v13 = vld [vmem:[#allocation2 + $0x75] sm:$0xff] }
 0x109   : > { %1902 = vst [vmem:[#allocation2 + $0x110] sm:$0xff] %v1866_v54  ;;  %v1964_v17 = vld [vmem:[#allocation2 + $0x2e] sm:$0xff]  ;;  %v6100_v46 = vmax.f32 %v5144_v32, 0.0  ;;  %v1084_v56 = vadd.s32 %v1083_v27, %v1073_v12  ;;  %v5186_v42 = vadd.s32 256, %v4174_v4  ;;  %v5189_v5 = vadd.f32 %v5043_v20, %v305_v55 }
 0x10a   : > { %2042 = vmatmul.f32.gmra.mxu0 %v1964_v17  ;;  %v5192_v37 = vadd.f32 %v5043_v20, %v286_v0  ;;  %v521_v59 = vshll.u32 %v5180_v36, 16  ;;  %v523_v29 = vshll.u32 %v5182_v26, 16  ;;  %v827_v53 = vsub.s32 %v5126_v10, %v826_v34 }
 0x10b   : > { %v1085_v22 = vadd.s32 %v1084_v56, %v1075_v28  ;;  %v520_v57 = vmul.u32 58254, %v515_v41  ;;  %v1326_v12 = vand.u32 65535, %v5186_v42  ;;  %v522_v35 = vshrl.u32 %v5180_v36, 16 }
 0x10c   : > { %vm525_vm14 = vc.u32 %v517_v9, %v521_v59  ;;  %v527_v52 = vadd.s32 %v521_v59, %v517_v9  ;;  %v1327_v55 = vshrl.u32 %v5186_v42, 16  ;;  %vm1453_vm2 = vcmp.ne.s32.totalorder %v827_v53, 0 }
 0x10d   : > { %vm1489_vm1 = vcmp.lt.s32.totalorder %v827_v53, 0  ;;  %v1561_v0 = vadd.s32 18, %v827_v53  ;;  %v1086_v39 = vshrl.u32 %v1085_v22, 4  ;;  %v526_v54 = vsel %vm525_vm14, 1, %v6104_v40 }
 0x10e   : > { %vm1525_vm8 = vmand %vm1489_vm1, %vm1453_vm2  ;;  %vm529_vm12 = vc.u32 %v527_v52, %v523_v29  ;;  %v1329_v15 = vmul.u32 14564, %v1326_v12  ;;  %v5201_v10 = vmul.u32 58254, %v1326_v12  ;;  %v528_v17 = vadd.s32 %v526_v54, %v520_v57  ;;  %v1946_v29 = vld [vmem:[%s6078_s3 + $0x18] sm:$0xff]  ;;  %v2727_v52 = vld [vmem:[%s6078_s3 + $0x220] sm:$0xff] }
 0x10f   : > { %v1597_v28 = vsel %vm1525_vm8, %v1561_v0, %v827_v53  ;;  %v1087_v27 = vmul.u32 18, %v1086_v39  ;;  %v530_v36 = vsel %vm529_vm12, 1, %v6104_v40  ;;  %v6225_v9 = vmov 0  ;;  %v2299_v53 = vld [vmem:[%s6078_s3 + $0x110] sm:$0xff]  ;;  %2148 = vmatpush.msrb.mxu1 %v1946_v29  ;;  %2750 = vmatpush.msrb.mxu0 %v2727_v52  ;;  %v274_v29 = vld [vmem:[%s4199_s10 + $0x100] sm:$0xff] }
 0x110   : > { %v1992_v41 = vld [vmem:[#allocation2 + $0x10e] sm:$0xff]  ;;  %vm5204_vm5 = vcmp.lt.s32.totalorder %v1597_v28, 16  ;;  %v524_v34 = vshrl.u32 %v5182_v26, 16  ;;  %v5209_v56 = vmul.u32 14564, %v1327_v55  ;;  %v1333_v59 = vshll.u32 %v5201_v10, 16  ;;  %2326 = vmatpush.msrb.mxu2 %v2299_v53 }
 0x111   : > { %2126 = vmatmul.f32.gmra.mxu3 %v1992_v41  ;;  %v6226_v9 = vsel %vm5204_vm5, 4294967295, %v6225_v9  ;;  %v1849_v22 = vsel %vm5204_vm5, %v6100_v46, 0.0  ;;  %v1088_v57 = vsub.s32 %v5140_v18, %v1087_v27  ;;  %v532_v26 = vadd.s32 %v530_v36, %v528_v17  ;;  %v2512_v0 = vld [vmem:[%s6078_s3 + $0x190] sm:$0xff]  ;;  %v2298_v28 = vld [vmem:[%s6078_s3 + $0x108] sm:$0xff]  ;;  %v2726_v27 = vld [vmem:[%s6078_s3 + $0x218] sm:$0xff] }
 0x112   : > { %6227 = vst [vmem:[#allocation28_spill] sm:$0xff] %v6226_v9  ;;  %v1332_v12 = vmul.u32 58254, %v1327_v55  ;;  %v1945_v39 = vld [vmem:[%s6078_s3 + $0x10] sm:$0xff]  ;;  %v1750_v18 = vmax.f32 %v5189_v5, 0.0  ;;  %v1335_v55 = vshll.u32 %v5209_v56, 16  ;;  %vm5234_vm14 = vc.u32 %v1329_v15, %v1333_v59  ;;  %2539 = vmatpush.msrb.mxu3 %v2512_v0  ;;  %v2511_v5 = vld [vmem:[%s6078_s3 + $0x188] sm:$0xff]  ;;  %2327 = vmatpush.msrb.mxu2 %v2298_v28 }
 0x113   : > { %1885 = vst [vmem:[#allocation2 + $0x88] sm:$0xff] %v1849_v22  ;;  %v1339_v41 = vadd.s32 %v1333_v59, %v1329_v15  ;;  %vm1462_vm2 = vcmp.ne.s32.totalorder %v1088_v57, 0  ;;  %vm1498_vm1 = vcmp.lt.s32.totalorder %v1088_v57, 0  ;;  %v1570_v17 = vadd.s32 18, %v1088_v57  ;;  %2149 = vmatpush.msrb.mxu1 %v1945_v39  ;;  %2751 = vmatpush.msrb.mxu0 %v2726_v27  ;;  %v247_v46 = vld [vmem:[%s4199_s10 + $0x28] sm:$0xff]  ;;  %v2491_v9 = vld [vmem:[#allocation2 + $0x9f] sm:$0xff] }
 0x114   : > { %v533_v36 = vadd.s32 %v532_v26, %v522_v35  ;;  %vm1534_vm8 = vmand %vm1498_vm1, %vm1462_vm2  ;;  %v1334_v15 = vshrl.u32 %v5201_v10, 16  ;;  %v1338_v59 = vsel %vm5234_vm14, 1, %v6104_v40  ;;  %2540 = vmatpush.msrb.mxu3 %v2511_v5  ;;  %v5253_v53 = vadd.s32 40, %v4174_v4 }
 0x115   : > { %vm1341_vm12 = vc.u32 %v1339_v41, %v1335_v55  ;;  %v1606_v22 = vsel %vm1534_vm8, %v1570_v17, %v1088_v57  ;;  %v1340_v0 = vadd.s32 %v1338_v59, %v1332_v12  ;;  %v6230_v26 = vmov 0 }
 0x116   : > { %v534_v52 = vadd.s32 %v533_v36, %v524_v34  ;;  %v1342_v35 = vsel %vm1341_vm12, 1, %v6104_v40  ;;  %vm5256_vm9 = vcmp.lt.s32.totalorder %v1606_v22, 16  ;;  %v314_v10 = vmul.f32 %v5064_v48, %v274_v29 }
 0x117   : > { %v6231_v26 = vsel %vm5256_vm9, 4294967295, %v6230_v26  ;;  %v543_v39 = vand.u32 65535, %v5253_v53  ;;  %v544_v55 = vshrl.u32 %v5253_v53, 16  ;;  %v1858_v54 = vsel %vm5256_vm9, %v1750_v18, 0.0 }
 0x118   : > { %6232 = vst [vmem:[#allocation29_spill] sm:$0xff] %v6231_v26  ;;  %v535_v41 = vshrl.u32 %v534_v52, 4  ;;  %v1336_v57 = vshrl.u32 %v5209_v56, 16  ;;  %v1344_v34 = vadd.s32 %v1342_v35, %v1340_v0  ;;  %v5271_v29 = vadd.s32 264, %v4174_v4 }
 0x119   : > { %1894 = vst [vmem:[#allocation2 + $0xd0] sm:$0xff] %v1858_v54  ;;  %v546_v12 = vmul.u32 14564, %v543_v39  ;;  %v5266_v28 = vmul.u32 58254, %v543_v39  ;;  %v5268_v27 = vmul.u32 14564, %v544_v55  ;;  %v5275_v18 = vadd.f32 %v5043_v20, %v314_v10 }
 0x11a   : > { %v1975_v5 = vld [vmem:[#allocation2 + $0x86] sm:$0xff]  ;;  %v536_v17 = vmul.u32 18, %v535_v41  ;;  %v1345_v36 = vadd.s32 %v1344_v34, %v1334_v15  ;;  %v549_v35 = vmul.u32 58254, %v544_v55  ;;  %v1355_v39 = vand.u32 65535, %v5271_v29  ;;  %v2489_v43 = vld [vmem:[#allocation2 + $0x8f] sm:$0xff] }
 0x11b   : > { %2075 = vmatmul.f32.gmra.mxu1 %v1975_v5  ;;  %v550_v56 = vshll.u32 %v5266_v28, 16  ;;  %v552_v22 = vshll.u32 %v5268_v27, 16  ;;  %v551_v15 = vshrl.u32 %v5266_v28, 16  ;;  %v1356_v41 = vshrl.u32 %v5271_v29, 16  ;;  %v1976_v28 = vld [vmem:[#allocation2 + $0x8e] sm:$0xff] }
 0x11c   : > { %v537_v52 = vsub.s32 %v5168_v49, %v536_v17  ;;  %v1346_v0 = vadd.s32 %v1345_v36, %v1336_v57  ;;  %v1358_v49 = vmul.u32 14564, %v1355_v39  ;;  %v5284_v57 = vmul.u32 58254, %v1355_v39  ;;  %v2488_v58 = vld [vmem:[#allocation2 + $0x87] sm:$0xff] }
 0x11d   : > { %vm554_vm14 = vc.u32 %v546_v12, %v550_v56  ;;  %v556_v54 = vadd.s32 %v550_v56, %v546_v12  ;;  %v6233_v56 = vmov 0  ;;  %v5293_v59 = vmul.u32 14564, %v1356_v41  ;;  %v1924_v38 = vld [vmem:[#allocation2 + $0x8d] sm:$0xff] }
 0x11e   : > { %vm1443_vm2 = vcmp.ne.s32.totalorder %v537_v52, 0  ;;  %vm1479_vm1 = vcmp.lt.s32.totalorder %v537_v52, 0  ;;  %v1551_v10 = vadd.s32 18, %v537_v52  ;;  %v1347_v34 = vshrl.u32 %v1346_v0, 4 }
 0x11f   : > { %vm1515_vm8 = vmand %vm1479_vm1, %vm1443_vm2  ;;  %v555_v5 = vsel %vm554_vm14, 1, %v6104_v40  ;;  %vm558_vm12 = vc.u32 %v556_v54, %v552_v22  ;;  %v553_v0 = vshrl.u32 %v5268_v27, 16  ;;  %v1362_v22 = vshll.u32 %v5284_v57, 16 }
 0x120   : > { %v1984_v55 = vld [vmem:[#allocation2 + $0xce] sm:$0xff]  ;;  %v1587_v17 = vsel %vm1515_vm8, %v1551_v10, %v537_v52  ;;  %v1348_v36 = vmul.u32 18, %v1347_v34  ;;  %v557_v31 = vadd.s32 %v555_v5, %v549_v35  ;;  %v559_v12 = vsel %vm558_vm12, 1, %v6104_v40  ;;  %v2297_v35 = vld [vmem:[%s6078_s3 + $0x100] sm:$0xff] }
 0x121   : > { %2102 = vmatmul.f32.gmra.mxu2 %v1984_v55  ;;  %vm5288_vm9 = vcmp.lt.s32.totalorder %v1587_v17, 16  ;;  %v1944_v52 = vld [vmem:[%s6078_s3 + $0x8] sm:$0xff]  ;;  %v6236_v39 = vmax.f32 %v5192_v37, 0.0  ;;  %v1361_v34 = vmul.u32 58254, %v1356_v41  ;;  %v2725_v5 = vld [vmem:[%s6078_s3 + $0x210] sm:$0xff]  ;;  %v2510_v55 = vld [vmem:[%s6078_s3 + $0x180] sm:$0xff]  ;;  %vm1366_vm14 = vc.u32 %v1358_v49, %v1362_v22 }
 0x122   : > { %v6234_v56 = vsel %vm5288_vm9, 4294967295, %v6233_v56  ;;  %v1349_v10 = vsub.s32 %v5186_v42, %v1348_v36  ;;  %v561_v27 = vadd.s32 %v559_v12, %v557_v31  ;;  %2150 = vmatpush.msrb.mxu1 %v1944_v52  ;;  %2328 = vmatpush.msrb.mxu2 %v2297_v35  ;;  %v1943_v17 = vld [vmem:[%s6078_s3] sm:$0xff]  ;;  %v1364_v31 = vshll.u32 %v5293_v59, 16  ;;  %v3164_v41 = vld [vmem:[%s6078_s3 + $0x378] sm:$0xff] }
 0x123   : > { %6235 = vst [vmem:[#allocation30_spill] sm:$0xff] %v6234_v56  ;;  %v1839_v54 = vsel %vm5288_vm9, %v6236_v39, 0.0  ;;  %v1759_v39 = vmax.f32 %v5275_v18, 0.0  ;;  %2078 = vmatmul.f32.gmra.mxu1 %v1976_v28  ;;  %v1368_v42 = vadd.s32 %v1362_v22, %v1358_v49  ;;  %2752 = vmatpush.msrb.mxu0 %v2725_v5  ;;  %v2724_v18 = vld [vmem:[%s6078_s3 + $0x208] sm:$0xff]  ;;  %v287_v28 = vmul.f32 %v5064_v48, %v247_v46  ;;  %v1985_v35 = vld [vmem:[#allocation2 + $0xd6] sm:$0xff] }
 0x124   : > { %1875 = vst [vmem:[#allocation2 + $0x38] sm:$0xff] %v1839_v54  ;;  %vm1471_vm2 = vcmp.ne.s32.totalorder %v1349_v10, 0  ;;  %vm1507_vm1 = vcmp.lt.s32.totalorder %v1349_v10, 0  ;;  %v1579_v36 = vadd.s32 18, %v1349_v10  ;;  %v562_v12 = vadd.s32 %v561_v27, %v551_v15  ;;  %2541 = vmatpush.msrb.mxu3 %v2510_v55  ;;  %2151 = vmatpush.msrb.mxu1 %v1943_v17 }
 0x125   : > { %vm1543_vm8 = vmand %vm1507_vm1, %vm1471_vm2  ;;  %v1363_v49 = vshrl.u32 %v5284_v57, 16  ;;  %v1367_v22 = vsel %vm1366_vm14, 1, %v6104_v40  ;;  %vm1370_vm12 = vc.u32 %v1368_v42, %v1364_v31  ;;  %3165 = vmatpush.msra.mxu2 %v3164_v41  ;;  %2753 = vmatpush.msrb.mxu0 %v2724_v18  ;;  %v6237_v5 = vmov 0  ;;  %v275_v57 = vld [vmem:[%s4199_s10 + $0x108] sm:$0xff] }
 0x126   : > { %v1615_v52 = vsel %vm1543_vm8, %v1579_v36, %v1349_v10  ;;  %v563_v15 = vadd.s32 %v562_v12, %v553_v0  ;;  %v1369_v54 = vadd.s32 %v1367_v22, %v1361_v34  ;;  %v1371_v27 = vsel %vm1370_vm12, 1, %v6104_v40  ;;  %v1907_v42 = vld [vmem:[#allocation2 + $0x5] sm:$0xff]  ;;  %v3377_v10 = vld [vmem:[%s6078_s3 + $0x3f8] sm:$0xff]  ;;  %v1920_v40 = vld [vmem:[#allocation2 + $0x6d] sm:$0xff] }
 0x127   : > { %vm5328_vm7 = vcmp.lt.s32.totalorder %v1615_v52, 16  ;;  %v1365_v17 = vshrl.u32 %v5293_v59, 16  ;;  %v5337_v0 = vadd.f32 %v5043_v20, %v287_v28  ;;  %v2951_v34 = vld [vmem:[%s6078_s3 + $0x2f8] sm:$0xff]  ;;  %3378 = vmatpush.msra.mxu3 %v3377_v10  ;;  %v315_v18 = vmul.f32 %v5064_v48, %v275_v57  ;;  %v2262_v10 = vld [vmem:[#allocation2 + $0xf] sm:$0xff] }
 0x128   : > { %v6238_v5 = vsel %vm5328_vm7, 4294967295, %v6237_v5  ;;  %v1867_v46 = vsel %vm5328_vm7, %v1759_v39, 0.0  ;;  %v564_v55 = vshrl.u32 %v563_v15, 4  ;;  %v1373_v31 = vadd.s32 %v1371_v27, %v1369_v54  ;;  %v2723_v39 = vld [vmem:[%s6078_s3 + $0x200] sm:$0xff]  ;;  %2952 = vmatpush.msra.mxu1 %v2951_v34  ;;  %v3590_v48 = vld [vmem:[%s6078_s3 + $0x478] sm:$0xff] }
 0x129   : > { %6239 = vst [vmem:[#allocation31_spill] sm:$0xff] %v6238_v5  ;;  %2105 = vmatmul.f32.gmra.mxu2 %v1985_v35  ;;  %2754 = vmatpush.msrb.mxu0 %v2723_v39  ;;  %v1732_v22 = vmax.f32 %v5337_v0, 0.0  ;;  %v2261_v15 = vld [vmem:[#allocation2 + $0x7] sm:$0xff]  ;;  %v355_v27 = vadd.f32 %v5043_v20, %v315_v18  ;;  %v6243_v34 = vmov 0  ;;  %v2474_v18 = vld [vmem:[#allocation2 + $0x17] sm:$0xff]  ;;  %v5684_v56 = vadd.s32 280, %v4174_v4 }
 0x12a   : > { %1903 = vst [vmem:[#allocation2 + $0x118] sm:$0xff] %v1867_v46  ;;  %v565_v41 = vmul.u32 18, %v564_v55  ;;  %v1374_v36 = vadd.s32 %v1373_v31, %v1363_v49  ;;  %v1908_v55 = vld [vmem:[#allocation2 + $0xd] sm:$0xff] }
 0x12b   : > { %v1965_v59 = vld [vmem:[#allocation2 + $0x36] sm:$0xff]  ;;  %2152 = vmatmul.f32.vlgmr.msrb.gmra.mxu1 %v1907_v42  ;;  %3591 = vmatpush.msra.mxu0 %v3590_v48  ;;  %v1760_v31 = vmax.f32 %v355_v27, 0.0  ;;  %v1911_v27 = vld [vmem:[#allocation2 + $0x25] sm:$0xff] }
 0x12c   : > { %2045 = vmatmul.f32.gmra.mxu0 %v1965_v59  ;;  %v566_v12 = vsub.s32 %v5253_v53, %v565_v41  ;;  %v1375_v28 = vadd.s32 %v1374_v36, %v1365_v17  ;;  %v6240_v53 = vmov 0  ;;  %v1909_v59 = vld [vmem:[#allocation2 + $0x15] sm:$0xff]  ;;  %v2949_v48 = vld [vmem:[%s6078_s3 + $0x2e8] sm:$0xff] }
 0x12d   : > { %v3376_v41 = vld [vmem:[%s6078_s3 + $0x3f0] sm:$0xff] }
 0x12e   : > { %vm1444_vm14 = vcmp.ne.s32.totalorder %v566_v12, 0  ;;  %vm1480_vm2 = vcmp.lt.s32.totalorder %v566_v12, 0  ;;  %v1552_v52 = vadd.s32 18, %v566_v12  ;;  %v1376_v35 = vshrl.u32 %v1375_v28, 4  ;;  %v2950_v36 = vld [vmem:[%s6078_s3 + $0x2f0] sm:$0xff]  ;;  %3379 = vmatpush.msra.mxu3 %v3376_v41  ;;  %v3374_v41 = vld [vmem:[%s6078_s3 + $0x3e0] sm:$0xff] }
 0x12f   : > { %vm1516_vm1 = vmand %vm1480_vm2, %vm1444_vm14  ;;  %2953 = vmatpush.msra.mxu1 %v2950_v36  ;;  %v2478_v36 = vld [vmem:[#allocation2 + $0x37] sm:$0xff] }
 0x130   : > { %v1588_v49 = vsel %vm1516_vm1, %v1552_v52, %v566_v12  ;;  %v1377_v46 = vmul.u32 18, %v1376_v35  ;;  %v1910_v35 = vld [vmem:[#allocation2 + $0x1d] sm:$0xff] }
 0x131   : > { %v1993_v54 = vld [vmem:[#allocation2 + $0x116] sm:$0xff]  ;;  %vm5352_vm8 = vcmp.lt.s32.totalorder %v1588_v49, 16  ;;  %2329 = vmatmul.f32.vlgmr.msrb.gmra.mxu2 %v2261_v15  ;;  %2954 = vmatpush.msra.mxu1 %v2949_v48  ;;  %v6247_v48 = vmax.f32 %v5192_v37, 0.0 }
 0x132   : > { %2129 = vmatmul.f32.gmra.mxu3 %v1993_v54  ;;  %v6241_v53 = vsel %vm5352_vm8, 4294967295, %v6240_v53  ;;  %v1840_v57 = vsel %vm5352_vm8, %v1732_v22, 0.0  ;;  %v1378_v17 = vsub.s32 %v5271_v29, %v1377_v46  ;;  %v3163_v29 = vld [vmem:[%s6078_s3 + $0x370] sm:$0xff]  ;;  %v2475_v54 = vld [vmem:[#allocation2 + $0x1f] sm:$0xff]  ;;  %v3162_v46 = vld [vmem:[%s6078_s3 + $0x368] sm:$0xff] }
 0x133   : > { %6242 = vst [vmem:[#allocation32_spill] sm:$0xff] %v6241_v53  ;;  %2155 = vmatmul.f32.gmra.mxu1 %v1908_v55  ;;  %3166 = vmatpush.msra.mxu2 %v3163_v29  ;;  %v3589_v15 = vld [vmem:[%s6078_s3 + $0x470] sm:$0xff]  ;;  %v2687_v49 = vld [vmem:[#allocation2 + $0x18] sm:$0xff]  ;;  %v3375_v55 = vld [vmem:[%s6078_s3 + $0x3e8] sm:$0xff] }
 0x134   : > { %1876 = vst [vmem:[#allocation2 + $0x40] sm:$0xff] %v1840_v57  ;;  %vm1472_vm12 = vcmp.ne.s32.totalorder %v1378_v17, 0  ;;  %vm1508_vm14 = vcmp.lt.s32.totalorder %v1378_v17, 0  ;;  %v1580_v20 = vadd.s32 18, %v1378_v17  ;;  %3592 = vmatpush.msra.mxu0 %v3589_v15  ;;  %3380 = vmatpush.msra.mxu3 %v3375_v55  ;;  %v2476_v57 = vld [vmem:[#allocation2 + $0x27] sm:$0xff]  ;;  %v6246_v15 = vmax.f32 %v5085_v23, 0.0 }
 0x135   : > { %vm1544_vm2 = vmand %vm1508_vm14, %vm1472_vm12  ;;  %3167 = vmatpush.msra.mxu2 %v3162_v46  ;;  %v3161_v29 = vld [vmem:[%s6078_s3 + $0x360] sm:$0xff]  ;;  %v3160_v55 = vld [vmem:[%s6078_s3 + $0x358] sm:$0xff] }
 0x136   : > { %v1616_v42 = vsel %vm1544_vm2, %v1580_v20, %v1378_v17  ;;  %v2688_v17 = vld [vmem:[#allocation2 + $0x20] sm:$0xff]  ;;  %v1912_v20 = vld [vmem:[#allocation2 + $0x2d] sm:$0xff]  ;;  %3381 = vmatpush.msra.mxu3 %v3374_v41  ;;  %v1917_v41 = vld [vmem:[#allocation2 + $0x55] sm:$0xff] }
 0x137   : > { %vm5364_vm1 = vcmp.lt.s32.totalorder %v1616_v42, 16  ;;  %v2477_v42 = vld [vmem:[#allocation2 + $0x2f] sm:$0xff]  ;;  %3168 = vmatpush.msra.mxu2 %v3161_v29 }
 0x138   : > { %v6244_v34 = vsel %vm5364_vm1, 4294967295, %v6243_v34  ;;  %v1868_v39 = vsel %vm5364_vm1, %v1760_v31, 0.0  ;;  %v3588_v31 = vld [vmem:[%s6078_s3 + $0x468] sm:$0xff] }
 0x139   : > { %6245 = vst [vmem:[#allocation33_spill] sm:$0xff] %v6244_v34  ;;  %2332 = vmatmul.f32.gmra.mxu2 %v2262_v10  ;;  %3593 = vmatpush.msra.mxu0 %v3588_v31  ;;  %v2689_v10 = vld [vmem:[#allocation2 + $0x28] sm:$0xff] }
 0x13a   : > { %1904 = vst [vmem:[#allocation2 + $0x120] sm:$0xff] %v1868_v39  ;;  %v1913_v39 = vld [vmem:[#allocation2 + $0x35] sm:$0xff]  ;;  %3169 = vmatpush.msra.mxu2 %v3160_v55  ;;  %v2693_v29 = vld [vmem:[#allocation2 + $0x48] sm:$0xff] }
 0x13b   : > { %v1966_v12 = vld [vmem:[#allocation2 + $0x3e] sm:$0xff]  ;;  %2158 = vmatmul.f32.gmra.mxu1 %v1909_v59  ;;  %v1967_v52 = vld [vmem:[#allocation2 + $0x46] sm:$0xff]  ;;  %v5394_v59 = vpop.f32.mrf.mxu1  ;;  %v3372_v55 = vld [vmem:[%s6078_s3 + $0x3d0] sm:$0xff] }
 0x13c   : > { %2048 = vmatmul.f32.gmra.mxu0 %v1966_v12  ;;  %v1914_v12 = vld [vmem:[#allocation2 + $0x3d] sm:$0xff]  ;;  %v2480_v23 = vld [vmem:[#allocation2 + $0x47] sm:$0xff] }
 0x13d   : > { %v2697_v34 = vld [vmem:[#allocation2 + $0x68] sm:$0xff] }
 0x141   : > { %v1994_v28 = vld [vmem:[#allocation2 + $0x11e] sm:$0xff]  ;;  %2335 = vmatmul.f32.gmra.mxu2 %v2474_v18 }
 0x142   : > { %2132 = vmatmul.f32.gmra.mxu3 %v1994_v28  ;;  %v5405_v28 = vpop.f32.mrf.mxu2 }
 0x143   : > { %2161 = vmatmul.f32.gmra.mxu1 %v1910_v35  ;;  %v3587_v35 = vld [vmem:[%s6078_s3 + $0x460] sm:$0xff] }
 0x144   : > { %2051 = vmatmul.f32.gmra.mxu0 %v1967_v52  ;;  %v5407_v52 = vpop.f32.mrf.mxu1 }
 0x145   : > { %3594 = vmatpush.msra.mxu0 %v3587_v35  ;;  %v2482_v35 = vld [vmem:[#allocation2 + $0x57] sm:$0xff] }
 0x149   : > { %2338 = vmatmul.f32.gmra.mxu2 %v2475_v54 }
 0x14a   : > { %2542 = vmatmul.f32.vlgmr.msrb.gmra.mxu3 %v2474_v18  ;;  %v2948_v18 = vld [vmem:[%s6078_s3 + $0x2e0] sm:$0xff] }
 0x14b   : > { %2164 = vmatmul.f32.gmra.mxu1 %v1911_v27  ;;  %v5416_v27 = vpop.f32.mrf.mxu2 }
 0x14c   : > { %2755 = vmatmul.f32.vlgmr.msrb.gmra.mxu0 %v2687_v49  ;;  %2955 = vmatpush.msra.mxu1 %v2948_v18  ;;  %v1915_v49 = vld [vmem:[#allocation2 + $0x45] sm:$0xff]  ;;  %v5418_v46 = vpop.f32.mrf.mxu1 }
 0x151   : > { %2341 = vmatmul.f32.gmra.mxu2 %v2476_v57 }
 0x152   : > { %2545 = vmatmul.f32.gmra.mxu3 %v2475_v54  ;;  %v2479_v54 = vld [vmem:[#allocation2 + $0x3f] sm:$0xff] }
 0x153   : > { %2167 = vmatmul.f32.gmra.mxu1 %v1912_v20  ;;  %v2947_v20 = vld [vmem:[%s6078_s3 + $0x2d8] sm:$0xff]  ;;  %v5437_v37 = vpop.f32.mrf.mxu2 }
 0x154   : > { %2758 = vmatmul.f32.gmra.mxu0 %v2688_v17  ;;  %v3373_v17 = vld [vmem:[%s6078_s3 + $0x3d8] sm:$0xff]  ;;  %v5433_v31 = vpop.f32.mrf.mxu1  ;;  %2956 = vmatpush.msra.mxu1 %v2947_v20 }
 0x155   : > { %3382 = vmatpush.msra.mxu3 %v3373_v17  ;;  %v2483_v20 = vld [vmem:[#allocation2 + $0x5f] sm:$0xff] }
 0x157   : > { %3383 = vmatpush.msra.mxu3 %v3372_v55 }
 0x159   : > { %2344 = vmatmul.f32.gmra.mxu2 %v2477_v42 }
 0x15a   : > { %2548 = vmatmul.f32.gmra.mxu3 %v2476_v57  ;;  %v1916_v57 = vld [vmem:[#allocation2 + $0x4d] sm:$0xff] }
 0x15b   : > { %2170 = vmatmul.f32.gmra.mxu1 %v1913_v39  ;;  %v2481_v39 = vld [vmem:[#allocation2 + $0x4f] sm:$0xff] }
 0x15c   : > { %2761 = vmatmul.f32.gmra.mxu0 %v2689_v10  ;;  %v5443_v10 = vpop.f32.mrf.mxu3 }
 0x161   : > { %2347 = vmatmul.f32.gmra.mxu2 %v2478_v36 }
 0x162   : > { %2551 = vmatmul.f32.gmra.mxu3 %v2477_v42  ;;  %v5435_v42 = vpop.f32.mrf.mxu0 }
 0x163   : > { %2173 = vmatmul.f32.gmra.mxu1 %v1914_v12  ;;  %v5448_v12 = vpop.f32.mrf.mxu1 }
 0x164   : > { %4109 = vmatmul.msk.f32.gmra.mxu0 %vm5152_vm4, %v6246_v15  ;;  %v5454_v18 = vpop.f32.mrf.mxu3  ;;  %v2694_v15 = vld [vmem:[#allocation2 + $0x50] sm:$0xff] }
 0x169   : > { %2350 = vmatmul.f32.gmra.mxu2 %v2479_v54 }
 0x16a   : > { %2554 = vmatmul.f32.gmra.mxu3 %v2478_v36  ;;  %v3586_v36 = vld [vmem:[%s6078_s3 + $0x458] sm:$0xff]  ;;  %v5450_v0 = vpop.f32.mrf.mxu0 }
 0x16b   : > { %2176 = vmatmul.f32.gmra.mxu1 %v1915_v49  ;;  %3595 = vmatpush.msra.mxu0 %v3586_v36  ;;  %v3159_v49 = vld [vmem:[%s6078_s3 + $0x350] sm:$0xff] }
 0x16c   : > { %4110 = vmatmul.msk.f32.gmra.mxu0 %vm5288_vm9, %v6247_v48  ;;  %v2946_v48 = vld [vmem:[%s6078_s3 + $0x2d0] sm:$0xff]  ;;  %3170 = vmatpush.msra.mxu2 %v3159_v49  ;;  %v2696_v49 = vld [vmem:[#allocation2 + $0x60] sm:$0xff] }
 0x16d   : > { %2957 = vmatpush.msra.mxu1 %v2946_v48  ;;  %v3585_v36 = vld [vmem:[%s6078_s3 + $0x450] sm:$0xff] }
 0x16e   : > { %3596 = vmatpush.msra.mxu0 %v3585_v36  ;;  %v2945_v36 = vld [vmem:[%s6078_s3 + $0x2c8] sm:$0xff] }
 0x16f   : > { %2958 = vmatpush.msra.mxu1 %v2945_v36  ;;  %v2698_v36 = vld [vmem:[#allocation2 + $0x70] sm:$0xff] }
 0x170   : > { %3597 = vmatpush.msra.mxu0 %v3584_v51  ;;  %v3157_v51 = vld [vmem:[%s6078_s3 + $0x340] sm:$0xff] }
 0x171   : > { %2353 = vmatmul.f32.gmra.mxu2 %v2480_v23  ;;  %2959 = vmatpush.msra.mxu1 %v2944_v33 }
 0x172   : > { %2557 = vmatmul.f32.gmra.mxu3 %v2479_v54  ;;  %v1918_v54 = vld [vmem:[#allocation2 + $0x5d] sm:$0xff] }
 0x173   : > { %2179 = vmatmul.f32.gmra.mxu1 %v1916_v57  ;;  %v5467_v57 = vpop.f32.mrf.mxu0 }
 0x174   : > { %4111 = vmatmul.msk.f32.gmra.mxu0 %vm5352_vm8, %v1732_v22  ;;  %v5452_v22 = vpop.f32.mrf.mxu2 }
 0x179   : > { %2356 = vmatmul.f32.gmra.mxu2 %v2481_v39 }
 0x17a   : > { %2560 = vmatmul.f32.gmra.mxu3 %v2480_v23  ;;  %v5465_v23 = vpop.f32.mrf.mxu1 }
 0x17b   : > { %2182 = vmatmul.f32.gmra.mxu1 %v1917_v41  ;;  %v1919_v41 = vld [vmem:[#allocation2 + $0x65] sm:$0xff]  ;;  %v5478_v55 = vpop.f32.mrf.mxu0 }
 0x17c   : > { %2773 = vmatmul.f32.gmra.mxu0 %v2693_v29  ;;  %v5469_v17 = vpop.f32.mrf.mxu2  ;;  %v5471_v29 = vpop.f32.mrf.mxu3 }
 0x181   : > { %2359 = vmatmul.f32.gmra.mxu2 %v2482_v35 }
 0x182   : > { %2563 = vmatmul.f32.gmra.mxu3 %v2481_v39  ;;  %v2695_v39 = vld [vmem:[#allocation2 + $0x58] sm:$0xff] }
 0x183   : > { %2185 = vmatmul.f32.gmra.mxu1 %v1918_v54  ;;  %v2484_v54 = vld [vmem:[#allocation2 + $0x67] sm:$0xff] }
 0x184   : > { %2776 = vmatmul.f32.gmra.mxu0 %v2694_v15  ;;  %v5476_v15 = vpop.f32.mrf.mxu1  ;;  %v5480_v48 = vpop.f32.mrf.mxu2 }
 0x189   : > { %2362 = vmatmul.f32.gmra.mxu2 %v2483_v20 }
 0x18a   : > { %2566 = vmatmul.f32.gmra.mxu3 %v2482_v35  ;;  %v3158_v35 = vld [vmem:[%s6078_s3 + $0x348] sm:$0xff] }
 0x18b   : > { %2188 = vmatmul.f32.gmra.mxu1 %v1919_v41  ;;  %v5488_v41 = vpop.f32.mrf.mxu3  ;;  %3171 = vmatpush.msra.mxu2 %v3158_v35  ;;  %v5498_v35 = vpop.f32.mrf.mxu0 }
 0x18c   : > { %2779 = vmatmul.f32.gmra.mxu0 %v2695_v39  ;;  %v3371_v39 = vld [vmem:[%s6078_s3 + $0x3c8] sm:$0xff] }
 0x18d   : > { %3384 = vmatpush.msra.mxu3 %v3371_v39  ;;  %v5500_v39 = vpop.f32.mrf.mxu2  ;;  %3172 = vmatpush.msra.mxu2 %v3157_v51  ;;  %v3583_v51 = vld [vmem:[%s6078_s3 + $0x440] sm:$0xff] }
 0x18e   : > { %3598 = vmatpush.msra.mxu0 %v3583_v51 }
 0x191   : > { %2365 = vmatmul.f32.gmra.mxu2 %v2484_v54 }
 0x192   : > { %2569 = vmatmul.f32.gmra.mxu3 %v2483_v20  ;;  %v2485_v20 = vld [vmem:[#allocation2 + $0x6f] sm:$0xff] }
 0x193   : > { %2191 = vmatmul.f32.gmra.mxu1 %v1920_v40  ;;  %v5502_v40 = vpop.f32.mrf.mxu3 }
 0x194   : > { %2782 = vmatmul.f32.gmra.mxu0 %v2696_v49  ;;  %v2486_v49 = vld [vmem:[#allocation2 + $0x77] sm:$0xff] }
 0x198   : > { %v5493_v5 = vpop.f32.mrf.mxu1 }
 0x199   : > { %2368 = vmatmul.f32.gmra.mxu2 %v2485_v20 }
 0x19a   : > { %2572 = vmatmul.f32.gmra.mxu3 %v2484_v54  ;;  %v5506_v54 = vpop.f32.mrf.mxu0 }
 0x19b   : > { %2194 = vmatmul.f32.gmra.mxu1 %v1921_v13  ;;  %v3370_v13 = vld [vmem:[%s6078_s3 + $0x3c0] sm:$0xff] }
 0x19c   : > { %2785 = vmatmul.f32.gmra.mxu0 %v2697_v34  ;;  %3385 = vmatpush.msra.mxu3 %v3370_v13  ;;  %v5516_v34 = vpop.f32.mrf.mxu3 }
 0x1a0   : > { %v5504_v63 = vpop.f32.mrf.mxu1 }
 0x1a1   : > { %2371 = vmatmul.f32.gmra.mxu2 %v2486_v49 }
 0x1a2   : > { %2575 = vmatmul.f32.gmra.mxu3 %v2485_v20  ;;  %v2487_v20 = vld [vmem:[#allocation2 + $0x7f] sm:$0xff] }
 0x1a3   : > { %2197 = vmatmul.f32.gmra.mxu1 %v1922_v11  ;;  %v1923_v11 = vld [vmem:[#allocation2 + $0x85] sm:$0xff] }
 0x1a4   : > { %2788 = vmatmul.f32.gmra.mxu0 %v2698_v36  ;;  %v5508_v14 = vpop.f32.mrf.mxu2  ;;  %v5528_v13 = vpop.f32.mrf.mxu3 }
 0x1a8   : > { %v2153_v36 = vpop.f32.mrf.mxu1 }
 0x1a9   : > { %2374 = vmatmul.f32.gmra.mxu2 %v2487_v20  ;;  %v5523_v26 = vpop.f32.mrf.mxu0 }
 0x1aa   : > { %2578 = vmatmul.f32.gmra.mxu3 %v2486_v49  ;;  %v2700_v49 = vld [vmem:[#allocation2 + $0x80] sm:$0xff] }
 0x1ab   : > { %2200 = vmatmul.f32.gmra.mxu1 %v1923_v11 }
 0x1ac   : > { %2791 = vmatmul.f32.gmra.mxu0 %v2699_v50  ;;  %v5521_v3 = vpop.f32.mrf.mxu2  ;;  %v3156_v50 = vld [vmem:[%s6078_s3 + $0x338] sm:$0xff] }
 0x1ad   : > { %3173 = vmatpush.msra.mxu2 %v3156_v50 }
 0x1b0   : > { %v2156_v60 = vpop.f32.mrf.mxu1 }
 0x1b1   : > { %2377 = vmatmul.f32.gmra.mxu2 %v2488_v58 }
 0x1b2   : > { %2581 = vmatmul.f32.gmra.mxu3 %v2487_v20  ;;  %v3369_v20 = vld [vmem:[%s6078_s3 + $0x3b8] sm:$0xff] }
 0x1b3   : > { %2203 = vmatmul.f32.gmra.mxu1 %v1924_v38  ;;  %v2943_v38 = vld [vmem:[%s6078_s3 + $0x2b8] sm:$0xff]  ;;  %3386 = vmatpush.msra.mxu3 %v3369_v20 }
 0x1b4   : > { %2794 = vmatmul.f32.gmra.mxu0 %v2700_v49  ;;  %v2330_v33 = vpop.f32.mrf.mxu2  ;;  %2960 = vmatpush.msra.mxu1 %v2943_v38  ;;  %v6248_v49 = vmax.f32 %v5144_v32, 0.0  ;;  %v3582_v20 = vld [vmem:[%s6078_s3 + $0x438] sm:$0xff]  ;;  %v2154_v38 = vadd.f32 %v2153_v36, %v5435_v42 }
 0x1b5   : > { %v5543_v51 = vpop.f32.mrf.mxu3  ;;  %3599 = vmatpush.msra.mxu0 %v3582_v20  ;;  %v3155_v20 = vld [vmem:[%s6078_s3 + $0x330] sm:$0xff] }
 0x1b6   : > { %3174 = vmatpush.msra.mxu2 %v3155_v20  ;;  %v1928_v20 = vld [vmem:[#allocation2 + $0xad] sm:$0xff] }
 0x1b8   : > { %v5535_v8 = vpop.f32.mrf.mxu1 }
 0x1b9   : > { %v5533_v11 = vpop.f32.mrf.mxu0  ;;  %2380 = vmatmul.f32.gmra.mxu2 %v2489_v43 }
 0x1ba   : > { %2584 = vmatmul.f32.gmra.mxu3 %v2488_v58 }
 0x1bb   : > { %2206 = vmatmul.f32.gmra.mxu1 %v1925_v24 }
 0x1bc   : > { %4112 = vmatmul.msk.f32.gmra.mxu0 %vm5204_vm5, %v6248_v49  ;;  %v2333_v58 = vpop.f32.mrf.mxu2 }
 0x1c0   : > { %v5551_v7 = vpop.f32.mrf.mxu1 }
 0x1c1   : > { %v5549_v50 = vpop.f32.mrf.mxu0  ;;  %2383 = vmatmul.f32.gmra.mxu2 %v2490_v1 }
 0x1c2   : > { %2587 = vmatmul.f32.gmra.mxu3 %v2489_v43  ;;  %v2438_v43 = vadd.f32 %v2330_v33, %v2154_v38  ;;  %v2157_v33 = vadd.f32 %v2156_v60, %v5450_v0 }
 0x1c3   : > { %2209 = vmatmul.f32.gmra.mxu1 %v1926_v25 }
 0x1c4   : > { %2800 = vmatmul.f32.gmra.mxu0 %v2702_v47  ;;  %v2336_v24 = vpop.f32.mrf.mxu2  ;;  %v3368_v47 = vld [vmem:[%s6078_s3 + $0x3b0] sm:$0xff] }
 0x1c5   : > { %v5556_v32 = vpop.f32.mrf.mxu3  ;;  %3387 = vmatpush.msra.mxu3 %v3368_v47 }
 0x1c8   : > { %v5559_v21 = vpop.f32.mrf.mxu1 }
 0x1c9   : > { %v2756_v49 = vpop.f32.mrf.mxu0  ;;  %2386 = vmatmul.f32.gmra.mxu2 %v2491_v9 }
 0x1ca   : > { %2590 = vmatmul.f32.gmra.mxu3 %v2490_v1  ;;  %v2942_v1 = vld [vmem:[%s6078_s3 + $0x2b0] sm:$0xff] }
 0x1cb   : > { %2212 = vmatmul.f32.gmra.mxu1 %v1927_v61  ;;  %v2439_v61 = vadd.f32 %v2333_v58, %v2157_v33 }
 0x1cc   : > { %2803 = vmatmul.f32.gmra.mxu0 %v2703_v45  ;;  %v2339_v42 = vpop.f32.mrf.mxu2  ;;  %2961 = vmatpush.msra.mxu1 %v2942_v1  ;;  %v3581_v45 = vld [vmem:[%s6078_s3 + $0x430] sm:$0xff] }
 0x1cd   : > { %v2543_v25 = vpop.f32.mrf.mxu3  ;;  %3600 = vmatpush.msra.mxu0 %v3581_v45  ;;  %v1929_v1 = vld [vmem:[#allocation2 + $0xb5] sm:$0xff] }
 0x1ce   : > { %v2651_v36 = vadd.f32 %v2543_v25, %v2438_v43 }
 0x1d0   : > { %v5571_v38 = vadd.f32 %v2756_v49, %v2651_v36  ;;  %v5573_v53 = vpop.f32.mrf.mxu1  ;;  %v2160_v49 = vadd.f32 %v5535_v8, %v5467_v57  ;;  %v2493_v36 = vld [vmem:[#allocation2 + $0xaf] sm:$0xff] }
 0x1d1   : > { %v2759_v19 = vpop.f32.mrf.mxu0  ;;  %2389 = vmatmul.f32.gmra.mxu2 %v2492_v30 }
 0x1d2   : > { %2593 = vmatmul.f32.gmra.mxu3 %v2491_v9  ;;  %v2705_v9 = vld [vmem:[#allocation2 + $0xa8] sm:$0xff]  ;;  %v2440_v33 = vadd.f32 %v2336_v24, %v2160_v49 }
 0x1d3   : > { %2215 = vmatmul.f32.gmra.mxu1 %v1928_v20  ;;  %v2941_v24 = vld [vmem:[%s6078_s3 + $0x2a8] sm:$0xff] }
 0x1d4   : > { %2806 = vmatmul.f32.gmra.mxu0 %v2704_v62  ;;  %v2342_v60 = vpop.f32.mrf.mxu2  ;;  %v3154_v62 = vld [vmem:[%s6078_s3 + $0x328] sm:$0xff]  ;;  %2962 = vmatpush.msra.mxu1 %v2941_v24 }
 0x1d5   : > { %v2546_v43 = vpop.f32.mrf.mxu3  ;;  %3175 = vmatpush.msra.mxu2 %v3154_v62 }
 0x1d6   : > { %v2652_v0 = vadd.f32 %v2546_v43, %v2439_v61  ;;  %v2494_v43 = vld [vmem:[#allocation2 + $0xb7] sm:$0xff] }
 0x1d8   : > { %v5580_v47 = vadd.f32 %v2759_v19, %v2652_v0  ;;  %v2171_v58 = vpop.f32.mrf.mxu1  ;;  %v3367_v19 = vld [vmem:[%s6078_s3 + $0x3a8] sm:$0xff]  ;;  %v2706_v0 = vld [vmem:[#allocation2 + $0xb0] sm:$0xff] }
 0x1d9   : > { %v2762_v25 = vpop.f32.mrf.mxu0  ;;  %2392 = vmatmul.f32.gmra.mxu2 %v2493_v36  ;;  %3388 = vmatpush.msra.mxu3 %v3367_v19 }
 0x1da   : > { %2596 = vmatmul.f32.gmra.mxu3 %v2492_v30  ;;  %v2163_v30 = vadd.f32 %v5551_v7, %v5478_v55 }
 0x1db   : > { %2218 = vmatmul.f32.gmra.mxu1 %v1929_v1 }
 0x1dc   : > { %2809 = vmatmul.f32.gmra.mxu0 %v2705_v9  ;;  %v2345_v61 = vpop.f32.mrf.mxu2  ;;  %v1930_v9 = vld [vmem:[#allocation2 + $0xbd] sm:$0xff]  ;;  %v2441_v1 = vadd.f32 %v2339_v42, %v2163_v30 }
 0x1dd   : > { %v2549_v20 = vpop.f32.mrf.mxu3  ;;  %v2707_v30 = vld [vmem:[#allocation2 + $0xb8] sm:$0xff] }
 0x1de   : > { %v2653_v8 = vadd.f32 %v2549_v20, %v2440_v33  ;;  %v2172_v33 = vadd.f32 %v2171_v58, %v5523_v26  ;;  %v3580_v20 = vld [vmem:[%s6078_s3 + $0x428] sm:$0xff] }
 0x1df   : > { %3601 = vmatpush.msra.mxu0 %v3580_v20  ;;  %v1931_v26 = vld [vmem:[#allocation2 + $0xc5] sm:$0xff] }
 0x1e0   : > { %v5590_v57 = vadd.f32 %v2762_v25, %v2653_v8  ;;  %v2174_v49 = vpop.f32.mrf.mxu1  ;;  %v2166_v8 = vadd.f32 %v5559_v21, %v5498_v35  ;;  %v3153_v21 = vld [vmem:[%s6078_s3 + $0x320] sm:$0xff]  ;;  %v2169_v35 = vadd.f32 %v5573_v53, %v5506_v54 }
 0x1e1   : > { %v2765_v45 = vpop.f32.mrf.mxu0  ;;  %2395 = vmatmul.f32.gmra.mxu2 %v2494_v43  ;;  %v2940_v53 = vld [vmem:[%s6078_s3 + $0x2a0] sm:$0xff] }
 0x1e2   : > { %2599 = vmatmul.f32.gmra.mxu3 %v2493_v36  ;;  %v2495_v36 = vld [vmem:[#allocation2 + $0xbf] sm:$0xff]  ;;  %v2442_v58 = vadd.f32 %v2342_v60, %v2166_v8  ;;  %3176 = vmatpush.msra.mxu2 %v3153_v21  ;;  %v2443_v20 = vadd.f32 %v2345_v61, %v2169_v35 }
 0x1e3   : > { %2221 = vmatmul.f32.gmra.mxu1 %v1930_v9  ;;  %v3366_v60 = vld [vmem:[%s6078_s3 + $0x3a0] sm:$0xff] }
 0x1e4   : > { %2812 = vmatmul.f32.gmra.mxu0 %v2706_v0  ;;  %v2348_v55 = vpop.f32.mrf.mxu2  ;;  %v2175_v0 = vadd.f32 %v2174_v49, %v5533_v11  ;;  %v2708_v49 = vld [vmem:[#allocation2 + $0xc0] sm:$0xff]  ;;  %3389 = vmatpush.msra.mxu3 %v3366_v60  ;;  %v3152_v60 = vld [vmem:[%s6078_s3 + $0x318] sm:$0xff] }
 0x1e5   : > { %v2552_v7 = vpop.f32.mrf.mxu3  ;;  %v2444_v62 = vadd.f32 %v2348_v55, %v2172_v33  ;;  %2963 = vmatpush.msra.mxu1 %v2940_v53  ;;  %v3579_v61 = vld [vmem:[%s6078_s3 + $0x420] sm:$0xff]  ;;  %3177 = vmatpush.msra.mxu2 %v3152_v60 }
 0x1e6   : > { %v2654_v25 = vadd.f32 %v2552_v7, %v2441_v1  ;;  %3602 = vmatpush.msra.mxu0 %v3579_v61  ;;  %v1934_v53 = vld [vmem:[#allocation2 + $0xdd] sm:$0xff] }
 0x1e8   : > { %v5601_v19 = vadd.f32 %v2765_v45, %v2654_v25  ;;  %v2177_v24 = vpop.f32.mrf.mxu1  ;;  %v1932_v25 = vld [vmem:[#allocation2 + $0xcd] sm:$0xff] }
 0x1e9   : > { %v2768_v42 = vpop.f32.mrf.mxu0  ;;  %2398 = vmatmul.f32.gmra.mxu2 %v2495_v36  ;;  %v2178_v54 = vadd.f32 %v2177_v24, %v5549_v50 }
 0x1ea   : > { %2602 = vmatmul.f32.gmra.mxu3 %v2494_v43  ;;  %v2496_v43 = vld [vmem:[#allocation2 + $0xc7] sm:$0xff] }
 0x1eb   : > { %2224 = vmatmul.f32.gmra.mxu1 %v1931_v26 }
 0x1ec   : > { %2815 = vmatmul.f32.gmra.mxu0 %v2707_v30  ;;  %v2351_v1 = vpop.f32.mrf.mxu2 }
 0x1ed   : > { %v2555_v9 = vpop.f32.mrf.mxu3  ;;  %v2445_v7 = vadd.f32 %v2351_v1, %v2175_v0  ;;  %v2497_v0 = vld [vmem:[#allocation2 + $0xcf] sm:$0xff] }
 0x1ee   : > { %v2655_v33 = vadd.f32 %v2555_v9, %v2442_v58  ;;  %v2709_v9 = vld [vmem:[#allocation2 + $0xc8] sm:$0xff] }
 0x1f0   : > { %v5609_v45 = vadd.f32 %v2768_v42, %v2655_v33  ;;  %v5614_v55 = vpop.f32.mrf.mxu1  ;;  %v1933_v33 = vld [vmem:[#allocation2 + $0xd5] sm:$0xff] }
 0x1f1   : > { %v2771_v11 = vpop.f32.mrf.mxu0  ;;  %2401 = vmatmul.f32.gmra.mxu2 %v2496_v43 }
 0x1f2   : > { %6249 = vst [vmem:[#allocation34_spill] sm:$0xff] %v5609_v45  ;;  %2605 = vmatmul.f32.gmra.mxu3 %v2495_v36  ;;  %v3363_v45 = vld [vmem:[%s6078_s3 + $0x388] sm:$0xff] }
 0x1f3   : > { %2227 = vmatmul.f32.gmra.mxu1 %v1932_v25  ;;  %v2710_v25 = vld [vmem:[#allocation2 + $0xd0] sm:$0xff] }
 0x1f4   : > { %2818 = vmatmul.f32.gmra.mxu0 %v2708_v49  ;;  %v2354_v42 = vpop.f32.mrf.mxu2  ;;  %v2498_v49 = vld [vmem:[#allocation2 + $0xd7] sm:$0xff] }
 0x1f5   : > { %v2558_v8 = vpop.f32.mrf.mxu3  ;;  %v2446_v26 = vadd.f32 %v2354_v42, %v2178_v54 }
 0x1f6   : > { %v2656_v30 = vadd.f32 %v2558_v8, %v2443_v20 }
 0x1f8   : > { %v5620_v58 = vadd.f32 %v2771_v11, %v2656_v30  ;;  %v5625_v1 = vpop.f32.mrf.mxu1 }
 0x1f9   : > { %v2774_v36 = vpop.f32.mrf.mxu0  ;;  %2404 = vmatmul.f32.gmra.mxu2 %v2497_v0 }
 0x1fa   : > { %6250 = vst [vmem:[#allocation35_spill] sm:$0xff] %v5620_v58  ;;  %2608 = vmatmul.f32.gmra.mxu3 %v2496_v43  ;;  %v3365_v43 = vld [vmem:[%s6078_s3 + $0x398] sm:$0xff] }
 0x1fb   : > { %2230 = vmatmul.f32.gmra.mxu1 %v1933_v33  ;;  %3390 = vmatpush.msra.mxu3 %v3365_v43  ;;  %v1935_v33 = vld [vmem:[#allocation2 + $0xe5] sm:$0xff] }
 0x1fc   : > { %2821 = vmatmul.f32.gmra.mxu0 %v2709_v9  ;;  %v2357_v24 = vpop.f32.mrf.mxu2  ;;  %v2500_v43 = vld [vmem:[#allocation2 + $0xe7] sm:$0xff] }
 0x1fd   : > { %v2561_v50 = vpop.f32.mrf.mxu3 }
 0x1fe   : > { %v2657_v21 = vadd.f32 %v2561_v50, %v2444_v62  ;;  %v2939_v62 = vld [vmem:[%s6078_s3 + $0x298] sm:$0xff] }
 0x1ff   : > { %2964 = vmatpush.msra.mxu1 %v2939_v62  ;;  %v3578_v50 = vld [vmem:[%s6078_s3 + $0x418] sm:$0xff] }
 0x200   : > { %v5627_v35 = vadd.f32 %v2774_v36, %v2657_v21  ;;  %v5632_v20 = vpop.f32.mrf.mxu1  ;;  %v2499_v36 = vld [vmem:[#allocation2 + $0xdf] sm:$0xff]  ;;  %3603 = vmatpush.msra.mxu0 %v3578_v50  ;;  %v2184_v50 = vadd.f32 %v5625_v1, %v5407_v52 }
 0x201   : > { %v2777_v11 = vpop.f32.mrf.mxu0  ;;  %2407 = vmatmul.f32.gmra.mxu2 %v2498_v49 }
 0x202   : > { %6251 = vst [vmem:[#allocation36_spill] sm:$0xff] %v5627_v35  ;;  %2611 = vmatmul.f32.gmra.mxu3 %v2497_v0  ;;  %v2711_v0 = vld [vmem:[#allocation2 + $0xd8] sm:$0xff] }
 0x203   : > { %2233 = vmatmul.f32.gmra.mxu1 %v1934_v53 }
 0x204   : > { %2824 = vmatmul.f32.gmra.mxu0 %v2710_v25  ;;  %v2360_v8 = vpop.f32.mrf.mxu2 }
 0x205   : > { %v2564_v54 = vpop.f32.mrf.mxu3 }
 0x206   : > { %v2658_v42 = vadd.f32 %v2564_v54, %v2445_v7  ;;  %v1936_v54 = vld [vmem:[#allocation2 + $0xed] sm:$0xff] }
 0x208   : > { %v5640_v30 = vadd.f32 %v2777_v11, %v2658_v42  ;;  %v5642_v9 = vpop.f32.mrf.mxu1  ;;  %v2181_v11 = vadd.f32 %v5614_v55, %v5394_v59 }
 0x209   : > { %v2780_v61 = vpop.f32.mrf.mxu0  ;;  %2410 = vmatmul.f32.gmra.mxu2 %v2499_v36 }
 0x20a   : > { %6252 = vst [vmem:[#allocation37_spill] sm:$0xff] %v5640_v30  ;;  %2614 = vmatmul.f32.gmra.mxu3 %v2498_v49  ;;  %v2712_v49 = vld [vmem:[#allocation2 + $0xe0] sm:$0xff]  ;;  %v2447_v42 = vadd.f32 %v2357_v24, %v2181_v11  ;;  %v2501_v11 = vld [vmem:[#allocation2 + $0xef] sm:$0xff] }
 0x20b   : > { %2236 = vmatmul.f32.gmra.mxu1 %v1935_v33 }
 0x20c   : > { %2827 = vmatmul.f32.gmra.mxu0 %v2711_v0  ;;  %v5647_v60 = vpop.f32.mrf.mxu2  ;;  %v3151_v0 = vld [vmem:[%s6078_s3 + $0x310] sm:$0xff] }
 0x20d   : > { %v2567_v21 = vpop.f32.mrf.mxu3  ;;  %3178 = vmatpush.msra.mxu2 %v3151_v0  ;;  %v1937_v0 = vld [vmem:[#allocation2 + $0xf5] sm:$0xff] }
 0x20e   : > { %v2659_v7 = vadd.f32 %v2567_v21, %v2446_v26  ;;  %v3364_v26 = vld [vmem:[%s6078_s3 + $0x390] sm:$0xff] }
 0x20f   : > { %3391 = vmatpush.msra.mxu3 %v3364_v26 }
 0x210   : > { %v5651_v25 = vadd.f32 %v2780_v61, %v2659_v7  ;;  %v5653_v62 = vpop.f32.mrf.mxu1  ;;  %v5664_v61 = vadd.s32 272, %v4174_v4 }
 0x211   : > { %v2783_v53 = vpop.f32.mrf.mxu0  ;;  %2413 = vmatmul.f32.gmra.mxu2 %v2500_v43  ;;  %3392 = vmatpush.msra.mxu3 %v3363_v45  ;;  %v1939_v45 = vld [vmem:[#allocation2 + $0x105] sm:$0xff] }
 0x212   : > { %6253 = vst [vmem:[#allocation38_spill] sm:$0xff] %v5651_v25  ;;  %2617 = vmatmul.f32.gmra.mxu3 %v2499_v36  ;;  %v2938_v36 = vld [vmem:[%s6078_s3 + $0x290] sm:$0xff]  ;;  %v1384_v33 = vand.u32 65535, %v5664_v61 }
 0x213   : > { %2239 = vmatmul.f32.gmra.mxu1 %v1936_v54 }
 0x214   : > { %2830 = vmatmul.f32.gmra.mxu0 %v2712_v49  ;;  %v5661_v55 = vpop.f32.mrf.mxu2  ;;  %2965 = vmatpush.msra.mxu1 %v2938_v36  ;;  %v2713_v49 = vld [vmem:[#allocation2 + $0xe8] sm:$0xff]  ;;  %v1388_v26 = vmul.u32 58254, %v1384_v33  ;;  %v3577_v36 = vld [vmem:[%s6078_s3 + $0x410] sm:$0xff]  ;;  %v1387_v52 = vmul.u32 14564, %v1384_v33  ;;  %v2187_v33 = vadd.f32 %v5632_v20, %v5418_v46 }
 0x215   : > { %v2570_v59 = vpop.f32.mrf.mxu3  ;;  %3604 = vmatpush.msra.mxu0 %v3577_v36  ;;  %v3150_v46 = vld [vmem:[%s6078_s3 + $0x308] sm:$0xff] }
 0x216   : > { %v2660_v24 = vadd.f32 %v2570_v59, %v2447_v42  ;;  %v1385_v42 = vshrl.u32 %v5664_v61, 16  ;;  %v2448_v59 = vadd.f32 %v2360_v8, %v2184_v50  ;;  %v6255_v8 = vmov 0   ;;  %3179 = vmatpush.msra.mxu2 %v3150_v46 }
 0x218   : > { %v5672_v21 = vadd.f32 %v2783_v53, %v2660_v24  ;;  %v5674_v54 = vpop.f32.mrf.mxu1  ;;  %v1389_v1 = vmul.u32 14564, %v1385_v42  ;;  %v1391_v53 = vshll.u32 %v1388_v26, 16  ;;  %v1390_v25 = vmul.u32 58254, %v1385_v42 }
 0x219   : > { %v2786_v7 = vpop.f32.mrf.mxu0  ;;  %2416 = vmatmul.f32.gmra.mxu2 %v2501_v11  ;;  %v1413_v42 = vand.u32 65535, %v5684_v56 }
 0x21a   : > { %6254 = vst [vmem:[#allocation39_spill] sm:$0xff] %v5672_v21  ;;  %2620 = vmatmul.f32.gmra.mxu3 %v2500_v43  ;;  %v1393_v30 = vshll.u32 %v1389_v1, 16  ;;  %vm1395_vm12 = vc.u32 %v1387_v52, %v1391_v53  ;;  %v1397_v35 = vadd.s32 %v1391_v53, %v1387_v52  ;;  %v2714_v52 = vld [vmem:[#allocation2 + $0xf0] sm:$0xff]  ;;  %v1938_v53 = vld [vmem:[#allocation2 + $0xfd] sm:$0xff] }
 0x21b   : > { %2242 = vmatmul.f32.gmra.mxu1 %v1937_v0  ;;  %v1396_v50 = vsel %vm1395_vm12, 1, %v6255_v8  ;;  %v1417_v20 = vmul.u32 58254, %v1413_v42 }
 0x21c   : > { %2833 = vmatmul.f32.gmra.mxu0 %v2713_v49  ;;  %v5680_v21 = vpop.f32.mrf.mxu2  ;;  %v1398_v58 = vadd.s32 %v1396_v50, %v1390_v25  ;;  %vm1399_vm14 = vc.u32 %v1397_v35, %v1393_v30  ;;  %v1414_v25 = vshrl.u32 %v5684_v56, 16  ;;  %v2449_v35 = vadd.f32 %v5647_v60, %v2187_v33 }
 0x21d   : > { %v2573_v24 = vpop.f32.mrf.mxu3  ;;  %v1400_v0 = vsel %vm1399_vm14, 1, %v6255_v8  ;;  %v1394_v30 = vshrl.u32 %v1389_v1, 16 }
 0x21e   : > { %v2661_v43 = vadd.f32 %v2573_v24, %v2448_v59  ;;  %v1392_v24 = vshrl.u32 %v1388_v26, 16  ;;  %v1402_v4 = vadd.s32 %v1400_v0, %v1398_v58  ;;  %v1418_v50 = vmul.u32 14564, %v1414_v25 }
 0x21f   : > { %v1420_v26 = vshll.u32 %v1417_v20, 16 }
 0x220   : > { %v5688_v49 = vadd.f32 %v2786_v7, %v2661_v43  ;;  %v5692_v59 = vpop.f32.mrf.mxu1  ;;  %v1403_v7 = vadd.s32 %v1402_v4, %v1392_v24  ;;  %v1416_v43 = vmul.u32 14564, %v1413_v42  ;;  %v1422_v60 = vshll.u32 %v1418_v50, 16  ;;  %v2937_v24 = vld [vmem:[%s6078_s3 + $0x288] sm:$0xff] }
 0x221   : > { %v2789_v36 = vpop.f32.mrf.mxu0  ;;  %2419 = vmatmul.f32.gmra.mxu2 %v2502_v16  ;;  %2966 = vmatpush.msra.mxu1 %v2937_v24 }
 0x222   : > { %6256 = vst [vmem:[#allocation40_spill] sm:$0xff] %v5688_v49  ;;  %2623 = vmatmul.f32.gmra.mxu3 %v2501_v11  ;;  %v1404_v11 = vadd.s32 %v1403_v7, %v1394_v30  ;;  %v1419_v49 = vmul.u32 58254, %v1414_v25  ;;  %vm1424_vm2 = vc.u32 %v1416_v43, %v1420_v26  ;;  %v1426_v46 = vadd.s32 %v1420_v26, %v1416_v43  ;;  %v2715_v30 = vld [vmem:[#allocation2 + $0xf8] sm:$0xff] }
 0x223   : > { %2245 = vmatmul.f32.gmra.mxu1 %v1938_v53  ;;  %v1425_v42 = vsel %vm1424_vm2, 1, %v6255_v8  ;;  %v1421_v26 = vshrl.u32 %v1417_v20, 16 }
 0x224   : > { %2836 = vmatmul.f32.gmra.mxu0 %v2714_v52  ;;  %v5699_v0 = vpop.f32.mrf.mxu2  ;;  %v1405_v1 = vshrl.u32 %v1404_v11, 4  ;;  %v2190_v52 = vadd.f32 %v5642_v9, %v5433_v31  ;;  %v1427_v4 = vadd.s32 %v1425_v42, %v1419_v49  ;;  %vm1428_vm12 = vc.u32 %v1426_v46, %v1422_v60  ;;  %v4107_v49 = vld [vmem:[%s6076_s1] ss:$0 sm:$0xff] }
 0x225   : > { %v2576_v58 = vpop.f32.mrf.mxu3  ;;  %v1429_v31 = vsel %vm1428_vm12, 1, %v6255_v8 }
 0x226   : > { %v2662_v33 = vadd.f32 %v2576_v58, %v2449_v35  ;;  %v2503_v35 = vld [vmem:[#allocation2 + $0xff] sm:$0xff]  ;;  %v1406_v43 = vmul.u32 18, %v1405_v1  ;;  %v2450_v9 = vadd.f32 %v5661_v55, %v2190_v52  ;;  %v1431_v58 = vadd.s32 %v1429_v31, %v1427_v4  ;;  %v2504_v31 = vld [vmem:[#allocation2 + $0x107] sm:$0xff] }
 0x227   : > { %v2193_v4 = vadd.f32 %v5653_v62, %v5448_v12  ;;  %v277_v62 = vld [vmem:[%s4199_s10 + $0x118] sm:$0xff] }
 0x228   : > { %v5707_v53 = vadd.f32 %v2789_v36, %v2662_v33  ;;  %v5712_v7 = vpop.f32.mrf.mxu1  ;;  %v276_v36 = vld [vmem:[%s4199_s10 + $0x110] sm:$0xff]  ;;  %v1407_v60 = vsub.s32 %v5664_v61, %v1406_v43  ;;  %v1423_v33 = vshrl.u32 %v1418_v50, 16  ;;  %v1432_v46 = vadd.s32 %v1431_v58, %v1421_v26  ;;  %v3576_v61 = vld [vmem:[%s6078_s3 + $0x408] sm:$0xff] }
 0x229   : > { %v2792_v25 = vpop.f32.mrf.mxu0  ;;  %2422 = vmatmul.f32.gmra.mxu2 %v2503_v35  ;;  %v316_v11 = vmul.f32 %v4107_v49, %v276_v36  ;;  %3605 = vmatpush.msra.mxu0 %v3576_v61  ;;  %v1940_v58 = vld [vmem:[#allocation2 + $0x10d] sm:$0xff]  ;;  %v2451_v12 = vadd.f32 %v5680_v21, %v2193_v4 }
 0x22a   : > { %2626 = vmatmul.f32.gmra.mxu3 %v2502_v16  ;;  %v4108_v16 = vld [vmem:[%s6077_s2] ss:$0 sm:$0xff]  ;;  %vm1473_vm14 = vcmp.ne.s32.totalorder %v1407_v60, 0  ;;  %vm1509_vm2 = vcmp.lt.s32.totalorder %v1407_v60, 0  ;;  %v1581_v8 = vadd.s32 18, %v1407_v60  ;;  %v1433_v50 = vadd.s32 %v1432_v46, %v1423_v33  ;;  %v2505_v4 = vld [vmem:[#allocation2 + $0x10f] sm:$0xff] }
 0x22b   : > { %2248 = vmatmul.f32.gmra.mxu1 %v1939_v45  ;;  %v5726_v55 = vadd.f32 %v4108_v16, %v316_v11  ;;  %vm1545_vm12 = vmand %vm1509_vm2, %vm1473_vm14 }
 0x22c   : > { %2839 = vmatmul.f32.gmra.mxu0 %v2715_v30  ;;  %v5721_v1 = vpop.f32.mrf.mxu2  ;;  %v1617_v52 = vsel %vm1545_vm12, %v1581_v8, %v1407_v60  ;;  %v1434_v43 = vshrl.u32 %v1433_v50, 4  ;;  %v317_v60 = vmul.f32 %v4107_v49, %v277_v62  ;;  %v3362_v50 = vld [vmem:[%s6078_s3 + $0x380] sm:$0xff] }
 0x22d   : > { %v2579_v20 = vpop.f32.mrf.mxu3  ;;  %v1761_v24 = vmax.f32 %v5726_v55, 0.0  ;;  %vm5736_vm1 = vcmp.lt.s32.totalorder %v1617_v52, 16  ;;  %3393 = vmatpush.msra.mxu3 %v3362_v50 }
 0x22e   : > { %v2663_v42 = vadd.f32 %v2579_v20, %v2450_v9  ;;  %v2716_v9 = vld [vmem:[#allocation2 + $0x100] sm:$0xff]  ;;  %v5749_v8 = vadd.f32 %v4108_v16, %v317_v60 }
 0x22f   : > { %v1869_v11 = vsel %vm5736_vm1, %v1761_v24, 0.0 }
 0x230   : > { %v5734_v30 = vadd.f32 %v2792_v25, %v2663_v42  ;;  %v5740_v36 = vpop.f32.mrf.mxu1  ;;  %1905 = vst [vmem:[#allocation2 + $0x128] sm:$0xff] %v1869_v11  ;;  %v1435_v25 = vmul.u32 18, %v1434_v43  ;;  %v1762_v61 = vmax.f32 %v5749_v8, 0.0  ;;  %v2717_v43 = vld [vmem:[#allocation2 + $0x108] sm:$0xff] }
 0x231   : > { %v2795_v26 = vpop.f32.mrf.mxu0  ;;  %2425 = vmatmul.f32.gmra.mxu2 %v2504_v31 }
 0x232   : > { %2629 = vmatmul.f32.gmra.mxu3 %v2503_v35  ;;  %v1436_v33 = vsub.s32 %v5684_v56, %v1435_v25  ;;  %v3149_v35 = vld [vmem:[%s6078_s3 + $0x300] sm:$0xff]  ;;  %v2196_v56 = vadd.f32 %v5674_v54, %v5465_v23  ;;  %v2199_v25 = vadd.f32 %v5692_v59, %v5476_v15 }
 0x233   : > { %2251 = vmatmul.f32.gmra.mxu1 %v1940_v58  ;;  %3180 = vmatpush.msra.mxu2 %v3149_v35  ;;  %v1941_v58 = vld [vmem:[#allocation2 + $0x115] sm:$0xff]  ;;  %v2936_v23 = vld [vmem:[%s6078_s3 + $0x280] sm:$0xff] }
 0x234   : > { %2842 = vmatmul.f32.gmra.mxu0 %v2716_v9  ;;  %v2378_v20 = vpop.f32.mrf.mxu2  ;;  %vm1474_vm14 = vcmp.ne.s32.totalorder %v1436_v33, 0  ;;  %vm1510_vm2 = vcmp.lt.s32.totalorder %v1436_v33, 0  ;;  %v1582_v49 = vadd.s32 18, %v1436_v33  ;;  %2967 = vmatpush.msra.mxu1 %v2936_v23  ;;  %v2718_v35 = vld [vmem:[#allocation2 + $0x110] sm:$0xff] }
 0x235   : > { %v2582_v46 = vpop.f32.mrf.mxu3  ;;  %vm5754_vm12 = vmand %vm1510_vm2, %vm1474_vm14 }
 0x236   : > { %v2664_v42 = vadd.f32 %v2582_v46, %v2451_v12  ;;  %v1618_v11 = vsel %vm5754_vm12, %v1582_v49, %v1436_v33  ;;  %v2452_v12 = vadd.f32 %v5699_v0, %v2196_v56  ;;  %v3575_v33 = vld [vmem:[%s6078_s3 + $0x400] sm:$0xff]  ;;  %v2453_v56 = vadd.f32 %v5721_v1, %v2199_v25  ;;  %v3113_v25 = vld [vmem:[#allocation2 + $0x29] sm:$0xff] }
 0x237   : > { %vm5774_vm14 = vcmp.lt.s32.totalorder %v1618_v11, 16  ;;  %v1942_v49 = vld [vmem:[#allocation2 + $0x11d] sm:$0xff]  ;;  %3606 = vmatpush.msra.mxu0 %v3575_v33  ;;  %v2205_v33 = vadd.f32 %v5740_v36, %v5504_v63 }
 0x238   : > { %v5761_v16 = vadd.f32 %v2795_v26, %v2664_v42  ;;  %v5766_v9 = vpop.f32.mrf.mxu1  ;;  %v1870_v26 = vsel %vm5774_vm14, %v1762_v61, 0.0  ;;  %v2506_v42 = vld [vmem:[#allocation2 + $0x117] sm:$0xff]  ;;  %v2507_v11 = vld [vmem:[#allocation2 + $0x11f] sm:$0xff] }
 0x239   : > { %v2798_v52 = vpop.f32.mrf.mxu0  ;;  %2428 = vmatmul.f32.gmra.mxu2 %v2505_v4  ;;  %1906 = vst [vmem:[#allocation2 + $0x130] sm:$0xff] %v1870_v26  ;;  %v2900_v26 = vld [vmem:[#allocation2 + $0x19] sm:$0xff] }
 0x23a   : > { %2632 = vmatmul.f32.gmra.mxu3 %v2504_v31 }
 0x23b   : > { %2254 = vmatmul.f32.gmra.mxu1 %v1941_v58 }
 0x23c   : > { %2845 = vmatmul.f32.gmra.mxu0 %v2717_v43  ;;  %v2381_v0 = vpop.f32.mrf.mxu2 }
 0x23d   : > { %v2585_v31 = vpop.f32.mrf.mxu3 }
 0x23e   : > { %v2665_v62 = vadd.f32 %v2585_v31, %v2452_v12  ;;  %v2719_v12 = vld [vmem:[#allocation2 + $0x118] sm:$0xff] }
 0x240   : > { %v5784_v60 = vadd.f32 %v2798_v52, %v2665_v62  ;;  %v2210_v21 = vpop.f32.mrf.mxu1  ;;  %v2202_v52 = vadd.f32 %v5712_v7, %v5493_v5 }
 0x241   : > { %v2801_v46 = vpop.f32.mrf.mxu0  ;;  %2431 = vmatmul.f32.gmra.mxu2 %v2506_v42 }
 0x242   : > { %2635 = vmatmul.f32.gmra.mxu3 %v2505_v4  ;;  %v2454_v4 = vadd.f32 %v2378_v20, %v2202_v52  ;;  %v3114_v52 = vld [vmem:[#allocation2 + $0x31] sm:$0xff] }
 0x243   : > { %2257 = vmatmul.f32.gmra.mxu1 %v1942_v49  ;;  %v2901_v49 = vld [vmem:[#allocation2 + $0x21] sm:$0xff] }
 0x244   : > { %2848 = vmatmul.f32.gmra.mxu0 %v2718_v35  ;;  %v2384_v15 = vpop.f32.mrf.mxu2 }
 0x245   : > { %v2588_v50 = vpop.f32.mrf.mxu3 }
 0x246   : > { %v2666_v59 = vadd.f32 %v2588_v50, %v2453_v56  ;;  %v2455_v56 = vadd.f32 %v2381_v0, %v2205_v33 }
 0x248   : > { %v5792_v43 = vadd.f32 %v2801_v46, %v2666_v59  ;;  %v2213_v23 = vpop.f32.mrf.mxu1  ;;  %v2720_v46 = vld [vmem:[#allocation2 + $0x120] sm:$0xff] }
 0x249   : > { %v2804_v58 = vpop.f32.mrf.mxu0  ;;  %2434 = vmatmul.f32.gmra.mxu2 %v2507_v11  ;;  %v2508_v59 = vld [vmem:[#allocation2 + $0x127] sm:$0xff] }
 0x24a   : > { %2638 = vmatmul.f32.gmra.mxu3 %v2506_v42 }
 0x24b   : > { %2968 = vmatmul.f32.vlgmr.msra.gmra.mxu1 %v2900_v26 }
 0x24c   : > { %2851 = vmatmul.f32.gmra.mxu0 %v2719_v12  ;;  %v2387_v31 = vpop.f32.mrf.mxu2  ;;  %v2208_v12 = vadd.f32 %v5766_v9, %v5405_v28  ;;  %v2211_v28 = vadd.f32 %v2210_v21, %v5416_v27  ;;  %v2214_v27 = vadd.f32 %v2213_v23, %v5437_v37  ;;  %v3540_v23 = vld [vmem:[#allocation2 + $0x33] sm:$0xff] }
 0x24d   : > { %v2591_v1 = vpop.f32.mrf.mxu3 }
 0x24e   : > { %v2667_v62 = vadd.f32 %v2591_v1, %v2454_v4  ;;  %v2456_v26 = vadd.f32 %v2384_v15, %v2208_v12  ;;  %v2509_v1 = vld [vmem:[#allocation2 + $0x12f] sm:$0xff]  ;;  %v2457_v15 = vadd.f32 %v2387_v31, %v2211_v28  ;;  %v3328_v28 = vld [vmem:[#allocation2 + $0x3a] sm:$0xff] }
 0x24f   : > { %v3117_v12 = vld [vmem:[#allocation2 + $0x49] sm:$0xff] }
 0x250   : > { %v5796_v5 = vadd.f32 %v2804_v58, %v2667_v62  ;;  %v2216_v35 = vpop.f32.mrf.mxu1  ;;  %v3115_v62 = vld [vmem:[#allocation2 + $0x39] sm:$0xff] }
 0x251   : > { %v2807_v7 = vpop.f32.mrf.mxu0  ;;  %3181 = vmatmul.f32.vlgmr.msra.gmra.mxu2 %v3113_v25 }
 0x252   : > { %2641 = vmatmul.f32.gmra.mxu3 %v2507_v11 }
 0x253   : > { %2971 = vmatmul.f32.gmra.mxu1 %v2901_v49  ;;  %v3116_v49 = vld [vmem:[#allocation2 + $0x41] sm:$0xff] }
 0x254   : > { %2854 = vmatmul.f32.gmra.mxu0 %v2720_v46  ;;  %v2390_v42 = vpop.f32.mrf.mxu2  ;;  %v3326_v46 = vld [vmem:[#allocation2 + $0x2a] sm:$0xff] }
 0x255   : > { %v2594_v20 = vpop.f32.mrf.mxu3  ;;  %v2458_v31 = vadd.f32 %v2390_v42, %v2214_v27 }
 0x256   : > { %v2668_v50 = vadd.f32 %v2594_v20, %v2455_v56  ;;  %v3539_v20 = vld [vmem:[#allocation2 + $0x2b] sm:$0xff] }
 0x258   : > { %v5800_v63 = vadd.f32 %v2807_v7, %v2668_v50  ;;  %v2219_v58 = vpop.f32.mrf.mxu1 }
 0x259   : > { %v2810_v36 = vpop.f32.mrf.mxu0  ;;  %3184 = vmatmul.f32.gmra.mxu2 %v3114_v52 }
 0x25a   : > { %2644 = vmatmul.f32.gmra.mxu3 %v2508_v59 }
 0x25b   : > { %2974 = vmatmul.f32.gmra.mxu1 %v3113_v25 }
 0x25c   : > { %4113 = vmatmul.msk.f32.gmra.mxu0 %vm5736_vm1, %v1761_v24  ;;  %v2393_v11 = vpop.f32.mrf.mxu2 }
 0x25d   : > { %v2597_v0 = vpop.f32.mrf.mxu3 }
 0x25e   : > { %v2669_v4 = vadd.f32 %v2597_v0, %v2456_v26 }
 0x260   : > { %v5807_v9 = vadd.f32 %v2810_v36, %v2669_v4  ;;  %v2222_v7 = vpop.f32.mrf.mxu1  ;;  %v2217_v36 = vadd.f32 %v2216_v35, %v5452_v22  ;;  %v3541_v35 = vld [vmem:[#allocation2 + $0x3b] sm:$0xff] }
 0x261   : > { %v2813_v33 = vpop.f32.mrf.mxu0  ;;  %3187 = vmatmul.f32.gmra.mxu2 %v3115_v62 }
 0x262   : > { %2647 = vmatmul.f32.gmra.mxu3 %v2509_v1  ;;  %v2459_v4 = vadd.f32 %v2393_v11, %v2217_v36 }
 0x263   : > { %2977 = vmatmul.f32.gmra.mxu1 %v3114_v52  ;;  %v3327_v52 = vld [vmem:[#allocation2 + $0x32] sm:$0xff] }
 0x264   : > { %4114 = vmatmul.msk.f32.gmra.mxu0 %vm5774_vm14, %v1762_v61  ;;  %v2396_v24 = vpop.f32.mrf.mxu2 }
 0x265   : > { %v2600_v55 = vpop.f32.mrf.mxu3 }
 0x266   : > { %v2670_v25 = vadd.f32 %v2600_v55, %v2457_v15  ;;  %v2220_v15 = vadd.f32 %v2219_v58, %v5469_v17  ;;  %v3542_v58 = vld [vmem:[#allocation2 + $0x43] sm:$0xff] }
 0x268   : > { %v5814_v21 = vadd.f32 %v2813_v33, %v2670_v25  ;;  %v2225_v50 = vpop.f32.mrf.mxu1  ;;  %v3118_v33 = vld [vmem:[#allocation2 + $0x51] sm:$0xff] }
 0x269   : > { %v2816_v56 = vpop.f32.mrf.mxu0  ;;  %3190 = vmatmul.f32.gmra.mxu2 %v3116_v49 }
 0x26a   : > { %3394 = vmatmul.f32.vlgmr.msra.gmra.mxu3 %v3326_v46  ;;  %v2460_v46 = vadd.f32 %v2396_v24, %v2220_v15 }
 0x26b   : > { %2980 = vmatmul.f32.gmra.mxu1 %v3115_v62 }
 0x26c   : > { %3607 = vmatmul.f32.vlgmr.msra.gmra.mxu0 %v3539_v20  ;;  %v2399_v61 = vpop.f32.mrf.mxu2  ;;  %v3119_v20 = vld [vmem:[#allocation2 + $0x59] sm:$0xff] }
 0x26d   : > { %v2603_v8 = vpop.f32.mrf.mxu3 }
 0x26e   : > { %v2671_v59 = vadd.f32 %v2603_v8, %v2458_v31  ;;  %v2223_v31 = vadd.f32 %v2222_v7, %v5480_v48  ;;  %v3543_v7 = vld [vmem:[#allocation2 + $0x4b] sm:$0xff] }
 0x270   : > { %v5817_v26 = vadd.f32 %v2816_v56, %v2671_v59  ;;  %v2228_v0 = vpop.f32.mrf.mxu1  ;;  %v3329_v56 = vld [vmem:[#allocation2 + $0x42] sm:$0xff] }
 0x271   : > { %v2819_v37 = vpop.f32.mrf.mxu0  ;;  %3193 = vmatmul.f32.gmra.mxu2 %v3117_v12 }
 0x272   : > { %3397 = vmatmul.f32.gmra.mxu3 %v3327_v52  ;;  %v2461_v52 = vadd.f32 %v2399_v61, %v2223_v31 }
 0x273   : > { %2983 = vmatmul.f32.gmra.mxu1 %v3116_v49 }
 0x274   : > { %3610 = vmatmul.f32.gmra.mxu0 %v3540_v23  ;;  %v2402_v1 = vpop.f32.mrf.mxu2  ;;  %v3120_v23 = vld [vmem:[#allocation2 + $0x61] sm:$0xff] }
 0x275   : > { %v2606_v42 = vpop.f32.mrf.mxu3 }
 0x276   : > { %v2672_v62 = vadd.f32 %v2606_v42, %v2459_v4  ;;  %v2226_v4 = vadd.f32 %v2225_v50, %v5500_v39  ;;  %v3544_v50 = vld [vmem:[#allocation2 + $0x53] sm:$0xff] }
 0x278   : > { %v5820_v55 = vadd.f32 %v2819_v37, %v2672_v62  ;;  %v2231_v25 = vpop.f32.mrf.mxu1  ;;  %v3330_v37 = vld [vmem:[#allocation2 + $0x4a] sm:$0xff] }
 0x279   : > { %v2822_v22 = vpop.f32.mrf.mxu0  ;;  %3196 = vmatmul.f32.gmra.mxu2 %v3118_v33 }
 0x27a   : > { %3400 = vmatmul.f32.gmra.mxu3 %v3328_v28  ;;  %v2462_v28 = vadd.f32 %v2402_v1, %v2226_v4 }
 0x27b   : > { %2986 = vmatmul.f32.gmra.mxu1 %v3117_v12 }
 0x27c   : > { %3613 = vmatmul.f32.gmra.mxu0 %v3541_v35  ;;  %v2405_v27 = vpop.f32.mrf.mxu2  ;;  %v3121_v35 = vld [vmem:[#allocation2 + $0x69] sm:$0xff] }
 0x27d   : > { %v2609_v11 = vpop.f32.mrf.mxu3 }
 0x27e   : > { %v2673_v49 = vadd.f32 %v2609_v11, %v2460_v46  ;;  %v2229_v46 = vadd.f32 %v2228_v0, %v5508_v14  ;;  %v3545_v0 = vld [vmem:[#allocation2 + $0x5b] sm:$0xff] }
 0x280   : > { %v5823_v8 = vadd.f32 %v2822_v22, %v2673_v49  ;;  %v2234_v59 = vpop.f32.mrf.mxu1  ;;  %v3331_v22 = vld [vmem:[#allocation2 + $0x52] sm:$0xff] }
 0x281   : > { %v2825_v17 = vpop.f32.mrf.mxu0  ;;  %3199 = vmatmul.f32.gmra.mxu2 %v3119_v20 }
 0x282   : > { %3403 = vmatmul.f32.gmra.mxu3 %v3329_v56  ;;  %v2463_v56 = vadd.f32 %v2405_v27, %v2229_v46 }
 0x283   : > { %2989 = vmatmul.f32.gmra.mxu1 %v3118_v33 }
 0x284   : > { %3616 = vmatmul.f32.gmra.mxu0 %v3542_v58  ;;  %v2408_v36 = vpop.f32.mrf.mxu2  ;;  %v3122_v58 = vld [vmem:[#allocation2 + $0x71] sm:$0xff] }
 0x285   : > { %v2612_v24 = vpop.f32.mrf.mxu3 }
 0x286   : > { %v2674_v12 = vadd.f32 %v2612_v24, %v2461_v52  ;;  %v2232_v52 = vadd.f32 %v2231_v25, %v5521_v3  ;;  %v3546_v25 = vld [vmem:[#allocation2 + $0x63] sm:$0xff] }
 0x288   : > { %v5826_v42 = vadd.f32 %v2825_v17, %v2674_v12  ;;  %v2237_v62 = vpop.f32.mrf.mxu1  ;;  %v3332_v17 = vld [vmem:[#allocation2 + $0x5a] sm:$0xff] }
 0x289   : > { %v2828_v48 = vpop.f32.mrf.mxu0  ;;  %3202 = vmatmul.f32.gmra.mxu2 %v3120_v23 }
 0x28a   : > { %3406 = vmatmul.f32.gmra.mxu3 %v3330_v37  ;;  %v2464_v37 = vadd.f32 %v2408_v36, %v2232_v52 }
 0x28b   : > { %2992 = vmatmul.f32.gmra.mxu1 %v3119_v20 }
 0x28c   : > { %3619 = vmatmul.f32.gmra.mxu0 %v3543_v7  ;;  %v2411_v15 = vpop.f32.mrf.mxu2  ;;  %v3123_v7 = vld [vmem:[#allocation2 + $0x79] sm:$0xff] }
 0x28d   : > { %v2615_v61 = vpop.f32.mrf.mxu3 }
 0x28e   : > { %v2675_v33 = vadd.f32 %v2615_v61, %v2462_v28  ;;  %v2235_v28 = vadd.f32 %v2234_v59, %v5443_v10  ;;  %v3547_v59 = vld [vmem:[#allocation2 + $0x6b] sm:$0xff] }
 0x290   : > { %v5829_v11 = vadd.f32 %v2828_v48, %v2675_v33  ;;  %v2240_v49 = vpop.f32.mrf.mxu1  ;;  %v3333_v48 = vld [vmem:[#allocation2 + $0x62] sm:$0xff] }
 0x291   : > { %v2831_v39 = vpop.f32.mrf.mxu0  ;;  %3205 = vmatmul.f32.gmra.mxu2 %v3121_v35 }
 0x292   : > { %3409 = vmatmul.f32.gmra.mxu3 %v3331_v22  ;;  %v2465_v22 = vadd.f32 %v2411_v15, %v2235_v28 }
 0x293   : > { %2995 = vmatmul.f32.gmra.mxu1 %v3120_v23 }
 0x294   : > { %3622 = vmatmul.f32.gmra.mxu0 %v3544_v50  ;;  %v2414_v31 = vpop.f32.mrf.mxu2  ;;  %v3124_v50 = vld [vmem:[#allocation2 + $0x81] sm:$0xff] }
 0x295   : > { %v2618_v1 = vpop.f32.mrf.mxu3 }
 0x296   : > { %v2676_v20 = vadd.f32 %v2618_v1, %v2463_v56  ;;  %v2238_v56 = vadd.f32 %v2237_v62, %v5454_v18  ;;  %v3548_v62 = vld [vmem:[#allocation2 + $0x73] sm:$0xff] }
 0x298   : > { %v5832_v24 = vadd.f32 %v2831_v39, %v2676_v20  ;;  %v2243_v12 = vpop.f32.mrf.mxu1  ;;  %v3334_v39 = vld [vmem:[#allocation2 + $0x6a] sm:$0xff] }
 0x299   : > { %v2834_v14 = vpop.f32.mrf.mxu0  ;;  %3208 = vmatmul.f32.gmra.mxu2 %v3122_v58 }
 0x29a   : > { %3412 = vmatmul.f32.gmra.mxu3 %v3332_v17  ;;  %v2466_v17 = vadd.f32 %v2414_v31, %v2238_v56 }
 0x29b   : > { %2998 = vmatmul.f32.gmra.mxu1 %v3121_v35 }
 0x29c   : > { %3625 = vmatmul.f32.gmra.mxu0 %v3545_v0  ;;  %v2417_v4 = vpop.f32.mrf.mxu2  ;;  %v3125_v0 = vld [vmem:[#allocation2 + $0x89] sm:$0xff] }
 0x29d   : > { %v2621_v27 = vpop.f32.mrf.mxu3 }
 0x29e   : > { %v2677_v23 = vadd.f32 %v2621_v27, %v2464_v37  ;;  %v2241_v37 = vadd.f32 %v2240_v49, %v5471_v29  ;;  %v3549_v49 = vld [vmem:[#allocation2 + $0x7b] sm:$0xff] }
 0x2a0   : > { %v5835_v61 = vadd.f32 %v2834_v14, %v2677_v23  ;;  %v2246_v33 = vpop.f32.mrf.mxu1  ;;  %v3335_v14 = vld [vmem:[#allocation2 + $0x72] sm:$0xff] }
 0x2a1   : > { %v2837_v3 = vpop.f32.mrf.mxu0  ;;  %3211 = vmatmul.f32.gmra.mxu2 %v3123_v7 }
 0x2a2   : > { %3415 = vmatmul.f32.gmra.mxu3 %v3333_v48  ;;  %v2467_v48 = vadd.f32 %v2417_v4, %v2241_v37 }
 0x2a3   : > { %3001 = vmatmul.f32.gmra.mxu1 %v3122_v58 }
 0x2a4   : > { %3628 = vmatmul.f32.gmra.mxu0 %v3546_v25  ;;  %v2420_v46 = vpop.f32.mrf.mxu2  ;;  %v3126_v25 = vld [vmem:[#allocation2 + $0x91] sm:$0xff] }
 0x2a5   : > { %v2624_v36 = vpop.f32.mrf.mxu3 }
 0x2a6   : > { %v2678_v35 = vadd.f32 %v2624_v36, %v2465_v22  ;;  %v2244_v22 = vadd.f32 %v2243_v12, %v5488_v41  ;;  %v3550_v12 = vld [vmem:[#allocation2 + $0x83] sm:$0xff] }
 0x2a8   : > { %v5838_v1 = vadd.f32 %v2837_v3, %v2678_v35  ;;  %v2249_v20 = vpop.f32.mrf.mxu1  ;;  %v3336_v3 = vld [vmem:[#allocation2 + $0x7a] sm:$0xff] }
 0x2a9   : > { %v2840_v10 = vpop.f32.mrf.mxu0  ;;  %3214 = vmatmul.f32.gmra.mxu2 %v3124_v50 }
 0x2aa   : > { %3418 = vmatmul.f32.gmra.mxu3 %v3334_v39  ;;  %v2468_v39 = vadd.f32 %v2420_v46, %v2244_v22 }
 0x2ab   : > { %3004 = vmatmul.f32.gmra.mxu1 %v3123_v7 }
 0x2ac   : > { %3631 = vmatmul.f32.gmra.mxu0 %v3547_v59  ;;  %v2423_v52 = vpop.f32.mrf.mxu2  ;;  %v3127_v59 = vld [vmem:[#allocation2 + $0x99] sm:$0xff] }
 0x2ad   : > { %v2627_v15 = vpop.f32.mrf.mxu3 }
 0x2ae   : > { %v2679_v58 = vadd.f32 %v2627_v15, %v2466_v17  ;;  %v2247_v17 = vadd.f32 %v2246_v33, %v5502_v40  ;;  %v3551_v33 = vld [vmem:[#allocation2 + $0x8b] sm:$0xff] }
 0x2b0   : > { %v5841_v27 = vadd.f32 %v2840_v10, %v2679_v58  ;;  %v2252_v23 = vpop.f32.mrf.mxu1  ;;  %v3337_v10 = vld [vmem:[#allocation2 + $0x82] sm:$0xff] }
 0x2b1   : > { %v2843_v18 = vpop.f32.mrf.mxu0  ;;  %3217 = vmatmul.f32.gmra.mxu2 %v3125_v0 }
 0x2b2   : > { %3421 = vmatmul.f32.gmra.mxu3 %v3335_v14  ;;  %v2469_v14 = vadd.f32 %v2423_v52, %v2247_v17 }
 0x2b3   : > { %3007 = vmatmul.f32.gmra.mxu1 %v3124_v50 }
 0x2b4   : > { %3634 = vmatmul.f32.gmra.mxu0 %v3548_v62  ;;  %v2426_v28 = vpop.f32.mrf.mxu2  ;;  %v3128_v62 = vld [vmem:[#allocation2 + $0xa1] sm:$0xff] }
 0x2b5   : > { %v2630_v31 = vpop.f32.mrf.mxu3 }
 0x2b6   : > { %v2680_v7 = vadd.f32 %v2630_v31, %v2467_v48  ;;  %v2250_v48 = vadd.f32 %v2249_v20, %v5516_v34  ;;  %v3552_v20 = vld [vmem:[#allocation2 + $0x93] sm:$0xff] }
 0x2b8   : > { %v5844_v36 = vadd.f32 %v2843_v18, %v2680_v7  ;;  %v2255_v35 = vpop.f32.mrf.mxu1  ;;  %v3338_v18 = vld [vmem:[#allocation2 + $0x8a] sm:$0xff] }
 0x2b9   : > { %v2846_v29 = vpop.f32.mrf.mxu0  ;;  %3220 = vmatmul.f32.gmra.mxu2 %v3126_v25 }
 0x2ba   : > { %3424 = vmatmul.f32.gmra.mxu3 %v3336_v3  ;;  %v2470_v3 = vadd.f32 %v2426_v28, %v2250_v48 }
 0x2bb   : > { %3010 = vmatmul.f32.gmra.mxu1 %v3125_v0 }
 0x2bc   : > { %3637 = vmatmul.f32.gmra.mxu0 %v3549_v49  ;;  %v2429_v56 = vpop.f32.mrf.mxu2  ;;  %v3129_v49 = vld [vmem:[#allocation2 + $0xa9] sm:$0xff] }
 0x2bd   : > { %v2633_v4 = vpop.f32.mrf.mxu3 }
 0x2be   : > { %v2681_v50 = vadd.f32 %v2633_v4, %v2468_v39  ;;  %v2253_v39 = vadd.f32 %v2252_v23, %v5528_v13  ;;  %v3553_v23 = vld [vmem:[#allocation2 + $0x9b] sm:$0xff] }
 0x2c0   : > { %v5847_v15 = vadd.f32 %v2846_v29, %v2681_v50  ;;  %v2258_v58 = vpop.f32.mrf.mxu1  ;;  %v3339_v29 = vld [vmem:[#allocation2 + $0x92] sm:$0xff] }
 0x2c1   : > { %v2849_v41 = vpop.f32.mrf.mxu0  ;;  %3223 = vmatmul.f32.gmra.mxu2 %v3127_v59 }
 0x2c2   : > { %3427 = vmatmul.f32.gmra.mxu3 %v3337_v10  ;;  %v2471_v10 = vadd.f32 %v2429_v56, %v2253_v39 }
 0x2c3   : > { %3013 = vmatmul.f32.gmra.mxu1 %v3126_v25 }
 0x2c4   : > { %3640 = vmatmul.f32.gmra.mxu0 %v3550_v12  ;;  %v2432_v37 = vpop.f32.mrf.mxu2  ;;  %v3130_v12 = vld [vmem:[#allocation2 + $0xb1] sm:$0xff] }
 0x2c5   : > { %v2636_v46 = vpop.f32.mrf.mxu3 }
 0x2c6   : > { %v2682_v0 = vadd.f32 %v2636_v46, %v2469_v14  ;;  %v2256_v14 = vadd.f32 %v2255_v35, %v5543_v51  ;;  %v3554_v35 = vld [vmem:[#allocation2 + $0xa3] sm:$0xff] }
 0x2c8   : > { %v5850_v31 = vadd.f32 %v2849_v41, %v2682_v0  ;;  %v2969_v7 = vpop.f32.mrf.mxu1  ;;  %v3340_v41 = vld [vmem:[#allocation2 + $0x9a] sm:$0xff] }
 0x2c9   : > { %v2852_v40 = vpop.f32.mrf.mxu0  ;;  %3226 = vmatmul.f32.gmra.mxu2 %v3128_v62 }
 0x2ca   : > { %3430 = vmatmul.f32.gmra.mxu3 %v3338_v18  ;;  %v2472_v18 = vadd.f32 %v2432_v37, %v2256_v14 }
 0x2cb   : > { %3016 = vmatmul.f32.gmra.mxu1 %v3127_v59 }
 0x2cc   : > { %3643 = vmatmul.f32.gmra.mxu0 %v3551_v33  ;;  %v2435_v22 = vpop.f32.mrf.mxu2  ;;  %v3131_v33 = vld [vmem:[#allocation2 + $0xb9] sm:$0xff] }
 0x2cd   : > { %v2639_v52 = vpop.f32.mrf.mxu3 }
 0x2ce   : > { %v2683_v25 = vadd.f32 %v2639_v52, %v2470_v3  ;;  %v2259_v3 = vadd.f32 %v2258_v58, %v5556_v32 }
 0x2d0   : > { %v5853_v4 = vadd.f32 %v2852_v40, %v2683_v25  ;;  %v2972_v50 = vpop.f32.mrf.mxu1  ;;  %v3341_v40 = vld [vmem:[#allocation2 + $0xa2] sm:$0xff] }
 0x2d1   : > { %v2855_v34 = vpop.f32.mrf.mxu0  ;;  %3229 = vmatmul.f32.gmra.mxu2 %v3129_v49 }
 0x2d2   : > { %3433 = vmatmul.f32.gmra.mxu3 %v3339_v29  ;;  %v2473_v29 = vadd.f32 %v2435_v22, %v2259_v3  ;;  %v3344_v3 = vld [vmem:[#allocation2 + $0xba] sm:$0xff] }
 0x2d3   : > { %3019 = vmatmul.f32.gmra.mxu1 %v3128_v62 }
 0x2d4   : > { %3646 = vmatmul.f32.gmra.mxu0 %v3552_v20  ;;  %v3182_v17 = vpop.f32.mrf.mxu2  ;;  %v3132_v20 = vld [vmem:[#allocation2 + $0xc1] sm:$0xff] }
 0x2d5   : > { %v2642_v28 = vpop.f32.mrf.mxu3 }
 0x2d6   : > { %v2684_v59 = vadd.f32 %v2642_v28, %v2471_v10  ;;  %v3077_v10 = vadd.f32 %v2969_v7, %v5571_v38  ;;  %v3555_v28 = vld [vmem:[#allocation2 + $0xab] sm:$0xff] }
 0x2d8   : > { %v5856_v46 = vadd.f32 %v2855_v34, %v2684_v59  ;;  %v2975_v0 = vpop.f32.mrf.mxu1  ;;  %v3342_v34 = vld [vmem:[#allocation2 + $0xaa] sm:$0xff] }
 0x2d9   : > { %v2858_v13 = vpop.f32.mrf.mxu0  ;;  %3232 = vmatmul.f32.gmra.mxu2 %v3130_v12 }
 0x2da   : > { %3436 = vmatmul.f32.gmra.mxu3 %v3340_v41  ;;  %v3290_v41 = vadd.f32 %v3182_v17, %v3077_v10  ;;  %v3556_v17 = vld [vmem:[#allocation2 + $0xb3] sm:$0xff] }
 0x2db   : > { %3022 = vmatmul.f32.gmra.mxu1 %v3129_v49 }
 0x2dc   : > { %3649 = vmatmul.f32.gmra.mxu0 %v3553_v23  ;;  %v3185_v48 = vpop.f32.mrf.mxu2  ;;  %v3133_v23 = vld [vmem:[#allocation2 + $0xc9] sm:$0xff] }
 0x2dd   : > { %v2645_v56 = vpop.f32.mrf.mxu3 }
 0x2de   : > { %v2685_v62 = vadd.f32 %v2645_v56, %v2472_v18  ;;  %v3078_v18 = vadd.f32 %v2972_v50, %v5580_v47 }
 0x2e0   : > { %v5859_v52 = vadd.f32 %v2858_v13, %v2685_v62  ;;  %v5861_v25 = vpop.f32.mrf.mxu1  ;;  %v3343_v13 = vld [vmem:[#allocation2 + $0xb2] sm:$0xff] }
 0x2e1   : > { %v2861_v51 = vpop.f32.mrf.mxu0  ;;  %3235 = vmatmul.f32.gmra.mxu2 %v3131_v33  ;;  %v3080_v6 = vadd.f32 %v5861_v25, %v5601_v19 }
 0x2e2   : > { %3439 = vmatmul.f32.gmra.mxu3 %v3341_v40  ;;  %v3291_v40 = vadd.f32 %v3185_v48, %v3078_v18 }
 0x2e3   : > { %3025 = vmatmul.f32.gmra.mxu1 %v3130_v12 }
 0x2e4   : > { %3652 = vmatmul.f32.gmra.mxu0 %v3554_v35  ;;  %v3188_v49 = vpop.f32.mrf.mxu2  ;;  %v3079_v35 = vadd.f32 %v2975_v0, %v5590_v57 }
 0x2e5   : > { %v2648_v37 = vpop.f32.mrf.mxu3 }
 0x2e6   : > { %v2686_v39 = vadd.f32 %v2648_v37, %v2473_v29  ;;  %v3292_v48 = vadd.f32 %v3188_v49, %v3079_v35  ;;  %v3558_v49 = vld [vmem:[#allocation2 + $0xc3] sm:$0xff] }
 0x2e7   : > { %v6263_v35 = vld [vmem:[#allocation34_spill] sm:$0xff] }
 0x2e8   : > { %v5864_v32 = vadd.f32 %v2861_v51, %v2686_v39  ;;  %v5866_v59 = vpop.f32.mrf.mxu1  ;;  %v3134_v51 = vld [vmem:[#allocation2 + $0xd1] sm:$0xff]  ;;  %v3557_v39 = vld [vmem:[#allocation2 + $0xbb] sm:$0xff] }
 0x2e9   : > { %v3608_v58 = vpop.f32.mrf.mxu0  ;;  %3238 = vmatmul.f32.gmra.mxu2 %v3132_v20 }
 0x2ea   : > { %3442 = vmatmul.f32.gmra.mxu3 %v3342_v34 }
 0x2eb   : > { %3028 = vmatmul.f32.gmra.mxu1 %v3131_v33 }
 0x2ec   : > { %3655 = vmatmul.f32.gmra.mxu0 %v3555_v28  ;;  %v3191_v12 = vpop.f32.mrf.mxu2 }
 0x2ed   : > { %v3395_v22 = vpop.f32.mrf.mxu3 }
 0x2ee   : > { %v3503_v14 = vadd.f32 %v3395_v22, %v3290_v41  ;;  %v3345_v22 = vld [vmem:[#allocation2 + $0xc2] sm:$0xff] }
 0x2f0   : > { %v3716_v38 = vadd.f32 %v3608_v58, %v3503_v14  ;;  %v5876_v56 = vpop.f32.mrf.mxu1  ;;  %v3135_v14 = vld [vmem:[#allocation2 + $0xd9] sm:$0xff] }
 0x2f1   : > { %v3611_v7 = vpop.f32.mrf.mxu0  ;;  %3241 = vmatmul.f32.gmra.mxu2 %v3133_v23 }
 0x2f2   : > { %v3752_v62 = vsel %vm4788_vm11, %v3716_v38, 0.0  ;;  %3445 = vmatmul.f32.gmra.mxu3 %v3343_v13 }
 0x2f3   : > { %3788 = vst [vmem:[%s5874_s9] sm:$0xff] %v3752_v62  ;;  %3031 = vmatmul.f32.gmra.mxu1 %v3132_v20  ;;  %v3866_v20 = vmul.f32 %v3752_v62, %v3752_v62 }
 0x2f4   : > { %3658 = vmatmul.f32.gmra.mxu0 %v3556_v17  ;;  %v3194_v50 = vpop.f32.mrf.mxu2 }
 0x2f5   : > { %v3398_v47 = vpop.f32.mrf.mxu3 }
 0x2f6   : > { %v3504_v33 = vadd.f32 %v3398_v47, %v3291_v40 }
 0x2f8   : > { %v3717_v29 = vadd.f32 %v3611_v7, %v3504_v33  ;;  %v5882_v34 = vpop.f32.mrf.mxu1  ;;  %v3346_v33 = vld [vmem:[#allocation2 + $0xca] sm:$0xff] }
 0x2f9   : > { %v3614_v37 = vpop.f32.mrf.mxu0  ;;  %3244 = vmatmul.f32.gmra.mxu2 %v3134_v51 }
 0x2fa   : > { %v3753_v44 = vsel %vm4908_vm0, %v3717_v29, 0.0  ;;  %3448 = vmatmul.f32.gmra.mxu3 %v3344_v3  ;;  %v3136_v3 = vld [vmem:[#allocation2 + $0xe1] sm:$0xff]  ;;  %v3081_v29 = vadd.f32 %v5866_v59, %v6263_v35 }
 0x2fb   : > { %3789 = vst [vmem:[%s5874_s9 + $0x8] sm:$0xff] %v3753_v44  ;;  %v3824_v10 = vadd.f32 %v3753_v44, %v3752_v62  ;;  %v3867_v58 = vmul.f32 %v3753_v44, %v3753_v44  ;;  %3034 = vmatmul.f32.gmra.mxu1 %v3133_v23  ;;  %v3293_v23 = vadd.f32 %v3191_v12, %v3080_v6  ;;  %v6265_v6 = vld [vmem:[#allocation35_spill] sm:$0xff]  ;;  %v3348_v35 = vld [vmem:[#allocation2 + $0xda] sm:$0xff] }
 0x2fc   : > { %3661 = vmatmul.f32.gmra.mxu0 %v3557_v39  ;;  %v3197_v0 = vpop.f32.mrf.mxu2  ;;  %v3559_v39 = vld [vmem:[#allocation2 + $0xcb] sm:$0xff] }
 0x2fd   : > { %v3902_v28 = vadd.f32 %v3867_v58, %v3866_v20  ;;  %v3401_v57 = vpop.f32.mrf.mxu3 }
 0x2fe   : > { %v3505_v41 = vadd.f32 %v3401_v57, %v3292_v48 }
 0x300   : > { %v3718_v13 = vadd.f32 %v3614_v37, %v3505_v41  ;;  %v5889_v38 = vpop.f32.mrf.mxu1  ;;  %v3347_v41 = vld [vmem:[#allocation2 + $0xd2] sm:$0xff] }
 0x301   : > { %v3617_v18 = vpop.f32.mrf.mxu0  ;;  %3247 = vmatmul.f32.gmra.mxu2 %v3135_v14 }
 0x302   : > { %v3754_v7 = vsel %vm5028_vm10, %v3718_v13, 0.0  ;;  %3451 = vmatmul.f32.gmra.mxu3 %v3345_v22  ;;  %v3137_v22 = vld [vmem:[#allocation2 + $0xe9] sm:$0xff]  ;;  %v3082_v13 = vadd.f32 %v5876_v56, %v6265_v6 }
 0x303   : > { %3790 = vst [vmem:[%s5874_s9 + $0x10] sm:$0xff] %v3754_v7  ;;  %v3825_v17 = vadd.f32 %v3824_v10, %v3754_v7  ;;  %v3868_v62 = vmul.f32 %v3754_v7, %v3754_v7  ;;  %3037 = vmatmul.f32.gmra.mxu1 %v3134_v51  ;;  %v3294_v51 = vadd.f32 %v3194_v50, %v3081_v29  ;;  %v3560_v7 = vld [vmem:[#allocation2 + $0xd3] sm:$0xff]  ;;  %v3349_v6 = vld [vmem:[#allocation2 + $0xe2] sm:$0xff] }
 0x304   : > { %3664 = vmatmul.f32.gmra.mxu0 %v3558_v49  ;;  %v3200_v19 = vpop.f32.mrf.mxu2  ;;  %v3138_v29 = vld [vmem:[#allocation2 + $0xf1] sm:$0xff] }
 0x305   : > { %v3903_v40 = vadd.f32 %v3902_v28, %v3868_v62  ;;  %v3404_v47 = vpop.f32.mrf.mxu3 }
 0x306   : > { %v3506_v25 = vadd.f32 %v3404_v47, %v3293_v23 }
 0x308   : > { %v3719_v2 = vadd.f32 %v3617_v18, %v3506_v25  ;;  %v5896_v12 = vpop.f32.mrf.mxu1 }
 0x309   : > { %v3620_v37 = vpop.f32.mrf.mxu0  ;;  %3250 = vmatmul.f32.gmra.mxu2 %v3136_v3 }
 0x30a   : > { %v3755_v48 = vsel %vm5152_vm4, %v3719_v2, 0.0  ;;  %3454 = vmatmul.f32.gmra.mxu3 %v3346_v33  ;;  %v6267_v2 = vld [vmem:[#allocation36_spill] sm:$0xff] }
 0x30b   : > { %3791 = vst [vmem:[%s5874_s9 + $0x18] sm:$0xff] %v3755_v48  ;;  %v3826_v20 = vadd.f32 %v3825_v17, %v3755_v48  ;;  %v3869_v10 = vmul.f32 %v3755_v48, %v3755_v48  ;;  %3040 = vmatmul.f32.gmra.mxu1 %v3135_v14  ;;  %v3295_v14 = vadd.f32 %v3197_v0, %v3082_v13  ;;  %v3561_v48 = vld [vmem:[#allocation2 + $0xdb] sm:$0xff] }
 0x30c   : > { %3667 = vmatmul.f32.gmra.mxu0 %v3559_v39  ;;  %v3203_v59 = vpop.f32.mrf.mxu2  ;;  %v3139_v13 = vld [vmem:[#allocation2 + $0xf9] sm:$0xff] }
 0x30d   : > { %v3904_v58 = vadd.f32 %v3903_v40, %v3869_v10  ;;  %v3407_v28 = vpop.f32.mrf.mxu3 }
 0x30e   : > { %v3507_v57 = vadd.f32 %v3407_v28, %v3294_v51 }
 0x310   : > { %v3720_v18 = vadd.f32 %v3620_v37, %v3507_v57  ;;  %v5903_v50 = vpop.f32.mrf.mxu1  ;;  %v3083_v37 = vadd.f32 %v5882_v34, %v6267_v2  ;;  %v3350_v2 = vld [vmem:[#allocation2 + $0xea] sm:$0xff] }
 0x311   : > { %v3623_v49 = vpop.f32.mrf.mxu0  ;;  %3253 = vmatmul.f32.gmra.mxu2 %v3137_v22 }
 0x312   : > { %v3756_v17 = vsel %vm5288_vm9, %v3720_v18, 0.0  ;;  %3457 = vmatmul.f32.gmra.mxu3 %v3347_v41  ;;  %v6269_v18 = vld [vmem:[#allocation37_spill] sm:$0xff] }
 0x313   : > { %3792 = vst [vmem:[%s5874_s9 + $0x20] sm:$0xff] %v3756_v17  ;;  %v3827_v62 = vadd.f32 %v3826_v20, %v3756_v17  ;;  %v3870_v40 = vmul.f32 %v3756_v17, %v3756_v17  ;;  %3043 = vmatmul.f32.gmra.mxu1 %v3136_v3  ;;  %v3296_v3 = vadd.f32 %v3200_v19, %v3083_v37  ;;  %v3562_v17 = vld [vmem:[#allocation2 + $0xe3] sm:$0xff] }
 0x314   : > { %3670 = vmatmul.f32.gmra.mxu0 %v3560_v7  ;;  %v3206_v56 = vpop.f32.mrf.mxu2  ;;  %v3140_v37 = vld [vmem:[#allocation2 + $0x101] sm:$0xff] }
 0x315   : > { %v3905_v47 = vadd.f32 %v3904_v58, %v3870_v40  ;;  %v3410_v25 = vpop.f32.mrf.mxu3 }
 0x316   : > { %v3508_v33 = vadd.f32 %v3410_v25, %v3295_v14 }
 0x318   : > { %v3721_v39 = vadd.f32 %v3623_v49, %v3508_v33  ;;  %v5910_v0 = vpop.f32.mrf.mxu1  ;;  %v3084_v49 = vadd.f32 %v5889_v38, %v6269_v18  ;;  %v3351_v18 = vld [vmem:[#allocation2 + $0xf2] sm:$0xff] }
 0x319   : > { %v3626_v44 = vpop.f32.mrf.mxu0  ;;  %3256 = vmatmul.f32.gmra.mxu2 %v3138_v29 }
 0x31a   : > { %v3757_v20 = vsel %vm5352_vm8, %v3721_v39, 0.0  ;;  %3460 = vmatmul.f32.gmra.mxu3 %v3348_v35  ;;  %v6271_v39 = vld [vmem:[#allocation38_spill] sm:$0xff] }
 0x31b   : > { %3793 = vst [vmem:[%s5874_s9 + $0x28] sm:$0xff] %v3757_v20  ;;  %v3828_v10 = vadd.f32 %v3827_v62, %v3757_v20  ;;  %v3871_v58 = vmul.f32 %v3757_v20, %v3757_v20  ;;  %3046 = vmatmul.f32.gmra.mxu1 %v3137_v22  ;;  %v3297_v22 = vadd.f32 %v3203_v59, %v3084_v49  ;;  %v3563_v20 = vld [vmem:[#allocation2 + $0xeb] sm:$0xff] }
 0x31c   : > { %3673 = vmatmul.f32.gmra.mxu0 %v3561_v48  ;;  %v3209_v34 = vpop.f32.mrf.mxu2  ;;  %v3141_v49 = vld [vmem:[#allocation2 + $0x109] sm:$0xff] }
 0x31d   : > { %v3906_v28 = vadd.f32 %v3905_v47, %v3871_v58  ;;  %v3413_v57 = vpop.f32.mrf.mxu3 }
 0x31e   : > { %v3509_v41 = vadd.f32 %v3413_v57, %v3296_v3 }
 0x320   : > { %v3722_v7 = vadd.f32 %v3626_v44, %v3509_v41  ;;  %v5917_v19 = vpop.f32.mrf.mxu1  ;;  %v3085_v44 = vadd.f32 %v5896_v12, %v6271_v39  ;;  %v3352_v39 = vld [vmem:[#allocation2 + $0xfa] sm:$0xff] }
 0x321   : > { %v3629_v23 = vpop.f32.mrf.mxu0  ;;  %3259 = vmatmul.f32.gmra.mxu2 %v3139_v13 }
 0x322   : > { %v3758_v62 = vsel %vm4329_vm13, %v3722_v7, 0.0  ;;  %3463 = vmatmul.f32.gmra.mxu3 %v3349_v6  ;;  %v6273_v7 = vld [vmem:[#allocation39_spill] sm:$0xff] }
 0x323   : > { %3794 = vst [vmem:[%s5874_s9 + $0x30] sm:$0xff] %v3758_v62  ;;  %v3829_v40 = vadd.f32 %v3828_v10, %v3758_v62  ;;  %v3872_v47 = vmul.f32 %v3758_v62, %v3758_v62  ;;  %3049 = vmatmul.f32.gmra.mxu1 %v3138_v29  ;;  %v3298_v29 = vadd.f32 %v3206_v56, %v3085_v44  ;;  %v3564_v62 = vld [vmem:[#allocation2 + $0xf3] sm:$0xff] }
 0x324   : > { %3676 = vmatmul.f32.gmra.mxu0 %v3562_v17  ;;  %v3212_v38 = vpop.f32.mrf.mxu2  ;;  %v3142_v44 = vld [vmem:[#allocation2 + $0x111] sm:$0xff] }
 0x325   : > { %v3907_v25 = vadd.f32 %v3906_v28, %v3872_v47  ;;  %v3416_v33 = vpop.f32.mrf.mxu3 }
 0x326   : > { %v3510_v35 = vadd.f32 %v3416_v33, %v3297_v22  ;;  %v3566_v22 = vld [vmem:[#allocation2 + $0x103] sm:$0xff] }
 0x328   : > { %v3723_v48 = vadd.f32 %v3629_v23, %v3510_v35  ;;  %v5924_v59 = vpop.f32.mrf.mxu1  ;;  %v3086_v23 = vadd.f32 %v5903_v50, %v6273_v7  ;;  %v3353_v7 = vld [vmem:[#allocation2 + $0x102] sm:$0xff] }
 0x329   : > { %v3632_v51 = vpop.f32.mrf.mxu0  ;;  %3262 = vmatmul.f32.gmra.mxu2 %v3140_v37 }
 0x32a   : > { %v3759_v10 = vsel %vm4345_vm15, %v3723_v48, 0.0  ;;  %3466 = vmatmul.f32.gmra.mxu3 %v3350_v2  ;;  %v6275_v48 = vld [vmem:[#allocation40_spill] sm:$0xff] }
 0x32b   : > { %3795 = vst [vmem:[%s5874_s9 + $0x38] sm:$0xff] %v3759_v10  ;;  %v3830_v58 = vadd.f32 %v3829_v40, %v3759_v10  ;;  %v3873_v28 = vmul.f32 %v3759_v10, %v3759_v10  ;;  %3052 = vmatmul.f32.gmra.mxu1 %v3139_v13  ;;  %v3299_v13 = vadd.f32 %v3209_v34, %v3086_v23  ;;  %v3565_v10 = vld [vmem:[#allocation2 + $0xfb] sm:$0xff] }
 0x32c   : > { %3679 = vmatmul.f32.gmra.mxu0 %v3563_v20  ;;  %v3215_v12 = vpop.f32.mrf.mxu2  ;;  %v3143_v23 = vld [vmem:[#allocation2 + $0x119] sm:$0xff] }
 0x32d   : > { %v3908_v57 = vadd.f32 %v3907_v25, %v3873_v28  ;;  %v3419_v41 = vpop.f32.mrf.mxu3 }
 0x32e   : > { %v3511_v6 = vadd.f32 %v3419_v41, %v3298_v29 }
 0x330   : > { %v3724_v17 = vadd.f32 %v3632_v51, %v3511_v6  ;;  %v5931_v56 = vpop.f32.mrf.mxu1  ;;  %v3087_v51 = vadd.f32 %v5910_v0, %v6275_v48  ;;  %v3089_v48 = vadd.f32 %v5924_v59, %v5734_v30 }
 0x331   : > { %v3635_v14 = vpop.f32.mrf.mxu0  ;;  %3265 = vmatmul.f32.gmra.mxu2 %v3141_v49 }
 0x332   : > { %v3760_v40 = vsel %vm4527_vm3, %v3724_v17, 0.0  ;;  %3469 = vmatmul.f32.gmra.mxu3 %v3351_v18  ;;  %v3088_v17 = vadd.f32 %v5917_v19, %v5707_v53 }
 0x333   : > { %3796 = vst [vmem:[%s5874_s9 + $0x40] sm:$0xff] %v3760_v40  ;;  %v3831_v47 = vadd.f32 %v3830_v58, %v3760_v40  ;;  %v3874_v25 = vmul.f32 %v3760_v40, %v3760_v40  ;;  %3055 = vmatmul.f32.gmra.mxu1 %v3140_v37  ;;  %v3300_v37 = vadd.f32 %v3212_v38, %v3087_v51  ;;  %v6277_v40 = vld [vmem:[#allocation15_spill] sm:$0xff] }
 0x334   : > { %3682 = vmatmul.f32.gmra.mxu0 %v3564_v62  ;;  %v3218_v50 = vpop.f32.mrf.mxu2  ;;  %vm6278_vm13 = vnez %v6277_v40 }
 0x335   : > { %v3909_v33 = vadd.f32 %v3908_v57, %v3874_v25  ;;  %v3422_v35 = vpop.f32.mrf.mxu3 }
 0x336   : > { %v3512_v2 = vadd.f32 %v3422_v35, %v3299_v13 }
 0x338   : > { %v3725_v20 = vadd.f32 %v3635_v14, %v3512_v2  ;;  %v5938_v34 = vpop.f32.mrf.mxu1  ;;  %v3354_v2 = vld [vmem:[#allocation2 + $0x10a] sm:$0xff] }
 0x339   : > { %v3638_v3 = vpop.f32.mrf.mxu0  ;;  %3268 = vmatmul.f32.gmra.mxu2 %v3142_v44 }
 0x33a   : > { %v3761_v58 = vsel %vm4637_vm6, %v3725_v20, 0.0  ;;  %3472 = vmatmul.f32.gmra.mxu3 %v3352_v39  ;;  %v3144_v39 = vld [vmem:[#allocation2 + $0x121] sm:$0xff] }
 0x33b   : > { %3797 = vst [vmem:[%s5874_s9 + $0x48] sm:$0xff] %v3761_v58  ;;  %v3832_v28 = vadd.f32 %v3831_v47, %v3761_v58  ;;  %v3875_v57 = vmul.f32 %v3761_v58, %v3761_v58  ;;  %3058 = vmatmul.f32.gmra.mxu1 %v3141_v49  ;;  %v3301_v49 = vadd.f32 %v3215_v12, %v3088_v17 }
 0x33c   : > { %3685 = vmatmul.f32.gmra.mxu0 %v3565_v10  ;;  %v3221_v0 = vpop.f32.mrf.mxu2  ;;  %v6279_v10 = vld [vmem:[#allocation18_spill] sm:$0xff] }
 0x33d   : > { %v3910_v41 = vadd.f32 %v3909_v33, %v3875_v57  ;;  %v3425_v6 = vpop.f32.mrf.mxu3  ;;  %vm6280_vm15 = vnez %v6279_v10 }
 0x33e   : > { %v3513_v18 = vadd.f32 %v3425_v6, %v3300_v37  ;;  %v3145_v6 = vld [vmem:[#allocation2 + $0x129] sm:$0xff] }
 0x340   : > { %v3726_v14 = vadd.f32 %v3638_v3, %v3513_v18  ;;  %v5945_v38 = vpop.f32.mrf.mxu1  ;;  %v3567_v3 = vld [vmem:[#allocation2 + $0x10b] sm:$0xff]  ;;  %v3090_v18 = vadd.f32 %v5931_v56, %v5761_v16 }
 0x341   : > { %v3641_v62 = vpop.f32.mrf.mxu0  ;;  %3271 = vmatmul.f32.gmra.mxu2 %v3143_v23 }
 0x342   : > { %v3762_v13 = vsel %vm6278_vm13, %v3726_v14, 0.0  ;;  %3475 = vmatmul.f32.gmra.mxu3 %v3353_v7  ;;  %v3568_v14 = vld [vmem:[#allocation2 + $0x113] sm:$0xff] }
 0x343   : > { %3798 = vst [vmem:[%s5874_s9 + $0x50] sm:$0xff] %v3762_v13  ;;  %v3833_v47 = vadd.f32 %v3832_v28, %v3762_v13  ;;  %v3876_v25 = vmul.f32 %v3762_v13, %v3762_v13  ;;  %3061 = vmatmul.f32.gmra.mxu1 %v3142_v44  ;;  %v3302_v44 = vadd.f32 %v3218_v50, %v3089_v48  ;;  %v3569_v48 = vld [vmem:[#allocation2 + $0x11b] sm:$0xff] }
 0x344   : > { %3688 = vmatmul.f32.gmra.mxu0 %v3566_v22  ;;  %v3224_v53 = vpop.f32.mrf.mxu2 }
 0x345   : > { %v3911_v33 = vadd.f32 %v3910_v41, %v3876_v25  ;;  %v3428_v35 = vpop.f32.mrf.mxu3  ;;  %v3355_v41 = vld [vmem:[#allocation2 + $0x112] sm:$0xff]  ;;  %v3356_v25 = vld [vmem:[#allocation2 + $0x11a] sm:$0xff] }
 0x346   : > { %v3514_v19 = vadd.f32 %v3428_v35, %v3301_v49  ;;  %v3091_v35 = vadd.f32 %v5938_v34, %v5784_v60 }
 0x348   : > { %v3727_v51 = vadd.f32 %v3641_v62, %v3514_v19  ;;  %v5952_v12 = vpop.f32.mrf.mxu1  ;;  %v6281_v62 = vld [vmem:[#allocation21_spill] sm:$0xff] }
 0x349   : > { %v3644_v20 = vpop.f32.mrf.mxu0  ;;  %3274 = vmatmul.f32.gmra.mxu2 %v3144_v39  ;;  %vm6282_vm4 = vnez %v6281_v62 }
 0x34a   : > { %v3763_v29 = vsel %vm6280_vm15, %v3727_v51, 0.0  ;;  %3478 = vmatmul.f32.gmra.mxu3 %v3354_v2  ;;  %v6283_v51 = vld [vmem:[#allocation24_spill] sm:$0xff] }
 0x34b   : > { %3799 = vst [vmem:[%s5874_s9 + $0x58] sm:$0xff] %v3763_v29  ;;  %v3834_v58 = vadd.f32 %v3833_v47, %v3763_v29  ;;  %v3877_v37 = vmul.f32 %v3763_v29, %v3763_v29  ;;  %3064 = vmatmul.f32.gmra.mxu1 %v3143_v23  ;;  %v3303_v23 = vadd.f32 %v3221_v0, %v3090_v18 }
 0x34c   : > { %3691 = vmatmul.f32.gmra.mxu0 %v3567_v3  ;;  %v3227_v30 = vpop.f32.mrf.mxu2  ;;  %vm6284_vm10 = vnez %v6283_v51 }
 0x34d   : > { %v3912_v28 = vadd.f32 %v3911_v33, %v3877_v37  ;;  %v3431_v57 = vpop.f32.mrf.mxu3  ;;  %v3146_v33 = vld [vmem:[#allocation2 + $0x131] sm:$0xff]  ;;  %v3147_v37 = vld [vmem:[#allocation2 + $0x139] sm:$0xff] }
 0x34e   : > { %v3515_v59 = vadd.f32 %v3431_v57, %v3302_v44 }
 0x350   : > { %v3728_v7 = vadd.f32 %v3644_v20, %v3515_v59  ;;  %v5959_v50 = vpop.f32.mrf.mxu1 }
 0x351   : > { %v3647_v17 = vpop.f32.mrf.mxu0  ;;  %3277 = vmatmul.f32.gmra.mxu2 %v3145_v6 }
 0x352   : > { %v3764_v22 = vsel %vm6282_vm4, %v3728_v7, 0.0  ;;  %3481 = vmatmul.f32.gmra.mxu3 %v3355_v41  ;;  %v3570_v41 = vld [vmem:[#allocation2 + $0x123] sm:$0xff] }
 0x353   : > { %3800 = vst [vmem:[%s5874_s9 + $0x60] sm:$0xff] %v3764_v22  ;;  %v3835_v40 = vadd.f32 %v3834_v58, %v3764_v22  ;;  %v3878_v13 = vmul.f32 %v3764_v22, %v3764_v22  ;;  %3067 = vmatmul.f32.gmra.mxu1 %v3144_v39  ;;  %v3304_v39 = vadd.f32 %v3224_v53, %v3091_v35  ;;  %v3357_v58 = vld [vmem:[#allocation2 + $0x122] sm:$0xff] }
 0x354   : > { %3694 = vmatmul.f32.gmra.mxu0 %v3568_v14  ;;  %v3230_v16 = vpop.f32.mrf.mxu2 }
 0x355   : > { %v3913_v49 = vadd.f32 %v3912_v28, %v3878_v13  ;;  %v3434_v47 = vpop.f32.mrf.mxu3  ;;  %v3092_v28 = vadd.f32 %v5945_v38, %v5792_v43  ;;  %v3093_v13 = vadd.f32 %v5952_v12, %v5796_v5  ;;  %v3359_v12 = vld [vmem:[#allocation2 + $0x132] sm:$0xff] }
 0x356   : > { %v3516_v56 = vadd.f32 %v3434_v47, %v3303_v23  ;;  %v3358_v23 = vld [vmem:[#allocation2 + $0x12a] sm:$0xff] }
 0x358   : > { %v3729_v19 = vadd.f32 %v3647_v17, %v3516_v56  ;;  %v5966_v0 = vpop.f32.mrf.mxu1  ;;  %v3571_v56 = vld [vmem:[#allocation2 + $0x12b] sm:$0xff] }
 0x359   : > { %v3650_v2 = vpop.f32.mrf.mxu0  ;;  %3280 = vmatmul.f32.gmra.mxu2 %v3146_v33 }
 0x35a   : > { %v3765_v20 = vsel %vm6284_vm10, %v3729_v19, 0.0  ;;  %3484 = vmatmul.f32.gmra.mxu3 %v3356_v25  ;;  %v6286_v25 = vld [vmem:[#allocation5_spill] sm:$0xff] }
 0x35b   : > { %3801 = vst [vmem:[%s5874_s9 + $0x68] sm:$0xff] %v3765_v20  ;;  %v3836_v3 = vadd.f32 %v3835_v40, %v3765_v20  ;;  %v3879_v10 = vmul.f32 %v3765_v20, %v3765_v20  ;;  %3070 = vmatmul.f32.gmra.mxu1 %v3145_v6  ;;  %v3305_v6 = vadd.f32 %v3227_v30, %v3092_v28  ;;  %v3148_v40 = vld [vmem:[#allocation2 + $0x141] sm:$0xff] }
 0x35c   : > { %3697 = vmatmul.f32.gmra.mxu0 %v3569_v48  ;;  %v3233_v60 = vpop.f32.mrf.mxu2  ;;  %vm6287_vm11 = vnez %v6286_v25 }
 0x35d   : > { %v3914_v29 = vadd.f32 %v3913_v49, %v3879_v10  ;;  %v3437_v44 = vpop.f32.mrf.mxu3 }
 0x35e   : > { %v3517_v34 = vadd.f32 %v3437_v44, %v3304_v39  ;;  %v3094_v39 = vadd.f32 %v5959_v50, %v5800_v63  ;;  %v3095_v63 = vadd.f32 %v5966_v0, %v5807_v9 }
 0x360   : > { %v3730_v57 = vadd.f32 %v3650_v2, %v3517_v34  ;;  %v5973_v53 = vpop.f32.mrf.mxu1  ;;  %v6288_v34 = vld [vmem:[#allocation6_spill] sm:$0xff] }
 0x361   : > { %v3653_v59 = vpop.f32.mrf.mxu0  ;;  %3283 = vmatmul.f32.gmra.mxu2 %v3147_v37  ;;  %vm6289_vm3 = vnez %v6288_v34  ;;  %v3096_v9 = vadd.f32 %v5973_v53, %v5814_v21 }
 0x362   : > { %v3766_v7 = vsel %vm5204_vm5, %v3730_v57, 0.0  ;;  %3487 = vmatmul.f32.gmra.mxu3 %v3357_v58  ;;  %v3307_v58 = vadd.f32 %v3233_v60, %v3094_v39 }
 0x363   : > { %3802 = vst [vmem:[%s5874_s9 + $0x70] sm:$0xff] %v3766_v7  ;;  %v3837_v17 = vadd.f32 %v3836_v3, %v3766_v7  ;;  %v3880_v14 = vmul.f32 %v3766_v7, %v3766_v7  ;;  %3073 = vmatmul.f32.gmra.mxu1 %v3146_v33  ;;  %v3306_v33 = vadd.f32 %v3230_v16, %v3093_v13  ;;  %v3360_v7 = vld [vmem:[#allocation2 + $0x13a] sm:$0xff] }
 0x364   : > { %3700 = vmatmul.f32.gmra.mxu0 %v3570_v41  ;;  %v3236_v43 = vpop.f32.mrf.mxu2 }
 0x365   : > { %v3915_v62 = vadd.f32 %v3914_v29, %v3880_v14  ;;  %v3440_v22 = vpop.f32.mrf.mxu3  ;;  %v3572_v29 = vld [vmem:[#allocation2 + $0x133] sm:$0xff]  ;;  %v6290_v14 = vld [vmem:[#allocation10_spill] sm:$0xff]  ;;  %v3308_v60 = vadd.f32 %v3236_v43, %v3095_v63 }
 0x366   : > { %v3518_v38 = vadd.f32 %v3440_v22, %v3305_v6  ;;  %vm6291_vm6 = vnez %v6290_v14 }
 0x368   : > { %v3731_v49 = vadd.f32 %v3653_v59, %v3518_v38  ;;  %v5980_v30 = vpop.f32.mrf.mxu1 }
 0x369   : > { %v3656_v47 = vpop.f32.mrf.mxu0  ;;  %3286 = vmatmul.f32.gmra.mxu2 %v3148_v40  ;;  %v3097_v21 = vadd.f32 %v5980_v30, %v5817_v26  ;;  %v6296_v26 = vld [vmem:[#allocation19_spill] sm:$0xff] }
 0x36a   : > { %v3767_v35 = vsel %vm6287_vm11, %v3731_v49, 0.0  ;;  %3490 = vmatmul.f32.gmra.mxu3 %v3358_v23  ;;  %vm6297_vm5 = vnez %v6296_v26 }
 0x36b   : > { %3803 = vst [vmem:[%s5874_s9 + $0x78] sm:$0xff] %v3767_v35  ;;  %v3838_v19 = vadd.f32 %v3837_v17, %v3767_v35  ;;  %v3881_v2 = vmul.f32 %v3767_v35, %v3767_v35  ;;  %v3573_v17 = vld [vmem:[#allocation2 + $0x13b] sm:$0xff]  ;;  %v3574_v35 = vld [vmem:[#allocation2 + $0x143] sm:$0xff] }
 0x36c   : > { %3703 = vmatmul.f32.gmra.mxu0 %v3571_v56  ;;  %v3239_v20 = vpop.f32.mrf.mxu2  ;;  %v3361_v56 = vld [vmem:[#allocation2 + $0x142] sm:$0xff] }
 0x36d   : > { %v3916_v48 = vadd.f32 %v3915_v62, %v3881_v2  ;;  %v3443_v51 = vpop.f32.mrf.mxu3 }
 0x36e   : > { %v3519_v5 = vadd.f32 %v3443_v51, %v3306_v33  ;;  %v6292_v33 = vld [vmem:[#allocation13_spill] sm:$0xff] }
 0x36f   : > { %vm6293_vm9 = vnez %v6292_v33 }
 0x370   : > { %v3732_v3 = vadd.f32 %v3656_v47, %v3519_v5  ;;  %v3032_v44 = vpop.f32.mrf.mxu1 }
 0x371   : > { %v3659_v10 = vpop.f32.mrf.mxu0 }
 0x372   : > { %v3768_v16 = vsel %vm6289_vm3, %v3732_v3, 0.0  ;;  %3493 = vmatmul.f32.gmra.mxu3 %v3359_v12 }
 0x373   : > { %3804 = vst [vmem:[%s5874_s9 + $0x80] sm:$0xff] %v3768_v16  ;;  %v3839_v37 = vadd.f32 %v3838_v19, %v3768_v16  ;;  %v3882_v28 = vmul.f32 %v3768_v16, %v3768_v16  ;;  %v3309_v19 = vadd.f32 %v3239_v20, %v3096_v9 }
 0x374   : > { %3706 = vmatmul.f32.gmra.mxu0 %v3572_v29  ;;  %v3242_v41 = vpop.f32.mrf.mxu2  ;;  %v6294_v29 = vld [vmem:[#allocation16_spill] sm:$0xff] }
 0x375   : > { %v3917_v57 = vadd.f32 %v3916_v48, %v3882_v28  ;;  %v3446_v59 = vpop.f32.mrf.mxu3  ;;  %vm6295_vm0 = vnez %v6294_v29  ;;  %v3310_v16 = vadd.f32 %v3242_v41, %v3097_v21 }
 0x376   : > { %v3520_v18 = vadd.f32 %v3446_v59, %v3307_v58 }
 0x378   : > { %v3733_v50 = vadd.f32 %v3659_v10, %v3520_v18  ;;  %v3035_v22 = vpop.f32.mrf.mxu1 }
 0x379   : > { %v3662_v6 = vpop.f32.mrf.mxu0 }
 0x37a   : > { %v3769_v62 = vsel %vm6291_vm6, %v3733_v50, 0.0  ;;  %3496 = vmatmul.f32.gmra.mxu3 %v3360_v7  ;;  %v3098_v7 = vadd.f32 %v3032_v44, %v5820_v55  ;;  %v6298_v44 = vld [vmem:[#allocation22_spill] sm:$0xff] }
 0x37b   : > { %3805 = vst [vmem:[%s5874_s9 + $0x88] sm:$0xff] %v3769_v62  ;;  %v3840_v38 = vadd.f32 %v3839_v37, %v3769_v62  ;;  %v3883_v23 = vmul.f32 %v3769_v62, %v3769_v62  ;;  %vm6299_vm8 = vnez %v6298_v44 }
 0x37c   : > { %3709 = vmatmul.f32.gmra.mxu0 %v3573_v17  ;;  %v3245_v49 = vpop.f32.mrf.mxu2 }
 0x37d   : > { %v3918_v40 = vadd.f32 %v3917_v57, %v3883_v23  ;;  %v3449_v13 = vpop.f32.mrf.mxu3  ;;  %v3099_v23 = vadd.f32 %v3035_v22, %v5823_v8  ;;  %v6300_v8 = vld [vmem:[#allocation25_spill] sm:$0xff] }
 0x37e   : > { %v3521_v47 = vadd.f32 %v3449_v13, %v3308_v60  ;;  %vm6301_vm2 = vnez %v6300_v8 }
 0x380   : > { %v3734_v0 = vadd.f32 %v3662_v6, %v3521_v47  ;;  %v3038_v51 = vpop.f32.mrf.mxu1  ;;  %v3311_v6 = vadd.f32 %v3245_v49, %v3098_v7 }
 0x381   : > { %v3665_v25 = vpop.f32.mrf.mxu0 }
 0x382   : > { %v3770_v43 = vsel %vm6293_vm9, %v3734_v0, 0.0  ;;  %3499 = vmatmul.f32.gmra.mxu3 %v3361_v56 }
 0x383   : > { %3806 = vst [vmem:[%s5874_s9 + $0x90] sm:$0xff] %v3770_v43  ;;  %v3841_v2 = vadd.f32 %v3840_v38, %v3770_v43  ;;  %v3884_v48 = vmul.f32 %v3770_v43, %v3770_v43  ;;  %v3100_v43 = vadd.f32 %v3038_v51, %v5826_v42  ;;  %v6302_v42 = vld [vmem:[#allocation29_spill] sm:$0xff] }
 0x384   : > { %3712 = vmatmul.f32.gmra.mxu0 %v3574_v35  ;;  %v3248_v39 = vpop.f32.mrf.mxu2  ;;  %vm6303_vm12 = vnez %v6302_v42 }
 0x385   : > { %v3919_v5 = vadd.f32 %v3918_v40, %v3884_v48  ;;  %v3452_v12 = vpop.f32.mrf.mxu3  ;;  %v3312_v56 = vadd.f32 %v3248_v39, %v3099_v23 }
 0x386   : > { %v3522_v3 = vadd.f32 %v3452_v12, %v3309_v19 }
 0x388   : > { %v3735_v53 = vadd.f32 %v3665_v25, %v3522_v3  ;;  %v3041_v18 = vpop.f32.mrf.mxu1 }
 0x389   : > { %v3668_v10 = vpop.f32.mrf.mxu0  ;;  %v3101_v29 = vadd.f32 %v3041_v18, %v5829_v11  ;;  %v6304_v11 = vld [vmem:[#allocation7_spill] sm:$0xff] }
 0x38a   : > { %v3771_v34 = vsel %vm6295_vm0, %v3735_v53, 0.0  ;;  %vm6305_vm13 = vnez %v6304_v11 }
 0x38b   : > { %3807 = vst [vmem:[%s5874_s9 + $0x98] sm:$0xff] %v3771_v34  ;;  %v3842_v20 = vadd.f32 %v3841_v2, %v3771_v34  ;;  %v3885_v58 = vmul.f32 %v3771_v34, %v3771_v34 }
 0x38c   : > { %v3251_v57 = vpop.f32.mrf.mxu2 }
 0x38d   : > { %v3920_v37 = vadd.f32 %v3919_v5, %v3885_v58  ;;  %v3455_v28 = vpop.f32.mrf.mxu3  ;;  %v3313_v48 = vadd.f32 %v3251_v57, %v3100_v43 }
 0x38e   : > { %v3523_v59 = vadd.f32 %v3455_v28, %v3310_v16 }
 0x390   : > { %v3736_v63 = vadd.f32 %v3668_v10, %v3523_v59  ;;  %v3044_v55 = vpop.f32.mrf.mxu1 }
 0x391   : > { %v3671_v50 = vpop.f32.mrf.mxu0 }
 0x392   : > { %v3772_v30 = vsel %vm6297_vm5, %v3736_v63, 0.0 }
 0x393   : > { %3808 = vst [vmem:[%s5874_s9 + $0xa0] sm:$0xff] %v3772_v30  ;;  %v3843_v17 = vadd.f32 %v3842_v20, %v3772_v30  ;;  %v3886_v41 = vmul.f32 %v3772_v30, %v3772_v30 }
 0x394   : > { %v3254_v60 = vpop.f32.mrf.mxu2 }
 0x395   : > { %v3921_v14 = vadd.f32 %v3920_v37, %v3886_v41  ;;  %v3458_v62 = vpop.f32.mrf.mxu3  ;;  %v3314_v20 = vadd.f32 %v3254_v60, %v3101_v29 }
 0x396   : > { %v3524_v38 = vadd.f32 %v3458_v62, %v3311_v6 }
 0x398   : > { %v3737_v40 = vadd.f32 %v3671_v50, %v3524_v38  ;;  %v3047_v39 = vpop.f32.mrf.mxu1  ;;  %v3102_v50 = vadd.f32 %v3044_v55, %v5832_v24  ;;  %v6306_v55 = vld [vmem:[#allocation8_spill] sm:$0xff] }
 0x399   : > { %v3674_v13 = vpop.f32.mrf.mxu0  ;;  %v3103_v23 = vadd.f32 %v3047_v39, %v5835_v61  ;;  %vm6307_vm15 = vnez %v6306_v55 }
 0x39a   : > { %v3773_v47 = vsel %vm6299_vm8, %v3737_v40, 0.0 }
 0x39b   : > { %3809 = vst [vmem:[%s5874_s9 + $0xa8] sm:$0xff] %v3773_v47  ;;  %v3844_v9 = vadd.f32 %v3843_v17, %v3773_v47  ;;  %v3887_v49 = vmul.f32 %v3773_v47, %v3773_v47 }
 0x39c   : > { %v3257_v35 = vpop.f32.mrf.mxu2 }
 0x39d   : > { %v3922_v0 = vadd.f32 %v3921_v14, %v3887_v49  ;;  %v3461_v25 = vpop.f32.mrf.mxu3  ;;  %v3315_v6 = vadd.f32 %v3257_v35, %v3102_v50 }
 0x39e   : > { %v3525_v33 = vadd.f32 %v3461_v25, %v3312_v56 }
 0x3a0   : > { %v3738_v19 = vadd.f32 %v3674_v13, %v3525_v33  ;;  %v3050_v59 = vpop.f32.mrf.mxu1 }
 0x3a1   : > { %v3677_v2 = vpop.f32.mrf.mxu0  ;;  %v3104_v35 = vadd.f32 %v3050_v59, %v5838_v1  ;;  %v6310_v1 = vld [vmem:[#allocation14_spill] sm:$0xff] }
 0x3a2   : > { %v3774_v22 = vsel %vm6301_vm2, %v3738_v19, 0.0  ;;  %v6308_v19 = vld [vmem:[#allocation11_spill] sm:$0xff]  ;;  %vm6311_vm10 = vnez %v6310_v1 }
 0x3a3   : > { %3810 = vst [vmem:[%s5874_s9 + $0xb0] sm:$0xff] %v3774_v22  ;;  %v3845_v5 = vadd.f32 %v3844_v9, %v3774_v22  ;;  %v3888_v12 = vmul.f32 %v3774_v22, %v3774_v22  ;;  %vm6309_vm4 = vnez %v6308_v19 }
 0x3a4   : > { %v3260_v53 = vpop.f32.mrf.mxu2 }
 0x3a5   : > { %v3923_v3 = vadd.f32 %v3922_v0, %v3888_v12  ;;  %v3464_v21 = vpop.f32.mrf.mxu3  ;;  %v3316_v47 = vadd.f32 %v3260_v53, %v3103_v23 }
 0x3a6   : > { %v3526_v10 = vadd.f32 %v3464_v21, %v3313_v48 }
 0x3a8   : > { %v3739_v34 = vadd.f32 %v3677_v2, %v3526_v10  ;;  %v3053_v38 = vpop.f32.mrf.mxu1 }
 0x3a9   : > { %v3680_v16 = vpop.f32.mrf.mxu0  ;;  %v3105_v21 = vadd.f32 %v3053_v38, %v5841_v27  ;;  %v6312_v27 = vld [vmem:[#allocation17_spill] sm:$0xff] }
 0x3aa   : > { %v3775_v51 = vsel %vm6303_vm12, %v3739_v34, 0.0  ;;  %vm6313_vm11 = vnez %v6312_v27 }
 0x3ab   : > { %3811 = vst [vmem:[%s5874_s9 + $0xb8] sm:$0xff] %v3775_v51  ;;  %v3846_v58 = vadd.f32 %v3845_v5, %v3775_v51  ;;  %v3889_v37 = vmul.f32 %v3775_v51, %v3775_v51 }
 0x3ac   : > { %v3263_v63 = vpop.f32.mrf.mxu2 }
 0x3ad   : > { %v3924_v28 = vadd.f32 %v3923_v3, %v3889_v37  ;;  %v3467_v57 = vpop.f32.mrf.mxu3  ;;  %v3317_v8 = vadd.f32 %v3263_v63, %v3104_v35 }
 0x3ae   : > { %v3527_v7 = vadd.f32 %v3467_v57, %v3314_v20 }
 0x3b0   : > { %v3740_v26 = vadd.f32 %v3680_v16, %v3527_v7  ;;  %v3056_v61 = vpop.f32.mrf.mxu1 }
 0x3b1   : > { %v3683_v30 = vpop.f32.mrf.mxu0  ;;  %v3106_v57 = vadd.f32 %v3056_v61, %v5844_v36  ;;  %v6314_v36 = vld [vmem:[#allocation20_spill] sm:$0xff] }
 0x3b2   : > { %v3776_v18 = vsel %vm6305_vm13, %v3740_v26, 0.0  ;;  %vm6315_vm3 = vnez %v6314_v36 }
 0x3b3   : > { %3812 = vst [vmem:[%s5874_s9 + $0xc0] sm:$0xff] %v3776_v18  ;;  %v3847_v17 = vadd.f32 %v3846_v58, %v3776_v18  ;;  %v3890_v41 = vmul.f32 %v3776_v18, %v3776_v18 }
 0x3b4   : > { %v3266_v24 = vpop.f32.mrf.mxu2 }
 0x3b5   : > { %v3925_v14 = vadd.f32 %v3924_v28, %v3890_v41  ;;  %v3470_v62 = vpop.f32.mrf.mxu3  ;;  %v3318_v34 = vadd.f32 %v3266_v24, %v3105_v21 }
 0x3b6   : > { %v3528_v60 = vadd.f32 %v3470_v62, %v3315_v6 }
 0x3b8   : > { %v3741_v40 = vadd.f32 %v3683_v30, %v3528_v60  ;;  %v3059_v51 = vpop.f32.mrf.mxu1 }
 0x3b9   : > { %v3686_v13 = vpop.f32.mrf.mxu0 }
 0x3ba   : > { %v3777_v44 = vsel %vm6307_vm15, %v3741_v40, 0.0 }
 0x3bb   : > { %3813 = vst [vmem:[%s5874_s9 + $0xc8] sm:$0xff] %v3777_v44  ;;  %v3848_v56 = vadd.f32 %v3847_v17, %v3777_v44  ;;  %v3891_v9 = vmul.f32 %v3777_v44, %v3777_v44 }
 0x3bc   : > { %v3269_v5 = vpop.f32.mrf.mxu2 }
 0x3bd   : > { %v3926_v49 = vadd.f32 %v3925_v14, %v3891_v9  ;;  %v3473_v0 = vpop.f32.mrf.mxu3  ;;  %v3319_v50 = vadd.f32 %v3269_v5, %v3106_v57  ;;  %v3107_v14 = vadd.f32 %v3059_v51, %v5847_v15  ;;  %v6318_v5 = vld [vmem:[#allocation27_spill] sm:$0xff] }
 0x3be   : > { %v3529_v25 = vadd.f32 %v3473_v0, %v3316_v47  ;;  %v6316_v0 = vld [vmem:[#allocation23_spill] sm:$0xff]  ;;  %vm6319_vm9 = vnez %v6318_v5 }
 0x3bf   : > { %vm6317_vm6 = vnez %v6316_v0 }
 0x3c0   : > { %v3742_v33 = vadd.f32 %v3686_v13, %v3529_v25  ;;  %v3062_v6 = vpop.f32.mrf.mxu1 }
 0x3c1   : > { %v3689_v43 = vpop.f32.mrf.mxu0 }
 0x3c2   : > { %v3778_v2 = vsel %vm6309_vm4, %v3742_v33, 0.0 }
 0x3c3   : > { %3814 = vst [vmem:[%s5874_s9 + $0xd0] sm:$0xff] %v3778_v2  ;;  %v3849_v22 = vadd.f32 %v3848_v56, %v3778_v2  ;;  %v3892_v48 = vmul.f32 %v3778_v2, %v3778_v2  ;;  %v3108_v56 = vadd.f32 %v3062_v6, %v5850_v31 }
 0x3c4   : > { %v3272_v37 = vpop.f32.mrf.mxu2 }
 0x3c5   : > { %v3927_v12 = vadd.f32 %v3926_v49, %v3892_v48  ;;  %v3476_v39 = vpop.f32.mrf.mxu3  ;;  %v3320_v23 = vadd.f32 %v3272_v37, %v3107_v14 }
 0x3c6   : > { %v3530_v3 = vadd.f32 %v3476_v39, %v3317_v8 }
 0x3c8   : > { %v3743_v53 = vadd.f32 %v3689_v43, %v3530_v3  ;;  %v3065_v47 = vpop.f32.mrf.mxu1 }
 0x3c9   : > { %v3692_v10 = vpop.f32.mrf.mxu0  ;;  %v3109_v8 = vadd.f32 %v3065_v47, %v5853_v4 }
 0x3ca   : > { %v3779_v29 = vsel %vm6311_vm10, %v3743_v53, 0.0 }
 0x3cb   : > { %3815 = vst [vmem:[%s5874_s9 + $0xd8] sm:$0xff] %v3779_v29  ;;  %v3850_v16 = vadd.f32 %v3849_v22, %v3779_v29  ;;  %v3893_v42 = vmul.f32 %v3779_v29, %v3779_v29 }
 0x3cc   : > { %v3275_v41 = vpop.f32.mrf.mxu2 }
 0x3cd   : > { %v3928_v20 = vadd.f32 %v3927_v12, %v3893_v42  ;;  %v3479_v58 = vpop.f32.mrf.mxu3  ;;  %v3321_v35 = vadd.f32 %v3275_v41, %v3108_v56 }
 0x3ce   : > { %v3531_v28 = vadd.f32 %v3479_v58, %v3318_v34 }
 0x3d0   : > { %v3744_v59 = vadd.f32 %v3692_v10, %v3531_v28  ;;  %v3068_v48 = vpop.f32.mrf.mxu1 }
 0x3d1   : > { %v3695_v7 = vpop.f32.mrf.mxu0  ;;  %v3110_v34 = vadd.f32 %v3068_v48, %v5856_v46 }
 0x3d2   : > { %v3780_v63 = vsel %vm6313_vm11, %v3744_v59, 0.0 }
 0x3d3   : > { %3816 = vst [vmem:[%s5874_s9 + $0xe0] sm:$0xff] %v3780_v63  ;;  %v3851_v26 = vadd.f32 %v3850_v16, %v3780_v63  ;;  %v3894_v30 = vmul.f32 %v3780_v63, %v3780_v63 }
 0x3d4   : > { %v3278_v15 = vpop.f32.mrf.mxu2 }
 0x3d5   : > { %v3929_v11 = vadd.f32 %v3928_v20, %v3894_v30  ;;  %v3482_v18 = vpop.f32.mrf.mxu3  ;;  %v3322_v39 = vadd.f32 %v3278_v15, %v3109_v8 }
 0x3d6   : > { %v3532_v17 = vadd.f32 %v3482_v18, %v3319_v50 }
 0x3d8   : > { %v3745_v62 = vadd.f32 %v3695_v7, %v3532_v17  ;;  %v3071_v28 = vpop.f32.mrf.mxu1 }
 0x3d9   : > { %v3698_v60 = vpop.f32.mrf.mxu0  ;;  %v3111_v63 = vadd.f32 %v3071_v28, %v5859_v52 }
 0x3da   : > { %v3781_v38 = vsel %vm6315_vm3, %v3745_v62, 0.0 }
 0x3db   : > { %3817 = vst [vmem:[%s5874_s9 + $0xe8] sm:$0xff] %v3781_v38  ;;  %v3852_v40 = vadd.f32 %v3851_v26, %v3781_v38  ;;  %v3895_v13 = vmul.f32 %v3781_v38, %v3781_v38  ;;  %v6321_v26 = vld [vmem:[#allocation33_spill] sm:$0xff] }
 0x3dc   : > { %v3281_v53 = vpop.f32.mrf.mxu2  ;;  %vm6322_vm0 = vnez %v6321_v26 }
 0x3dd   : > { %v3930_v24 = vadd.f32 %v3929_v11, %v3895_v13  ;;  %v3485_v55 = vpop.f32.mrf.mxu3  ;;  %v3323_v20 = vadd.f32 %v3281_v53, %v3110_v34 }
 0x3de   : > { %v3533_v44 = vadd.f32 %v3485_v55, %v3320_v23 }
 0x3e0   : > { %v3746_v9 = vadd.f32 %v3698_v60, %v3533_v44  ;;  %v3074_v41 = vpop.f32.mrf.mxu1 }
 0x3e1   : > { %v3701_v49 = vpop.f32.mrf.mxu0  ;;  %v3112_v36 = vadd.f32 %v3074_v41, %v5864_v32 }
 0x3e2   : > { %v3782_v25 = vsel %vm6317_vm6, %v3746_v9, 0.0 }
 0x3e3   : > { %3818 = vst [vmem:[%s5874_s9 + $0xf0] sm:$0xff] %v3782_v25  ;;  %v3853_v33 = vadd.f32 %v3852_v40, %v3782_v25  ;;  %v3896_v43 = vmul.f32 %v3782_v25, %v3782_v25 }
 0x3e4   : > { %v3284_v7 = vpop.f32.mrf.mxu2 }
 0x3e5   : > { %v3931_v61 = vadd.f32 %v3930_v24, %v3896_v43  ;;  %v3488_v19 = vpop.f32.mrf.mxu3  ;;  %v3324_v30 = vadd.f32 %v3284_v7, %v3111_v63 }
 0x3e6   : > { %v3534_v2 = vadd.f32 %v3488_v19, %v3321_v35 }
 0x3e8   : > { %v3747_v22 = vadd.f32 %v3701_v49, %v3534_v2 }
 0x3e9   : > { %v3704_v31 = vpop.f32.mrf.mxu0 }
 0x3ea   : > { %v3783_v12 = vsel %vm6319_vm9, %v3747_v22, 0.0 }
 0x3eb   : > { %3819 = vst [vmem:[%s5874_s9 + $0xf8] sm:$0xff] %v3783_v12  ;;  %v3854_v3 = vadd.f32 %v3853_v33, %v3783_v12  ;;  %v3897_v21 = vmul.f32 %v3783_v12, %v3783_v12 }
 0x3ec   : > { %v3287_v60 = vpop.f32.mrf.mxu2 }
 0x3ed   : > { %v3932_v10 = vadd.f32 %v3931_v61, %v3897_v21  ;;  %v3491_v1 = vpop.f32.mrf.mxu3  ;;  %v3325_v23 = vadd.f32 %v3287_v60, %v3112_v36 }
 0x3ee   : > { %v3535_v29 = vadd.f32 %v3491_v1, %v3322_v39 }
 0x3f0   : > { %v3748_v16 = vadd.f32 %v3704_v31, %v3535_v29 }
 0x3f1   : > { %v3707_v4 = vpop.f32.mrf.mxu0 }
 0x3f2   : > { %v3784_v51 = vsel %vm5328_vm7, %v3748_v16, 0.0 }
 0x3f3   : > { %3820 = vst [vmem:[%s5874_s9 + $0x100] sm:$0xff] %v3784_v51  ;;  %v3855_v58 = vadd.f32 %v3854_v3, %v3784_v51  ;;  %v3898_v37 = vmul.f32 %v3784_v51, %v3784_v51 }
 0x3f5   : > { %v3933_v57 = vadd.f32 %v3932_v10, %v3898_v37  ;;  %v3494_v59 = vpop.f32.mrf.mxu3 }
 0x3f6   : > { %v3536_v27 = vadd.f32 %v3494_v59, %v3323_v20 }
 0x3f8   : > { %v3749_v50 = vadd.f32 %v3707_v4, %v3536_v27 }
 0x3f9   : > { %v3710_v6 = vpop.f32.mrf.mxu0 }
 0x3fa   : > { %v3785_v46 = vsel %vm6322_vm0, %v3749_v50, 0.0 }
 0x3fb   : > { %3821 = vst [vmem:[%s5874_s9 + $0x108] sm:$0xff] %v3785_v46  ;;  %v3856_v11 = vadd.f32 %v3855_v58, %v3785_v46  ;;  %v3899_v18 = vmul.f32 %v3785_v46, %v3785_v46 }
 0x3fd   : > { %v3934_v17 = vadd.f32 %v3933_v57, %v3899_v18  ;;  %v3497_v14 = vpop.f32.mrf.mxu3 }
 0x3fe   : > { %v3537_v62 = vadd.f32 %v3497_v14, %v3324_v30 }
 0x400   : > { %v3750_v38 = vadd.f32 %v3710_v6, %v3537_v62 }
 0x401   : > { %v3713_v44 = vpop.f32.mrf.mxu0 }
 0x402   : > { %v3786_v52 = vsel %vm5736_vm1, %v3750_v38, 0.0 }
 0x403   : > { %3822 = vst [vmem:[%s5874_s9 + $0x110] sm:$0xff] %v3786_v52  ;;  %v3857_v40 = vadd.f32 %v3856_v11, %v3786_v52  ;;  %v3900_v13 = vmul.f32 %v3786_v52, %v3786_v52 }
 0x405   : > { %v3935_v24 = vadd.f32 %v3934_v17, %v3900_v13  ;;  %v3500_v55 = vpop.f32.mrf.mxu3 }
 0x406   : > { %v3538_v47 = vadd.f32 %v3500_v55, %v3325_v23 }
 0x408   : > { %v3751_v56 = vadd.f32 %v3713_v44, %v3538_v47 }
 0x40a   : > { %v3787_v9 = vsel %vm5774_vm14, %v3751_v56, 0.0 }
 0x40b   : > { %3823 = vst [vmem:[%s5874_s9 + $0x118] sm:$0xff] %v3787_v9  ;;  %v3858_v49 = vadd.f32 %v3857_v40, %v3787_v9  ;;  %v3901_v32 = vmul.f32 %v3787_v9, %v3787_v9 }
 0x40d   : > { %v3859_v15 = vrot.slane %v3858_v49, 4  ;;  %v3936_v0 = vadd.f32 %v3935_v24, %v3901_v32 }
 0x40f   : > { %v3860_v45 = vadd.f32 %v3859_v15, %v3858_v49  ;;  %v3937_v25 = vrot.slane %v3936_v0, 4 }
 0x411   : > { %v3861_v35 = vrot.slane %v3860_v45, 2  ;;  %v3938_v33 = vadd.f32 %v3937_v25, %v3936_v0 }
 0x413   : > { %v3862_v43 = vadd.f32 %v3861_v35, %v3860_v45  ;;  %v3939_v61 = vrot.slane %v3938_v33, 2 }
 0x415   : > { %v3863_v19 = vrot.slane %v3862_v43, 1  ;;  %v3940_v2 = vadd.f32 %v3939_v61, %v3938_v33 }
 0x417   : > { %v3864_v54 = vadd.f32 %v3863_v19, %v3862_v43  ;;  %v3941_v8 = vrot.slane %v3940_v2, 1 }
 0x419   : > { %v3942_v22 = vadd.f32 %v3941_v8, %v3940_v2  ;;  %3944 = vst [vmem:[%s235_s13] sm:$0x1] %v3864_v54 }
 0x41b   : > { %3945 = vst [vmem:[%s235_s13 + $0x1] sm:$0x1] %v3942_v22 }
 0x41c PF: > { %s16_s18 = sadd.s32 1, %s4121_s18  }
 0x41d   : > { %p13_p4 = scmp.ge.s32.totalorder %s16_s18, 4  }
 0x41f   :  { %15 = sbr.rel (!%p13_p4) target bundleno = 1 (0x1), region = 78 }

</bundles_post_ra>
